<compile_context>
chip_gen: v7x
topology: tpu7x:2x2x1
jax: 0.10.0
libtpu: 0.0.40
codegen_flags: <defaults>
</compile_context>

<pallas_src>
import functools

import jax
import jax.numpy as jnp
from jax.experimental import pallas as pl
from jax.experimental.pallas import tpu as pltpu


# --------------------------------------------------------------------------
# Pallas kernels
# --------------------------------------------------------------------------

def fused_sa_pool_kernel(g1_ref, xyz_ref,
                         w11, b11, w12, b12, w13, b13,
                         w2x, w2f, b21, w22, b22, w23, b23,
                         w3x, w3f, b31, w32, b32, w33, b33,
                         w4x, w4f, b41, w42, b42, w43, b43,
                         o_ref, *, n_valid):
    """Fused sa1..sa4 + global max-pool for one tile of `tm` points of batch b.

    g1_ref : (1, tm*K, 12) bf16  grouped sa1 input (rel_xyz ++ point feats),
                                 point-major, K neighbors contiguous per point.
    xyz_ref: (1, tm, 3)    f32   point coordinates.
    o_ref  : (1, 1, 512)   f32   running per-batch max of sa4 features
                                 (block resident across the point-chunk axis).
    """
    tm = xyz_ref.shape[1]
    k = g1_ref.shape[1] // tm
    i = pl.program_id(1)

    def mm(x_bf16, w_ref):
        return jnp.dot(x_bf16, w_ref[...], preferred_element_type=jnp.float32)

    def layer(x, w_ref, b_ref):
        # bf16 MXU operands, f32 accumulation + bias + ReLU.
        return jnp.maximum(mm(x.astype(jnp.bfloat16), w_ref) + b_ref[...], 0.0)

    # ---- sa1: MLP over the (tm*K, 12) grouped rows, then max over neighbors.
    h = layer(g1_ref[0], w11, b11)
    h = layer(h, w12, b12)
    h = layer(h, w13, b13)                                   # (tm*K, 64) f32
    f = jnp.max(h.reshape(tm, k, h.shape[-1]), axis=1)       # (tm, 64)   f32

    xyz = xyz_ref[0]                                         # (tm, 3) f32

    def xyz_bias(wx_ref, b_ref):
        # xyz @ Wx + b as three VPU rank-1 updates: avoids a 3-deep MXU push
        # and the extra (tm, C) add; the VPU has slack (kernel is MXU-bound).
        wx = wx_ref[...]                                     # (3, C) f32
        return (xyz[:, 0:1] * wx[0:1, :] + xyz[:, 1:2] * wx[1:2, :]
                + xyz[:, 2:3] * wx[2:3, :] + b_ref[...])

    # ---- sa2/sa3/sa4: per-point MLPs; cat(xyz, xyz, feat) of the reference
    #      is replaced by split weights: h = f @ Wf + (xyz @ Wx + b).
    def sa_block(f, wx, wf, b1, w2, b2, w3, b3):
        h = jnp.maximum(mm(f.astype(jnp.bfloat16), wf) + xyz_bias(wx, b1), 0.0)
        h = layer(h, w2, b2)
        h = layer(h, w3, b3)
        return h

    f = sa_block(f, w2x, w2f, b21, w22, b22, w23, b23)       # (tm, 128)
    f = sa_block(f, w3x, w3f, b31, w32, b32, w33, b33)       # (tm, 256)
    f = sa_block(f, w4x, w4f, b41, w42, b42, w43, b43)       # (tm, 512)

    # ---- mask padded rows, fold this tile into the running per-batch max.
    row = i * tm + jax.lax.broadcasted_iota(jnp.int32, (tm, 1), 0)
    f = jnp.where(row < n_valid, f, -jnp.inf)
    part = jnp.max(f, axis=0, keepdims=True)                 # (1, 512)

    @pl.when(i == 0)
    def _():
        o_ref[...] = jnp.full(o_ref.shape, -jnp.inf, o_ref.dtype)

    o_ref[...] = jnp.maximum(o_ref[...], part.reshape(o_ref.shape))


def head_kernel(g_ref, w1, b1, w2, b2, w3, b3, o_ref):
    """fc1/ReLU + fc2/ReLU + fc3 over all B pooled rows in one call."""
    g = g_ref[...].astype(jnp.bfloat16)                      # (B, 512)
    h = jnp.maximum(
        jnp.dot(g, w1[...], preferred_element_type=jnp.float32) + b1[...], 0.0)
    h = jnp.maximum(
        jnp.dot(h.astype(jnp.bfloat16), w2[...],
                preferred_element_type=jnp.float32) + b2[...], 0.0)
    o_ref[...] = jnp.dot(h.astype(jnp.bfloat16), w3[...],
                         preferred_element_type=jnp.float32) + b3[...]


# --------------------------------------------------------------------------
# Wrappers around pallas_call
# --------------------------------------------------------------------------

def fused_sa_pool(grouped, xyz, sa_weights, tm, n_valid):
    """grouped: (B, Np*K, 12) bf16 ; xyz: (B, Np, 3) f32 -> (B, 512) f32 pooled max."""
    B, npk, cin = grouped.shape
    np_pts = xyz.shape[1]
    K = npk // np_pts
    cout = sa_weights[-2].shape[1]          # last layer width (512)
    assert np_pts % tm == 0

    def full(a):
        return pl.BlockSpec(a.shape, lambda b, i: (0,) * a.ndim)

    in_specs = [pl.BlockSpec((1, tm * K, cin), lambda b, i: (b, i, 0)),
                pl.BlockSpec((1, tm, 3), lambda b, i: (b, i, 0))]
    in_specs += [full(w) for w in sa_weights]

    out = pl.pallas_call(
        functools.partial(fused_sa_pool_kernel, n_valid=n_valid),
        out_shape=jax.ShapeDtypeStruct((B, 1, cout), jnp.float32),
        grid=(B, np_pts // tm),
        in_specs=in_specs,
        out_specs=pl.BlockSpec((1, 1, cout), lambda b, i: (b, 0, 0)),
        compiler_params=pltpu.CompilerParams(
            dimension_semantics=("parallel", "arbitrary"),
            vmem_limit_bytes=48 * 1024 * 1024),
    )(grouped, xyz, *sa_weights)
    return out.reshape(B, cout)


def classifier_head(pooled, head_params):
    """pooled: (B, 512) f32 -> logits (B, num_classes) f32; one tiny call."""
    w1, b1, w2, b2, w3, b3 = head_params
    B = pooled.shape[0]
    nc = w3.shape[1]
    return pl.pallas_call(
        head_kernel,
        out_shape=jax.ShapeDtypeStruct((B, nc), jnp.float32),
    )(pooled, w1, b1, w2, b2, w3, b3)


# --------------------------------------------------------------------------
# Parameter construction (deterministic, BN folded into conv weights)
# --------------------------------------------------------------------------

_BN_EPS = 1e-5


def make_sa_params(key, cin, widths):
    """3 x (Conv2d 1x1 + BatchNorm2d, eval mode) folded to (W, b) pairs (f32)."""
    params = []
    c = cin
    for w_out in widths:
        key, kw, kb, kg, kbe, km, kv = jax.random.split(key, 7)
        W = jax.random.normal(kw, (c, w_out), jnp.float32) / jnp.sqrt(c)
        b = 0.01 * jax.random.normal(kb, (w_out,), jnp.float32)
        gamma = 1.0 + 0.1 * jax.random.normal(kg, (w_out,), jnp.float32)
        beta = 0.1 * jax.random.normal(kbe, (w_out,), jnp.float32)
        mean = 0.1 * jax.random.normal(km, (w_out,), jnp.float32)
        var = 1.0 + 0.1 * jnp.abs(jax.random.normal(kv, (w_out,), jnp.float32))
        scale = gamma / jnp.sqrt(var + _BN_EPS)
        params.append(W * scale[None, :])                       # folded weight
        params.append(((b - mean) * scale + beta)[None, :])     # folded bias (1, C)
        c = w_out
    return key, params


def make_fc(key, cin, cout):
    key, kw, kb = jax.random.split(key, 3)
    W = jax.random.normal(kw, (cin, cout), jnp.float32) / jnp.sqrt(cin)
    b = (0.01 * jax.random.normal(kb, (cout,), jnp.float32))[None, :]
    return key, W, b


def make_params(key, num_classes=10):
    p = {}
    key, p["sa1"] = make_sa_params(key, 12,  [32, 32, 64])     # (6+3)+3
    key, p["sa2"] = make_sa_params(key, 70,  [64, 64, 128])    # (64+3)+3
    key, p["sa3"] = make_sa_params(key, 134, [128, 128, 256])  # (128+3)+3
    key, p["sa4"] = make_sa_params(key, 262, [256, 256, 512])  # (256+3)+3
    key, w1, b1 = make_fc(key, 512, 256)
    key, w2, b2 = make_fc(key, 256, 128)
    key, w3, b3 = make_fc(key, 128, num_classes)
    p["head"] = [w1, b1, w2, b2, w3, b3]
    return p


def prep_kernel_params(params):
    """Kernel-ready params: split sa2/3/4 first-layer weights into xyz/feature
    parts (folding the duplicated xyz columns); matmul weights in bf16, xyz
    (VPU path) weights and biases stay f32 (accumulation dtype)."""
    bf = lambda a: a.astype(jnp.bfloat16)

    w11, b11, w12, b12, w13, b13 = params["sa1"]
    sa_flat = [bf(w11), b11, bf(w12), b12, bf(w13), b13]

    for name in ("sa2", "sa3", "sa4"):
        w1, b1, w2, b2, w3, b3 = params[name]
        wx = w1[0:3] + w1[3:6]          # cat(xyz, xyz, feat): xyz appears twice
        wf = w1[6:]
        sa_flat += [wx, bf(wf), b1, bf(w2), b2, bf(w3), b3]   # wx stays f32

    hw1, hb1, hw2, hb2, hw3, hb3 = params["head"]
    head = [bf(hw1), hb1, bf(hw2), hb2, bf(hw3), hb3]
    return sa_flat, head


# --------------------------------------------------------------------------
# Forward pass (glue in plain JAX: kNN / gather; everything else in kernels)
# --------------------------------------------------------------------------

def knn_group(xyz, feats, nsample):
    """xyz: (B,N,3), feats: (B,N,C) -> (B,N,K,3+C) f32 (rel_xyz first).

    Pairwise distances via |a|^2+|b|^2-2ab (no (B,N,N,3) intermediate); the
    gather + relative-xyz concat stay in XLA.
    # TODO(synk): move the kNN + gather into a Pallas kernel (index prefetch +
    # DMA gather) so the grouped tensor never hits HBM.
    """
    sq = jnp.sum(xyz * xyz, axis=-1)                                   # (B,N)
    d2 = sq[:, :, None] + sq[:, None, :] - 2.0 * jnp.einsum(
        "bnd,bmd->bnm", xyz, xyz)                                      # (B,N,N)
    _, idx = jax.lax.top_k(-d2, nsample)                               # (B,N,K)
    gather = jax.vmap(lambda pts, ids: pts[ids])                       # per-batch
    nbr_xyz = gather(xyz, idx)                                         # (B,N,K,3)
    nbr_feat = gather(feats, idx)                                      # (B,N,K,C)
    rel_xyz = nbr_xyz - xyz[:, :, None, :]
    return jnp.concatenate([rel_xyz, nbr_feat], axis=-1)               # (B,N,K,3+C)


@functools.partial(jax.jit, static_argnames=("nsample", "tm"))
def pointnet2_forward(x, sa_params, head_params, nsample=32, tm=256):
    """x: (B, N, 9) point cloud; x[..., :3] are xyz coordinates."""
    B, N, _ = x.shape
    xyz = x[..., :3]

    # sa1 grouping (JAX side): kNN + relative xyz.
    grouped = knn_group(xyz, x, nsample)                     # (B, N, K, 12) f32

    # Point-row tile; pad N per batch so the tile divides it (tm multiple of 8).
    tm_eff = tm if N >= tm else ((N + 7) // 8) * 8
    n_pad = ((N + tm_eff - 1) // tm_eff) * tm_eff
    if n_pad > N:
        grouped = jnp.pad(grouped, ((0, 0), (0, n_pad - N), (0, 0), (0, 0)))
        xyz = jnp.pad(xyz, ((0, 0), (0, n_pad - N), (0, 0)))

    grouped = grouped.reshape(B, n_pad * nsample, -1).astype(jnp.bfloat16)

    # Fused sa1..sa4 + global max pool (features never leave VMEM).
    pooled = fused_sa_pool(grouped, xyz.astype(jnp.float32), sa_params,
                           tm_eff, n_valid=N)                # (B, 512) f32

    # Classifier head: one small batched GEMM chain over the B pooled rows.
    return classifier_head(pooled, head_params)              # (B, num_classes)


# --------------------------------------------------------------------------

if __name__ == "__main__":
    B, N, NSAMPLE, NUM_CLASSES = 2, 64, 32, 10

    key = jax.random.PRNGKey(0)
    key, kx = jax.random.split(key)
    x = jax.random.normal(kx, (B, N, 9), dtype=jnp.float32)

    params = make_params(key, num_classes=NUM_CLASSES)
    sa_kp, head_kp = prep_kernel_params(params)

    out = pointnet2_forward(x, sa_kp, head_kp, nsample=NSAMPLE, tm=256)
    out = jax.block_until_ready(out)

    assert out.shape == (B, NUM_CLASSES), out.shape
    assert jnp.all(jnp.isfinite(out))
    print("KERNEL_OK")
</pallas_src>

<mosaic_0001>
module attributes {stable_mosaic.version = 11 : i64} {
  func.func @fused_sa_pool_kernel(%arg0: i32, %arg1: i32, %arg2: memref<1x2048x12xbf16, #tpu.memory_space<vmem>>, %arg3: memref<1x64x3xf32, #tpu.memory_space<vmem>>, %arg4: memref<12x32xbf16, #tpu.memory_space<vmem>>, %arg5: memref<1x32xf32, #tpu.memory_space<vmem>>, %arg6: memref<32x32xbf16, #tpu.memory_space<vmem>>, %arg7: memref<1x32xf32, #tpu.memory_space<vmem>>, %arg8: memref<32x64xbf16, #tpu.memory_space<vmem>>, %arg9: memref<1x64xf32, #tpu.memory_space<vmem>>, %arg10: memref<3x64xf32, #tpu.memory_space<vmem>>, %arg11: memref<64x64xbf16, #tpu.memory_space<vmem>>, %arg12: memref<1x64xf32, #tpu.memory_space<vmem>>, %arg13: memref<64x64xbf16, #tpu.memory_space<vmem>>, %arg14: memref<1x64xf32, #tpu.memory_space<vmem>>, %arg15: memref<64x128xbf16, #tpu.memory_space<vmem>>, %arg16: memref<1x128xf32, #tpu.memory_space<vmem>>, %arg17: memref<3x128xf32, #tpu.memory_space<vmem>>, %arg18: memref<128x128xbf16, #tpu.memory_space<vmem>>, %arg19: memref<1x128xf32, #tpu.memory_space<vmem>>, %arg20: memref<128x128xbf16, #tpu.memory_space<vmem>>, %arg21: memref<1x128xf32, #tpu.memory_space<vmem>>, %arg22: memref<128x256xbf16, #tpu.memory_space<vmem>>, %arg23: memref<1x256xf32, #tpu.memory_space<vmem>>, %arg24: memref<3x256xf32, #tpu.memory_space<vmem>>, %arg25: memref<256x256xbf16, #tpu.memory_space<vmem>>, %arg26: memref<1x256xf32, #tpu.memory_space<vmem>>, %arg27: memref<256x256xbf16, #tpu.memory_space<vmem>>, %arg28: memref<1x256xf32, #tpu.memory_space<vmem>>, %arg29: memref<256x512xbf16, #tpu.memory_space<vmem>>, %arg30: memref<1x512xf32, #tpu.memory_space<vmem>>, %arg31: memref<1x1x512xf32, #tpu.memory_space<vmem>>) attributes {dimension_semantics = [#tpu.dimension_semantics<parallel>, #tpu.dimension_semantics<arbitrary>], iteration_bounds = array<i64: 2, 1>, scalar_prefetch = 0 : i64, scratch_operands = 0 : i64, tpu.core_type = #tpu.core_type<tc>, window_params = [{transform_indices = @transform_0, window_bounds = array<i64: 1, 2048, 12>}, {transform_indices = @transform_1, window_bounds = array<i64: 1, 64, 3>}, {pipeline_mode = #tpu.pipeline_mode<synchronous>, transform_indices = @transform_2, window_bounds = array<i64: 12, 32>}, {pipeline_mode = #tpu.pipeline_mode<synchronous>, transform_indices = @transform_3, window_bounds = array<i64: 1, 32>}, {pipeline_mode = #tpu.pipeline_mode<synchronous>, transform_indices = @transform_4, window_bounds = array<i64: 32, 32>}, {pipeline_mode = #tpu.pipeline_mode<synchronous>, transform_indices = @transform_5, window_bounds = array<i64: 1, 32>}, {pipeline_mode = #tpu.pipeline_mode<synchronous>, transform_indices = @transform_6, window_bounds = array<i64: 32, 64>}, {pipeline_mode = #tpu.pipeline_mode<synchronous>, transform_indices = @transform_7, window_bounds = array<i64: 1, 64>}, {pipeline_mode = #tpu.pipeline_mode<synchronous>, transform_indices = @transform_8, window_bounds = array<i64: 3, 64>}, {pipeline_mode = #tpu.pipeline_mode<synchronous>, transform_indices = @transform_9, window_bounds = array<i64: 64, 64>}, {pipeline_mode = #tpu.pipeline_mode<synchronous>, transform_indices = @transform_10, window_bounds = array<i64: 1, 64>}, {pipeline_mode = #tpu.pipeline_mode<synchronous>, transform_indices = @transform_11, window_bounds = array<i64: 64, 64>}, {pipeline_mode = #tpu.pipeline_mode<synchronous>, transform_indices = @transform_12, window_bounds = array<i64: 1, 64>}, {pipeline_mode = #tpu.pipeline_mode<synchronous>, transform_indices = @transform_13, window_bounds = array<i64: 64, 128>}, {pipeline_mode = #tpu.pipeline_mode<synchronous>, transform_indices = @transform_14, window_bounds = array<i64: 1, 128>}, {pipeline_mode = #tpu.pipeline_mode<synchronous>, transform_indices = @transform_15, window_bounds = array<i64: 3, 128>}, {pipeline_mode = #tpu.pipeline_mode<synchronous>, transform_indices = @transform_16, window_bounds = array<i64: 128, 128>}, {pipeline_mode = #tpu.pipeline_mode<synchronous>, transform_indices = @transform_17, window_bounds = array<i64: 1, 128>}, {pipeline_mode = #tpu.pipeline_mode<synchronous>, transform_indices = @transform_18, window_bounds = array<i64: 128, 128>}, {pipeline_mode = #tpu.pipeline_mode<synchronous>, transform_indices = @transform_19, window_bounds = array<i64: 1, 128>}, {pipeline_mode = #tpu.pipeline_mode<synchronous>, transform_indices = @transform_20, window_bounds = array<i64: 128, 256>}, {pipeline_mode = #tpu.pipeline_mode<synchronous>, transform_indices = @transform_21, window_bounds = array<i64: 1, 256>}, {pipeline_mode = #tpu.pipeline_mode<synchronous>, transform_indices = @transform_22, window_bounds = array<i64: 3, 256>}, {pipeline_mode = #tpu.pipeline_mode<synchronous>, transform_indices = @transform_23, window_bounds = array<i64: 256, 256>}, {pipeline_mode = #tpu.pipeline_mode<synchronous>, transform_indices = @transform_24, window_bounds = array<i64: 1, 256>}, {pipeline_mode = #tpu.pipeline_mode<synchronous>, transform_indices = @transform_25, window_bounds = array<i64: 256, 256>}, {pipeline_mode = #tpu.pipeline_mode<synchronous>, transform_indices = @transform_26, window_bounds = array<i64: 1, 256>}, {pipeline_mode = #tpu.pipeline_mode<synchronous>, transform_indices = @transform_27, window_bounds = array<i64: 256, 512>}, {pipeline_mode = #tpu.pipeline_mode<synchronous>, transform_indices = @transform_28, window_bounds = array<i64: 1, 512>}, {transform_indices = @transform_29, window_bounds = array<i64: 1, 1, 512>}]} {
    %c0 = arith.constant 0 : index
    %c0_0 = arith.constant 0 : index
    %c0_1 = arith.constant 0 : index
    %0 = vector.load %arg2[%c0, %c0_0, %c0_1] : memref<1x2048x12xbf16, #tpu.memory_space<vmem>>, vector<1x2048x12xbf16>
    %1 = vector.shape_cast %0 : vector<1x2048x12xbf16> to vector<2048x12xbf16>
    %c0_2 = arith.constant 0 : index
    %c0_3 = arith.constant 0 : index
    %2 = vector.load %arg4[%c0_2, %c0_3] : memref<12x32xbf16, #tpu.memory_space<vmem>>, vector<12x32xbf16>
    %cst = arith.constant dense<0.000000e+00> : vector<2048x32xf32>
    %3 = tpu.matmul %1, %2, %cst {dimension_numbers = #tpu.dot_dimension_numbers<[1], [0], [0], [1], [0, 0, 1, 1], [], []>} : vector<2048x12xbf16>, vector<12x32xbf16>, vector<2048x32xf32> -> vector<2048x32xf32>
    %c0_4 = arith.constant 0 : index
    %c0_5 = arith.constant 0 : index
    %4 = vector.load %arg5[%c0_4, %c0_5] : memref<1x32xf32, #tpu.memory_space<vmem>>, vector<1x32xf32>
    %5 = vector.broadcast %4 : vector<1x32xf32> to vector<2048x32xf32>
    %6 = arith.addf %3, %5 : vector<2048x32xf32>
    %cst_6 = arith.constant 0.000000e+00 : f32
    %7 = vector.broadcast %cst_6 : f32 to vector<2048x32xf32>
    %8 = arith.maximumf %6, %7 : vector<2048x32xf32>
    %9 = arith.truncf %8 : vector<2048x32xf32> to vector<2048x32xbf16>
    %c0_7 = arith.constant 0 : index
    %c0_8 = arith.constant 0 : index
    %10 = vector.load %arg6[%c0_7, %c0_8] : memref<32x32xbf16, #tpu.memory_space<vmem>>, vector<32x32xbf16>
    %cst_9 = arith.constant dense<0.000000e+00> : vector<2048x32xf32>
    %11 = tpu.matmul %9, %10, %cst_9 {dimension_numbers = #tpu.dot_dimension_numbers<[1], [0], [0], [1], [0, 0, 1, 1], [], []>} : vector<2048x32xbf16>, vector<32x32xbf16>, vector<2048x32xf32> -> vector<2048x32xf32>
    %c0_10 = arith.constant 0 : index
    %c0_11 = arith.constant 0 : index
    %12 = vector.load %arg7[%c0_10, %c0_11] : memref<1x32xf32, #tpu.memory_space<vmem>>, vector<1x32xf32>
    %13 = vector.broadcast %12 : vector<1x32xf32> to vector<2048x32xf32>
    %14 = arith.addf %11, %13 : vector<2048x32xf32>
    %cst_12 = arith.constant 0.000000e+00 : f32
    %15 = vector.broadcast %cst_12 : f32 to vector<2048x32xf32>
    %16 = arith.maximumf %14, %15 : vector<2048x32xf32>
    %17 = arith.truncf %16 : vector<2048x32xf32> to vector<2048x32xbf16>
    %c0_13 = arith.constant 0 : index
    %c0_14 = arith.constant 0 : index
    %18 = vector.load %arg8[%c0_13, %c0_14] : memref<32x64xbf16, #tpu.memory_space<vmem>>, vector<32x64xbf16>
    %cst_15 = arith.constant dense<0.000000e+00> : vector<2048x64xf32>
    %19 = tpu.matmul %17, %18, %cst_15 {dimension_numbers = #tpu.dot_dimension_numbers<[1], [0], [0], [1], [0, 0, 1, 1], [], []>} : vector<2048x32xbf16>, vector<32x64xbf16>, vector<2048x64xf32> -> vector<2048x64xf32>
    %c0_16 = arith.constant 0 : index
    %c0_17 = arith.constant 0 : index
    %20 = vector.load %arg9[%c0_16, %c0_17] : memref<1x64xf32, #tpu.memory_space<vmem>>, vector<1x64xf32>
    %21 = vector.broadcast %20 : vector<1x64xf32> to vector<2048x64xf32>
    %22 = arith.addf %19, %21 : vector<2048x64xf32>
    %cst_18 = arith.constant 0.000000e+00 : f32
    %23 = vector.broadcast %cst_18 : f32 to vector<2048x64xf32>
    %24 = arith.maximumf %22, %23 : vector<2048x64xf32>
    %25 = vector.shape_cast %24 : vector<2048x64xf32> to vector<64x32x64xf32>
    %cst_19 = arith.constant dense<0xFF800000> : vector<64x64xf32>
    %26 = vector.multi_reduction <maximumf>, %25, %cst_19 [1] : vector<64x32x64xf32> to vector<64x64xf32>
    %c0_20 = arith.constant 0 : index
    %c0_21 = arith.constant 0 : index
    %c0_22 = arith.constant 0 : index
    %27 = vector.load %arg3[%c0_20, %c0_21, %c0_22] : memref<1x64x3xf32, #tpu.memory_space<vmem>>, vector<1x64x3xf32>
    %28 = vector.shape_cast %27 : vector<1x64x3xf32> to vector<64x3xf32>
    %29 = arith.truncf %26 : vector<64x64xf32> to vector<64x64xbf16>
    %c0_23 = arith.constant 0 : index
    %c0_24 = arith.constant 0 : index
    %30 = vector.load %arg11[%c0_23, %c0_24] : memref<64x64xbf16, #tpu.memory_space<vmem>>, vector<64x64xbf16>
    %cst_25 = arith.constant dense<0.000000e+00> : vector<64x64xf32>
    %31 = tpu.matmul %29, %30, %cst_25 {dimension_numbers = #tpu.dot_dimension_numbers<[1], [0], [0], [1], [0, 0, 1, 1], [], []>} : vector<64x64xbf16>, vector<64x64xbf16>, vector<64x64xf32> -> vector<64x64xf32>
    %c0_26 = arith.constant 0 : index
    %c0_27 = arith.constant 0 : index
    %32 = vector.load %arg10[%c0_26, %c0_27] : memref<3x64xf32, #tpu.memory_space<vmem>>, vector<3x64xf32>
    %33 = vector.extract_strided_slice %28 {offsets = [0, 0], sizes = [64, 1], strides = [1, 1]} : vector<64x3xf32> to vector<64x1xf32>
    %34 = vector.extract_strided_slice %32 {offsets = [0, 0], sizes = [1, 64], strides = [1, 1]} : vector<3x64xf32> to vector<1x64xf32>
    %35 = vector.broadcast %33 : vector<64x1xf32> to vector<64x64xf32>
    %36 = vector.broadcast %34 : vector<1x64xf32> to vector<64x64xf32>
    %37 = arith.mulf %35, %36 : vector<64x64xf32>
    %38 = vector.extract_strided_slice %28 {offsets = [0, 1], sizes = [64, 1], strides = [1, 1]} : vector<64x3xf32> to vector<64x1xf32>
    %39 = vector.extract_strided_slice %32 {offsets = [1, 0], sizes = [1, 64], strides = [1, 1]} : vector<3x64xf32> to vector<1x64xf32>
    %40 = vector.broadcast %38 : vector<64x1xf32> to vector<64x64xf32>
    %41 = vector.broadcast %39 : vector<1x64xf32> to vector<64x64xf32>
    %42 = arith.mulf %40, %41 : vector<64x64xf32>
    %43 = arith.addf %37, %42 : vector<64x64xf32>
    %44 = vector.extract_strided_slice %28 {offsets = [0, 2], sizes = [64, 1], strides = [1, 1]} : vector<64x3xf32> to vector<64x1xf32>
    %45 = vector.extract_strided_slice %32 {offsets = [2, 0], sizes = [1, 64], strides = [1, 1]} : vector<3x64xf32> to vector<1x64xf32>
    %46 = vector.broadcast %44 : vector<64x1xf32> to vector<64x64xf32>
    %47 = vector.broadcast %45 : vector<1x64xf32> to vector<64x64xf32>
    %48 = arith.mulf %46, %47 : vector<64x64xf32>
    %49 = arith.addf %43, %48 : vector<64x64xf32>
    %c0_28 = arith.constant 0 : index
    %c0_29 = arith.constant 0 : index
    %50 = vector.load %arg12[%c0_28, %c0_29] : memref<1x64xf32, #tpu.memory_space<vmem>>, vector<1x64xf32>
    %51 = vector.broadcast %50 : vector<1x64xf32> to vector<64x64xf32>
    %52 = arith.addf %49, %51 : vector<64x64xf32>
    %53 = arith.addf %31, %52 : vector<64x64xf32>
    %cst_30 = arith.constant 0.000000e+00 : f32
    %54 = vector.broadcast %cst_30 : f32 to vector<64x64xf32>
    %55 = arith.maximumf %53, %54 : vector<64x64xf32>
    %56 = arith.truncf %55 : vector<64x64xf32> to vector<64x64xbf16>
    %c0_31 = arith.constant 0 : index
    %c0_32 = arith.constant 0 : index
    %57 = vector.load %arg13[%c0_31, %c0_32] : memref<64x64xbf16, #tpu.memory_space<vmem>>, vector<64x64xbf16>
    %cst_33 = arith.constant dense<0.000000e+00> : vector<64x64xf32>
    %58 = tpu.matmul %56, %57, %cst_33 {dimension_numbers = #tpu.dot_dimension_numbers<[1], [0], [0], [1], [0, 0, 1, 1], [], []>} : vector<64x64xbf16>, vector<64x64xbf16>, vector<64x64xf32> -> vector<64x64xf32>
    %c0_34 = arith.constant 0 : index
    %c0_35 = arith.constant 0 : index
    %59 = vector.load %arg14[%c0_34, %c0_35] : memref<1x64xf32, #tpu.memory_space<vmem>>, vector<1x64xf32>
    %60 = vector.broadcast %59 : vector<1x64xf32> to vector<64x64xf32>
    %61 = arith.addf %58, %60 : vector<64x64xf32>
    %cst_36 = arith.constant 0.000000e+00 : f32
    %62 = vector.broadcast %cst_36 : f32 to vector<64x64xf32>
    %63 = arith.maximumf %61, %62 : vector<64x64xf32>
    %64 = arith.truncf %63 : vector<64x64xf32> to vector<64x64xbf16>
    %c0_37 = arith.constant 0 : index
    %c0_38 = arith.constant 0 : index
    %65 = vector.load %arg15[%c0_37, %c0_38] : memref<64x128xbf16, #tpu.memory_space<vmem>>, vector<64x128xbf16>
    %cst_39 = arith.constant dense<0.000000e+00> : vector<64x128xf32>
    %66 = tpu.matmul %64, %65, %cst_39 {dimension_numbers = #tpu.dot_dimension_numbers<[1], [0], [0], [1], [0, 0, 1, 1], [], []>} : vector<64x64xbf16>, vector<64x128xbf16>, vector<64x128xf32> -> vector<64x128xf32>
    %c0_40 = arith.constant 0 : index
    %c0_41 = arith.constant 0 : index
    %67 = vector.load %arg16[%c0_40, %c0_41] : memref<1x128xf32, #tpu.memory_space<vmem>>, vector<1x128xf32>
    %68 = vector.broadcast %67 : vector<1x128xf32> to vector<64x128xf32>
    %69 = arith.addf %66, %68 : vector<64x128xf32>
    %cst_42 = arith.constant 0.000000e+00 : f32
    %70 = vector.broadcast %cst_42 : f32 to vector<64x128xf32>
    %71 = arith.maximumf %69, %70 : vector<64x128xf32>
    %72 = arith.truncf %71 : vector<64x128xf32> to vector<64x128xbf16>
    %c0_43 = arith.constant 0 : index
    %c0_44 = arith.constant 0 : index
    %73 = vector.load %arg18[%c0_43, %c0_44] : memref<128x128xbf16, #tpu.memory_space<vmem>>, vector<128x128xbf16>
    %cst_45 = arith.constant dense<0.000000e+00> : vector<64x128xf32>
    %74 = tpu.matmul %72, %73, %cst_45 {dimension_numbers = #tpu.dot_dimension_numbers<[1], [0], [0], [1], [0, 0, 1, 1], [], []>} : vector<64x128xbf16>, vector<128x128xbf16>, vector<64x128xf32> -> vector<64x128xf32>
    %c0_46 = arith.constant 0 : index
    %c0_47 = arith.constant 0 : index
    %75 = vector.load %arg17[%c0_46, %c0_47] : memref<3x128xf32, #tpu.memory_space<vmem>>, vector<3x128xf32>
    %76 = vector.extract_strided_slice %28 {offsets = [0, 0], sizes = [64, 1], strides = [1, 1]} : vector<64x3xf32> to vector<64x1xf32>
    %77 = vector.extract_strided_slice %75 {offsets = [0, 0], sizes = [1, 128], strides = [1, 1]} : vector<3x128xf32> to vector<1x128xf32>
    %78 = vector.broadcast %76 : vector<64x1xf32> to vector<64x128xf32>
    %79 = vector.broadcast %77 : vector<1x128xf32> to vector<64x128xf32>
    %80 = arith.mulf %78, %79 : vector<64x128xf32>
    %81 = vector.extract_strided_slice %28 {offsets = [0, 1], sizes = [64, 1], strides = [1, 1]} : vector<64x3xf32> to vector<64x1xf32>
    %82 = vector.extract_strided_slice %75 {offsets = [1, 0], sizes = [1, 128], strides = [1, 1]} : vector<3x128xf32> to vector<1x128xf32>
    %83 = vector.broadcast %81 : vector<64x1xf32> to vector<64x128xf32>
    %84 = vector.broadcast %82 : vector<1x128xf32> to vector<64x128xf32>
    %85 = arith.mulf %83, %84 : vector<64x128xf32>
    %86 = arith.addf %80, %85 : vector<64x128xf32>
    %87 = vector.extract_strided_slice %28 {offsets = [0, 2], sizes = [64, 1], strides = [1, 1]} : vector<64x3xf32> to vector<64x1xf32>
    %88 = vector.extract_strided_slice %75 {offsets = [2, 0], sizes = [1, 128], strides = [1, 1]} : vector<3x128xf32> to vector<1x128xf32>
    %89 = vector.broadcast %87 : vector<64x1xf32> to vector<64x128xf32>
    %90 = vector.broadcast %88 : vector<1x128xf32> to vector<64x128xf32>
    %91 = arith.mulf %89, %90 : vector<64x128xf32>
    %92 = arith.addf %86, %91 : vector<64x128xf32>
    %c0_48 = arith.constant 0 : index
    %c0_49 = arith.constant 0 : index
    %93 = vector.load %arg19[%c0_48, %c0_49] : memref<1x128xf32, #tpu.memory_space<vmem>>, vector<1x128xf32>
    %94 = vector.broadcast %93 : vector<1x128xf32> to vector<64x128xf32>
    %95 = arith.addf %92, %94 : vector<64x128xf32>
    %96 = arith.addf %74, %95 : vector<64x128xf32>
    %cst_50 = arith.constant 0.000000e+00 : f32
    %97 = vector.broadcast %cst_50 : f32 to vector<64x128xf32>
    %98 = arith.maximumf %96, %97 : vector<64x128xf32>
    %99 = arith.truncf %98 : vector<64x128xf32> to vector<64x128xbf16>
    %c0_51 = arith.constant 0 : index
    %c0_52 = arith.constant 0 : index
    %100 = vector.load %arg20[%c0_51, %c0_52] : memref<128x128xbf16, #tpu.memory_space<vmem>>, vector<128x128xbf16>
    %cst_53 = arith.constant dense<0.000000e+00> : vector<64x128xf32>
    %101 = tpu.matmul %99, %100, %cst_53 {dimension_numbers = #tpu.dot_dimension_numbers<[1], [0], [0], [1], [0, 0, 1, 1], [], []>} : vector<64x128xbf16>, vector<128x128xbf16>, vector<64x128xf32> -> vector<64x128xf32>
    %c0_54 = arith.constant 0 : index
    %c0_55 = arith.constant 0 : index
    %102 = vector.load %arg21[%c0_54, %c0_55] : memref<1x128xf32, #tpu.memory_space<vmem>>, vector<1x128xf32>
    %103 = vector.broadcast %102 : vector<1x128xf32> to vector<64x128xf32>
    %104 = arith.addf %101, %103 : vector<64x128xf32>
    %cst_56 = arith.constant 0.000000e+00 : f32
    %105 = vector.broadcast %cst_56 : f32 to vector<64x128xf32>
    %106 = arith.maximumf %104, %105 : vector<64x128xf32>
    %107 = arith.truncf %106 : vector<64x128xf32> to vector<64x128xbf16>
    %c0_57 = arith.constant 0 : index
    %c0_58 = arith.constant 0 : index
    %108 = vector.load %arg22[%c0_57, %c0_58] : memref<128x256xbf16, #tpu.memory_space<vmem>>, vector<128x256xbf16>
    %cst_59 = arith.constant dense<0.000000e+00> : vector<64x256xf32>
    %109 = tpu.matmul %107, %108, %cst_59 {dimension_numbers = #tpu.dot_dimension_numbers<[1], [0], [0], [1], [0, 0, 1, 1], [], []>} : vector<64x128xbf16>, vector<128x256xbf16>, vector<64x256xf32> -> vector<64x256xf32>
    %c0_60 = arith.constant 0 : index
    %c0_61 = arith.constant 0 : index
    %110 = vector.load %arg23[%c0_60, %c0_61] : memref<1x256xf32, #tpu.memory_space<vmem>>, vector<1x256xf32>
    %111 = vector.broadcast %110 : vector<1x256xf32> to vector<64x256xf32>
    %112 = arith.addf %109, %111 : vector<64x256xf32>
    %cst_62 = arith.constant 0.000000e+00 : f32
    %113 = vector.broadcast %cst_62 : f32 to vector<64x256xf32>
    %114 = arith.maximumf %112, %113 : vector<64x256xf32>
    %115 = arith.truncf %114 : vector<64x256xf32> to vector<64x256xbf16>
    %c0_63 = arith.constant 0 : index
    %c0_64 = arith.constant 0 : index
    %116 = vector.load %arg25[%c0_63, %c0_64] : memref<256x256xbf16, #tpu.memory_space<vmem>>, vector<256x256xbf16>
    %cst_65 = arith.constant dense<0.000000e+00> : vector<64x256xf32>
    %117 = tpu.matmul %115, %116, %cst_65 {dimension_numbers = #tpu.dot_dimension_numbers<[1], [0], [0], [1], [0, 0, 1, 1], [], []>} : vector<64x256xbf16>, vector<256x256xbf16>, vector<64x256xf32> -> vector<64x256xf32>
    %c0_66 = arith.constant 0 : index
    %c0_67 = arith.constant 0 : index
    %118 = vector.load %arg24[%c0_66, %c0_67] : memref<3x256xf32, #tpu.memory_space<vmem>>, vector<3x256xf32>
    %119 = vector.extract_strided_slice %28 {offsets = [0, 0], sizes = [64, 1], strides = [1, 1]} : vector<64x3xf32> to vector<64x1xf32>
    %120 = vector.extract_strided_slice %118 {offsets = [0, 0], sizes = [1, 256], strides = [1, 1]} : vector<3x256xf32> to vector<1x256xf32>
    %121 = vector.broadcast %119 : vector<64x1xf32> to vector<64x256xf32>
    %122 = vector.broadcast %120 : vector<1x256xf32> to vector<64x256xf32>
    %123 = arith.mulf %121, %122 : vector<64x256xf32>
    %124 = vector.extract_strided_slice %28 {offsets = [0, 1], sizes = [64, 1], strides = [1, 1]} : vector<64x3xf32> to vector<64x1xf32>
    %125 = vector.extract_strided_slice %118 {offsets = [1, 0], sizes = [1, 256], strides = [1, 1]} : vector<3x256xf32> to vector<1x256xf32>
    %126 = vector.broadcast %124 : vector<64x1xf32> to vector<64x256xf32>
    %127 = vector.broadcast %125 : vector<1x256xf32> to vector<64x256xf32>
    %128 = arith.mulf %126, %127 : vector<64x256xf32>
    %129 = arith.addf %123, %128 : vector<64x256xf32>
    %130 = vector.extract_strided_slice %28 {offsets = [0, 2], sizes = [64, 1], strides = [1, 1]} : vector<64x3xf32> to vector<64x1xf32>
    %131 = vector.extract_strided_slice %118 {offsets = [2, 0], sizes = [1, 256], strides = [1, 1]} : vector<3x256xf32> to vector<1x256xf32>
    %132 = vector.broadcast %130 : vector<64x1xf32> to vector<64x256xf32>
    %133 = vector.broadcast %131 : vector<1x256xf32> to vector<64x256xf32>
    %134 = arith.mulf %132, %133 : vector<64x256xf32>
    %135 = arith.addf %129, %134 : vector<64x256xf32>
    %c0_68 = arith.constant 0 : index
    %c0_69 = arith.constant 0 : index
    %136 = vector.load %arg26[%c0_68, %c0_69] : memref<1x256xf32, #tpu.memory_space<vmem>>, vector<1x256xf32>
    %137 = vector.broadcast %136 : vector<1x256xf32> to vector<64x256xf32>
    %138 = arith.addf %135, %137 : vector<64x256xf32>
    %139 = arith.addf %117, %138 : vector<64x256xf32>
    %cst_70 = arith.constant 0.000000e+00 : f32
    %140 = vector.broadcast %cst_70 : f32 to vector<64x256xf32>
    %141 = arith.maximumf %139, %140 : vector<64x256xf32>
    %142 = arith.truncf %141 : vector<64x256xf32> to vector<64x256xbf16>
    %c0_71 = arith.constant 0 : index
    %c0_72 = arith.constant 0 : index
    %143 = vector.load %arg27[%c0_71, %c0_72] : memref<256x256xbf16, #tpu.memory_space<vmem>>, vector<256x256xbf16>
    %cst_73 = arith.constant dense<0.000000e+00> : vector<64x256xf32>
    %144 = tpu.matmul %142, %143, %cst_73 {dimension_numbers = #tpu.dot_dimension_numbers<[1], [0], [0], [1], [0, 0, 1, 1], [], []>} : vector<64x256xbf16>, vector<256x256xbf16>, vector<64x256xf32> -> vector<64x256xf32>
    %c0_74 = arith.constant 0 : index
    %c0_75 = arith.constant 0 : index
    %145 = vector.load %arg28[%c0_74, %c0_75] : memref<1x256xf32, #tpu.memory_space<vmem>>, vector<1x256xf32>
    %146 = vector.broadcast %145 : vector<1x256xf32> to vector<64x256xf32>
    %147 = arith.addf %144, %146 : vector<64x256xf32>
    %cst_76 = arith.constant 0.000000e+00 : f32
    %148 = vector.broadcast %cst_76 : f32 to vector<64x256xf32>
    %149 = arith.maximumf %147, %148 : vector<64x256xf32>
    %150 = arith.truncf %149 : vector<64x256xf32> to vector<64x256xbf16>
    %c0_77 = arith.constant 0 : index
    %c0_78 = arith.constant 0 : index
    %151 = vector.load %arg29[%c0_77, %c0_78] : memref<256x512xbf16, #tpu.memory_space<vmem>>, vector<256x512xbf16>
    %cst_79 = arith.constant dense<0.000000e+00> : vector<64x512xf32>
    %152 = tpu.matmul %150, %151, %cst_79 {dimension_numbers = #tpu.dot_dimension_numbers<[1], [0], [0], [1], [0, 0, 1, 1], [], []>} : vector<64x256xbf16>, vector<256x512xbf16>, vector<64x512xf32> -> vector<64x512xf32>
    %c0_80 = arith.constant 0 : index
    %c0_81 = arith.constant 0 : index
    %153 = vector.load %arg30[%c0_80, %c0_81] : memref<1x512xf32, #tpu.memory_space<vmem>>, vector<1x512xf32>
    %154 = vector.broadcast %153 : vector<1x512xf32> to vector<64x512xf32>
    %155 = arith.addf %152, %154 : vector<64x512xf32>
    %cst_82 = arith.constant 0.000000e+00 : f32
    %156 = vector.broadcast %cst_82 : f32 to vector<64x512xf32>
    %157 = arith.maximumf %155, %156 : vector<64x512xf32>
    %c64_i32 = arith.constant 64 : i32
    %158 = arith.muli %arg1, %c64_i32 : i32
    %159 = tpu.iota {dimensions = array<i32: 0>} : vector<64x1xi32>
    %160 = vector.broadcast %158 : i32 to vector<64x1xi32>
    %161 = arith.addi %160, %159 : vector<64x1xi32>
    %c64_i32_83 = arith.constant 64 : i32
    %162 = vector.broadcast %c64_i32_83 : i32 to vector<64x1xi32>
    %163 = arith.cmpi slt, %161, %162 : vector<64x1xi32>
    %cst_84 = arith.constant 0xFF800000 : f32
    %164 = vector.shape_cast %163 : vector<64x1xi1> to vector<64x1xi1>
    %165 = vector.broadcast %164 : vector<64x1xi1> to vector<64x512xi1>
    %166 = vector.broadcast %cst_84 : f32 to vector<64x512xf32>
    %167 = arith.select %165, %157, %166 : vector<64x512xi1>, vector<64x512xf32>
    %cst_85 = arith.constant dense<0xFF800000> : vector<512xf32>
    %168 = vector.multi_reduction <maximumf>, %167, %cst_85 [0] : vector<64x512xf32> to vector<512xf32>
    %169 = vector.shape_cast %168 : vector<512xf32> to vector<1x512xf32>
    %c0_i32 = arith.constant 0 : i32
    %170 = arith.cmpi eq, %arg1, %c0_i32 : i32
    %171 = arith.extui %170 : i1 to i32
    %c0_i32_86 = arith.constant 0 : i32
    %172 = arith.cmpi ne, %171, %c0_i32_86 : i32
    scf.if %172 {
      %cst_93 = arith.constant 0xFF800000 : f32
      %177 = vector.broadcast %cst_93 : f32 to vector<1x1x512xf32>
      %c0_94 = arith.constant 0 : index
      %c0_95 = arith.constant 0 : index
      %c0_96 = arith.constant 0 : index
      %178 = vector.load %arg31[%c0_94, %c0_95, %c0_96] : memref<1x1x512xf32, #tpu.memory_space<vmem>>, vector<1x1x512xf32>
      tpu.vector_store %arg31[%c0_94, %c0_95, %c0_96], %177 {strides = array<i32>} : memref<1x1x512xf32, #tpu.memory_space<vmem>>, vector<1x1x512xf32>,
    } else {
    }
    %c0_87 = arith.constant 0 : index
    %c0_88 = arith.constant 0 : index
    %c0_89 = arith.constant 0 : index
    %173 = vector.load %arg31[%c0_87, %c0_88, %c0_89] : memref<1x1x512xf32, #tpu.memory_space<vmem>>, vector<1x1x512xf32>
    %174 = vector.shape_cast %169 : vector<1x512xf32> to vector<1x1x512xf32>
    %175 = arith.maximumf %173, %174 : vector<1x1x512xf32>
    %c0_90 = arith.constant 0 : index
    %c0_91 = arith.constant 0 : index
    %c0_92 = arith.constant 0 : index
    %176 = vector.load %arg31[%c0_90, %c0_91, %c0_92] : memref<1x1x512xf32, #tpu.memory_space<vmem>>, vector<1x1x512xf32>
    tpu.vector_store %arg31[%c0_90, %c0_91, %c0_92], %175 {strides = array<i32>} : memref<1x1x512xf32, #tpu.memory_space<vmem>>, vector<1x1x512xf32>,
    return
  }
  func.func @transform_0(%arg0: i32, %arg1: i32) -> (i32, i32, i32) {
    %c0_i32 = arith.constant 0 : i32
    %c0_i32_0 = arith.constant 0 : i32
    return %arg0, %arg1, %c0_i32 : i32, i32, i32
  }
  func.func @transform_1(%arg0: i32, %arg1: i32) -> (i32, i32, i32) {
    %c0_i32 = arith.constant 0 : i32
    %c0_i32_0 = arith.constant 0 : i32
    return %arg0, %arg1, %c0_i32 : i32, i32, i32
  }
  func.func @transform_2(%arg0: i32, %arg1: i32) -> (i32, i32) {
    %c0_i32 = arith.constant 0 : i32
    %c0_i32_0 = arith.constant 0 : i32
    %c0_i32_1 = arith.constant 0 : i32
    return %c0_i32, %c0_i32_0 : i32, i32
  }
  func.func @transform_3(%arg0: i32, %arg1: i32) -> (i32, i32) {
    %c0_i32 = arith.constant 0 : i32
    %c0_i32_0 = arith.constant 0 : i32
    %c0_i32_1 = arith.constant 0 : i32
    return %c0_i32, %c0_i32_0 : i32, i32
  }
  func.func @transform_4(%arg0: i32, %arg1: i32) -> (i32, i32) {
    %c0_i32 = arith.constant 0 : i32
    %c0_i32_0 = arith.constant 0 : i32
    %c0_i32_1 = arith.constant 0 : i32
    return %c0_i32, %c0_i32_0 : i32, i32
  }
  func.func @transform_5(%arg0: i32, %arg1: i32) -> (i32, i32) {
    %c0_i32 = arith.constant 0 : i32
    %c0_i32_0 = arith.constant 0 : i32
    %c0_i32_1 = arith.constant 0 : i32
    return %c0_i32, %c0_i32_0 : i32, i32
  }
  func.func @transform_6(%arg0: i32, %arg1: i32) -> (i32, i32) {
    %c0_i32 = arith.constant 0 : i32
    %c0_i32_0 = arith.constant 0 : i32
    %c0_i32_1 = arith.constant 0 : i32
    return %c0_i32, %c0_i32_0 : i32, i32
  }
  func.func @transform_7(%arg0: i32, %arg1: i32) -> (i32, i32) {
    %c0_i32 = arith.constant 0 : i32
    %c0_i32_0 = arith.constant 0 : i32
    %c0_i32_1 = arith.constant 0 : i32
    return %c0_i32, %c0_i32_0 : i32, i32
  }
  func.func @transform_8(%arg0: i32, %arg1: i32) -> (i32, i32) {
    %c0_i32 = arith.constant 0 : i32
    %c0_i32_0 = arith.constant 0 : i32
    %c0_i32_1 = arith.constant 0 : i32
    return %c0_i32, %c0_i32_0 : i32, i32
  }
  func.func @transform_9(%arg0: i32, %arg1: i32) -> (i32, i32) {
    %c0_i32 = arith.constant 0 : i32
    %c0_i32_0 = arith.constant 0 : i32
    %c0_i32_1 = arith.constant 0 : i32
    return %c0_i32, %c0_i32_0 : i32, i32
  }
  func.func @transform_10(%arg0: i32, %arg1: i32) -> (i32, i32) {
    %c0_i32 = arith.constant 0 : i32
    %c0_i32_0 = arith.constant 0 : i32
    %c0_i32_1 = arith.constant 0 : i32
    return %c0_i32, %c0_i32_0 : i32, i32
  }
  func.func @transform_11(%arg0: i32, %arg1: i32) -> (i32, i32) {
    %c0_i32 = arith.constant 0 : i32
    %c0_i32_0 = arith.constant 0 : i32
    %c0_i32_1 = arith.constant 0 : i32
    return %c0_i32, %c0_i32_0 : i32, i32
  }
  func.func @transform_12(%arg0: i32, %arg1: i32) -> (i32, i32) {
    %c0_i32 = arith.constant 0 : i32
    %c0_i32_0 = arith.constant 0 : i32
    %c0_i32_1 = arith.constant 0 : i32
    return %c0_i32, %c0_i32_0 : i32, i32
  }
  func.func @transform_13(%arg0: i32, %arg1: i32) -> (i32, i32) {
    %c0_i32 = arith.constant 0 : i32
    %c0_i32_0 = arith.constant 0 : i32
    %c0_i32_1 = arith.constant 0 : i32
    return %c0_i32, %c0_i32_0 : i32, i32
  }
  func.func @transform_14(%arg0: i32, %arg1: i32) -> (i32, i32) {
    %c0_i32 = arith.constant 0 : i32
    %c0_i32_0 = arith.constant 0 : i32
    %c0_i32_1 = arith.constant 0 : i32
    return %c0_i32, %c0_i32_0 : i32, i32
  }
  func.func @transform_15(%arg0: i32, %arg1: i32) -> (i32, i32) {
    %c0_i32 = arith.constant 0 : i32
    %c0_i32_0 = arith.constant 0 : i32
    %c0_i32_1 = arith.constant 0 : i32
    return %c0_i32, %c0_i32_0 : i32, i32
  }
  func.func @transform_16(%arg0: i32, %arg1: i32) -> (i32, i32) {
    %c0_i32 = arith.constant 0 : i32
    %c0_i32_0 = arith.constant 0 : i32
    %c0_i32_1 = arith.constant 0 : i32
    return %c0_i32, %c0_i32_0 : i32, i32
  }
  func.func @transform_17(%arg0: i32, %arg1: i32) -> (i32, i32) {
    %c0_i32 = arith.constant 0 : i32
    %c0_i32_0 = arith.constant 0 : i32
    %c0_i32_1 = arith.constant 0 : i32
    return %c0_i32, %c0_i32_0 : i32, i32
  }
  func.func @transform_18(%arg0: i32, %arg1: i32) -> (i32, i32) {
    %c0_i32 = arith.constant 0 : i32
    %c0_i32_0 = arith.constant 0 : i32
    %c0_i32_1 = arith.constant 0 : i32
    return %c0_i32, %c0_i32_0 : i32, i32
  }
  func.func @transform_19(%arg0: i32, %arg1: i32) -> (i32, i32) {
    %c0_i32 = arith.constant 0 : i32
    %c0_i32_0 = arith.constant 0 : i32
    %c0_i32_1 = arith.constant 0 : i32
    return %c0_i32, %c0_i32_0 : i32, i32
  }
  func.func @transform_20(%arg0: i32, %arg1: i32) -> (i32, i32) {
    %c0_i32 = arith.constant 0 : i32
    %c0_i32_0 = arith.constant 0 : i32
    %c0_i32_1 = arith.constant 0 : i32
    return %c0_i32, %c0_i32_0 : i32, i32
  }
  func.func @transform_21(%arg0: i32, %arg1: i32) -> (i32, i32) {
    %c0_i32 = arith.constant 0 : i32
    %c0_i32_0 = arith.constant 0 : i32
    %c0_i32_1 = arith.constant 0 : i32
    return %c0_i32, %c0_i32_0 : i32, i32
  }
  func.func @transform_22(%arg0: i32, %arg1: i32) -> (i32, i32) {
    %c0_i32 = arith.constant 0 : i32
    %c0_i32_0 = arith.constant 0 : i32
    %c0_i32_1 = arith.constant 0 : i32
    return %c0_i32, %c0_i32_0 : i32, i32
  }
  func.func @transform_23(%arg0: i32, %arg1: i32) -> (i32, i32) {
    %c0_i32 = arith.constant 0 : i32
    %c0_i32_0 = arith.constant 0 : i32
    %c0_i32_1 = arith.constant 0 : i32
    return %c0_i32, %c0_i32_0 : i32, i32
  }
  func.func @transform_24(%arg0: i32, %arg1: i32) -> (i32, i32) {
    %c0_i32 = arith.constant 0 : i32
    %c0_i32_0 = arith.constant 0 : i32
    %c0_i32_1 = arith.constant 0 : i32
    return %c0_i32, %c0_i32_0 : i32, i32
  }
  func.func @transform_25(%arg0: i32, %arg1: i32) -> (i32, i32) {
    %c0_i32 = arith.constant 0 : i32
    %c0_i32_0 = arith.constant 0 : i32
    %c0_i32_1 = arith.constant 0 : i32
    return %c0_i32, %c0_i32_0 : i32, i32
  }
  func.func @transform_26(%arg0: i32, %arg1: i32) -> (i32, i32) {
    %c0_i32 = arith.constant 0 : i32
    %c0_i32_0 = arith.constant 0 : i32
    %c0_i32_1 = arith.constant 0 : i32
    return %c0_i32, %c0_i32_0 : i32, i32
  }
  func.func @transform_27(%arg0: i32, %arg1: i32) -> (i32, i32) {
    %c0_i32 = arith.constant 0 : i32
    %c0_i32_0 = arith.constant 0 : i32
    %c0_i32_1 = arith.constant 0 : i32
    return %c0_i32, %c0_i32_0 : i32, i32
  }
  func.func @transform_28(%arg0: i32, %arg1: i32) -> (i32, i32) {
    %c0_i32 = arith.constant 0 : i32
    %c0_i32_0 = arith.constant 0 : i32
    %c0_i32_1 = arith.constant 0 : i32
    return %c0_i32, %c0_i32_0 : i32, i32
  }
  func.func @transform_29(%arg0: i32, %arg1: i32) -> (i32, i32, i32) {
    %c0_i32 = arith.constant 0 : i32
    %c0_i32_0 = arith.constant 0 : i32
    %c0_i32_1 = arith.constant 0 : i32
    return %arg0, %c0_i32, %c0_i32_0 : i32, i32, i32
  }
}

module attributes {stable_mosaic.version = 11 : i64} {
  func.func @head_kernel(%arg0: memref<2x512xf32, #tpu.memory_space<vmem>>, %arg1: memref<512x256xbf16, #tpu.memory_space<vmem>>, %arg2: memref<1x256xf32, #tpu.memory_space<vmem>>, %arg3: memref<256x128xbf16, #tpu.memory_space<vmem>>, %arg4: memref<1x128xf32, #tpu.memory_space<vmem>>, %arg5: memref<128x10xbf16, #tpu.memory_space<vmem>>, %arg6: memref<1x10xf32, #tpu.memory_space<vmem>>, %arg7: memref<2x10xf32, #tpu.memory_space<vmem>>) attributes {dimension_semantics = [], scalar_prefetch = 0 : i64, scratch_operands = 0 : i64, tpu.core_type = #tpu.core_type<tc>} {
    %c0 = arith.constant 0 : index
    %c0_0 = arith.constant 0 : index
    %0 = vector.load %arg0[%c0, %c0_0] : memref<2x512xf32, #tpu.memory_space<vmem>>, vector<2x512xf32>
    %1 = arith.truncf %0 : vector<2x512xf32> to vector<2x512xbf16>
    %c0_1 = arith.constant 0 : index
    %c0_2 = arith.constant 0 : index
    %2 = vector.load %arg1[%c0_1, %c0_2] : memref<512x256xbf16, #tpu.memory_space<vmem>>, vector<512x256xbf16>
    %cst = arith.constant dense<0.000000e+00> : vector<2x256xf32>
    %3 = tpu.matmul %1, %2, %cst {dimension_numbers = #tpu.dot_dimension_numbers<[1], [0], [0], [1], [0, 0, 1, 1], [], []>} : vector<2x512xbf16>, vector<512x256xbf16>, vector<2x256xf32> -> vector<2x256xf32>
    %c0_3 = arith.constant 0 : index
    %c0_4 = arith.constant 0 : index
    %4 = vector.load %arg2[%c0_3, %c0_4] : memref<1x256xf32, #tpu.memory_space<vmem>>, vector<1x256xf32>
    %5 = vector.broadcast %4 : vector<1x256xf32> to vector<2x256xf32>
    %6 = arith.addf %3, %5 : vector<2x256xf32>
    %cst_5 = arith.constant 0.000000e+00 : f32
    %7 = vector.broadcast %cst_5 : f32 to vector<2x256xf32>
    %8 = arith.maximumf %6, %7 : vector<2x256xf32>
    %9 = arith.truncf %8 : vector<2x256xf32> to vector<2x256xbf16>
    %c0_6 = arith.constant 0 : index
    %c0_7 = arith.constant 0 : index
    %10 = vector.load %arg3[%c0_6, %c0_7] : memref<256x128xbf16, #tpu.memory_space<vmem>>, vector<256x128xbf16>
    %cst_8 = arith.constant dense<0.000000e+00> : vector<2x128xf32>
    %11 = tpu.matmul %9, %10, %cst_8 {dimension_numbers = #tpu.dot_dimension_numbers<[1], [0], [0], [1], [0, 0, 1, 1], [], []>} : vector<2x256xbf16>, vector<256x128xbf16>, vector<2x128xf32> -> vector<2x128xf32>
    %c0_9 = arith.constant 0 : index
    %c0_10 = arith.constant 0 : index
    %12 = vector.load %arg4[%c0_9, %c0_10] : memref<1x128xf32, #tpu.memory_space<vmem>>, vector<1x128xf32>
    %13 = vector.broadcast %12 : vector<1x128xf32> to vector<2x128xf32>
    %14 = arith.addf %11, %13 : vector<2x128xf32>
    %cst_11 = arith.constant 0.000000e+00 : f32
    %15 = vector.broadcast %cst_11 : f32 to vector<2x128xf32>
    %16 = arith.maximumf %14, %15 : vector<2x128xf32>
    %17 = arith.truncf %16 : vector<2x128xf32> to vector<2x128xbf16>
    %c0_12 = arith.constant 0 : index
    %c0_13 = arith.constant 0 : index
    %18 = vector.load %arg5[%c0_12, %c0_13] : memref<128x10xbf16, #tpu.memory_space<vmem>>, vector<128x10xbf16>
    %cst_14 = arith.constant dense<0.000000e+00> : vector<2x10xf32>
    %19 = tpu.matmul %17, %18, %cst_14 {dimension_numbers = #tpu.dot_dimension_numbers<[1], [0], [0], [1], [0, 0, 1, 1], [], []>} : vector<2x128xbf16>, vector<128x10xbf16>, vector<2x10xf32> -> vector<2x10xf32>
    %c0_15 = arith.constant 0 : index
    %c0_16 = arith.constant 0 : index
    %20 = vector.load %arg6[%c0_15, %c0_16] : memref<1x10xf32, #tpu.memory_space<vmem>>, vector<1x10xf32>
    %21 = vector.broadcast %20 : vector<1x10xf32> to vector<2x10xf32>
    %22 = arith.addf %19, %21 : vector<2x10xf32>
    %c0_17 = arith.constant 0 : index
    %c0_18 = arith.constant 0 : index
    %23 = vector.load %arg7[%c0_17, %c0_18] : memref<2x10xf32, #tpu.memory_space<vmem>>, vector<2x10xf32>
    tpu.vector_store %arg7[%c0_17, %c0_18], %22 {strides = array<i32>} : memref<2x10xf32, #tpu.memory_space<vmem>>, vector<2x10xf32>,
    return
  }
}

</mosaic_0001>

<bundles_post_ra>
// kernel: pointnet2_forward.3
= control target key start
LH: loop header
LB: loop body
LE: loop exit
PB: predicated region body
PF: predicated region fallthrough
CT: control target
= control target key end

     0   :  { %v1137_v7 = vmov 1983009808   ;;  %v34_v9 = vlaneseq  ;;  %s1486_s0 = inlined_call_operand.vmem [shape: f32[2,512], index: 0, kind: input, shape index: {}]   ;;  %s1487_s1 = inlined_call_operand.vmem [shape: bf16[512,256], index: 1, kind: input, shape index: {}]   ;;  %s1488_s2 = inlined_call_operand.vmem [shape: f32[1,256], index: 2, kind: input, shape index: {}]   ;;  %s1489_s3 = inlined_call_operand.vmem [shape: bf16[256,128], index: 3, kind: input, shape index: {}]   ;;  %s1490_s4 = inlined_call_operand.vmem [shape: f32[1,128], index: 4, kind: input, shape index: {}]   ;;  %s1491_s5 = inlined_call_operand.vmem [shape: bf16[128,10], index: 5, kind: input, shape index: {}]   ;;  %s1492_s6 = inlined_call_operand.vmem [shape: f32[1,10], index: 6, kind: input, shape index: {}]   ;;  %s1493_s7 = inlined_call_operand.hbm [shape: f32[2,10], index: 7, kind: output, shape index: {}]  }
   0x1   :  { %v992_v0 = vld [vmem:[%s1487_s1 + $0x4] ss:$8 sps:$4 sm:$0xff]   ;;  %v994_v1 = vld [vmem:[%s1487_s1] ss:$8 sps:$4 sm:$0xff]   ;;  %v995_v2 = vld [vmem:[%s1487_s1 + $0x14] ss:$8 sps:$4 sm:$0xff]   ;;  %v32_v8 = vunpack.c.l.s4 %v1137_v7 }
   0x2   :  { %451 = vmatprep.subr.bf16.mxu0 %v992_v0  ;;  %v997_v3 = vld [vmem:[%s1487_s1 + $0x10] ss:$8 sps:$4 sm:$0xff]   ;;  %v998_v4 = vld [vmem:[%s1487_s1 + $0x24] ss:$8 sps:$4 sm:$0xff]   ;;  %v1000_v5 = vld [vmem:[%s1487_s1 + $0x20] ss:$8 sps:$4 sm:$0xff]  }
   0x3   :  { %452 = vmatpush1.bf16.msra.mxu0 %v994_v1  ;;  %v1001_v6 = vld [vmem:[%s1487_s1 + $0x34] ss:$8 sps:$4 sm:$0xff]   ;;  %v1003_v10 = vld [vmem:[%s1487_s1 + $0x30] ss:$8 sps:$4 sm:$0xff]   ;;  %v1004_v11 = vld [vmem:[%s1487_s1 + $0x44] ss:$8 sps:$4 sm:$0xff]   ;;  %v33_v12 = vunpack.c.0.s8 %v32_v8 }
   0x4   :  { %453 = vmatprep.subr.bf16.mxu0 %v995_v2  ;;  %v1208_v13 = vshrl.u32 %v34_v9, 7  ;;  %v1006_v14 = vld [vmem:[%s1487_s1 + $0x40] ss:$8 sps:$4 sm:$0xff]   ;;  %v1007_v15 = vld [vmem:[%s1487_s1 + $0x54] ss:$8 sps:$4 sm:$0xff]  }
   0x5   :  { %v1009_v17 = vld [vmem:[%s1487_s1 + $0x50] ss:$8 sps:$4 sm:$0xff]   ;;  %v1010_v18 = vld [vmem:[%s1487_s1 + $0x64] ss:$8 sps:$4 sm:$0xff]   ;;  %v1012_v21 = vld [vmem:[%s1487_s1 + $0x60] ss:$8 sps:$4 sm:$0xff]  }
   0x6   :  { %v36_v16 = vsub.s32 %v33_v12, %v1208_v13  ;;  %v28_v19 = vld [vmem:[%s1486_s0] sm:$0xff]  ;;  %v1013_v22 = vld [vmem:[%s1487_s1 + $0x74] ss:$8 sps:$4 sm:$0xff]   ;;  %v1015_v25 = vld [vmem:[%s1487_s1 + $0x70] ss:$8 sps:$4 sm:$0xff]  }
   0x7   :  { %454 = vmatpush1.bf16.msra.mxu0 %v997_v3  ;;  %v1016_v26 = vld [vmem:[%s1487_s1 + $0x84] ss:$8 sps:$4 sm:$0xff]   ;;  %v1018_v27 = vld [vmem:[%s1487_s1 + $0x80] ss:$8 sps:$4 sm:$0xff]   ;;  %v1019_v28 = vld [vmem:[%s1487_s1 + $0x94] ss:$8 sps:$4 sm:$0xff]   ;;  %v30_v44 = vcombine.high %v28_v19, %v28_v19 }
   0x8   :  { %455 = vmatprep.subr.bf16.mxu0 %v998_v4  ;;  %v1226_v20 = vrot.slane %v28_v19, %v36_v16  ;;  %v1021_v29 = vld [vmem:[%s1487_s1 + $0x90] ss:$8 sps:$4 sm:$0xff]   ;;  %v1022_v30 = vld [vmem:[%s1487_s1 + $0xa4] ss:$8 sps:$4 sm:$0xff]   ;;  %v1024_v31 = vld [vmem:[%s1487_s1 + $0xa0] ss:$8 sps:$4 sm:$0xff]  }
   0x9   :  { %v1025_v32 = vld [vmem:[%s1487_s1 + $0xb4] ss:$8 sps:$4 sm:$0xff]   ;;  %v1027_v33 = vld [vmem:[%s1487_s1 + $0xb0] ss:$8 sps:$4 sm:$0xff]   ;;  %v1028_v34 = vld [vmem:[%s1487_s1 + $0xc4] ss:$8 sps:$4 sm:$0xff]   ;;  %v1308_v50 = vrot.slane %v30_v44, %v36_v16 }
   0xa   :  { %v45_v23 = vcombine.high %v1226_v20, %v1226_v20  ;;  %v1089_v35 = vld [vmem:[%s1489_s3 + $0x40] sm:$0xff]   ;;  %v1091_v38 = vld [vmem:[%s1489_s3 + $0x48] sm:$0xff]   ;;  %v1093_v40 = vld [vmem:[%s1489_s3 + $0x50] sm:$0xff]   ;;  %v51_v58 = vpack.c.bf16 %v1226_v20, %v1226_v20 }
   0xb   :  { %456 = vmatpush1.bf16.msra.mxu0 %v1000_v5  ;;  %v1090_v36 = vld [vmem:[%s1489_s3] sm:$0xff]   ;;  %931 = vmatprep.subr.bf16.mxu1 %v1089_v35  ;;  %v1092_v39 = vld [vmem:[%s1489_s3 + $0x8] sm:$0xff]   ;;  %v1031_v41 = vld [vmem:[%s1487_s1 + $0xd4] ss:$8 sps:$4 sm:$0xff]   ;;  %v46_v56 = vcombine.high %v1308_v50, %v1308_v50 }
   0xc   :  { %457 = vmatprep.subr.bf16.mxu0 %v1001_v6  ;;  %v52_v24 = vpack.c.bf16 %v45_v23, %v45_v23  ;;  %v1030_v37 = vld [vmem:[%s1487_s1 + $0xc0] ss:$8 sps:$4 sm:$0xff]   ;;  %932 = vmatpush3.bf16.msra.mxu1 %v1090_v36  ;;  %v1033_v42 = vld [vmem:[%s1487_s1 + $0xd0] ss:$8 sps:$4 sm:$0xff]   ;;  %v1034_v46 = vld [vmem:[%s1487_s1 + $0xe4] ss:$8 sps:$4 sm:$0xff]  }
   0xd   :  { %933 = vmatprep.subr.bf16.mxu1 %v1091_v38  ;;  %v1094_v43 = vld [vmem:[%s1489_s3 + $0x10] sm:$0xff]   ;;  %v1095_v45 = vld [vmem:[%s1489_s3 + $0x58] sm:$0xff]   ;;  %v1036_v47 = vld [vmem:[%s1487_s1 + $0xe0] ss:$8 sps:$4 sm:$0xff]   ;;  %v54_v60 = vpack.c.bf16 %v46_v56, %v46_v56 }
   0xe   :  { %483 = vmatprep.mubr.bf16.mxu0 %v52_v24  ;;  %v1037_v48 = vld [vmem:[%s1487_s1 + $0xf4] ss:$8 sps:$4 sm:$0xff]   ;;  %v1097_v51 = vld [vmem:[%s1489_s3 + $0x60] sm:$0xff]   ;;  %v1039_v53 = vld [vmem:[%s1487_s1 + $0xf0] ss:$8 sps:$4 sm:$0xff]  }
   0xf   :  { %458 = vmatpush1.bf16.msra.mxu0 %v1003_v10  ;;  %v1096_v49 = vld [vmem:[%s1489_s3 + $0x18] sm:$0xff]   ;;  %v1098_v52 = vld [vmem:[%s1489_s3 + $0x20] sm:$0xff]   ;;  %v1099_v54 = vld [vmem:[%s1489_s3 + $0x68] sm:$0xff]  }
  0x10   :  { %459 = vmatprep.subr.bf16.mxu0 %v1004_v11  ;;  %934 = vmatpush3.bf16.msra.mxu1 %v1092_v39  ;;  %v1043_v55 = vld [vmem:[%s1487_s1 + $0x104] ss:$8 sps:$4 sm:$0xff]   ;;  %v1041_v59 = vld [vmem:[%s1487_s1 + $0x100] ss:$8 sps:$4 sm:$0xff]  }
  0x11   :  { %935 = vmatprep.subr.bf16.mxu1 %v1093_v40  ;;  %v1100_v57 = vld [vmem:[%s1489_s3 + $0x28] sm:$0xff]  }
  0x13   :  { %460 = vmatpush1.bf16.msra.mxu0 %v1006_v14 }
  0x14   :  { %461 = vmatprep.subr.bf16.mxu0 %v1007_v15  ;;  %936 = vmatpush3.bf16.msra.mxu1 %v1094_v43 }
  0x15   :  { %937 = vmatprep.subr.bf16.mxu1 %v1095_v45 }
  0x17   :  { %462 = vmatpush1.bf16.msra.mxu0 %v1009_v17 }
  0x18   :  { %463 = vmatprep.subr.bf16.mxu0 %v1010_v18  ;;  %938 = vmatpush3.bf16.msra.mxu1 %v1096_v49 }
  0x19   :  { %939 = vmatprep.subr.bf16.mxu1 %v1097_v51 }
  0x1b   :  { %464 = vmatpush1.bf16.msra.mxu0 %v1012_v21 }
  0x1c   :  { %465 = vmatprep.subr.bf16.mxu0 %v1013_v22  ;;  %940 = vmatpush3.bf16.msra.mxu1 %v1098_v52 }
  0x1d   :  { %941 = vmatprep.subr.bf16.mxu1 %v1099_v54 }
  0x1f   :  { %466 = vmatpush1.bf16.msra.mxu0 %v1015_v25 }
  0x20   :  { %467 = vmatprep.subr.bf16.mxu0 %v1016_v26 }
  0x23   :  { %468 = vmatpush1.bf16.msra.mxu0 %v1018_v27 }
  0x24   :  { %469 = vmatprep.subr.bf16.mxu0 %v1019_v28 }
  0x27   :  { %470 = vmatpush1.bf16.msra.mxu0 %v1021_v29 }
  0x28   :  { %471 = vmatprep.subr.bf16.mxu0 %v1022_v30 }
  0x2b   :  { %472 = vmatpush1.bf16.msra.mxu0 %v1024_v31 }
  0x2c   :  { %473 = vmatprep.subr.bf16.mxu0 %v1025_v32 }
  0x2f   :  { %474 = vmatpush1.bf16.msra.mxu0 %v1027_v33 }
  0x30   :  { %475 = vmatprep.subr.bf16.mxu0 %v1028_v34 }
  0x33   :  { %476 = vmatpush1.bf16.msra.mxu0 %v1030_v37 }
  0x34   :  { %477 = vmatprep.subr.bf16.mxu0 %v1031_v41 }
  0x37   :  { %478 = vmatpush1.bf16.msra.mxu0 %v1033_v42 }
  0x38   :  { %479 = vmatprep.subr.bf16.mxu0 %v1034_v46 }
  0x3b   :  { %480 = vmatpush1.bf16.msra.mxu0 %v1036_v47 }
  0x3c   :  { %481 = vmatprep.subr.bf16.mxu0 %v1037_v48 }
  0x3f   :  { %482 = vmatpush1.bf16.msra.mxu0 %v1039_v53 }
  0x40   :  { %12 = vsyncpa [#allocation3], 0  ;;  %492 = vmatprep.subr.bf16.mxu0 %v1043_v55  ;;  %v1046_v61 = vld [vmem:[%s1487_s1 + $0x114] ss:$8 sps:$4 sm:$0xff]   ;;  %942 = vmatpush3.bf16.msra.mxu1 %v1100_v57  ;;  %v1044_v62 = vld [vmem:[%s1487_s1 + $0x110] ss:$8 sps:$4 sm:$0xff]   ;;  %v53_v28 = vpack.c.bf16 %v1308_v50, %v1308_v50 }
  0x41   :  { %v1049_v63 = vld [vmem:[%s1487_s1 + $0x124] ss:$8 sps:$4 sm:$0xff]   ;;  %v1047_v0 = vld [vmem:[%s1487_s1 + $0x120] ss:$8 sps:$4 sm:$0xff]   ;;  %v1052_v1 = vld [vmem:[%s1487_s1 + $0x134] ss:$8 sps:$4 sm:$0xff]  }
  0x42   :  { %484 = vmatmul.mubr.bf16.vlgmr.msra.gmra.mrb[0].mxu0 %v51_v58  ;;  %v1050_v2 = vld [vmem:[%s1487_s1 + $0x130] ss:$8 sps:$4 sm:$0xff]   ;;  %v1055_v3 = vld [vmem:[%s1487_s1 + $0x144] ss:$8 sps:$4 sm:$0xff]   ;;  %v1053_v4 = vld [vmem:[%s1487_s1 + $0x140] ss:$8 sps:$4 sm:$0xff]  }
  0x43   :  { %493 = vmatpush1.bf16.msra.mxu0 %v1041_v59  ;;  %524 = vmatprep.mubr.bf16.mxu0 %v54_v60  ;;  %v1058_v5 = vld [vmem:[%s1487_s1 + $0x154] ss:$8 sps:$4 sm:$0xff]   ;;  %v1056_v6 = vld [vmem:[%s1487_s1 + $0x150] ss:$8 sps:$4 sm:$0xff]   ;;  %v1061_v7 = vld [vmem:[%s1487_s1 + $0x164] ss:$8 sps:$4 sm:$0xff]  }
  0x44   :  { %494 = vmatprep.subr.bf16.mxu0 %v1046_v61  ;;  %v1059_v8 = vld [vmem:[%s1487_s1 + $0x160] ss:$8 sps:$4 sm:$0xff]   ;;  %v1064_v9 = vld [vmem:[%s1487_s1 + $0x174] ss:$8 sps:$4 sm:$0xff]   ;;  %v1062_v10 = vld [vmem:[%s1487_s1 + $0x170] ss:$8 sps:$4 sm:$0xff]  }
  0x45   :  { %v1067_v11 = vld [vmem:[%s1487_s1 + $0x184] ss:$8 sps:$4 sm:$0xff]   ;;  %v1065_v12 = vld [vmem:[%s1487_s1 + $0x180] ss:$8 sps:$4 sm:$0xff]   ;;  %v1070_v14 = vld [vmem:[%s1487_s1 + $0x194] ss:$8 sps:$4 sm:$0xff]  }
  0x46   :  { %v1068_v15 = vld [vmem:[%s1487_s1 + $0x190] ss:$8 sps:$4 sm:$0xff]   ;;  %v1073_v16 = vld [vmem:[%s1487_s1 + $0x1a4] ss:$8 sps:$4 sm:$0xff]   ;;  %v1071_v17 = vld [vmem:[%s1487_s1 + $0x1a0] ss:$8 sps:$4 sm:$0xff]  }
  0x47   :  { %495 = vmatpush1.bf16.msra.mxu0 %v1044_v62  ;;  %v1076_v18 = vld [vmem:[%s1487_s1 + $0x1b4] ss:$8 sps:$4 sm:$0xff]   ;;  %v1074_v19 = vld [vmem:[%s1487_s1 + $0x1b0] ss:$8 sps:$4 sm:$0xff]   ;;  %v1079_v20 = vld [vmem:[%s1487_s1 + $0x1c4] ss:$8 sps:$4 sm:$0xff]  }
  0x48   :  { %496 = vmatprep.subr.bf16.mxu0 %v1049_v63  ;;  %v1077_v21 = vld [vmem:[%s1487_s1 + $0x1c0] ss:$8 sps:$4 sm:$0xff]   ;;  %v1082_v22 = vld [vmem:[%s1487_s1 + $0x1d4] ss:$8 sps:$4 sm:$0xff]   ;;  %v1080_v23 = vld [vmem:[%s1487_s1 + $0x1d0] ss:$8 sps:$4 sm:$0xff]  }
  0x49   :  { %v1085_v24 = vld [vmem:[%s1487_s1 + $0x1e4] ss:$8 sps:$4 sm:$0xff]   ;;  %v1083_v25 = vld [vmem:[%s1487_s1 + $0x1e0] ss:$8 sps:$4 sm:$0xff]   ;;  %v1088_v26 = vld [vmem:[%s1487_s1 + $0x1f4] ss:$8 sps:$4 sm:$0xff]  }
  0x4a   :  { %v1086_v27 = vld [vmem:[%s1487_s1 + $0x1f0] ss:$8 sps:$4 sm:$0xff]   ;;  %v1138_v33 = vmov 0.0   ;;  %v123_v34 = vsub.s32 0, %v1208_v13  ;;  %v119_v35 = vld [vmem:[%s1488_s2] sm:$0x3] }
  0x4b   :  { %497 = vmatpush1.bf16.msra.mxu0 %v1047_v0  ;;  %v1101_v29 = vld [vmem:[%s1489_s3 + $0x70] sm:$0xff]   ;;  %v1103_v31 = vld [vmem:[%s1489_s3 + $0x78] sm:$0xff]   ;;  %v127_v36 = vsub.s32 1, %v1208_v13  ;;  %v1105_v48 = vld [vmem:[%s1491_s5] sm:$0xff]   ;;  %vm1139_vm0 = vmmov 0   ;;  %vm825_vm1 = vcmask 74752  }
  0x4c   :  { %498 = vmatprep.subr.bf16.mxu0 %v1052_v1  ;;  %v1102_v30 = vld [vmem:[%s1489_s3 + $0x30] sm:$0xff]   ;;  %943 = vmatprep.subr.bf16.mxu1 %v1101_v29  ;;  %v1104_v32 = vld [vmem:[%s1489_s3 + $0x38] sm:$0xff]   ;;  %v124_v37 = vrot.slane %v119_v35, %v123_v34  ;;  %v1106_v13 = vld [vmem:[%s1491_s5 + $0x8] sm:$0xff]  }
  0x4d   :  { %944 = vmatpush3.bf16.msra.mxu1 %v1102_v30  ;;  %v128_v38 = vrot.slane %v119_v35, %v127_v36  ;;  %v1107_v50 = vld [vmem:[%s1491_s5 + $0x10] sm:$0xff]   ;;  %v1108_v51 = vld [vmem:[%s1491_s5 + $0x18] sm:$0xff]   ;;  %v1109_v52 = vld [vmem:[%s1491_s5 + $0x20] sm:$0xff]  }
  0x4e   :  { %945 = vmatprep.subr.bf16.mxu1 %v1103_v31  ;;  %v1110_v53 = vld [vmem:[%s1491_s5 + $0x28] sm:$0xff]   ;;  %v1111_v54 = vld [vmem:[%s1491_s5 + $0x30] sm:$0xff]   ;;  %v1112_v55 = vld [vmem:[%s1491_s5 + $0x38] sm:$0xff]   ;;  %s1140_s5 = smov [#allocation2]  }
  0x4f   :  { %499 = vmatpush1.bf16.msra.mxu0 %v1050_v2  ;;  %v905_v57 = vld [vmem:[%s1490_s4] ss:$0 sm:$0xff]  ;;  %s833_s14 = sshll.u32 %s1140_s5, 4  ;;  %s834_s14 = int_to_ptr.vmem [resolvable:$true] %s833_s14 }
  0x50   :  { %500 = vmatprep.subr.bf16.mxu0 %v1055_v3  ;;  %v922_v1 = vld [vmem:[%s1492_s6] ss:$0 sm:$0xff]  ;;  %s1113_s4 = scalar_lea.vmem %s834_s14, 32  ;;  %p1118_p1 = scmp.lt.s32.totalorder %s834_s14, %s834_s14 }
  0x51   :  { %946 = vmatpush3.bf16.msra.mxu1 %v1104_v32  ;;  %p1114_p0 = scmp.ne.s32.totalorder %s834_s14, %s1113_s4  ;;  %p1119_p2 = scmp.lt.s32.totalorder %s1113_s4, %s1113_s4 }
  0x52   :  { %962 = vmatprep.subr.bf16.mxu1 %v1138_v33 }
  0x53   :  { %501 = vmatpush1.bf16.msra.mxu0 %v1053_v4  ;;  %p1120_p3 = por %p1119_p2, %p1118_p1 }
  0x54   :  { %502 = vmatprep.subr.bf16.mxu0 %v1058_v5 }
  0x55   :  { %p1121_p4 = pnand %p1120_p3, %p1114_p0 }
  0x57   :  { %503 = vmatpush1.bf16.msra.mxu0 %v1056_v6 }
  0x58   :  { %504 = vmatprep.subr.bf16.mxu0 %v1061_v7 }
  0x5b   :  { %505 = vmatpush1.bf16.msra.mxu0 %v1059_v8 }
  0x5c   :  { %506 = vmatprep.subr.bf16.mxu0 %v1064_v9 }
  0x5f   :  { %507 = vmatpush1.bf16.msra.mxu0 %v1062_v10 }
  0x60   :  { %508 = vmatprep.subr.bf16.mxu0 %v1067_v11 }
  0x63   :  { %509 = vmatpush1.bf16.msra.mxu0 %v1065_v12 }
  0x64   :  { %510 = vmatprep.subr.bf16.mxu0 %v1070_v14 }
  0x67   :  { %511 = vmatpush1.bf16.msra.mxu0 %v1068_v15 }
  0x68   :  { %512 = vmatprep.subr.bf16.mxu0 %v1073_v16 }
  0x6b   :  { %513 = vmatpush1.bf16.msra.mxu0 %v1071_v17 }
  0x6c   :  { %514 = vmatprep.subr.bf16.mxu0 %v1076_v18 }
  0x6f   :  { %515 = vmatpush1.bf16.msra.mxu0 %v1074_v19 }
  0x70   :  { %516 = vmatprep.subr.bf16.mxu0 %v1079_v20 }
  0x73   :  { %517 = vmatpush1.bf16.msra.mxu0 %v1077_v21 }
  0x74   :  { %518 = vmatprep.subr.bf16.mxu0 %v1082_v22 }
  0x77   :  { %519 = vmatpush1.bf16.msra.mxu0 %v1080_v23 }
  0x78   :  { %520 = vmatprep.subr.bf16.mxu0 %v1085_v24 }
  0x7b   :  { %521 = vmatpush1.bf16.msra.mxu0 %v1083_v25 }
  0x7c   :  { %522 = vmatprep.subr.bf16.mxu0 %v1088_v26 }
  0x7f   :  { %523 = vmatpush1.bf16.msra.mxu0 %v1086_v27 }
  0x82   :  { %525 = vmatmul.mubr.bf16.vlgmr.msra.gmra.mrb[0].mxu0 %v53_v28 }
 0x155   :  { %v526_v39 = vpop.f32.mrb[0].mxu0 }
 0x156   :  { %v982_v40 = vadd.f32 %v526_v39, %v124_v37  ;;  %v528_v41 = vpop.f32.mrb[1].mxu0 }
 0x157   :  { %v983_v42 = vadd.f32 %v528_v41, %v128_v38  ;;  %v530_v43 = vpop.f32.mrb[2].mxu0 }
 0x158   :  { %v533_v44 = vmax.f32 %v982_v40, 0.0  ;;  %v531_v45 = vpop.f32.mrb[3].mxu0 }
 0x159   :  { %v534_v46 = vmax.f32 %v983_v42, 0.0 }
 0x15a   :  { %v535_v49 = vpack.c.bf16 %v533_v44, %v533_v44 }
 0x15b   :  { %v536_v47 = vpack.c.bf16 %v534_v46, %v534_v46 }
 0x15d   :  { %704 = vmatprep.mubr.bf16.mxu1 %v536_v47 }
 0x15e   :  { %705 = vmatmul.mubr.bf16.vlgmr.msra.gmra.mrb[0].mxu1 %v535_v49 }
 0x15f   :  { %963 = vmatpush3.bf16.msra.mxu1 %v1105_v48  ;;  %978 = vmatprep.mubr.msk.bf16.mxu1 %vm1139_vm0, %v1138_v33 }
 0x160   :  { %964 = vmatprep.subr.bf16.mxu1 %v1138_v33 }
 0x163   :  { %965 = vmatpush3.bf16.msra.mxu1 %v1106_v13 }
 0x164   :  { %966 = vmatprep.subr.bf16.mxu1 %v1138_v33 }
 0x167   :  { %967 = vmatpush3.bf16.msra.mxu1 %v1107_v50 }
 0x168   :  { %968 = vmatprep.subr.bf16.mxu1 %v1138_v33 }
 0x16b   :  { %969 = vmatpush3.bf16.msra.mxu1 %v1108_v51 }
 0x16c   :  { %970 = vmatprep.subr.bf16.mxu1 %v1138_v33 }
 0x16f   :  { %971 = vmatpush3.bf16.msra.mxu1 %v1109_v52 }
 0x170   :  { %972 = vmatprep.subr.bf16.mxu1 %v1138_v33 }
 0x173   :  { %973 = vmatpush3.bf16.msra.mxu1 %v1110_v53 }
 0x174   :  { %974 = vmatprep.subr.bf16.mxu1 %v1138_v33 }
 0x177   :  { %975 = vmatpush3.bf16.msra.mxu1 %v1111_v54 }
 0x178   :  { %976 = vmatprep.subr.bf16.mxu1 %v1138_v33 }
 0x17b   :  { %977 = vmatpush3.bf16.msra.mxu1 %v1112_v55 }
 0x231   :  { %v947_v56 = vpop.f32.mrb[0].mxu1 }
 0x232   :  { %v948_v58 = vpop.f32.mrb[1].mxu1 }
 0x233   :  { %v949_v59 = vadd.f32 %v948_v58, %v947_v56  ;;  %v950_v60 = vpop.f32.mrb[2].mxu1 }
 0x234   :  { %v951_v61 = vpop.f32.mrb[3].mxu1 }
 0x235   :  { %v707_v62 = vadd.f32 %v949_v59, %v905_v57 }
 0x237   :  { %v712_v63 = vmax.f32 %v707_v62, 0.0 }
 0x239   :  { %v713_v0 = vpack.c.bf16 %v712_v63, %v712_v63 }
 0x23b   :  { %979 = vmatmul.mubr.bf16.vlgmr.msra.gmra.mrb[4].mxu1 %v713_v0 }
 0x30e   :  { %v819_v2 = vpop.f32.mrb[4].mxu1 }
 0x30f   :  { %v820_v3 = vadd.f32 %v922_v1, %v819_v2  ;;  %v980_v4 = vpop.f32.mrb[5].mxu1 }
 0x310   :  { %v822_v5 = vpop.f32.mrb[6].mxu1 }
 0x311   :  { %v981_v6 = vpop.f32.mrb[7].mxu1  ;;  %826 = vst.msk [vmem:[#allocation2] sm:$0x3] %vm825_vm1, %v820_v3 }
 0x312   :  { %1124 = shalt.err (!%p1121_p4)
}
 0x313   :  { %s1125_s6 = scalar_lea.hbm %s1493_s7, 32 }
 0x314   :  { %p1126_p5 = scmp.ne.s32.totalorder %s1493_s7, %s1125_s6  ;;  %p1129_p6 = scmp.lt.u32.totalorder %s1125_s6, %s1493_s7 }
 0x316   :  { %p1131_p7 = pnand %p1129_p6, %p1126_p5 }
 0x318   :  { %1134 = shalt.err (!%p1131_p7)
}
 0x319   :  { %836 = dma.vmem_to_hbm [thread:$0]  %s834_s14, 32, %s1493_s7, [#allocation3]  }
 0x31a   :  { %1135 = dma.done.wait [#allocation3], 32  }
 0x31b   :  { %1136 = vsyncadd [#allocation3], 4294967264 }
 0x31c   :  { %840 = vsyncpa [#allocation3], 1 }

// kernel: pointnet2_forward.2
= control target key start
LH: loop header
LB: loop body
LE: loop exit
PB: predicated region body
PF: predicated region fallthrough
CT: control target
= control target key end

     0   :  { %s13633_s6 = smov 1   ;;  %s13634_s10 = smov 2   ;;  %s16997_s0 = inlined_call_operand.smem [shape: u32[30], index: -1, kind: input, shape index: {}] }
   0x1   :  { %s13675_s5 = sld [smem:[%s16997_s0]]   ;;  %s13635_s14 = smov 3  }
   0x2   :  { %s13680_s9 = sld [smem:[%s16997_s0 + %s13633_s6]]   ;;  %s13636_s18 = smov 4  }
   0x3   :  { %s13685_s13 = sld [smem:[%s16997_s0 + %s13634_s10]]   ;;  %s13637_s22 = smov 5  }
   0x4   :  { %s13690_s17 = sld [smem:[%s16997_s0 + %s13635_s14]]   ;;  %s13638_s26 = smov 6  }
   0x5   :  { %s13695_s21 = sld [smem:[%s16997_s0 + %s13636_s18]]   ;;  %s13639_s30 = smov 7  }
   0x6   :  { %s13700_s25 = sld [smem:[%s16997_s0 + %s13637_s22]]   ;;  %s13640_s4 = smov 8  }
   0x7   :  { %s13705_s29 = sld [smem:[%s16997_s0 + %s13638_s26]]   ;;  %s13641_s10 = smov 9  }
   0x8   :  { %s13710_s3 = sld [smem:[%s16997_s0 + %s13639_s30]]   ;;  %s13642_s15 = smov 10  }
   0x9   :  { %s13715_s8 = sld [smem:[%s16997_s0 + %s13640_s4]]   ;;  %s13643_s20 = smov 11  }
   0xa   :  { %s13720_s14 = sld [smem:[%s16997_s0 + %s13641_s10]]   ;;  %s13644_s26 = smov 12  }
   0xb   :  { %s13725_s19 = sld [smem:[%s16997_s0 + %s13642_s15]]   ;;  %s13645_s1 = smov 13  }
   0xc   :  { %s13730_s24 = sld [smem:[%s16997_s0 + %s13643_s20]]   ;;  %s13646_s7 = smov 14  }
   0xd   :  { %s13735_s30 = sld [smem:[%s16997_s0 + %s13644_s26]]   ;;  %s13647_s15 = smov 15  }
   0xe   :  { %s13740_s6 = sld [smem:[%s16997_s0 + %s13645_s1]]   ;;  %s13648_s22 = smov 16  }
   0xf   :  { %s13745_s12 = sld [smem:[%s16997_s0 + %s13646_s7]]   ;;  %s13649_s28 = smov 17  }
  0x10   :  { %s13750_s20 = sld [smem:[%s16997_s0 + %s13647_s15]]   ;;  %s13650_s7 = smov 18  }
  0x11   :  { %s13755_s27 = sld [smem:[%s16997_s0 + %s13648_s22]]   ;;  %s13651_s15 = smov 19  }
  0x12   :  { %s13760_s4 = sld [smem:[%s16997_s0 + %s13649_s28]]   ;;  %s13652_s22 = smov 20  }
  0x13   :  { %17009 = sst [smem:[#allocation2_spill]] %s13735_s30  ;;  %s13653_s28 = smov 21  }
  0x14   :  { %s13770_s30 = sld [smem:[%s16997_s0 + %s13651_s15]]   ;;  %s13655_s15 = smov 23  }
  0x15   :  { %17010 = sst [smem:[#allocation3_spill]] %s13745_s12  ;;  %s13824_s10 = smov 0  }
  0x16   :  { %17011 = sst [smem:[#allocation4_spill]] %s13750_s20  ;;  %s13826_s11 = smov 0  }
  0x17   :  { %17012 = sst [smem:[#allocation5_spill]] %s13755_s27 }
  0x18   :  { %17013 = sst [smem:[#allocation6_spill]] %s13760_s4 }
  0x19   :  { %s13765_s12 = sld [smem:[%s16997_s0 + %s13650_s7]]   ;;  %s13654_s7 = smov 22  }
  0x1a   :  { %17015 = sst [smem:[#allocation8_spill]] %s13770_s30 }
  0x1b   :  { %s13775_s27 = sld [smem:[%s16997_s0 + %s13652_s22]]   ;;  %s13656_s22 = smov 24  }
  0x1c   :  { %s13780_s4 = sld [smem:[%s16997_s0 + %s13653_s28]]   ;;  %s13657_s28 = smov 25  }
  0x1d   :  { %s13790_s30 = sld [smem:[%s16997_s0 + %s13655_s15]]   ;;  %s13659_s15 = smov 27  }
  0x1f   :  { %17014 = sst [smem:[#allocation7_spill]] %s13765_s12 }
  0x20   :  { %s13785_s12 = sld [smem:[%s16997_s0 + %s13654_s7]]   ;;  %s13658_s7 = smov 26  }
  0x21   :  { %17016 = sst [smem:[#allocation9_spill]] %s13775_s27 }
  0x22   :  { %17017 = sst [smem:[#allocation10_spill]] %s13780_s4 }
  0x23   :  { %17018 = sst [smem:[#allocation11_spill]] %s13790_s30 }
  0x24   :  { %s13795_s27 = sld [smem:[%s16997_s0 + %s13656_s22]]   ;;  %s13660_s22 = smov 28  }
  0x25   :  { %s13800_s4 = sld [smem:[%s16997_s0 + %s13657_s28]]   ;;  %s13661_s28 = smov 29  }
  0x26   :  { %s13805_s20 = sld [smem:[%s16997_s0 + %s13658_s7]]   ;;  %s13822_s7 = smov 0  }
  0x27   :  { %s13810_s30 = sld [smem:[%s16997_s0 + %s13659_s15]]  }
  0x2a   :  { %17019 = sst [smem:[#allocation12_spill]] %s13795_s27 }
  0x2b   :  { %17020 = sst [smem:[#allocation13_spill]] %s13800_s4 }
  0x2c   :  { %s13815_s27 = sld [smem:[%s16997_s0 + %s13660_s22]]  }
  0x2d   :  { %s13820_s4 = sld [smem:[%s16997_s0 + %s13661_s28]]  }
  0x2e LB: > { %s81_s0 = sadd.s32 1, %s13627_s10  ;;  %p11114_p0 = scmp.ge.s32.totalorder %s13631_s11, 1  ;;  %s13631_s11 = sphi %s13826_s11, %s69_s11   ;;  %s13627_s10 = sphi %s13824_s10, %s17060_s10   ;;  %s13623_s7 = sphi %s13822_s7, %s17059_s7  }
  0x2f   : > { %p83_p1 = scmp.ge.s32.totalorder %s81_s0, 2  ;;  %p853_p2 = scmp.lt.s32.totalorder %s13631_s11, 3 }
  0x31   : > { %s17062_s0 = smov (%p83_p1, %s81_s0), 0  ;;  %p854_p3 = pnand %p11114_p0, %p853_p2 }
  0x33   : > { %857 = sbr.rel (%p854_p3) target bundleno = 3337 (0xd09), region = 136 }
  0x3a   : > { %v13221_v0 = vld [vmem:[%s13685_s13] sm:$0x3f]   ;;  %vm2261_vm0 = vcmask 1045504   ;;  %p942_p4 = scmp.lt.s32.totalorder %s13623_s7, 1  ;;  %vm1876_vm1 = vcmask 97280   ;;  %v13292_v41 = vld [vmem:[%s13695_s21 + $0x8] sm:$0xff]  }
  0x3b   : > { %v13223_v1 = vld [vmem:[%s13705_s29] sm:$0xff]   ;;  %13146 = vmatprep.subr.msk.bf16.mxu0 %vm2261_vm0, %v13221_v0  ;;  %v2263_v2 = vsel %vm2261_vm0, %v13221_v0, 0  ;;  %13147 = vmatprep.subr.msk.bf16.mxu1 %vm2261_vm0, %v13221_v0  ;;  %v13296_v47 = vld [vmem:[%s13705_s29 + $0x8] sm:$0xff]   ;;  %vm3729_vm2 = vcmask 261120   ;;  %vm7275_vm3 = vcmask 523264   ;;  %vm8488_vm4 = vcmask 1041409  }
  0x3c   : > { %12271 = vmatpush3.bf16.msra.mxu0 %v2263_v2  ;;  %s17064_s7 = smov (!%p942_p4, %s13623_s7), 1  ;;  %13145 = vmatpush3.bf16.msra.mxu1 %v2263_v2  ;;  %v13279_v28 = vld [vmem:[%s13695_s21] sm:$0xff]   ;;  %vm8490_vm5 = vcmask 1042434   ;;  %vm8492_vm6 = vcmask 1043459   ;;  %vm8494_vm7 = vcmask 1044484   ;;  %vm8496_vm8 = vcmask 1045509  }
  0x3d   : > { %12788 = vmatprep.subr.bf16.mxu0 %v13223_v1  ;;  %s11831_s15 = sshll.u32 %s17064_s7, 10  ;;  %12528 = vmatprep.subr.bf16.mxu1 %v13279_v28  ;;  %vm8498_vm9 = vcmask 1046534   ;;  %vm8500_vm10 = vcmask 1047559   ;;  %s11832_s18 = sshll.u32 %s17064_s7, 6 }
  0x3e   : > { %s13846_s16 = scalar_lea.vmem %s13675_s5, %s11831_s15  ;;  %s15966_s22 = scalar_lea.vmem %s13680_s9, %s11832_s18 }
  0x3f   : > { %v13222_v3 = vld [vmem:[%s13846_s16] sm:$0xff]   ;;  %v13224_v4 = vld [vmem:[%s13846_s16 + $0x8] sm:$0xff]   ;;  %v13225_v5 = vld [vmem:[%s13846_s16 + $0x10] sm:$0xff]   ;;  %s17023_s23 = sld [smem:[#allocation4_spill]]  ;;  %s17024_s26 = sld [smem:[#allocation5_spill]] }
  0x40   : > { %12272 = vmatprep.mubr.msk.bf16.mxu0 %vm1876_vm1, %v13222_v3  ;;  %v13226_v6 = vld [vmem:[%s13846_s16 + $0x18] sm:$0xff]   ;;  %v13227_v7 = vld [vmem:[%s13846_s16 + $0x20] sm:$0xff]   ;;  %v13228_v8 = vld [vmem:[%s13846_s16 + $0x28] sm:$0xff]   ;;  %s17032_s28 = sld [smem:[#allocation12_spill]]  ;;  %s17033_s1 = sld [smem:[#allocation6_spill]] }
  0x41   : > { %12273 = vmatmul.mubr.msk.bf16.vlgmr.msra.gmra.mrb[0].mxu0 %vm1876_vm1, %v13224_v4  ;;  %v13229_v9 = vld [vmem:[%s13846_s16 + $0x30] sm:$0xff]   ;;  %v13230_v10 = vld [vmem:[%s13846_s16 + $0x38] sm:$0xff]   ;;  %v13231_v11 = vld [vmem:[%s13846_s16 + $0x40] sm:$0xff]   ;;  %s17036_s2 = sld [smem:[#allocation2_spill]]  ;;  %s17037_s15 = sld [smem:[#allocation7_spill]] }
  0x42   : > { %12789 = vmatpush3.bf16.msra.mxu0 %v13223_v1  ;;  %12276 = vmatprep.mubr.msk.bf16.mxu0 %vm1876_vm1, %v13225_v5  ;;  %v13232_v12 = vld [vmem:[%s13846_s16 + $0x48] sm:$0xff]   ;;  %v13233_v13 = vld [vmem:[%s13846_s16 + $0x50] sm:$0xff]   ;;  %v13234_v14 = vld [vmem:[%s13846_s16 + $0x58] sm:$0xff]   ;;  %s17039_s18 = sld [smem:[#allocation9_spill]] }
  0x43   : > { %v13235_v15 = vld [vmem:[%s13846_s16 + $0x60] sm:$0xff]   ;;  %v13268_v17 = vld [vmem:[%s13846_s16 + $0x3a8] sm:$0xff]   ;;  %v13237_v19 = vld [vmem:[%s13846_s16 + $0x70] sm:$0xff]   ;;  %12790 = vmatprep.subr.bf16.mxu0 %v13296_v47 }
  0x44   : > { %v13267_v16 = vld [vmem:[%s13846_s16 + $0x3a0] sm:$0xff]   ;;  %v13236_v18 = vld [vmem:[%s13846_s16 + $0x68] sm:$0xff]   ;;  %v13271_v20 = vld [vmem:[%s13846_s16 + $0x3b0] sm:$0xff]  }
  0x45   : > { %12504 = vmatprep.mubr.msk.bf16.mxu1 %vm1876_vm1, %v13267_v16  ;;  %v13272_v21 = vld [vmem:[%s13846_s16 + $0x3b8] sm:$0xff]   ;;  %v13239_v23 = vld [vmem:[%s13846_s16 + $0x80] sm:$0xff]   ;;  %v13276_v25 = vld [vmem:[%s13846_s16 + $0x3c8] sm:$0xff]  }
  0x46   : > { %12505 = vmatmul.mubr.msk.bf16.vlgmr.msra.gmra.mrb[0].mxu1 %vm1876_vm1, %v13268_v17  ;;  %v13238_v22 = vld [vmem:[%s13846_s16 + $0x78] sm:$0xff]   ;;  %v13275_v24 = vld [vmem:[%s13846_s16 + $0x3c0] sm:$0xff]   ;;  %v13240_v26 = vld [vmem:[%s13846_s16 + $0x88] sm:$0xff]   ;;  %12791 = vmatpush3.bf16.msra.mxu0 %v13296_v47 }
  0x47   : > { %12508 = vmatprep.mubr.msk.bf16.mxu1 %vm1876_vm1, %v13271_v20  ;;  %v13241_v27 = vld [vmem:[%s13846_s16 + $0x90] sm:$0xff]   ;;  %v13281_v30 = vld [vmem:[%s13846_s16 + $0x3d8] sm:$0xff]   ;;  %v13243_v32 = vld [vmem:[%s13846_s16 + $0xa0] sm:$0xff]   ;;  %12529 = vmatpush3.bf16.msra.mxu1 %v13279_v28 }
  0x48   : > { %v13280_v29 = vld [vmem:[%s13846_s16 + $0x3d0] sm:$0xff]   ;;  %v13242_v31 = vld [vmem:[%s13846_s16 + $0x98] sm:$0xff]   ;;  %v13284_v33 = vld [vmem:[%s13846_s16 + $0x3e0] sm:$0xff]   ;;  %12530 = vmatprep.subr.bf16.mxu1 %v13292_v41 }
  0x49   : > { %12277 = vmatmul.mubr.msk.bf16.gmra.mrb[4].mxu0 %vm1876_vm1, %v13226_v6  ;;  %v13285_v34 = vld [vmem:[%s13846_s16 + $0x3e8] sm:$0xff]   ;;  %v13245_v36 = vld [vmem:[%s13846_s16 + $0xb0] sm:$0xff]   ;;  %v13246_v37 = vld [vmem:[%s13846_s16 + $0xb8] sm:$0xff]  }
  0x4a   : > { %12280 = vmatprep.mubr.msk.bf16.mxu0 %vm1876_vm1, %v13227_v7  ;;  %v13244_v35 = vld [vmem:[%s13846_s16 + $0xa8] sm:$0xff]   ;;  %v13288_v38 = vld [vmem:[%s13846_s16 + $0x3f0] sm:$0xff]   ;;  %v13289_v39 = vld [vmem:[%s13846_s16 + $0x3f8] sm:$0xff]  }
  0x4b   : > { %v13247_v40 = vld [vmem:[%s13846_s16 + $0xc0] sm:$0xff]   ;;  %v13248_v42 = vld [vmem:[%s13846_s16 + $0xc8] sm:$0xff]   ;;  %12531 = vmatpush3.bf16.msra.mxu1 %v13292_v41  ;;  %v13249_v43 = vld [vmem:[%s13846_s16 + $0xd0] sm:$0xff]  }
  0x4c   : > { %v13250_v44 = vld [vmem:[%s13846_s16 + $0xd8] sm:$0xff]   ;;  %v13251_v45 = vld [vmem:[%s13846_s16 + $0xe0] sm:$0xff]   ;;  %v13252_v46 = vld [vmem:[%s13846_s16 + $0xe8] sm:$0xff]  }
  0x4d   : > { %v13253_v48 = vld [vmem:[%s13846_s16 + $0xf0] sm:$0xff]   ;;  %v13254_v49 = vld [vmem:[%s13846_s16 + $0xf8] sm:$0xff]   ;;  %v13255_v50 = vld [vmem:[%s13846_s16 + $0x100] sm:$0xff]  }
  0x4e   : > { %12509 = vmatmul.mubr.msk.bf16.gmra.mrb[4].mxu1 %vm1876_vm1, %v13272_v21  ;;  %v13256_v51 = vld [vmem:[%s13846_s16 + $0x108] sm:$0xff]   ;;  %v13257_v52 = vld [vmem:[%s13846_s16 + $0x110] sm:$0xff]   ;;  %v13258_v53 = vld [vmem:[%s13846_s16 + $0x118] sm:$0xff]  }
  0x4f   : > { %12512 = vmatprep.mubr.msk.bf16.mxu1 %vm1876_vm1, %v13275_v24  ;;  %v13259_v54 = vld [vmem:[%s13846_s16 + $0x120] sm:$0xff]   ;;  %v13260_v55 = vld [vmem:[%s13846_s16 + $0x128] sm:$0xff]   ;;  %v13261_v56 = vld [vmem:[%s13846_s16 + $0x130] sm:$0xff]  }
  0x50   : > { %v13262_v57 = vld [vmem:[%s13846_s16 + $0x138] sm:$0xff]   ;;  %v13263_v58 = vld [vmem:[%s13846_s16 + $0x140] sm:$0xff]   ;;  %v13264_v59 = vld [vmem:[%s13846_s16 + $0x148] sm:$0xff]  }
  0x51   : > { %12281 = vmatmul.mubr.msk.bf16.gmra.mrb[8].mxu0 %vm1876_vm1, %v13228_v8  ;;  %v13265_v60 = vld [vmem:[%s13846_s16 + $0x150] sm:$0xff]   ;;  %v13266_v61 = vld [vmem:[%s13846_s16 + $0x158] sm:$0xff]   ;;  %v13269_v62 = vld [vmem:[%s13846_s16 + $0x160] sm:$0xff]  }
  0x52   : > { %12284 = vmatprep.mubr.msk.bf16.mxu0 %vm1876_vm1, %v13229_v9  ;;  %v13270_v63 = vld [vmem:[%s13846_s16 + $0x168] sm:$0xff]   ;;  %v13273_v0 = vld [vmem:[%s13846_s16 + $0x170] sm:$0xff]   ;;  %v13274_v1 = vld [vmem:[%s13846_s16 + $0x178] sm:$0xff]  }
  0x53   : > { %v13277_v2 = vld [vmem:[%s13846_s16 + $0x180] sm:$0xff]   ;;  %v13278_v3 = vld [vmem:[%s13846_s16 + $0x188] sm:$0xff]   ;;  %v13282_v4 = vld [vmem:[%s13846_s16 + $0x190] sm:$0xff]  }
  0x54   : > { %v13283_v5 = vld [vmem:[%s13846_s16 + $0x198] sm:$0xff]   ;;  %v13286_v6 = vld [vmem:[%s13846_s16 + $0x1a0] sm:$0xff]   ;;  %v13287_v7 = vld [vmem:[%s13846_s16 + $0x1a8] sm:$0xff]  }
  0x55   : > { %v13290_v8 = vld [vmem:[%s13846_s16 + $0x1b0] sm:$0xff]   ;;  %v13985_v9 = vld [vmem:[%s13690_s17] ss:$0 sm:$0xff] }
  0x56   : > { %12513 = vmatmul.mubr.msk.bf16.gmra.mrb[8].mxu1 %vm1876_vm1, %v13276_v25  ;;  %v13293_v16 = vld [vmem:[%s13846_s16 + $0x1c0] sm:$0xff]  }
  0x57   : > { %12516 = vmatprep.mubr.msk.bf16.mxu1 %vm1876_vm1, %v13280_v29  ;;  %v13294_v29 = vld [vmem:[%s13846_s16 + $0x1c8] sm:$0xff]  }
  0x59   : > { %12285 = vmatmul.mubr.msk.bf16.gmra.mrb[12].mxu0 %vm1876_vm1, %v13230_v10 }
  0x5a   : > { %12288 = vmatprep.mubr.msk.bf16.mxu0 %vm1876_vm1, %v13231_v11 }
  0x5e   : > { %12517 = vmatmul.mubr.msk.bf16.gmra.mrb[12].mxu1 %vm1876_vm1, %v13281_v30 }
  0x5f   : > { %12520 = vmatprep.mubr.msk.bf16.mxu1 %vm1876_vm1, %v13284_v33 }
  0x61   : > { %12289 = vmatmul.mubr.msk.bf16.gmra.mrb[16].mxu0 %vm1876_vm1, %v13232_v12 }
  0x62   : > { %12292 = vmatprep.mubr.msk.bf16.mxu0 %vm1876_vm1, %v13233_v13  ;;  %v13291_v13 = vld [vmem:[%s13846_s16 + $0x1b8] sm:$0xff]  }
  0x66   : > { %12521 = vmatmul.mubr.msk.bf16.gmra.mrb[16].mxu1 %vm1876_vm1, %v13285_v34 }
  0x67   : > { %12524 = vmatprep.mubr.msk.bf16.mxu1 %vm1876_vm1, %v13288_v38 }
  0x69   : > { %12293 = vmatmul.mubr.msk.bf16.gmra.mrb[20].mxu0 %vm1876_vm1, %v13234_v14 }
  0x6a   : > { %12296 = vmatprep.mubr.msk.bf16.mxu0 %vm1876_vm1, %v13235_v15 }
  0x6e   : > { %12525 = vmatmul.mubr.msk.bf16.gmra.mrb[20].mxu1 %vm1876_vm1, %v13289_v39 }
  0x71   : > { %12297 = vmatmul.mubr.msk.bf16.gmra.mrb[24].mxu0 %vm1876_vm1, %v13236_v18 }
  0x72   : > { %12300 = vmatprep.mubr.msk.bf16.mxu0 %vm1876_vm1, %v13237_v19 }
  0x79   : > { %12301 = vmatmul.mubr.msk.bf16.gmra.mrb[28].mxu0 %vm1876_vm1, %v13238_v22 }
  0x7a   : > { %12304 = vmatprep.mubr.msk.bf16.mxu0 %vm1876_vm1, %v13239_v23 }
  0x81   : > { %12305 = vmatmul.mubr.msk.bf16.gmra.mrb[32].mxu0 %vm1876_vm1, %v13240_v26 }
  0x82   : > { %12308 = vmatprep.mubr.msk.bf16.mxu0 %vm1876_vm1, %v13241_v27 }
  0x89   : > { %12309 = vmatmul.mubr.msk.bf16.gmra.mrb[36].mxu0 %vm1876_vm1, %v13242_v31 }
  0x8a   : > { %12312 = vmatprep.mubr.msk.bf16.mxu0 %vm1876_vm1, %v13243_v32  ;;  %v13295_v32 = vld [vmem:[%s13846_s16 + $0x1d0] sm:$0xff]  }
  0x91   : > { %12313 = vmatmul.mubr.msk.bf16.gmra.mrb[40].mxu0 %vm1876_vm1, %v13244_v35 }
  0x92   : > { %12316 = vmatprep.mubr.msk.bf16.mxu0 %vm1876_vm1, %v13245_v36 }
  0x99   : > { %12317 = vmatmul.mubr.msk.bf16.gmra.mrb[44].mxu0 %vm1876_vm1, %v13246_v37 }
  0x9a   : > { %12320 = vmatprep.mubr.msk.bf16.mxu0 %vm1876_vm1, %v13247_v40 }
  0xa1   : > { %12321 = vmatmul.mubr.msk.bf16.gmra.mrb[48].mxu0 %vm1876_vm1, %v13248_v42 }
  0xa2   : > { %12324 = vmatprep.mubr.msk.bf16.mxu0 %vm1876_vm1, %v13249_v43 }
  0xa9   : > { %12325 = vmatmul.mubr.msk.bf16.gmra.mrb[52].mxu0 %vm1876_vm1, %v13250_v44 }
  0xaa   : > { %12328 = vmatprep.mubr.msk.bf16.mxu0 %vm1876_vm1, %v13251_v45  ;;  %v13297_v45 = vld [vmem:[%s13846_s16 + $0x1d8] sm:$0xff]  }
  0xb1   : > { %12329 = vmatmul.mubr.msk.bf16.gmra.mrb[56].mxu0 %vm1876_vm1, %v13252_v46 }
  0xb2   : > { %12332 = vmatprep.mubr.msk.bf16.mxu0 %vm1876_vm1, %v13253_v48  ;;  %v13298_v48 = vld [vmem:[%s13846_s16 + $0x1e0] sm:$0xff]  }
  0xb9   : > { %12333 = vmatmul.mubr.msk.bf16.gmra.mrb[60].mxu0 %vm1876_vm1, %v13254_v49 }
  0xba   : > { %12336 = vmatprep.mubr.msk.bf16.mxu0 %vm1876_vm1, %v13255_v50 }
  0xc1   : > { %12337 = vmatmul.mubr.msk.bf16.gmra.mrb[64].mxu0 %vm1876_vm1, %v13256_v51 }
  0xc2   : > { %12340 = vmatprep.mubr.msk.bf16.mxu0 %vm1876_vm1, %v13257_v52 }
  0xc9   : > { %12341 = vmatmul.mubr.msk.bf16.gmra.mrb[68].mxu0 %vm1876_vm1, %v13258_v53 }
  0xca   : > { %12344 = vmatprep.mubr.msk.bf16.mxu0 %vm1876_vm1, %v13259_v54 }
  0xd1   : > { %12345 = vmatmul.mubr.msk.bf16.gmra.mrb[72].mxu0 %vm1876_vm1, %v13260_v55 }
  0xd2   : > { %12348 = vmatprep.mubr.msk.bf16.mxu0 %vm1876_vm1, %v13261_v56 }
  0xd9   : > { %12349 = vmatmul.mubr.msk.bf16.gmra.mrb[76].mxu0 %vm1876_vm1, %v13262_v57 }
  0xda   : > { %12352 = vmatprep.mubr.msk.bf16.mxu0 %vm1876_vm1, %v13263_v58 }
  0xe1   : > { %12353 = vmatmul.mubr.msk.bf16.gmra.mrb[80].mxu0 %vm1876_vm1, %v13264_v59 }
  0xe2   : > { %12356 = vmatprep.mubr.msk.bf16.mxu0 %vm1876_vm1, %v13265_v60 }
  0xe9   : > { %12357 = vmatmul.mubr.msk.bf16.gmra.mrb[84].mxu0 %vm1876_vm1, %v13266_v61  ;;  %v13299_v61 = vld [vmem:[%s13846_s16 + $0x1e8] sm:$0xff]  }
  0xea   : > { %12360 = vmatprep.mubr.msk.bf16.mxu0 %vm1876_vm1, %v13269_v62 }
  0xf1   : > { %12361 = vmatmul.mubr.msk.bf16.gmra.mrb[88].mxu0 %vm1876_vm1, %v13270_v63 }
  0xf2   : > { %12364 = vmatprep.mubr.msk.bf16.mxu0 %vm1876_vm1, %v13273_v0  ;;  %v13300_v0 = vld [vmem:[%s13846_s16 + $0x1f0] sm:$0xff]  }
  0xf9   : > { %12365 = vmatmul.mubr.msk.bf16.gmra.mrb[92].mxu0 %vm1876_vm1, %v13274_v1 }
  0xfa   : > { %12368 = vmatprep.mubr.msk.bf16.mxu0 %vm1876_vm1, %v13277_v2 }
 0x101   : > { %12369 = vmatmul.mubr.msk.bf16.gmra.mrb[96].mxu0 %vm1876_vm1, %v13278_v3 }
 0x102   : > { %12372 = vmatprep.mubr.msk.bf16.mxu0 %vm1876_vm1, %v13282_v4 }
 0x109   : > { %12373 = vmatmul.mubr.msk.bf16.gmra.mrb[100].mxu0 %vm1876_vm1, %v13283_v5 }
 0x10a   : > { %12376 = vmatprep.mubr.msk.bf16.mxu0 %vm1876_vm1, %v13286_v6 }
 0x111   : > { %12377 = vmatmul.mubr.msk.bf16.gmra.mrb[104].mxu0 %vm1876_vm1, %v13287_v7 }
 0x112   : > { %12380 = vmatprep.mubr.msk.bf16.mxu0 %vm1876_vm1, %v13290_v8 }
 0x114   : > { %v12274_v10 = vpop.f32.mrb[0].mxu0 }
 0x115   : > { %v2308_v11 = vadd.f32 %v12274_v10, %v13985_v9  ;;  %v2299_v12 = vpop.f32.mrb[1].mxu0 }
 0x116   : > { %v2300_v14 = vadd.f32 %v13985_v9, %v2299_v12  ;;  %v12275_v15 = vpop.f32.mrb[2].mxu0 }
 0x117   : > { %v2311_v17 = vadd.f32 %v12275_v15, %v13985_v9  ;;  %v2302_v18 = vpop.f32.mrb[3].mxu0  ;;  %v3324_v20 = vmax.f32 %v2308_v11, 0.0 }
 0x118   : > { %v2303_v19 = vadd.f32 %v13985_v9, %v2302_v18  ;;  %v3322_v22 = vmax.f32 %v2300_v14, 0.0  ;;  %v13301_v14 = vld [vmem:[%s13846_s16 + $0x1f8] sm:$0xff]  }
 0x119   : > { %v3325_v21 = vmax.f32 %v2311_v17, 0.0  ;;  %12381 = vmatmul.mubr.msk.bf16.gmra.mrb[108].mxu0 %vm1876_vm1, %v13291_v13  ;;  %v13302_v17 = vld [vmem:[%s13846_s16 + $0x200] sm:$0xff]  }
 0x11a   : > { %v3323_v23 = vmax.f32 %v2303_v19, 0.0  ;;  %12384 = vmatprep.mubr.msk.bf16.mxu0 %vm1876_vm1, %v13293_v16 }
 0x11b   : > { %v3579_v24 = vpack.c.bf16 %v3325_v21, %v3324_v20 }
 0x11c   : > { %v3578_v25 = vpack.c.bf16 %v3323_v23, %v3322_v22  ;;  %v12278_v26 = vpop.f32.mrb[4].mxu0 }
 0x11d   : > { %v2324_v27 = vadd.f32 %v12278_v26, %v13985_v9  ;;  %v2315_v28 = vpop.f32.mrb[5].mxu0 }
 0x11e   : > { %v2316_v30 = vadd.f32 %v13985_v9, %v2315_v28  ;;  %v12279_v31 = vpop.f32.mrb[6].mxu0  ;;  %12532 = vmatprep.mubr.msk.bf16.mxu1 %vm3729_vm2, %v3578_v25 }
 0x11f   : > { %v2327_v33 = vadd.f32 %v12279_v31, %v13985_v9  ;;  %v2318_v34 = vpop.f32.mrb[7].mxu0  ;;  %12533 = vmatmul.mubr.msk.bf16.vlgmr.msra.gmra.mrb[24].mxu1 %vm3729_vm2, %v3579_v24  ;;  %v3328_v36 = vmax.f32 %v2324_v27, 0.0 }
 0x120   : > { %v2319_v35 = vadd.f32 %v13985_v9, %v2318_v34  ;;  %v3326_v38 = vmax.f32 %v2316_v30, 0.0  ;;  %v13303_v30 = vld [vmem:[%s13846_s16 + $0x208] sm:$0xff]  }
 0x121   : > { %v3329_v37 = vmax.f32 %v2327_v33, 0.0  ;;  %12385 = vmatmul.mubr.msk.bf16.gmra.mrb[112].mxu0 %vm1876_vm1, %v13294_v29  ;;  %v13304_v33 = vld [vmem:[%s13846_s16 + $0x210] sm:$0xff]  }
 0x122   : > { %v3327_v39 = vmax.f32 %v2319_v35, 0.0  ;;  %12388 = vmatprep.mubr.msk.bf16.mxu0 %vm1876_vm1, %v13295_v32 }
 0x123   : > { %v3581_v40 = vpack.c.bf16 %v3329_v37, %v3328_v36 }
 0x124   : > { %v3580_v41 = vpack.c.bf16 %v3327_v39, %v3326_v38  ;;  %v12282_v42 = vpop.f32.mrb[8].mxu0 }
 0x125   : > { %v2340_v43 = vadd.f32 %v12282_v42, %v13985_v9  ;;  %v2331_v44 = vpop.f32.mrb[9].mxu0 }
 0x126   : > { %v2332_v46 = vadd.f32 %v13985_v9, %v2331_v44  ;;  %v12283_v47 = vpop.f32.mrb[10].mxu0  ;;  %12536 = vmatprep.mubr.msk.bf16.mxu1 %vm3729_vm2, %v3580_v41 }
 0x127   : > { %v2343_v49 = vadd.f32 %v12283_v47, %v13985_v9  ;;  %v2334_v50 = vpop.f32.mrb[11].mxu0  ;;  %12537 = vmatmul.mubr.msk.bf16.gmra.mrb[28].mxu1 %vm3729_vm2, %v3581_v40  ;;  %v3332_v52 = vmax.f32 %v2340_v43, 0.0 }
 0x128   : > { %v2335_v51 = vadd.f32 %v13985_v9, %v2334_v50  ;;  %v3330_v54 = vmax.f32 %v2332_v46, 0.0  ;;  %v13305_v46 = vld [vmem:[%s13846_s16 + $0x218] sm:$0xff]  }
 0x129   : > { %v3333_v53 = vmax.f32 %v2343_v49, 0.0  ;;  %12389 = vmatmul.mubr.msk.bf16.gmra.mrb[116].mxu0 %vm1876_vm1, %v13297_v45  ;;  %v13306_v49 = vld [vmem:[%s13846_s16 + $0x220] sm:$0xff]  }
 0x12a   : > { %v3331_v55 = vmax.f32 %v2335_v51, 0.0  ;;  %12392 = vmatprep.mubr.msk.bf16.mxu0 %vm1876_vm1, %v13298_v48 }
 0x12b   : > { %v3583_v56 = vpack.c.bf16 %v3333_v53, %v3332_v52 }
 0x12c   : > { %v3582_v57 = vpack.c.bf16 %v3331_v55, %v3330_v54  ;;  %v12286_v58 = vpop.f32.mrb[12].mxu0 }
 0x12d   : > { %v2356_v59 = vadd.f32 %v12286_v58, %v13985_v9  ;;  %v2347_v60 = vpop.f32.mrb[13].mxu0 }
 0x12e   : > { %v2348_v62 = vadd.f32 %v13985_v9, %v2347_v60  ;;  %v12287_v63 = vpop.f32.mrb[14].mxu0  ;;  %12540 = vmatprep.mubr.msk.bf16.mxu1 %vm3729_vm2, %v3582_v57 }
 0x12f   : > { %v2359_v1 = vadd.f32 %v12287_v63, %v13985_v9  ;;  %v2350_v2 = vpop.f32.mrb[15].mxu0  ;;  %12541 = vmatmul.mubr.msk.bf16.gmra.mrb[32].mxu1 %vm3729_vm2, %v3583_v56  ;;  %v3336_v4 = vmax.f32 %v2356_v59, 0.0 }
 0x130   : > { %v2351_v3 = vadd.f32 %v13985_v9, %v2350_v2  ;;  %v3334_v6 = vmax.f32 %v2348_v62, 0.0  ;;  %v13307_v62 = vld [vmem:[%s13846_s16 + $0x228] sm:$0xff]  }
 0x131   : > { %v3337_v5 = vmax.f32 %v2359_v1, 0.0  ;;  %12393 = vmatmul.mubr.msk.bf16.gmra.mrb[120].mxu0 %vm1876_vm1, %v13299_v61  ;;  %v13308_v1 = vld [vmem:[%s13846_s16 + $0x230] sm:$0xff]  }
 0x132   : > { %v3335_v7 = vmax.f32 %v2351_v3, 0.0  ;;  %12396 = vmatprep.mubr.msk.bf16.mxu0 %vm1876_vm1, %v13300_v0 }
 0x133   : > { %v3585_v8 = vpack.c.bf16 %v3337_v5, %v3336_v4 }
 0x134   : > { %v3584_v10 = vpack.c.bf16 %v3335_v7, %v3334_v6  ;;  %v12290_v11 = vpop.f32.mrb[16].mxu0 }
 0x135   : > { %v2372_v12 = vadd.f32 %v12290_v11, %v13985_v9  ;;  %v2363_v13 = vpop.f32.mrb[17].mxu0  ;;  %v12506_v11 = vpop.f32.mrb[0].mxu1 }
 0x136   : > { %v2364_v15 = vadd.f32 %v13985_v9, %v2363_v13  ;;  %v12291_v16 = vpop.f32.mrb[18].mxu0  ;;  %12544 = vmatprep.mubr.msk.bf16.mxu1 %vm3729_vm2, %v3584_v10 }
 0x137   : > { %v2375_v18 = vadd.f32 %v12291_v16, %v13985_v9  ;;  %v2366_v19 = vpop.f32.mrb[19].mxu0  ;;  %12545 = vmatmul.mubr.msk.bf16.gmra.mrb[36].mxu1 %vm3729_vm2, %v3585_v8  ;;  %v3340_v21 = vmax.f32 %v2372_v12, 0.0 }
 0x138   : > { %v2367_v20 = vadd.f32 %v13985_v9, %v2366_v19  ;;  %v3338_v23 = vmax.f32 %v2364_v15, 0.0  ;;  %v3227_v15 = vpop.f32.mrb[1].mxu1 }
 0x139   : > { %v3341_v22 = vmax.f32 %v2375_v18, 0.0  ;;  %12397 = vmatmul.mubr.msk.bf16.gmra.mrb[124].mxu0 %vm1876_vm1, %v13301_v14  ;;  %v3236_v14 = vadd.f32 %v12506_v11, %v13985_v9  ;;  %v13309_v18 = vld [vmem:[%s13846_s16 + $0x238] sm:$0xff]   ;;  %v12507_v19 = vpop.f32.mrb[2].mxu1 }
 0x13a   : > { %v3339_v24 = vmax.f32 %v2367_v20, 0.0  ;;  %12400 = vmatprep.mubr.msk.bf16.mxu0 %vm1876_vm1, %v13302_v17 }
 0x13b   : > { %v3587_v25 = vpack.c.bf16 %v3341_v22, %v3340_v21  ;;  %v13310_v22 = vld [vmem:[%s13846_s16 + $0x240] sm:$0xff]  }
 0x13c   : > { %v3586_v26 = vpack.c.bf16 %v3339_v24, %v3338_v23  ;;  %v12294_v27 = vpop.f32.mrb[20].mxu0  ;;  %v3230_v23 = vpop.f32.mrb[3].mxu1 }
 0x13d   : > { %v2388_v28 = vadd.f32 %v12294_v27, %v13985_v9  ;;  %v2379_v29 = vpop.f32.mrb[21].mxu0  ;;  %v3228_v27 = vadd.f32 %v13985_v9, %v3227_v15 }
 0x13e   : > { %v2380_v31 = vadd.f32 %v13985_v9, %v2379_v29  ;;  %v12295_v32 = vpop.f32.mrb[22].mxu0  ;;  %12548 = vmatprep.mubr.msk.bf16.mxu1 %vm3729_vm2, %v3586_v26  ;;  %v3556_v26 = vmax.f32 %v3236_v14, 0.0 }
 0x13f   : > { %v2391_v34 = vadd.f32 %v12295_v32, %v13985_v9  ;;  %v2382_v35 = vpop.f32.mrb[23].mxu0  ;;  %12549 = vmatmul.mubr.msk.bf16.gmra.mrb[40].mxu1 %vm3729_vm2, %v3587_v25  ;;  %v3344_v37 = vmax.f32 %v2388_v28, 0.0  ;;  %v3239_v28 = vadd.f32 %v12507_v19, %v13985_v9 }
 0x140   : > { %v2383_v36 = vadd.f32 %v13985_v9, %v2382_v35  ;;  %v3342_v39 = vmax.f32 %v2380_v31, 0.0 }
 0x141   : > { %v3345_v38 = vmax.f32 %v2391_v34, 0.0  ;;  %12401 = vmatmul.mubr.msk.bf16.gmra.mrb[128].mxu0 %vm1876_vm1, %v13303_v30  ;;  %v3231_v30 = vadd.f32 %v13985_v9, %v3230_v23  ;;  %v3557_v34 = vmax.f32 %v3239_v28, 0.0 }
 0x142   : > { %v3343_v40 = vmax.f32 %v2383_v36, 0.0  ;;  %12404 = vmatprep.mubr.msk.bf16.mxu0 %vm1876_vm1, %v13304_v33  ;;  %v3554_v33 = vmax.f32 %v3228_v27, 0.0 }
 0x143   : > { %v3589_v41 = vpack.c.bf16 %v3345_v38, %v3344_v37  ;;  %v3555_v37 = vmax.f32 %v3231_v30, 0.0 }
 0x144   : > { %v3588_v42 = vpack.c.bf16 %v3343_v40, %v3342_v39  ;;  %v12298_v43 = vpop.f32.mrb[24].mxu0  ;;  %v14080_v39 = vpack.c.bf16 %v3557_v34, %v3556_v26  ;;  %v12510_v40 = vpop.f32.mrb[4].mxu1 }
 0x145   : > { %v2404_v44 = vadd.f32 %v12298_v43, %v13985_v9  ;;  %v2395_v45 = vpop.f32.mrb[25].mxu0  ;;  %v14082_v43 = vpack.c.bf16 %v3555_v37, %v3554_v33 }
 0x146   : > { %v2396_v47 = vadd.f32 %v13985_v9, %v2395_v45  ;;  %v12299_v48 = vpop.f32.mrb[26].mxu0  ;;  %12552 = vmatprep.mubr.msk.bf16.mxu1 %vm3729_vm2, %v3588_v42  ;;  %v3243_v45 = vpop.f32.mrb[5].mxu1 }
 0x147   : > { %v2407_v50 = vadd.f32 %v12299_v48, %v13985_v9  ;;  %v2398_v51 = vpop.f32.mrb[27].mxu0  ;;  %12553 = vmatmul.mubr.msk.bf16.gmra.mrb[44].mxu1 %vm3729_vm2, %v3589_v41  ;;  %v3348_v53 = vmax.f32 %v2404_v44, 0.0  ;;  %v3252_v44 = vadd.f32 %v12510_v40, %v13985_v9  ;;  %v13311_v48 = vld [vmem:[%s13846_s16 + $0x248] sm:$0xff]  }
 0x148   : > { %v2399_v52 = vadd.f32 %v13985_v9, %v2398_v51  ;;  %v3346_v55 = vmax.f32 %v2396_v47, 0.0 }
 0x149   : > { %v3349_v54 = vmax.f32 %v2407_v50, 0.0  ;;  %12405 = vmatmul.mubr.msk.bf16.gmra.mrb[132].mxu0 %vm1876_vm1, %v13305_v46 }
 0x14a   : > { %v3347_v56 = vmax.f32 %v2399_v52, 0.0  ;;  %12408 = vmatprep.mubr.msk.bf16.mxu0 %vm1876_vm1, %v13306_v49  ;;  %v12511_v49 = vpop.f32.mrb[6].mxu1  ;;  %v13312_v52 = vld [vmem:[%s13846_s16 + $0x250] sm:$0xff]  }
 0x14b   : > { %v3591_v57 = vpack.c.bf16 %v3349_v54, %v3348_v53  ;;  %v3246_v53 = vpop.f32.mrb[7].mxu1 }
 0x14c   : > { %v3590_v58 = vpack.c.bf16 %v3347_v56, %v3346_v55  ;;  %v12302_v59 = vpop.f32.mrb[28].mxu0  ;;  %v3560_v56 = vmax.f32 %v3252_v44, 0.0 }
 0x14d   : > { %v2420_v60 = vadd.f32 %v12302_v59, %v13985_v9  ;;  %v2411_v61 = vpop.f32.mrb[29].mxu0 }
 0x14e   : > { %v2412_v63 = vadd.f32 %v13985_v9, %v2411_v61  ;;  %v12303_v0 = vpop.f32.mrb[30].mxu0  ;;  %12556 = vmatprep.mubr.msk.bf16.mxu1 %vm3729_vm2, %v3590_v58  ;;  %v3255_v58 = vadd.f32 %v12511_v49, %v13985_v9 }
 0x14f   : > { %v2423_v2 = vadd.f32 %v12303_v0, %v13985_v9  ;;  %v2414_v3 = vpop.f32.mrb[31].mxu0  ;;  %12557 = vmatmul.mubr.msk.bf16.gmra.mrb[48].mxu1 %vm3729_vm2, %v3591_v57  ;;  %v3352_v5 = vmax.f32 %v2420_v60, 0.0  ;;  %v3244_v57 = vadd.f32 %v13985_v9, %v3243_v45  ;;  %v3247_v60 = vadd.f32 %v13985_v9, %v3246_v53 }
 0x150   : > { %v2415_v4 = vadd.f32 %v13985_v9, %v2414_v3  ;;  %v3350_v7 = vmax.f32 %v2412_v63, 0.0  ;;  %v3561_v0 = vmax.f32 %v3255_v58, 0.0 }
 0x151   : > { %v3353_v6 = vmax.f32 %v2423_v2, 0.0  ;;  %12409 = vmatmul.mubr.msk.bf16.gmra.mrb[136].mxu0 %vm1876_vm1, %v13307_v62  ;;  %v3558_v63 = vmax.f32 %v3244_v57, 0.0  ;;  %v3559_v3 = vmax.f32 %v3247_v60, 0.0 }
 0x152   : > { %v3351_v8 = vmax.f32 %v2415_v4, 0.0  ;;  %12412 = vmatprep.mubr.msk.bf16.mxu0 %vm1876_vm1, %v13308_v1  ;;  %v12514_v4 = vpop.f32.mrb[8].mxu1 }
 0x153   : > { %v3593_v10 = vpack.c.bf16 %v3353_v6, %v3352_v5  ;;  %v14098_v6 = vpack.c.bf16 %v3561_v0, %v3560_v56  ;;  %v14100_v11 = vpack.c.bf16 %v3559_v3, %v3558_v63 }
 0x154   : > { %v3592_v12 = vpack.c.bf16 %v3351_v8, %v3350_v7  ;;  %v12306_v13 = vpop.f32.mrb[32].mxu0  ;;  %v3259_v7 = vpop.f32.mrb[9].mxu1 }
 0x155   : > { %v2436_v16 = vadd.f32 %v12306_v13, %v13985_v9  ;;  %v2427_v17 = vpop.f32.mrb[33].mxu0  ;;  %v3260_v13 = vadd.f32 %v13985_v9, %v3259_v7  ;;  %v12515_v14 = vpop.f32.mrb[10].mxu1 }
 0x156   : > { %v2428_v20 = vadd.f32 %v13985_v9, %v2427_v17  ;;  %v12307_v21 = vpop.f32.mrb[34].mxu0  ;;  %12560 = vmatprep.mubr.msk.bf16.mxu1 %vm3729_vm2, %v3592_v12  ;;  %v3268_v12 = vadd.f32 %v12514_v4, %v13985_v9  ;;  %v13313_v17 = vld [vmem:[%s13846_s16 + $0x258] sm:$0xff]   ;;  %v3271_v27 = vadd.f32 %v12515_v14, %v13985_v9 }
 0x157   : > { %v2439_v24 = vadd.f32 %v12307_v21, %v13985_v9  ;;  %v2430_v25 = vpop.f32.mrb[35].mxu0  ;;  %12561 = vmatmul.mubr.msk.bf16.gmra.mrb[52].mxu1 %vm3729_vm2, %v3593_v10  ;;  %v3356_v31 = vmax.f32 %v2436_v16, 0.0  ;;  %v13314_v21 = vld [vmem:[%s13846_s16 + $0x260] sm:$0xff]   ;;  %v3562_v26 = vmax.f32 %v3260_v13, 0.0 }
 0x158   : > { %v2431_v29 = vadd.f32 %v13985_v9, %v2430_v25  ;;  %v3354_v35 = vmax.f32 %v2428_v20, 0.0  ;;  %v3565_v34 = vmax.f32 %v3271_v27, 0.0 }
 0x159   : > { %v3357_v32 = vmax.f32 %v2439_v24, 0.0  ;;  %12413 = vmatmul.mubr.msk.bf16.gmra.mrb[140].mxu0 %vm1876_vm1, %v13309_v18  ;;  %v3262_v18 = vpop.f32.mrb[11].mxu1 }
 0x15a   : > { %v3355_v36 = vmax.f32 %v2431_v29, 0.0  ;;  %12416 = vmatprep.mubr.msk.bf16.mxu0 %vm1876_vm1, %v13310_v22  ;;  %v3564_v22 = vmax.f32 %v3268_v12, 0.0  ;;  %v12518_v23 = vpop.f32.mrb[12].mxu1  ;;  %v3263_v28 = vadd.f32 %v13985_v9, %v3262_v18 }
 0x15b   : > { %v3595_v38 = vpack.c.bf16 %v3357_v32, %v3356_v31  ;;  %v3275_v29 = vpop.f32.mrb[13].mxu1  ;;  %v3284_v45 = vadd.f32 %v12518_v23, %v13985_v9 }
 0x15c   : > { %v3594_v41 = vpack.c.bf16 %v3355_v36, %v3354_v35  ;;  %v12310_v42 = vpop.f32.mrb[36].mxu0  ;;  %v12519_v31 = vpop.f32.mrb[14].mxu1  ;;  %v3563_v35 = vmax.f32 %v3263_v28, 0.0  ;;  %v3276_v49 = vadd.f32 %v13985_v9, %v3275_v29 }
 0x15d   : > { %v2452_v46 = vadd.f32 %v12310_v42, %v13985_v9  ;;  %v2443_v47 = vpop.f32.mrb[37].mxu0  ;;  %v3278_v36 = vpop.f32.mrb[15].mxu1  ;;  %v14116_v42 = vpack.c.bf16 %v3565_v34, %v3564_v22  ;;  %v3568_v56 = vmax.f32 %v3284_v45, 0.0 }
 0x15e   : > { %v2444_v50 = vadd.f32 %v13985_v9, %v2443_v47  ;;  %v12311_v51 = vpop.f32.mrb[38].mxu0  ;;  %12564 = vmatprep.mubr.msk.bf16.mxu1 %vm3729_vm2, %v3594_v41  ;;  %v12522_v40 = vpop.f32.mrb[16].mxu1  ;;  %v14118_v44 = vpack.c.bf16 %v3563_v35, %v3562_v26  ;;  %v3566_v63 = vmax.f32 %v3276_v49, 0.0 }
 0x15f   : > { %v2455_v54 = vadd.f32 %v12311_v51, %v13985_v9  ;;  %v2446_v55 = vpop.f32.mrb[39].mxu0  ;;  %12565 = vmatmul.mubr.msk.bf16.gmra.mrb[56].mxu1 %vm3729_vm2, %v3595_v38  ;;  %v3360_v61 = vmax.f32 %v2452_v46, 0.0  ;;  %v3291_v46 = vpop.f32.mrb[17].mxu1  ;;  %v3279_v51 = vadd.f32 %v13985_v9, %v3278_v36  ;;  %v3300_v57 = vadd.f32 %v12522_v40, %v13985_v9  ;;  %v13318_v40 = vld [vmem:[%s13846_s16 + $0x280] sm:$0xff]  }
 0x160   : > { %v2447_v59 = vadd.f32 %v13985_v9, %v2446_v55  ;;  %v3358_v1 = vmax.f32 %v2444_v50, 0.0  ;;  %v3287_v50 = vadd.f32 %v12519_v31, %v13985_v9  ;;  %v13315_v55 = vld [vmem:[%s13846_s16 + $0x268] sm:$0xff]   ;;  %v3292_v58 = vadd.f32 %v13985_v9, %v3291_v46 }
 0x161   : > { %v3361_v62 = vmax.f32 %v2455_v54, 0.0  ;;  %12417 = vmatmul.mubr.msk.bf16.gmra.mrb[144].mxu0 %vm1876_vm1, %v13311_v48  ;;  %v3572_v13 = vmax.f32 %v3300_v57, 0.0 }
 0x162   : > { %v3359_v2 = vmax.f32 %v2447_v59, 0.0  ;;  %12420 = vmatprep.mubr.msk.bf16.mxu0 %vm1876_vm1, %v13312_v52  ;;  %v12523_v52 = vpop.f32.mrb[18].mxu1  ;;  %v3569_v0 = vmax.f32 %v3287_v50, 0.0 }
 0x163   : > { %v3597_v5 = vpack.c.bf16 %v3361_v62, %v3360_v61  ;;  %v3294_v59 = vpop.f32.mrb[19].mxu1  ;;  %v13316_v62 = vld [vmem:[%s13846_s16 + $0x270] sm:$0xff]  }
 0x164   : > { %v3596_v8 = vpack.c.bf16 %v3359_v2, %v3358_v1  ;;  %v12314_v10 = vpop.f32.mrb[40].mxu0  ;;  %v3567_v1 = vmax.f32 %v3279_v51, 0.0  ;;  %v12526_v2 = vpop.f32.mrb[20].mxu1  ;;  %v3295_v18 = vadd.f32 %v13985_v9, %v3294_v59 }
 0x165   : > { %v2468_v15 = vadd.f32 %v12314_v10, %v13985_v9  ;;  %v2459_v16 = vpop.f32.mrb[41].mxu0  ;;  %v3307_v7 = vpop.f32.mrb[21].mxu1  ;;  %v14134_v10 = vpack.c.bf16 %v3569_v0, %v3568_v56  ;;  %v13320_v0 = vld [vmem:[%s13846_s16 + $0x290] sm:$0xff]  }
 0x166   : > { %v2460_v19 = vadd.f32 %v13985_v9, %v2459_v16  ;;  %v12315_v20 = vpop.f32.mrb[42].mxu0  ;;  %12568 = vmatprep.mubr.msk.bf16.mxu1 %vm3729_vm2, %v3596_v8  ;;  %v14136_v12 = vpack.c.bf16 %v3567_v1, %v3566_v63  ;;  %v12527_v14 = vpop.f32.mrb[22].mxu1  ;;  %v3570_v16 = vmax.f32 %v3292_v58, 0.0  ;;  %v3308_v28 = vadd.f32 %v13985_v9, %v3307_v7 }
 0x167   : > { %v2471_v24 = vadd.f32 %v12315_v20, %v13985_v9  ;;  %v2462_v25 = vpop.f32.mrb[43].mxu0  ;;  %12569 = vmatmul.mubr.msk.bf16.gmra.mrb[60].mxu1 %vm3729_vm2, %v3597_v5  ;;  %v3364_v32 = vmax.f32 %v2468_v15, 0.0  ;;  %v3319_v29 = vadd.f32 %v12527_v14, %v13985_v9 }
 0x168   : > { %v2463_v30 = vadd.f32 %v13985_v9, %v2462_v25  ;;  %v3362_v37 = vmax.f32 %v2460_v19, 0.0  ;;  %v3310_v19 = vpop.f32.mrb[23].mxu1  ;;  %v3316_v25 = vadd.f32 %v12526_v2, %v13985_v9 }
 0x169   : > { %v3365_v33 = vmax.f32 %v2471_v24, 0.0  ;;  %12421 = vmatmul.mubr.msk.bf16.gmra.mrb[148].mxu0 %vm1876_vm1, %v13313_v17  ;;  %v3303_v17 = vadd.f32 %v12523_v52, %v13985_v9  ;;  %v3571_v24 = vmax.f32 %v3295_v18, 0.0  ;;  %v3577_v45 = vmax.f32 %v3319_v29, 0.0  ;;  %v13321_v18 = vld [vmem:[%s13846_s16 + $0x298] sm:$0xff]  }
 0x16a   : > { %v3363_v38 = vmax.f32 %v2463_v30, 0.0  ;;  %12424 = vmatprep.mubr.msk.bf16.mxu0 %vm1876_vm1, %v13314_v21  ;;  %v3311_v30 = vadd.f32 %v13985_v9, %v3310_v19  ;;  %v3576_v36 = vmax.f32 %v3316_v25, 0.0 }
 0x16b   : > { %v3599_v41 = vpack.c.bf16 %v3365_v33, %v3364_v32  ;;  %v3573_v23 = vmax.f32 %v3303_v17, 0.0  ;;  %v13317_v33 = vld [vmem:[%s13846_s16 + $0x278] sm:$0xff]   ;;  %v14150_v35 = vpack.c.bf16 %v3571_v24, %v3570_v16 }
 0x16c   : > { %v3598_v47 = vpack.c.bf16 %v3363_v38, %v3362_v37  ;;  %v12318_v48 = vpop.f32.mrb[44].mxu0  ;;  %v3575_v46 = vmax.f32 %v3311_v30, 0.0  ;;  %v14158_v50 = vpack.c.bf16 %v3577_v45, %v3576_v36  ;;  %v13323_v36 = vld [vmem:[%s13846_s16 + $0x2a8] sm:$0xff]  }
 0x16d   : > { %v2484_v53 = vadd.f32 %v12318_v48, %v13985_v9  ;;  %v2475_v54 = vpop.f32.mrb[45].mxu0  ;;  %v14148_v34 = vpack.c.bf16 %v3573_v23, %v3572_v13 }
 0x16e   : > { %v2476_v60 = vadd.f32 %v13985_v9, %v2475_v54  ;;  %v12319_v61 = vpop.f32.mrb[46].mxu0  ;;  %12572 = vmatprep.mubr.msk.bf16.mxu1 %vm3729_vm2, %v3598_v47 }
 0x16f   : > { %v3368_v3 = vmax.f32 %v2484_v53, 0.0  ;;  %v2487_v4 = vadd.f32 %v12319_v61, %v13985_v9  ;;  %v2478_v5 = vpop.f32.mrb[47].mxu0  ;;  %12573 = vmatmul.mubr.msk.bf16.gmra.mrb[64].mxu1 %vm3729_vm2, %v3599_v41  ;;  %v3574_v41 = vmax.f32 %v3308_v28, 0.0  ;;  %v13319_v61 = vld [vmem:[%s13846_s16 + $0x288] sm:$0xff]  }
 0x170   : > { %v2479_v8 = vadd.f32 %v13985_v9, %v2478_v5  ;;  %v3366_v20 = vmax.f32 %v2476_v60, 0.0 }
 0x171   : > { %v3369_v15 = vmax.f32 %v2487_v4, 0.0  ;;  %12425 = vmatmul.mubr.msk.bf16.gmra.mrb[152].mxu0 %vm1876_vm1, %v13315_v55  ;;  %v14160_v51 = vpack.c.bf16 %v3575_v46, %v3574_v41 }
 0x172   : > { %v3367_v21 = vmax.f32 %v2479_v8, 0.0  ;;  %12428 = vmatprep.mubr.msk.bf16.mxu0 %vm1876_vm1, %v13316_v62 }
 0x173   : > { %v3601_v22 = vpack.c.bf16 %v3369_v15, %v3368_v3 }
 0x174   : > { %v3600_v26 = vpack.c.bf16 %v3367_v21, %v3366_v20  ;;  %v12322_v27 = vpop.f32.mrb[48].mxu0  ;;  %v13322_v21 = vld [vmem:[%s13846_s16 + $0x2a0] sm:$0xff]  }
 0x175   : > { %v2500_v31 = vadd.f32 %v12322_v27, %v13985_v9  ;;  %v2491_v32 = vpop.f32.mrb[49].mxu0 }
 0x176   : > { %v2492_v37 = vadd.f32 %v13985_v9, %v2491_v32  ;;  %v12323_v38 = vpop.f32.mrb[50].mxu0  ;;  %12576 = vmatprep.mubr.msk.bf16.mxu1 %vm3729_vm2, %v3600_v26 }
 0x177   : > { %v2503_v47 = vadd.f32 %v12323_v38, %v13985_v9  ;;  %v2494_v48 = vpop.f32.mrb[51].mxu0  ;;  %12577 = vmatmul.mubr.msk.bf16.gmra.mrb[68].mxu1 %vm3729_vm2, %v3601_v22  ;;  %v3372_v52 = vmax.f32 %v2500_v31, 0.0 }
 0x178   : > { %v2495_v49 = vadd.f32 %v13985_v9, %v2494_v48  ;;  %v3370_v54 = vmax.f32 %v2492_v37, 0.0 }
 0x179   : > { %v3373_v53 = vmax.f32 %v2503_v47, 0.0  ;;  %12429 = vmatmul.mubr.msk.bf16.gmra.mrb[156].mxu0 %vm1876_vm1, %v13317_v33 }
 0x17a   : > { %v3371_v55 = vmax.f32 %v2495_v49, 0.0  ;;  %12432 = vmatprep.mubr.msk.bf16.mxu0 %vm1876_vm1, %v13318_v40  ;;  %v13324_v40 = vld [vmem:[%s13846_s16 + $0x2b0] sm:$0xff]  }
 0x17b   : > { %v3603_v56 = vpack.c.bf16 %v3373_v53, %v3372_v52 }
 0x17c   : > { %v3602_v57 = vpack.c.bf16 %v3371_v55, %v3370_v54  ;;  %v12326_v58 = vpop.f32.mrb[52].mxu0 }
 0x17d   : > { %v2516_v59 = vadd.f32 %v12326_v58, %v13985_v9  ;;  %v2507_v60 = vpop.f32.mrb[53].mxu0  ;;  %v13325_v58 = vld [vmem:[%s13846_s16 + $0x2b8] sm:$0xff]  }
 0x17e   : > { %v2508_v62 = vadd.f32 %v13985_v9, %v2507_v60  ;;  %v12327_v63 = vpop.f32.mrb[54].mxu0  ;;  %12580 = vmatprep.mubr.msk.bf16.mxu1 %vm3729_vm2, %v3602_v57 }
 0x17f   : > { %v2519_v1 = vadd.f32 %v12327_v63, %v13985_v9  ;;  %v2510_v2 = vpop.f32.mrb[55].mxu0  ;;  %12581 = vmatmul.mubr.msk.bf16.gmra.mrb[72].mxu1 %vm3729_vm2, %v3603_v56  ;;  %v3376_v4 = vmax.f32 %v2516_v59, 0.0 }
 0x180   : > { %v2511_v3 = vadd.f32 %v13985_v9, %v2510_v2  ;;  %v3374_v7 = vmax.f32 %v2508_v62, 0.0 }
 0x181   : > { %v3377_v5 = vmax.f32 %v2519_v1, 0.0  ;;  %12433 = vmatmul.mubr.msk.bf16.gmra.mrb[160].mxu0 %vm1876_vm1, %v13319_v61  ;;  %v13326_v61 = vld [vmem:[%s13846_s16 + $0x2c0] sm:$0xff]  }
 0x182   : > { %v3375_v8 = vmax.f32 %v2511_v3, 0.0  ;;  %12436 = vmatprep.mubr.msk.bf16.mxu0 %vm1876_vm1, %v13320_v0 }
 0x183   : > { %v3605_v13 = vpack.c.bf16 %v3377_v5, %v3376_v4 }
 0x184   : > { %v3604_v14 = vpack.c.bf16 %v3375_v8, %v3374_v7  ;;  %v12330_v15 = vpop.f32.mrb[56].mxu0 }
 0x185   : > { %v2532_v16 = vadd.f32 %v12330_v15, %v13985_v9  ;;  %v2523_v17 = vpop.f32.mrb[57].mxu0  ;;  %v13327_v15 = vld [vmem:[%s13846_s16 + $0x2c8] sm:$0xff]  }
 0x186   : > { %v2524_v19 = vadd.f32 %v13985_v9, %v2523_v17  ;;  %v12331_v20 = vpop.f32.mrb[58].mxu0  ;;  %12584 = vmatprep.mubr.msk.bf16.mxu1 %vm3729_vm2, %v3604_v14 }
 0x187   : > { %v2535_v22 = vadd.f32 %v12331_v20, %v13985_v9  ;;  %v2526_v23 = vpop.f32.mrb[59].mxu0  ;;  %12585 = vmatmul.mubr.msk.bf16.gmra.mrb[76].mxu1 %vm3729_vm2, %v3605_v13  ;;  %v3380_v25 = vmax.f32 %v2532_v16, 0.0 }
 0x188   : > { %v2527_v24 = vadd.f32 %v13985_v9, %v2526_v23  ;;  %v3378_v27 = vmax.f32 %v2524_v19, 0.0 }
 0x189   : > { %v3381_v26 = vmax.f32 %v2535_v22, 0.0  ;;  %12437 = vmatmul.mubr.msk.bf16.gmra.mrb[164].mxu0 %vm1876_vm1, %v13321_v18  ;;  %v13328_v18 = vld [vmem:[%s13846_s16 + $0x2d0] sm:$0xff]  }
 0x18a   : > { %v3379_v28 = vmax.f32 %v2527_v24, 0.0  ;;  %12440 = vmatprep.mubr.msk.bf16.mxu0 %vm1876_vm1, %v13322_v21 }
 0x18b   : > { %v3607_v29 = vpack.c.bf16 %v3381_v26, %v3380_v25 }
 0x18c   : > { %v3606_v30 = vpack.c.bf16 %v3379_v28, %v3378_v27  ;;  %v12334_v31 = vpop.f32.mrb[60].mxu0 }
 0x18d   : > { %v2548_v32 = vadd.f32 %v12334_v31, %v13985_v9  ;;  %v2539_v33 = vpop.f32.mrb[61].mxu0  ;;  %v13329_v31 = vld [vmem:[%s13846_s16 + $0x2d8] sm:$0xff]  }
 0x18e   : > { %v2540_v37 = vadd.f32 %v13985_v9, %v2539_v33  ;;  %v12335_v38 = vpop.f32.mrb[62].mxu0  ;;  %12588 = vmatprep.mubr.msk.bf16.mxu1 %vm3729_vm2, %v3606_v30 }
 0x18f   : > { %v2551_v41 = vadd.f32 %v12335_v38, %v13985_v9  ;;  %v2542_v45 = vpop.f32.mrb[63].mxu0  ;;  %12589 = vmatmul.mubr.msk.bf16.gmra.mrb[80].mxu1 %vm3729_vm2, %v3607_v29  ;;  %v3384_v47 = vmax.f32 %v2548_v32, 0.0 }
 0x190   : > { %v2543_v46 = vadd.f32 %v13985_v9, %v2542_v45  ;;  %v3382_v49 = vmax.f32 %v2540_v37, 0.0 }
 0x191   : > { %v3385_v48 = vmax.f32 %v2551_v41, 0.0  ;;  %12441 = vmatmul.mubr.msk.bf16.gmra.mrb[168].mxu0 %vm1876_vm1, %v13323_v36  ;;  %v13330_v36 = vld [vmem:[%s13846_s16 + $0x2e0] sm:$0xff]  }
 0x192   : > { %v3383_v52 = vmax.f32 %v2543_v46, 0.0  ;;  %12444 = vmatprep.mubr.msk.bf16.mxu0 %vm1876_vm1, %v13324_v40 }
 0x193   : > { %v3609_v53 = vpack.c.bf16 %v3385_v48, %v3384_v47 }
 0x194   : > { %v3608_v54 = vpack.c.bf16 %v3383_v52, %v3382_v49  ;;  %v12338_v55 = vpop.f32.mrb[64].mxu0 }
 0x195   : > { %v2564_v56 = vadd.f32 %v12338_v55, %v13985_v9  ;;  %v2555_v57 = vpop.f32.mrb[65].mxu0  ;;  %v13331_v55 = vld [vmem:[%s13846_s16 + $0x2e8] sm:$0xff]  }
 0x196   : > { %v2556_v59 = vadd.f32 %v13985_v9, %v2555_v57  ;;  %v12339_v60 = vpop.f32.mrb[66].mxu0  ;;  %12592 = vmatprep.mubr.msk.bf16.mxu1 %vm3729_vm2, %v3608_v54 }
 0x197   : > { %v2567_v62 = vadd.f32 %v12339_v60, %v13985_v9  ;;  %v2558_v63 = vpop.f32.mrb[67].mxu0  ;;  %12593 = vmatmul.mubr.msk.bf16.gmra.mrb[84].mxu1 %vm3729_vm2, %v3609_v53  ;;  %v3388_v1 = vmax.f32 %v2564_v56, 0.0 }
 0x198   : > { %v2559_v0 = vadd.f32 %v13985_v9, %v2558_v63  ;;  %v3386_v3 = vmax.f32 %v2556_v59, 0.0 }
 0x199   : > { %v3389_v2 = vmax.f32 %v2567_v62, 0.0  ;;  %12445 = vmatmul.mubr.msk.bf16.gmra.mrb[172].mxu0 %vm1876_vm1, %v13325_v58  ;;  %v13332_v58 = vld [vmem:[%s13846_s16 + $0x2f0] sm:$0xff]  }
 0x19a   : > { %v3387_v4 = vmax.f32 %v2559_v0, 0.0  ;;  %12448 = vmatprep.mubr.msk.bf16.mxu0 %vm1876_vm1, %v13326_v61 }
 0x19b   : > { %v3611_v5 = vpack.c.bf16 %v3389_v2, %v3388_v1 }
 0x19c   : > { %v3610_v7 = vpack.c.bf16 %v3387_v4, %v3386_v3  ;;  %v12342_v8 = vpop.f32.mrb[68].mxu0 }
 0x19d   : > { %v2580_v13 = vadd.f32 %v12342_v8, %v13985_v9  ;;  %v2571_v14 = vpop.f32.mrb[69].mxu0  ;;  %v13333_v8 = vld [vmem:[%s13846_s16 + $0x2f8] sm:$0xff]  }
 0x19e   : > { %v2572_v16 = vadd.f32 %v13985_v9, %v2571_v14  ;;  %v12343_v17 = vpop.f32.mrb[70].mxu0  ;;  %12596 = vmatprep.mubr.msk.bf16.mxu1 %vm3729_vm2, %v3610_v7 }
 0x19f   : > { %v2583_v19 = vadd.f32 %v12343_v17, %v13985_v9  ;;  %v2574_v20 = vpop.f32.mrb[71].mxu0  ;;  %12597 = vmatmul.mubr.msk.bf16.gmra.mrb[88].mxu1 %vm3729_vm2, %v3611_v5  ;;  %v3392_v22 = vmax.f32 %v2580_v13, 0.0 }
 0x1a0   : > { %v2575_v21 = vadd.f32 %v13985_v9, %v2574_v20  ;;  %v3390_v24 = vmax.f32 %v2572_v16, 0.0 }
 0x1a1   : > { %v3393_v23 = vmax.f32 %v2583_v19, 0.0  ;;  %12449 = vmatmul.mubr.msk.bf16.gmra.mrb[176].mxu0 %vm1876_vm1, %v13327_v15  ;;  %v13334_v15 = vld [vmem:[%s13846_s16 + $0x300] sm:$0xff]  }
 0x1a2   : > { %v3391_v25 = vmax.f32 %v2575_v21, 0.0  ;;  %12452 = vmatprep.mubr.msk.bf16.mxu0 %vm1876_vm1, %v13328_v18 }
 0x1a3   : > { %v3613_v26 = vpack.c.bf16 %v3393_v23, %v3392_v22 }
 0x1a4   : > { %v3612_v27 = vpack.c.bf16 %v3391_v25, %v3390_v24  ;;  %v12346_v28 = vpop.f32.mrb[72].mxu0 }
 0x1a5   : > { %v2596_v29 = vadd.f32 %v12346_v28, %v13985_v9  ;;  %v2587_v30 = vpop.f32.mrb[73].mxu0  ;;  %v13335_v28 = vld [vmem:[%s13846_s16 + $0x308] sm:$0xff]  }
 0x1a6   : > { %v2588_v32 = vadd.f32 %v13985_v9, %v2587_v30  ;;  %v12347_v33 = vpop.f32.mrb[74].mxu0  ;;  %12600 = vmatprep.mubr.msk.bf16.mxu1 %vm3729_vm2, %v3612_v27 }
 0x1a7   : > { %v2599_v37 = vadd.f32 %v12347_v33, %v13985_v9  ;;  %v2590_v38 = vpop.f32.mrb[75].mxu0  ;;  %12601 = vmatmul.mubr.msk.bf16.gmra.mrb[92].mxu1 %vm3729_vm2, %v3613_v26  ;;  %v3396_v41 = vmax.f32 %v2596_v29, 0.0 }
 0x1a8   : > { %v2591_v40 = vadd.f32 %v13985_v9, %v2590_v38  ;;  %v3394_v46 = vmax.f32 %v2588_v32, 0.0  ;;  %v14250_v32 = vld [vmem:[%s13690_s17] ss:$0 sm:$0xff] }
 0x1a9   : > { %v3397_v45 = vmax.f32 %v2599_v37, 0.0  ;;  %12453 = vmatmul.mubr.msk.bf16.gmra.mrb[180].mxu0 %vm1876_vm1, %v13329_v31  ;;  %v13336_v31 = vld [vmem:[%s13846_s16 + $0x310] sm:$0xff]  }
 0x1aa   : > { %v3395_v47 = vmax.f32 %v2591_v40, 0.0  ;;  %12456 = vmatprep.mubr.msk.bf16.mxu0 %vm1876_vm1, %v13330_v36 }
 0x1ab   : > { %v3615_v48 = vpack.c.bf16 %v3397_v45, %v3396_v41 }
 0x1ac   : > { %v3614_v49 = vpack.c.bf16 %v3395_v47, %v3394_v46  ;;  %v12350_v52 = vpop.f32.mrb[76].mxu0 }
 0x1ad   : > { %v2612_v53 = vadd.f32 %v12350_v52, %v13985_v9  ;;  %v2603_v54 = vpop.f32.mrb[77].mxu0  ;;  %v13337_v52 = vld [vmem:[%s13846_s16 + $0x318] sm:$0xff]  }
 0x1ae   : > { %v2604_v56 = vadd.f32 %v13985_v9, %v2603_v54  ;;  %v12351_v57 = vpop.f32.mrb[78].mxu0  ;;  %12604 = vmatprep.mubr.msk.bf16.mxu1 %vm3729_vm2, %v3614_v49 }
 0x1af   : > { %v2615_v59 = vadd.f32 %v12351_v57, %v13985_v9  ;;  %v2606_v60 = vpop.f32.mrb[79].mxu0  ;;  %12605 = vmatmul.mubr.msk.bf16.gmra.mrb[96].mxu1 %vm3729_vm2, %v3615_v48  ;;  %v3400_v62 = vmax.f32 %v2612_v53, 0.0 }
 0x1b0   : > { %v2607_v61 = vadd.f32 %v13985_v9, %v2606_v60  ;;  %v3398_v0 = vmax.f32 %v2604_v56, 0.0 }
 0x1b1   : > { %v3401_v63 = vmax.f32 %v2615_v59, 0.0  ;;  %12457 = vmatmul.mubr.msk.bf16.gmra.mrb[184].mxu0 %vm1876_vm1, %v13331_v55  ;;  %v13338_v55 = vld [vmem:[%s13846_s16 + $0x320] sm:$0xff]  }
 0x1b2   : > { %v3399_v1 = vmax.f32 %v2607_v61, 0.0  ;;  %12460 = vmatprep.mubr.msk.bf16.mxu0 %vm1876_vm1, %v13332_v58 }
 0x1b3   : > { %v3617_v2 = vpack.c.bf16 %v3401_v63, %v3400_v62 }
 0x1b4   : > { %v3616_v3 = vpack.c.bf16 %v3399_v1, %v3398_v0  ;;  %v12354_v4 = vpop.f32.mrb[80].mxu0 }
 0x1b5   : > { %v2628_v5 = vadd.f32 %v12354_v4, %v13985_v9  ;;  %v2619_v7 = vpop.f32.mrb[81].mxu0  ;;  %v13339_v4 = vld [vmem:[%s13846_s16 + $0x328] sm:$0xff]  }
 0x1b6   : > { %v2620_v13 = vadd.f32 %v13985_v9, %v2619_v7  ;;  %v12355_v14 = vpop.f32.mrb[82].mxu0  ;;  %12608 = vmatprep.mubr.msk.bf16.mxu1 %vm3729_vm2, %v3616_v3 }
 0x1b7   : > { %v2631_v16 = vadd.f32 %v12355_v14, %v13985_v9  ;;  %v2622_v17 = vpop.f32.mrb[83].mxu0  ;;  %12609 = vmatmul.mubr.msk.bf16.gmra.mrb[100].mxu1 %vm3729_vm2, %v3617_v2  ;;  %v3404_v19 = vmax.f32 %v2628_v5, 0.0 }
 0x1b8   : > { %v2623_v18 = vadd.f32 %v13985_v9, %v2622_v17  ;;  %v3402_v21 = vmax.f32 %v2620_v13, 0.0 }
 0x1b9   : > { %v3405_v20 = vmax.f32 %v2631_v16, 0.0  ;;  %12461 = vmatmul.mubr.msk.bf16.gmra.mrb[188].mxu0 %vm1876_vm1, %v13333_v8  ;;  %v13340_v8 = vld [vmem:[%s13846_s16 + $0x330] sm:$0xff]  }
 0x1ba   : > { %v3403_v22 = vmax.f32 %v2623_v18, 0.0  ;;  %12464 = vmatprep.mubr.msk.bf16.mxu0 %vm1876_vm1, %v13334_v15 }
 0x1bb   : > { %v3619_v23 = vpack.c.bf16 %v3405_v20, %v3404_v19 }
 0x1bc   : > { %v3618_v24 = vpack.c.bf16 %v3403_v22, %v3402_v21  ;;  %v12358_v25 = vpop.f32.mrb[84].mxu0 }
 0x1bd   : > { %v2644_v26 = vadd.f32 %v12358_v25, %v13985_v9  ;;  %v2635_v27 = vpop.f32.mrb[85].mxu0  ;;  %v13341_v25 = vld [vmem:[%s13846_s16 + $0x338] sm:$0xff]  }
 0x1be   : > { %v2636_v29 = vadd.f32 %v13985_v9, %v2635_v27  ;;  %v12359_v30 = vpop.f32.mrb[86].mxu0  ;;  %12612 = vmatprep.mubr.msk.bf16.mxu1 %vm3729_vm2, %v3618_v24 }
 0x1bf   : > { %v2647_v33 = vadd.f32 %v14250_v32, %v12359_v30  ;;  %v2638_v36 = vpop.f32.mrb[87].mxu0  ;;  %12613 = vmatmul.mubr.msk.bf16.gmra.mrb[104].mxu1 %vm3729_vm2, %v3619_v23  ;;  %v3408_v38 = vmax.f32 %v2644_v26, 0.0 }
 0x1c0   : > { %v2639_v37 = vadd.f32 %v14250_v32, %v2638_v36  ;;  %v3406_v9 = vmax.f32 %v2636_v29, 0.0 }
 0x1c1   : > { %v3409_v40 = vmax.f32 %v2647_v33, 0.0  ;;  %12465 = vmatmul.mubr.msk.bf16.gmra.mrb[192].mxu0 %vm1876_vm1, %v13335_v28  ;;  %v13342_v28 = vld [vmem:[%s13846_s16 + $0x340] sm:$0xff]  }
 0x1c2   : > { %v3407_v41 = vmax.f32 %v2639_v37, 0.0  ;;  %12468 = vmatprep.mubr.msk.bf16.mxu0 %vm1876_vm1, %v13336_v31 }
 0x1c3   : > { %v3621_v45 = vpack.c.bf16 %v3409_v40, %v3408_v38 }
 0x1c4   : > { %v3620_v46 = vpack.c.bf16 %v3407_v41, %v3406_v9  ;;  %v12362_v47 = vpop.f32.mrb[88].mxu0 }
 0x1c5   : > { %v2660_v48 = vadd.f32 %v14250_v32, %v12362_v47  ;;  %v2651_v49 = vpop.f32.mrb[89].mxu0  ;;  %v13343_v47 = vld [vmem:[%s13846_s16 + $0x348] sm:$0xff]  }
 0x1c6   : > { %v2652_v53 = vadd.f32 %v14250_v32, %v2651_v49  ;;  %v12363_v54 = vpop.f32.mrb[90].mxu0  ;;  %12616 = vmatprep.mubr.msk.bf16.mxu1 %vm3729_vm2, %v3620_v46 }
 0x1c7   : > { %v2663_v56 = vadd.f32 %v14250_v32, %v12363_v54  ;;  %v2654_v57 = vpop.f32.mrb[91].mxu0  ;;  %12617 = vmatmul.mubr.msk.bf16.gmra.mrb[108].mxu1 %vm3729_vm2, %v3621_v45  ;;  %v3412_v59 = vmax.f32 %v2660_v48, 0.0 }
 0x1c8   : > { %v2655_v58 = vadd.f32 %v14250_v32, %v2654_v57  ;;  %v3410_v61 = vmax.f32 %v2652_v53, 0.0 }
 0x1c9   : > { %v3413_v60 = vmax.f32 %v2663_v56, 0.0  ;;  %12469 = vmatmul.mubr.msk.bf16.gmra.mrb[196].mxu0 %vm1876_vm1, %v13337_v52  ;;  %v13344_v52 = vld [vmem:[%s13846_s16 + $0x350] sm:$0xff]  }
 0x1ca   : > { %v3411_v62 = vmax.f32 %v2655_v58, 0.0  ;;  %12472 = vmatprep.mubr.msk.bf16.mxu0 %vm1876_vm1, %v13338_v55 }
 0x1cb   : > { %v3623_v63 = vpack.c.bf16 %v3413_v60, %v3412_v59 }
 0x1cc   : > { %v3622_v0 = vpack.c.bf16 %v3411_v62, %v3410_v61  ;;  %v12366_v1 = vpop.f32.mrb[92].mxu0 }
 0x1cd   : > { %v2676_v2 = vadd.f32 %v14250_v32, %v12366_v1  ;;  %v2667_v3 = vpop.f32.mrb[93].mxu0  ;;  %v13345_v1 = vld [vmem:[%s13846_s16 + $0x358] sm:$0xff]  }
 0x1ce   : > { %v2668_v5 = vadd.f32 %v14250_v32, %v2667_v3  ;;  %v12367_v7 = vpop.f32.mrb[94].mxu0  ;;  %12620 = vmatprep.mubr.msk.bf16.mxu1 %vm3729_vm2, %v3622_v0 }
 0x1cf   : > { %v2679_v13 = vadd.f32 %v14250_v32, %v12367_v7  ;;  %v2670_v14 = vpop.f32.mrb[95].mxu0  ;;  %12621 = vmatmul.mubr.msk.bf16.gmra.mrb[112].mxu1 %vm3729_vm2, %v3623_v63  ;;  %v3416_v16 = vmax.f32 %v2676_v2, 0.0 }
 0x1d0   : > { %v2671_v15 = vadd.f32 %v14250_v32, %v2670_v14  ;;  %v3414_v18 = vmax.f32 %v2668_v5, 0.0 }
 0x1d1   : > { %v3417_v17 = vmax.f32 %v2679_v13, 0.0  ;;  %12473 = vmatmul.mubr.msk.bf16.gmra.mrb[200].mxu0 %vm1876_vm1, %v13339_v4  ;;  %v13346_v4 = vld [vmem:[%s13846_s16 + $0x360] sm:$0xff]  }
 0x1d2   : > { %v3415_v19 = vmax.f32 %v2671_v15, 0.0  ;;  %12476 = vmatprep.mubr.msk.bf16.mxu0 %vm1876_vm1, %v13340_v8 }
 0x1d3   : > { %v3625_v20 = vpack.c.bf16 %v3417_v17, %v3416_v16 }
 0x1d4   : > { %v3624_v21 = vpack.c.bf16 %v3415_v19, %v3414_v18  ;;  %v12370_v22 = vpop.f32.mrb[96].mxu0 }
 0x1d5   : > { %v2692_v23 = vadd.f32 %v14250_v32, %v12370_v22  ;;  %v2683_v24 = vpop.f32.mrb[97].mxu0  ;;  %v13347_v22 = vld [vmem:[%s13846_s16 + $0x368] sm:$0xff]  }
 0x1d6   : > { %v2684_v26 = vadd.f32 %v14250_v32, %v2683_v24  ;;  %v12371_v27 = vpop.f32.mrb[98].mxu0  ;;  %12624 = vmatprep.mubr.msk.bf16.mxu1 %vm3729_vm2, %v3624_v21 }
 0x1d7   : > { %v2695_v29 = vadd.f32 %v14250_v32, %v12371_v27  ;;  %v2686_v30 = vpop.f32.mrb[99].mxu0  ;;  %12625 = vmatmul.mubr.msk.bf16.gmra.mrb[116].mxu1 %vm3729_vm2, %v3625_v20  ;;  %v3420_v33 = vmax.f32 %v2692_v23, 0.0 }
 0x1d8   : > { %v2687_v31 = vadd.f32 %v14250_v32, %v2686_v30  ;;  %v3418_v37 = vmax.f32 %v2684_v26, 0.0 }
 0x1d9   : > { %v3421_v36 = vmax.f32 %v2695_v29, 0.0  ;;  %12477 = vmatmul.mubr.msk.bf16.gmra.mrb[204].mxu0 %vm1876_vm1, %v13341_v25  ;;  %v13348_v25 = vld [vmem:[%s13846_s16 + $0x370] sm:$0xff]   ;;  %v14316_v29 = vld [vmem:[%s13700_s25] ss:$0 sm:$0xff] }
 0x1da   : > { %v3419_v38 = vmax.f32 %v2687_v31, 0.0  ;;  %12480 = vmatprep.mubr.msk.bf16.mxu0 %vm1876_vm1, %v13342_v28 }
 0x1db   : > { %v3627_v40 = vpack.c.bf16 %v3421_v36, %v3420_v33 }
 0x1dc   : > { %v3626_v9 = vpack.c.bf16 %v3419_v38, %v3418_v37  ;;  %v12374_v41 = vpop.f32.mrb[100].mxu0 }
 0x1dd   : > { %v2708_v45 = vadd.f32 %v14250_v32, %v12374_v41  ;;  %v2699_v46 = vpop.f32.mrb[101].mxu0 }
 0x1de   : > { %v2700_v48 = vadd.f32 %v14250_v32, %v2699_v46  ;;  %v12375_v49 = vpop.f32.mrb[102].mxu0  ;;  %12628 = vmatprep.mubr.msk.bf16.mxu1 %vm3729_vm2, %v3626_v9 }
 0x1df   : > { %v2711_v53 = vadd.f32 %v14250_v32, %v12375_v49  ;;  %v2702_v54 = vpop.f32.mrb[103].mxu0  ;;  %12629 = vmatmul.mubr.msk.bf16.gmra.mrb[120].mxu1 %vm3729_vm2, %v3627_v40  ;;  %v3424_v56 = vmax.f32 %v2708_v45, 0.0 }
 0x1e0   : > { %v2703_v55 = vadd.f32 %v14250_v32, %v2702_v54  ;;  %v3422_v58 = vmax.f32 %v2700_v48, 0.0  ;;  %v13349_v54 = vld [vmem:[%s13846_s16 + $0x378] sm:$0xff]  }
 0x1e1   : > { %v3425_v57 = vmax.f32 %v2711_v53, 0.0  ;;  %12481 = vmatmul.mubr.msk.bf16.gmra.mrb[208].mxu0 %vm1876_vm1, %v13343_v47 }
 0x1e2   : > { %v3423_v59 = vmax.f32 %v2703_v55, 0.0  ;;  %12484 = vmatprep.mubr.msk.bf16.mxu0 %vm1876_vm1, %v13344_v52 }
 0x1e3   : > { %v3629_v60 = vpack.c.bf16 %v3425_v57, %v3424_v56 }
 0x1e4   : > { %v3628_v61 = vpack.c.bf16 %v3423_v59, %v3422_v58  ;;  %v12378_v62 = vpop.f32.mrb[104].mxu0  ;;  %v13350_v58 = vld [vmem:[%s13846_s16 + $0x380] sm:$0xff]  }
 0x1e5   : > { %v2724_v63 = vadd.f32 %v14250_v32, %v12378_v62  ;;  %v2715_v0 = vpop.f32.mrb[105].mxu0 }
 0x1e6   : > { %v2716_v2 = vadd.f32 %v14250_v32, %v2715_v0  ;;  %v12379_v3 = vpop.f32.mrb[106].mxu0  ;;  %12632 = vmatprep.mubr.msk.bf16.mxu1 %vm3729_vm2, %v3628_v61 }
 0x1e7   : > { %v2727_v5 = vadd.f32 %v14250_v32, %v12379_v3  ;;  %v2718_v7 = vpop.f32.mrb[107].mxu0  ;;  %12633 = vmatmul.mubr.msk.bf16.gmra.mrb[124].mxu1 %vm3729_vm2, %v3629_v60  ;;  %v3428_v13 = vmax.f32 %v2724_v63, 0.0 }
 0x1e8   : > { %v2719_v8 = vadd.f32 %v14250_v32, %v2718_v7  ;;  %v3426_v15 = vmax.f32 %v2716_v2, 0.0 }
 0x1e9   : > { %v3429_v14 = vmax.f32 %v2727_v5, 0.0  ;;  %12485 = vmatmul.mubr.msk.bf16.gmra.mrb[212].mxu0 %vm1876_vm1, %v13345_v1 }
 0x1ea   : > { %v3427_v16 = vmax.f32 %v2719_v8, 0.0  ;;  %12488 = vmatprep.mubr.msk.bf16.mxu0 %vm1876_vm1, %v13346_v4 }
 0x1eb   : > { %v3631_v17 = vpack.c.bf16 %v3429_v14, %v3428_v13 }
 0x1ec   : > { %v3630_v18 = vpack.c.bf16 %v3427_v16, %v3426_v15  ;;  %v12382_v19 = vpop.f32.mrb[108].mxu0 }
 0x1ed   : > { %v2740_v20 = vadd.f32 %v14250_v32, %v12382_v19  ;;  %v2731_v21 = vpop.f32.mrb[109].mxu0 }
 0x1ee   : > { %v2732_v23 = vadd.f32 %v14250_v32, %v2731_v21  ;;  %v12383_v24 = vpop.f32.mrb[110].mxu0  ;;  %12636 = vmatprep.mubr.msk.bf16.mxu1 %vm3729_vm2, %v3630_v18 }
 0x1ef   : > { %v2743_v26 = vadd.f32 %v14250_v32, %v12383_v24  ;;  %v2734_v27 = vpop.f32.mrb[111].mxu0  ;;  %12637 = vmatmul.mubr.msk.bf16.gmra.mrb[128].mxu1 %vm3729_vm2, %v3631_v17  ;;  %v3432_v30 = vmax.f32 %v2740_v20, 0.0 }
 0x1f0   : > { %v2735_v28 = vadd.f32 %v14250_v32, %v2734_v27  ;;  %v3430_v33 = vmax.f32 %v2732_v23, 0.0 }
 0x1f1   : > { %v3433_v31 = vmax.f32 %v2743_v26, 0.0  ;;  %12489 = vmatmul.mubr.msk.bf16.gmra.mrb[216].mxu0 %vm1876_vm1, %v13347_v22 }
 0x1f2   : > { %v3431_v36 = vmax.f32 %v2735_v28, 0.0  ;;  %v12534_v37 = vpop.f32.mrb[24].mxu1  ;;  %12492 = vmatprep.mubr.msk.bf16.mxu0 %vm1876_vm1, %v13348_v25  ;;  %v13351_v25 = vld [vmem:[%s13846_s16 + $0x388] sm:$0xff]  }
 0x1f3   : > { %v3633_v38 = vpack.c.bf16 %v3433_v31, %v3432_v30  ;;  %v4157_v40 = vadd.f32 %v12534_v37, %v14316_v29  ;;  %v4148_v9 = vpop.f32.mrb[25].mxu1  ;;  %v13352_v30 = vld [vmem:[%s13846_s16 + $0x390] sm:$0xff]  }
 0x1f4   : > { %v3632_v41 = vpack.c.bf16 %v3431_v36, %v3430_v33  ;;  %v4149_v45 = vadd.f32 %v14316_v29, %v4148_v9  ;;  %v12386_v46 = vpop.f32.mrb[112].mxu0  ;;  %v12535_v47 = vpop.f32.mrb[26].mxu1 }
 0x1f5   : > { %v2756_v48 = vadd.f32 %v14250_v32, %v12386_v46  ;;  %v4160_v49 = vadd.f32 %v12535_v47, %v14316_v29  ;;  %v2747_v52 = vpop.f32.mrb[113].mxu0  ;;  %v4151_v53 = vpop.f32.mrb[27].mxu1  ;;  %v5173_v59 = vmax.f32 %v4157_v40, 0.0 }
 0x1f6   : > { %v2748_v55 = vadd.f32 %v14250_v32, %v2747_v52  ;;  %v4152_v56 = vadd.f32 %v14316_v29, %v4151_v53  ;;  %v12387_v57 = vpop.f32.mrb[114].mxu0  ;;  %12640 = vmatprep.mubr.msk.bf16.mxu1 %vm3729_vm2, %v3632_v41  ;;  %v5171_v63 = vmax.f32 %v4149_v45, 0.0 }
 0x1f7   : > { %v5174_v60 = vmax.f32 %v4160_v49, 0.0  ;;  %v2759_v61 = vadd.f32 %v14250_v32, %v12387_v57  ;;  %v2750_v62 = vpop.f32.mrb[115].mxu0  ;;  %12641 = vmatmul.mubr.msk.bf16.gmra.mrb[132].mxu1 %vm3729_vm2, %v3633_v38  ;;  %v3436_v2 = vmax.f32 %v2756_v48, 0.0 }
 0x1f8   : > { %v5172_v0 = vmax.f32 %v4152_v56, 0.0  ;;  %v2751_v1 = vadd.f32 %v14250_v32, %v2750_v62  ;;  %v3434_v5 = vmax.f32 %v2748_v55, 0.0 }
 0x1f9   : > { %v14332_v3 = vpack.c.bf16 %v5174_v60, %v5173_v59  ;;  %v3437_v4 = vmax.f32 %v2759_v61, 0.0  ;;  %12493 = vmatmul.mubr.msk.bf16.gmra.mrb[220].mxu0 %vm1876_vm1, %v13349_v54 }
 0x1fa   : > { %v14335_v7 = vpack.c.bf16 %v5172_v0, %v5171_v63  ;;  %v3435_v8 = vmax.f32 %v2751_v1, 0.0  ;;  %v12538_v13 = vpop.f32.mrb[28].mxu1  ;;  %12496 = vmatprep.mubr.msk.bf16.mxu0 %vm1876_vm1, %v13350_v58  ;;  %v13353_v0 = vld [vmem:[%s13846_s16 + $0x398] sm:$0xff]   ;;  %s17038_s16 = sld [smem:[#allocation3_spill]] }
 0x1fb   : > { %v3635_v14 = vpack.c.bf16 %v3437_v4, %v3436_v2  ;;  %v4173_v15 = vadd.f32 %v12538_v13, %v14316_v29  ;;  %v4164_v16 = vpop.f32.mrb[29].mxu1 }
 0x1fc   : > { %v3634_v17 = vpack.c.bf16 %v3435_v8, %v3434_v5  ;;  %v4165_v18 = vadd.f32 %v14316_v29, %v4164_v16  ;;  %v12390_v19 = vpop.f32.mrb[116].mxu0  ;;  %v12539_v20 = vpop.f32.mrb[30].mxu1 }
 0x1fd   : > { %v2772_v21 = vadd.f32 %v14250_v32, %v12390_v19  ;;  %v4176_v22 = vadd.f32 %v12539_v20, %v14316_v29  ;;  %v2763_v23 = vpop.f32.mrb[117].mxu0  ;;  %v4167_v24 = vpop.f32.mrb[31].mxu1  ;;  %v5177_v31 = vmax.f32 %v4173_v15, 0.0 }
 0x1fe   : > { %v2764_v26 = vadd.f32 %v14250_v32, %v2763_v23  ;;  %v4168_v27 = vadd.f32 %v14316_v29, %v4167_v24  ;;  %v12391_v28 = vpop.f32.mrb[118].mxu0  ;;  %12644 = vmatprep.mubr.msk.bf16.mxu1 %vm3729_vm2, %v3634_v17  ;;  %v5175_v38 = vmax.f32 %v4165_v18, 0.0 }
 0x1ff   : > { %v5178_v33 = vmax.f32 %v4176_v22, 0.0  ;;  %v2775_v36 = vadd.f32 %v14250_v32, %v12391_v28  ;;  %v2766_v37 = vpop.f32.mrb[119].mxu0  ;;  %12645 = vmatmul.mubr.msk.bf16.gmra.mrb[136].mxu1 %vm3729_vm2, %v3635_v14  ;;  %v3440_v41 = vmax.f32 %v2772_v21, 0.0 }
 0x200   : > { %v5176_v40 = vmax.f32 %v4168_v27, 0.0  ;;  %v2767_v9 = vadd.f32 %v14250_v32, %v2766_v37  ;;  %v3438_v47 = vmax.f32 %v2764_v26, 0.0 }
 0x201   : > { %v14350_v45 = vpack.c.bf16 %v5178_v33, %v5177_v31  ;;  %v3441_v46 = vmax.f32 %v2775_v36, 0.0  ;;  %12497 = vmatmul.mubr.msk.bf16.gmra.mrb[224].mxu0 %vm1876_vm1, %v13351_v25 }
 0x202   : > { %v14353_v48 = vpack.c.bf16 %v5176_v40, %v5175_v38  ;;  %v3439_v49 = vmax.f32 %v2767_v9, 0.0  ;;  %v12542_v52 = vpop.f32.mrb[32].mxu1  ;;  %12500 = vmatprep.mubr.msk.bf16.mxu0 %vm1876_vm1, %v13352_v30 }
 0x203   : > { %v3637_v53 = vpack.c.bf16 %v3441_v46, %v3440_v41  ;;  %v4189_v54 = vadd.f32 %v12542_v52, %v14316_v29  ;;  %v4180_v55 = vpop.f32.mrb[33].mxu1 }
 0x204   : > { %v3636_v56 = vpack.c.bf16 %v3439_v49, %v3438_v47  ;;  %v4181_v57 = vadd.f32 %v14316_v29, %v4180_v55  ;;  %v12394_v58 = vpop.f32.mrb[120].mxu0  ;;  %v12543_v59 = vpop.f32.mrb[34].mxu1 }
 0x205   : > { %v2788_v60 = vadd.f32 %v14250_v32, %v12394_v58  ;;  %v4192_v61 = vadd.f32 %v12543_v59, %v14316_v29  ;;  %v2779_v62 = vpop.f32.mrb[121].mxu0  ;;  %v4183_v63 = vpop.f32.mrb[35].mxu1  ;;  %v5181_v5 = vmax.f32 %v4189_v54, 0.0 }
 0x206   : > { %v2780_v1 = vadd.f32 %v14250_v32, %v2779_v62  ;;  %v4184_v2 = vadd.f32 %v14316_v29, %v4183_v63  ;;  %v12395_v4 = vpop.f32.mrb[122].mxu0  ;;  %12648 = vmatprep.mubr.msk.bf16.mxu1 %vm3729_vm2, %v3636_v56  ;;  %v5179_v15 = vmax.f32 %v4181_v57, 0.0 }
 0x207   : > { %v5182_v8 = vmax.f32 %v4192_v61, 0.0  ;;  %v2791_v13 = vadd.f32 %v14250_v32, %v12395_v4  ;;  %v2782_v14 = vpop.f32.mrb[123].mxu0  ;;  %12649 = vmatmul.mubr.msk.bf16.gmra.mrb[140].mxu1 %vm3729_vm2, %v3637_v53  ;;  %v3444_v18 = vmax.f32 %v2788_v60, 0.0 }
 0x208   : > { %v5180_v16 = vmax.f32 %v4184_v2, 0.0  ;;  %v2783_v17 = vadd.f32 %v14250_v32, %v2782_v14  ;;  %v3442_v21 = vmax.f32 %v2780_v1, 0.0 }
 0x209   : > { %v14367_v19 = vpack.c.bf16 %v5182_v8, %v5181_v5  ;;  %v3445_v20 = vmax.f32 %v2791_v13, 0.0  ;;  %12501 = vmatmul.mubr.msk.bf16.gmra.mrb[228].mxu0 %vm1876_vm1, %v13353_v0 }
 0x20a   : > { %v14370_v22 = vpack.c.bf16 %v5180_v16, %v5179_v15  ;;  %v3443_v23 = vmax.f32 %v2783_v17, 0.0  ;;  %v12546_v24 = vpop.f32.mrb[36].mxu1  ;;  %12792 = vmatprep.mubr.msk.bf16.mxu0 %vm3729_vm2, %v14335_v7 }
 0x20b   : > { %v3639_v25 = vpack.c.bf16 %v3445_v20, %v3444_v18  ;;  %v4205_v26 = vadd.f32 %v12546_v24, %v14316_v29  ;;  %v4196_v27 = vpop.f32.mrb[37].mxu1 }
 0x20c   : > { %v3638_v28 = vpack.c.bf16 %v3443_v23, %v3442_v21  ;;  %v4197_v30 = vadd.f32 %v14316_v29, %v4196_v27  ;;  %v12398_v31 = vpop.f32.mrb[124].mxu0  ;;  %v12547_v33 = vpop.f32.mrb[38].mxu1 }
 0x20d   : > { %v2804_v36 = vadd.f32 %v14250_v32, %v12398_v31  ;;  %v4208_v37 = vadd.f32 %v12547_v33, %v14316_v29  ;;  %v2795_v38 = vpop.f32.mrb[125].mxu0  ;;  %v4199_v40 = vpop.f32.mrb[39].mxu1  ;;  %v5185_v46 = vmax.f32 %v4205_v26, 0.0 }
 0x20e   : > { %v2796_v9 = vadd.f32 %v14250_v32, %v2795_v38  ;;  %v4200_v41 = vadd.f32 %v14316_v29, %v4199_v40  ;;  %v12399_v7 = vpop.f32.mrb[126].mxu0  ;;  %12652 = vmatprep.mubr.msk.bf16.mxu1 %vm3729_vm2, %v3638_v28  ;;  %v5183_v53 = vmax.f32 %v4197_v30, 0.0 }
 0x20f   : > { %v5186_v47 = vmax.f32 %v4208_v37, 0.0  ;;  %v2807_v49 = vadd.f32 %v14250_v32, %v12399_v7  ;;  %v2798_v52 = vpop.f32.mrb[127].mxu0  ;;  %12653 = vmatmul.mubr.msk.bf16.gmra.mrb[144].mxu1 %vm3729_vm2, %v3639_v25  ;;  %v3448_v56 = vmax.f32 %v2804_v36, 0.0 }
 0x210   : > { %v5184_v54 = vmax.f32 %v4200_v41, 0.0  ;;  %v2799_v55 = vadd.f32 %v14250_v32, %v2798_v52  ;;  %v3446_v59 = vmax.f32 %v2796_v9, 0.0 }
 0x211   : > { %v14384_v57 = vpack.c.bf16 %v5186_v47, %v5185_v46  ;;  %v3449_v58 = vmax.f32 %v2807_v49, 0.0  ;;  %12793 = vmatmul.mubr.msk.bf16.vlgmr.msra.gmra.mrb[232].mxu0 %vm3729_vm2, %v14332_v3 }
 0x212   : > { %v14388_v60 = vpack.c.bf16 %v5184_v54, %v5183_v53  ;;  %v3447_v61 = vmax.f32 %v2799_v55, 0.0  ;;  %v12550_v62 = vpop.f32.mrb[40].mxu1  ;;  %12796 = vmatprep.mubr.msk.bf16.mxu0 %vm3729_vm2, %v14353_v48 }
 0x213   : > { %v3641_v63 = vpack.c.bf16 %v3449_v58, %v3448_v56  ;;  %v4221_v0 = vadd.f32 %v12550_v62, %v14316_v29  ;;  %v4212_v1 = vpop.f32.mrb[41].mxu1 }
 0x214   : > { %v3640_v2 = vpack.c.bf16 %v3447_v61, %v3446_v59  ;;  %v4213_v4 = vadd.f32 %v14316_v29, %v4212_v1  ;;  %v12402_v5 = vpop.f32.mrb[128].mxu0  ;;  %v12551_v8 = vpop.f32.mrb[42].mxu1 }
 0x215   : > { %v2820_v13 = vadd.f32 %v14250_v32, %v12402_v5  ;;  %v4224_v3 = vadd.f32 %v12551_v8, %v14316_v29  ;;  %v2811_v14 = vpop.f32.mrb[129].mxu0  ;;  %v4215_v15 = vpop.f32.mrb[43].mxu1  ;;  %v5189_v18 = vmax.f32 %v4221_v0, 0.0 }
 0x216   : > { %v2812_v16 = vadd.f32 %v14250_v32, %v2811_v14  ;;  %v4216_v17 = vadd.f32 %v14316_v29, %v4215_v15  ;;  %v12403_v48 = vpop.f32.mrb[130].mxu0  ;;  %12656 = vmatprep.mubr.msk.bf16.mxu1 %vm3729_vm2, %v3640_v2  ;;  %v5187_v24 = vmax.f32 %v4213_v4, 0.0 }
 0x217   : > { %v5190_v20 = vmax.f32 %v4224_v3, 0.0  ;;  %v2823_v21 = vadd.f32 %v14250_v32, %v12403_v48  ;;  %v2814_v23 = vpop.f32.mrb[131].mxu0  ;;  %12657 = vmatmul.mubr.msk.bf16.gmra.mrb[148].mxu1 %vm3729_vm2, %v3641_v63  ;;  %v3452_v27 = vmax.f32 %v2820_v13, 0.0 }
 0x218   : > { %v5188_v25 = vmax.f32 %v4216_v17, 0.0  ;;  %v2815_v26 = vadd.f32 %v14250_v32, %v2814_v23  ;;  %v3450_v31 = vmax.f32 %v2812_v16, 0.0 }
 0x219   : > { %v14402_v28 = vpack.c.bf16 %v5190_v20, %v5189_v18  ;;  %v3453_v30 = vmax.f32 %v2823_v21, 0.0  ;;  %12797 = vmatmul.mubr.msk.bf16.gmra.mrb[236].mxu0 %vm3729_vm2, %v14350_v45 }
 0x21a   : > { %v14406_v33 = vpack.c.bf16 %v5188_v25, %v5187_v24  ;;  %v3451_v36 = vmax.f32 %v2815_v26, 0.0  ;;  %v12554_v37 = vpop.f32.mrb[44].mxu1  ;;  %12800 = vmatprep.mubr.msk.bf16.mxu0 %vm3729_vm2, %v14370_v22 }
 0x21b   : > { %v3643_v38 = vpack.c.bf16 %v3453_v30, %v3452_v27  ;;  %v4237_v40 = vadd.f32 %v12554_v37, %v14316_v29  ;;  %v4228_v9 = vpop.f32.mrb[45].mxu1 }
 0x21c   : > { %v3642_v41 = vpack.c.bf16 %v3451_v36, %v3450_v31  ;;  %v4229_v7 = vadd.f32 %v14316_v29, %v4228_v9  ;;  %v12406_v46 = vpop.f32.mrb[132].mxu0  ;;  %v12555_v47 = vpop.f32.mrb[46].mxu1 }
 0x21d   : > { %v2836_v49 = vadd.f32 %v14250_v32, %v12406_v46  ;;  %v4240_v45 = vadd.f32 %v12555_v47, %v14316_v29  ;;  %v2827_v52 = vpop.f32.mrb[133].mxu0  ;;  %v4231_v53 = vpop.f32.mrb[47].mxu1  ;;  %v5193_v56 = vmax.f32 %v4237_v40, 0.0 }
 0x21e   : > { %v2828_v54 = vadd.f32 %v14250_v32, %v2827_v52  ;;  %v4232_v55 = vadd.f32 %v14316_v29, %v4231_v53  ;;  %v12407_v22 = vpop.f32.mrb[134].mxu0  ;;  %12660 = vmatprep.mubr.msk.bf16.mxu1 %vm3729_vm2, %v3642_v41  ;;  %v5191_v62 = vmax.f32 %v4229_v7, 0.0 }
 0x21f   : > { %v5194_v58 = vmax.f32 %v4240_v45, 0.0  ;;  %v2839_v59 = vadd.f32 %v14250_v32, %v12407_v22  ;;  %v2830_v61 = vpop.f32.mrb[135].mxu0  ;;  %12661 = vmatmul.mubr.msk.bf16.gmra.mrb[152].mxu1 %vm3729_vm2, %v3643_v38  ;;  %v3456_v1 = vmax.f32 %v2836_v49, 0.0 }
 0x220   : > { %v5192_v63 = vmax.f32 %v4232_v55, 0.0  ;;  %v2831_v0 = vadd.f32 %v14250_v32, %v2830_v61  ;;  %v3454_v5 = vmax.f32 %v2828_v54, 0.0 }
 0x221   : > { %v14420_v2 = vpack.c.bf16 %v5194_v58, %v5193_v56  ;;  %v3457_v4 = vmax.f32 %v2839_v59, 0.0  ;;  %12801 = vmatmul.mubr.msk.bf16.gmra.mrb[240].mxu0 %vm3729_vm2, %v14367_v19 }
 0x222   : > { %v14424_v8 = vpack.c.bf16 %v5192_v63, %v5191_v62  ;;  %v3455_v13 = vmax.f32 %v2831_v0, 0.0  ;;  %v12558_v3 = vpop.f32.mrb[48].mxu1  ;;  %12804 = vmatprep.mubr.msk.bf16.mxu0 %vm3729_vm2, %v14388_v60 }
 0x223   : > { %v3645_v14 = vpack.c.bf16 %v3457_v4, %v3456_v1  ;;  %v4253_v15 = vadd.f32 %v12558_v3, %v14316_v29  ;;  %v4244_v16 = vpop.f32.mrb[49].mxu1 }
 0x224   : > { %v3644_v17 = vpack.c.bf16 %v3455_v13, %v3454_v5  ;;  %v4245_v48 = vadd.f32 %v14316_v29, %v4244_v16  ;;  %v12410_v18 = vpop.f32.mrb[136].mxu0  ;;  %v12559_v20 = vpop.f32.mrb[50].mxu1 }
 0x225   : > { %v2852_v21 = vadd.f32 %v14250_v32, %v12410_v18  ;;  %v4256_v19 = vadd.f32 %v12559_v20, %v14316_v29  ;;  %v2843_v23 = vpop.f32.mrb[137].mxu0  ;;  %v4247_v24 = vpop.f32.mrb[51].mxu1  ;;  %v5197_v27 = vmax.f32 %v4253_v15, 0.0 }
 0x226   : > { %v2844_v25 = vadd.f32 %v14250_v32, %v2843_v23  ;;  %v4248_v26 = vadd.f32 %v14316_v29, %v4247_v24  ;;  %v12411_v60 = vpop.f32.mrb[138].mxu0  ;;  %12664 = vmatprep.mubr.msk.bf16.mxu1 %vm3729_vm2, %v3644_v17  ;;  %v5195_v37 = vmax.f32 %v4245_v48, 0.0 }
 0x227   : > { %v5198_v30 = vmax.f32 %v4256_v19, 0.0  ;;  %v2855_v31 = vadd.f32 %v14250_v32, %v12411_v60  ;;  %v2846_v36 = vpop.f32.mrb[139].mxu0  ;;  %12665 = vmatmul.mubr.msk.bf16.gmra.mrb[156].mxu1 %vm3729_vm2, %v3645_v14  ;;  %v3460_v9 = vmax.f32 %v2852_v21, 0.0 }
 0x228   : > { %v5196_v38 = vmax.f32 %v4248_v26, 0.0  ;;  %v2847_v40 = vadd.f32 %v14250_v32, %v2846_v36  ;;  %v3458_v46 = vmax.f32 %v2844_v25, 0.0 }
 0x229   : > { %v14438_v41 = vpack.c.bf16 %v5198_v30, %v5197_v27  ;;  %v3461_v7 = vmax.f32 %v2855_v31, 0.0  ;;  %12805 = vmatmul.mubr.msk.bf16.gmra.mrb[244].mxu0 %vm3729_vm2, %v14384_v57 }
 0x22a   : > { %v14442_v47 = vpack.c.bf16 %v5196_v38, %v5195_v37  ;;  %v3459_v49 = vmax.f32 %v2847_v40, 0.0  ;;  %v12562_v45 = vpop.f32.mrb[52].mxu1  ;;  %12808 = vmatprep.mubr.msk.bf16.mxu0 %vm3729_vm2, %v14406_v33 }
 0x22b   : > { %v3647_v52 = vpack.c.bf16 %v3461_v7, %v3460_v9  ;;  %v4269_v53 = vadd.f32 %v12562_v45, %v14316_v29  ;;  %v4260_v54 = vpop.f32.mrb[53].mxu1 }
 0x22c   : > { %v3646_v55 = vpack.c.bf16 %v3459_v49, %v3458_v46  ;;  %v4261_v22 = vadd.f32 %v14316_v29, %v4260_v54  ;;  %v12414_v56 = vpop.f32.mrb[140].mxu0  ;;  %v12563_v58 = vpop.f32.mrb[54].mxu1 }
 0x22d   : > { %v2868_v59 = vadd.f32 %v14250_v32, %v12414_v56  ;;  %v4272_v57 = vadd.f32 %v12563_v58, %v14316_v29  ;;  %v2859_v61 = vpop.f32.mrb[141].mxu0  ;;  %v4263_v62 = vpop.f32.mrb[55].mxu1  ;;  %v5201_v1 = vmax.f32 %v4269_v53, 0.0 }
 0x22e   : > { %v2860_v63 = vadd.f32 %v14250_v32, %v2859_v61  ;;  %v4264_v0 = vadd.f32 %v14316_v29, %v4263_v62  ;;  %v12415_v33 = vpop.f32.mrb[142].mxu0  ;;  %12668 = vmatprep.mubr.msk.bf16.mxu1 %vm3729_vm2, %v3646_v55  ;;  %v5199_v3 = vmax.f32 %v4261_v22, 0.0 }
 0x22f   : > { %v5202_v4 = vmax.f32 %v4272_v57, 0.0  ;;  %v2871_v5 = vadd.f32 %v14250_v32, %v12415_v33  ;;  %v2862_v13 = vpop.f32.mrb[143].mxu0  ;;  %12669 = vmatmul.mubr.msk.bf16.gmra.mrb[160].mxu1 %vm3729_vm2, %v3647_v52  ;;  %v3464_v16 = vmax.f32 %v2868_v59, 0.0 }
 0x230   : > { %v5200_v14 = vmax.f32 %v4264_v0, 0.0  ;;  %v2863_v15 = vadd.f32 %v14250_v32, %v2862_v13  ;;  %v3462_v18 = vmax.f32 %v2860_v63, 0.0 }
 0x231   : > { %v14456_v17 = vpack.c.bf16 %v5202_v4, %v5201_v1  ;;  %v3465_v48 = vmax.f32 %v2871_v5, 0.0  ;;  %12809 = vmatmul.mubr.msk.bf16.gmra.mrb[248].mxu0 %vm3729_vm2, %v14402_v28 }
 0x232   : > { %v14460_v20 = vpack.c.bf16 %v5200_v14, %v5199_v3  ;;  %v3463_v21 = vmax.f32 %v2863_v15, 0.0  ;;  %v12566_v19 = vpop.f32.mrb[56].mxu1  ;;  %12812 = vmatprep.mubr.msk.bf16.mxu0 %vm3729_vm2, %v14424_v8 }
 0x233   : > { %v3649_v23 = vpack.c.bf16 %v3465_v48, %v3464_v16  ;;  %v4285_v24 = vadd.f32 %v12566_v19, %v14316_v29  ;;  %v4276_v25 = vpop.f32.mrb[57].mxu1 }
 0x234   : > { %v3648_v26 = vpack.c.bf16 %v3463_v21, %v3462_v18  ;;  %v4277_v60 = vadd.f32 %v14316_v29, %v4276_v25  ;;  %v12418_v27 = vpop.f32.mrb[144].mxu0  ;;  %v12567_v30 = vpop.f32.mrb[58].mxu1 }
 0x235   : > { %v2884_v31 = vadd.f32 %v14250_v32, %v12418_v27  ;;  %v4288_v28 = vadd.f32 %v12567_v30, %v14316_v29  ;;  %v2875_v36 = vpop.f32.mrb[145].mxu0  ;;  %v4279_v37 = vpop.f32.mrb[59].mxu1  ;;  %v5205_v9 = vmax.f32 %v4285_v24, 0.0 }
 0x236   : > { %v2876_v38 = vadd.f32 %v14250_v32, %v2875_v36  ;;  %v4280_v40 = vadd.f32 %v14316_v29, %v4279_v37  ;;  %v12419_v8 = vpop.f32.mrb[146].mxu0  ;;  %12672 = vmatprep.mubr.msk.bf16.mxu1 %vm3729_vm2, %v3648_v26  ;;  %v5203_v45 = vmax.f32 %v4277_v60, 0.0 }
 0x237   : > { %v5206_v7 = vmax.f32 %v4288_v28, 0.0  ;;  %v2887_v46 = vadd.f32 %v14250_v32, %v12419_v8  ;;  %v2878_v49 = vpop.f32.mrb[147].mxu0  ;;  %12673 = vmatmul.mubr.msk.bf16.gmra.mrb[164].mxu1 %vm3729_vm2, %v3649_v23  ;;  %v3468_v54 = vmax.f32 %v2884_v31, 0.0 }
 0x238   : > { %v5204_v52 = vmax.f32 %v4280_v40, 0.0  ;;  %v2879_v53 = vadd.f32 %v14250_v32, %v2878_v49  ;;  %v3466_v56 = vmax.f32 %v2876_v38, 0.0 }
 0x239   : > { %v14474_v55 = vpack.c.bf16 %v5206_v7, %v5205_v9  ;;  %v3469_v22 = vmax.f32 %v2887_v46, 0.0  ;;  %12813 = vmatmul.mubr.msk.bf16.gmra.mrb[252].mxu0 %vm3729_vm2, %v14420_v2 }
 0x23a   : > { %v14478_v58 = vpack.c.bf16 %v5204_v52, %v5203_v45  ;;  %v3467_v59 = vmax.f32 %v2879_v53, 0.0  ;;  %v12570_v57 = vpop.f32.mrb[60].mxu1  ;;  %12816 = vmatprep.mubr.msk.bf16.mxu0 %vm3729_vm2, %v14442_v47 }
 0x23b   : > { %v3651_v61 = vpack.c.bf16 %v3469_v22, %v3468_v54  ;;  %v4301_v62 = vadd.f32 %v12570_v57, %v14316_v29  ;;  %v4292_v63 = vpop.f32.mrb[61].mxu1 }
 0x23c   : > { %v3650_v0 = vpack.c.bf16 %v3467_v59, %v3466_v56  ;;  %v4293_v33 = vadd.f32 %v14316_v29, %v4292_v63  ;;  %v12422_v1 = vpop.f32.mrb[148].mxu0  ;;  %v12571_v4 = vpop.f32.mrb[62].mxu1 }
 0x23d   : > { %v2900_v5 = vadd.f32 %v14250_v32, %v12422_v1  ;;  %v4304_v2 = vadd.f32 %v12571_v4, %v14316_v29  ;;  %v2891_v13 = vpop.f32.mrb[149].mxu0  ;;  %v4295_v3 = vpop.f32.mrb[63].mxu1  ;;  %v5209_v16 = vmax.f32 %v4301_v62, 0.0 }
 0x23e   : > { %v2892_v14 = vadd.f32 %v14250_v32, %v2891_v13  ;;  %v4296_v15 = vadd.f32 %v14316_v29, %v4295_v3  ;;  %v12423_v47 = vpop.f32.mrb[150].mxu0  ;;  %12676 = vmatprep.mubr.msk.bf16.mxu1 %vm3729_vm2, %v3650_v0  ;;  %v5207_v19 = vmax.f32 %v4293_v33, 0.0 }
 0x23f   : > { %v5210_v48 = vmax.f32 %v4304_v2, 0.0  ;;  %v2903_v18 = vadd.f32 %v14250_v32, %v12423_v47  ;;  %v2894_v21 = vpop.f32.mrb[151].mxu0  ;;  %12677 = vmatmul.mubr.msk.bf16.gmra.mrb[168].mxu1 %vm3729_vm2, %v3651_v61  ;;  %v3472_v25 = vmax.f32 %v2900_v5, 0.0 }
 0x240   : > { %v5208_v23 = vmax.f32 %v4296_v15, 0.0  ;;  %v2895_v24 = vadd.f32 %v14250_v32, %v2894_v21  ;;  %v3470_v27 = vmax.f32 %v2892_v14, 0.0 }
 0x241   : > { %v14492_v26 = vpack.c.bf16 %v5210_v48, %v5209_v16  ;;  %v3473_v60 = vmax.f32 %v2903_v18, 0.0  ;;  %12817 = vmatmul.mubr.msk.bf16.gmra.mrb[0].mxu0 %vm3729_vm2, %v14438_v41 }
 0x242   : > { %v14496_v30 = vpack.c.bf16 %v5208_v23, %v5207_v19  ;;  %v3471_v31 = vmax.f32 %v2895_v24, 0.0  ;;  %v12574_v28 = vpop.f32.mrb[64].mxu1  ;;  %12820 = vmatprep.mubr.msk.bf16.mxu0 %vm3729_vm2, %v14460_v20 }
 0x243   : > { %v3653_v36 = vpack.c.bf16 %v3473_v60, %v3472_v25  ;;  %v4317_v37 = vadd.f32 %v12574_v28, %v14316_v29  ;;  %v4308_v38 = vpop.f32.mrb[65].mxu1 }
 0x244   : > { %v3652_v40 = vpack.c.bf16 %v3471_v31, %v3470_v27  ;;  %v4309_v8 = vadd.f32 %v14316_v29, %v4308_v38  ;;  %v12426_v9 = vpop.f32.mrb[152].mxu0  ;;  %v12575_v7 = vpop.f32.mrb[66].mxu1 }
 0x245   : > { %v2916_v46 = vadd.f32 %v14250_v32, %v12426_v9  ;;  %v4320_v41 = vadd.f32 %v12575_v7, %v14316_v29  ;;  %v2907_v49 = vpop.f32.mrb[153].mxu0  ;;  %v4311_v45 = vpop.f32.mrb[67].mxu1  ;;  %v5213_v54 = vmax.f32 %v4317_v37, 0.0 }
 0x246   : > { %v2908_v52 = vadd.f32 %v14250_v32, %v2907_v49  ;;  %v4312_v53 = vadd.f32 %v14316_v29, %v4311_v45  ;;  %v12427_v20 = vpop.f32.mrb[154].mxu0  ;;  %12680 = vmatprep.mubr.msk.bf16.mxu1 %vm3729_vm2, %v3652_v40  ;;  %v5211_v57 = vmax.f32 %v4309_v8, 0.0 }
 0x247   : > { %v5214_v22 = vmax.f32 %v4320_v41, 0.0  ;;  %v2919_v56 = vadd.f32 %v14250_v32, %v12427_v20  ;;  %v2910_v59 = vpop.f32.mrb[155].mxu0  ;;  %12681 = vmatmul.mubr.msk.bf16.gmra.mrb[172].mxu1 %vm3729_vm2, %v3653_v36  ;;  %v3476_v63 = vmax.f32 %v2916_v46, 0.0 }
 0x248   : > { %v5212_v61 = vmax.f32 %v4312_v53, 0.0  ;;  %v2911_v62 = vadd.f32 %v14250_v32, %v2910_v59  ;;  %v3474_v1 = vmax.f32 %v2908_v52, 0.0  ;;  %v13354_v52 = vld [vmem:[%s13720_s14] sm:$0xff]  }
 0x249   : > { %v14510_v0 = vpack.c.bf16 %v5214_v22, %v5213_v54  ;;  %v3477_v33 = vmax.f32 %v2919_v56, 0.0  ;;  %12821 = vmatmul.mubr.msk.bf16.gmra.mrb[4].mxu0 %vm3729_vm2, %v14456_v17  ;;  %v14540_v56 = vld [vmem:[%s13690_s17] ss:$0 sm:$0xff]  ;;  %13048 = vmatprep.subr.bf16.mxu1 %v13354_v52 }
 0x24a   : > { %v14514_v4 = vpack.c.bf16 %v5212_v61, %v5211_v57  ;;  %v3475_v5 = vmax.f32 %v2911_v62, 0.0  ;;  %v12578_v2 = vpop.f32.mrb[68].mxu1  ;;  %12824 = vmatprep.mubr.msk.bf16.mxu0 %vm3729_vm2, %v14478_v58  ;;  %13049 = vmatpush3.bf16.msra.mxu1 %v13354_v52 }
 0x24b   : > { %v3655_v13 = vpack.c.bf16 %v3477_v33, %v3476_v63  ;;  %v4333_v3 = vadd.f32 %v12578_v2, %v14316_v29  ;;  %v4324_v14 = vpop.f32.mrb[69].mxu1 }
 0x24c   : > { %v3654_v15 = vpack.c.bf16 %v3475_v5, %v3474_v1  ;;  %v4325_v47 = vadd.f32 %v14316_v29, %v4324_v14  ;;  %v12430_v16 = vpop.f32.mrb[156].mxu0  ;;  %v12579_v48 = vpop.f32.mrb[70].mxu1 }
 0x24d   : > { %v2932_v18 = vadd.f32 %v14250_v32, %v12430_v16  ;;  %v4336_v17 = vadd.f32 %v12579_v48, %v14316_v29  ;;  %v2923_v21 = vpop.f32.mrb[157].mxu0  ;;  %v4327_v19 = vpop.f32.mrb[71].mxu1  ;;  %v5217_v25 = vmax.f32 %v4333_v3, 0.0 }
 0x24e   : > { %v2924_v23 = vadd.f32 %v14250_v32, %v2923_v21  ;;  %v4328_v24 = vadd.f32 %v14316_v29, %v4327_v19  ;;  %v12431_v58 = vpop.f32.mrb[158].mxu0  ;;  %12684 = vmatprep.mubr.msk.bf16.mxu1 %vm3729_vm2, %v3654_v15  ;;  %v5215_v28 = vmax.f32 %v4325_v47, 0.0 }
 0x24f   : > { %v5218_v60 = vmax.f32 %v4336_v17, 0.0  ;;  %v2935_v27 = vadd.f32 %v14250_v32, %v12431_v58  ;;  %v2926_v31 = vpop.f32.mrb[159].mxu0  ;;  %12685 = vmatmul.mubr.msk.bf16.gmra.mrb[176].mxu1 %vm3729_vm2, %v3655_v13  ;;  %v3480_v38 = vmax.f32 %v2932_v18, 0.0 }
 0x250   : > { %v5216_v36 = vmax.f32 %v4328_v24, 0.0  ;;  %v2927_v37 = vadd.f32 %v14250_v32, %v2926_v31  ;;  %v3478_v9 = vmax.f32 %v2924_v23, 0.0 }
 0x251   : > { %v14528_v40 = vpack.c.bf16 %v5218_v60, %v5217_v25  ;;  %v3481_v8 = vmax.f32 %v2935_v27, 0.0  ;;  %12825 = vmatmul.mubr.msk.bf16.gmra.mrb[8].mxu0 %vm3729_vm2, %v14474_v55 }
 0x252   : > { %v14532_v7 = vpack.c.bf16 %v5216_v36, %v5215_v28  ;;  %v3479_v46 = vmax.f32 %v2927_v37, 0.0  ;;  %v12582_v41 = vpop.f32.mrb[72].mxu1  ;;  %12828 = vmatprep.mubr.msk.bf16.mxu0 %vm3729_vm2, %v14496_v30 }
 0x253   : > { %v3657_v49 = vpack.c.bf16 %v3481_v8, %v3480_v38  ;;  %v4349_v45 = vadd.f32 %v12582_v41, %v14316_v29  ;;  %v4340_v32 = vpop.f32.mrb[73].mxu1 }
 0x254   : > { %v3656_v53 = vpack.c.bf16 %v3479_v46, %v3478_v9  ;;  %v4341_v20 = vadd.f32 %v14316_v29, %v4340_v32  ;;  %v12434_v54 = vpop.f32.mrb[160].mxu0  ;;  %v12583_v22 = vpop.f32.mrb[74].mxu1 }
 0x255   : > { %v2948_v55 = vadd.f32 %v14540_v56, %v12434_v54  ;;  %v4352_v59 = vadd.f32 %v12583_v22, %v14316_v29  ;;  %v2939_v57 = vpop.f32.mrb[161].mxu0  ;;  %v4343_v61 = vpop.f32.mrb[75].mxu1  ;;  %v5221_v33 = vmax.f32 %v4349_v45, 0.0 }
 0x256   : > { %v2940_v30 = vadd.f32 %v14540_v56, %v2939_v57  ;;  %v4344_v62 = vadd.f32 %v14316_v29, %v4343_v61  ;;  %v12435_v63 = vpop.f32.mrb[162].mxu0  ;;  %12688 = vmatprep.mubr.msk.bf16.mxu1 %vm3729_vm2, %v3656_v53  ;;  %v5219_v13 = vmax.f32 %v4341_v20, 0.0 }
 0x257   : > { %v5222_v1 = vmax.f32 %v4352_v59, 0.0  ;;  %v2951_v5 = vadd.f32 %v14540_v56, %v12435_v63  ;;  %v2942_v2 = vpop.f32.mrb[163].mxu0  ;;  %12689 = vmatmul.mubr.msk.bf16.gmra.mrb[180].mxu1 %vm3729_vm2, %v3657_v49  ;;  %v3484_v15 = vmax.f32 %v2948_v55, 0.0 }
 0x258   : > { %v5220_v3 = vmax.f32 %v4344_v62, 0.0  ;;  %v2943_v14 = vadd.f32 %v14540_v56, %v2942_v2  ;;  %v3482_v48 = vmax.f32 %v2940_v30, 0.0 }
 0x259   : > { %v14550_v47 = vpack.c.bf16 %v5222_v1, %v5221_v33  ;;  %v3485_v16 = vmax.f32 %v2951_v5, 0.0  ;;  %12829 = vmatmul.mubr.msk.bf16.gmra.mrb[12].mxu0 %vm3729_vm2, %v14492_v26 }
 0x25a   : > { %v14554_v18 = vpack.c.bf16 %v5220_v3, %v5219_v13  ;;  %v3483_v17 = vmax.f32 %v2943_v14, 0.0  ;;  %v12586_v21 = vpop.f32.mrb[76].mxu1  ;;  %12832 = vmatprep.mubr.msk.bf16.mxu0 %vm3729_vm2, %v14514_v4 }
 0x25b   : > { %v3659_v19 = vpack.c.bf16 %v3485_v16, %v3484_v15  ;;  %v4365_v23 = vadd.f32 %v12586_v21, %v14316_v29  ;;  %v4356_v24 = vpop.f32.mrb[77].mxu1 }
 0x25c   : > { %v3658_v58 = vpack.c.bf16 %v3483_v17, %v3482_v48  ;;  %v4357_v25 = vadd.f32 %v14316_v29, %v4356_v24  ;;  %v12438_v60 = vpop.f32.mrb[164].mxu0  ;;  %v12587_v27 = vpop.f32.mrb[78].mxu1 }
 0x25d   : > { %v2964_v31 = vadd.f32 %v14540_v56, %v12438_v60  ;;  %v4368_v26 = vadd.f32 %v12587_v27, %v14316_v29  ;;  %v2955_v28 = vpop.f32.mrb[165].mxu0  ;;  %v4359_v36 = vpop.f32.mrb[79].mxu1  ;;  %v5225_v8 = vmax.f32 %v4365_v23, 0.0 }
 0x25e   : > { %v2956_v37 = vadd.f32 %v14540_v56, %v2955_v28  ;;  %v4360_v38 = vadd.f32 %v14316_v29, %v4359_v36  ;;  %v12439_v4 = vpop.f32.mrb[166].mxu0  ;;  %12692 = vmatprep.mubr.msk.bf16.mxu1 %vm3729_vm2, %v3658_v58  ;;  %v5223_v49 = vmax.f32 %v4357_v25, 0.0 }
 0x25f   : > { %v5226_v9 = vmax.f32 %v4368_v26, 0.0  ;;  %v2967_v46 = vadd.f32 %v14540_v56, %v12439_v4  ;;  %v2958_v41 = vpop.f32.mrb[167].mxu0  ;;  %12693 = vmatmul.mubr.msk.bf16.gmra.mrb[184].mxu1 %vm3729_vm2, %v3659_v19  ;;  %v3488_v52 = vmax.f32 %v2964_v31, 0.0 }
 0x260   : > { %v5224_v45 = vmax.f32 %v4360_v38, 0.0  ;;  %v2959_v32 = vadd.f32 %v14540_v56, %v2958_v41  ;;  %v3486_v54 = vmax.f32 %v2956_v37, 0.0 }
 0x261   : > { %v14568_v53 = vpack.c.bf16 %v5226_v9, %v5225_v8  ;;  %v3489_v20 = vmax.f32 %v2967_v46, 0.0  ;;  %12833 = vmatmul.mubr.msk.bf16.gmra.mrb[16].mxu0 %vm3729_vm2, %v14510_v0 }
 0x262   : > { %v14572_v22 = vpack.c.bf16 %v5224_v45, %v5223_v49  ;;  %v3487_v55 = vmax.f32 %v2959_v32, 0.0  ;;  %v12590_v59 = vpop.f32.mrb[80].mxu1  ;;  %12836 = vmatprep.mubr.msk.bf16.mxu0 %vm3729_vm2, %v14532_v7 }
 0x263   : > { %v3661_v57 = vpack.c.bf16 %v3489_v20, %v3488_v52  ;;  %v4381_v61 = vadd.f32 %v12590_v59, %v14316_v29  ;;  %v4372_v30 = vpop.f32.mrb[81].mxu1 }
 0x264   : > { %v3660_v62 = vpack.c.bf16 %v3487_v55, %v3486_v54  ;;  %v4373_v63 = vadd.f32 %v14316_v29, %v4372_v30  ;;  %v12442_v33 = vpop.f32.mrb[168].mxu0  ;;  %v12591_v1 = vpop.f32.mrb[82].mxu1 }
 0x265   : > { %v2980_v5 = vadd.f32 %v14540_v56, %v12442_v33  ;;  %v4384_v0 = vadd.f32 %v12591_v1, %v14316_v29  ;;  %v2971_v2 = vpop.f32.mrb[169].mxu0  ;;  %v4375_v13 = vpop.f32.mrb[83].mxu1  ;;  %v5229_v15 = vmax.f32 %v4381_v61, 0.0 }
 0x266   : > { %v2972_v3 = vadd.f32 %v14540_v56, %v2971_v2  ;;  %v4376_v14 = vadd.f32 %v14316_v29, %v4375_v13  ;;  %v12443_v7 = vpop.f32.mrb[170].mxu0  ;;  %12696 = vmatprep.mubr.msk.bf16.mxu1 %vm3729_vm2, %v3660_v62  ;;  %v5227_v21 = vmax.f32 %v4373_v63, 0.0  ;;  %v14613_v2 = vld [vmem:[%s13700_s25] ss:$0 sm:$0xff] }
 0x267   : > { %v5230_v16 = vmax.f32 %v4384_v0, 0.0  ;;  %v2983_v48 = vadd.f32 %v14540_v56, %v12443_v7  ;;  %v2974_v17 = vpop.f32.mrb[171].mxu0  ;;  %12697 = vmatmul.mubr.msk.bf16.gmra.mrb[188].mxu1 %vm3729_vm2, %v3661_v57  ;;  %v3492_v24 = vmax.f32 %v2980_v5, 0.0 }
 0x268   : > { %v5228_v19 = vmax.f32 %v4376_v14, 0.0  ;;  %v2975_v23 = vadd.f32 %v14540_v56, %v2974_v17  ;;  %v3490_v60 = vmax.f32 %v2972_v3, 0.0 }
 0x269   : > { %v14586_v58 = vpack.c.bf16 %v5230_v16, %v5229_v15  ;;  %v3493_v25 = vmax.f32 %v2983_v48, 0.0  ;;  %12837 = vmatmul.mubr.msk.bf16.gmra.mrb[20].mxu0 %vm3729_vm2, %v14528_v40 }
 0x26a   : > { %v14590_v27 = vpack.c.bf16 %v5228_v19, %v5227_v21  ;;  %v3491_v31 = vmax.f32 %v2975_v23, 0.0  ;;  %v12594_v26 = vpop.f32.mrb[84].mxu1  ;;  %12840 = vmatprep.mubr.msk.bf16.mxu0 %vm3729_vm2, %v14554_v18 }
 0x26b   : > { %v3663_v28 = vpack.c.bf16 %v3493_v25, %v3492_v24  ;;  %v4397_v36 = vadd.f32 %v12594_v26, %v14316_v29  ;;  %v4388_v37 = vpop.f32.mrb[85].mxu1 }
 0x26c   : > { %v3662_v38 = vpack.c.bf16 %v3491_v31, %v3490_v60  ;;  %v4389_v4 = vadd.f32 %v14316_v29, %v4388_v37  ;;  %v12446_v8 = vpop.f32.mrb[172].mxu0  ;;  %v12595_v9 = vpop.f32.mrb[86].mxu1 }
 0x26d   : > { %v2996_v46 = vadd.f32 %v14540_v56, %v12446_v8  ;;  %v4400_v40 = vadd.f32 %v12595_v9, %v14316_v29  ;;  %v2987_v41 = vpop.f32.mrb[173].mxu0  ;;  %v4391_v49 = vpop.f32.mrb[87].mxu1  ;;  %v5233_v52 = vmax.f32 %v4397_v36, 0.0 }
 0x26e   : > { %v2988_v45 = vadd.f32 %v14540_v56, %v2987_v41  ;;  %v4392_v32 = vadd.f32 %v14316_v29, %v4391_v49  ;;  %v12447_v18 = vpop.f32.mrb[174].mxu0  ;;  %12700 = vmatprep.mubr.msk.bf16.mxu1 %vm3729_vm2, %v3662_v38  ;;  %v5231_v59 = vmax.f32 %v4389_v4, 0.0 }
 0x26f   : > { %v5234_v20 = vmax.f32 %v4400_v40, 0.0  ;;  %v2999_v54 = vadd.f32 %v14540_v56, %v12447_v18  ;;  %v2990_v55 = vpop.f32.mrb[175].mxu0  ;;  %12701 = vmatmul.mubr.msk.bf16.gmra.mrb[192].mxu1 %vm3729_vm2, %v3663_v28  ;;  %v3496_v30 = vmax.f32 %v2996_v46, 0.0 }
 0x270   : > { %v5232_v57 = vmax.f32 %v4392_v32, 0.0  ;;  %v2991_v61 = vadd.f32 %v14540_v56, %v2990_v55  ;;  %v3494_v29 = vmax.f32 %v2988_v45, 0.0 }
 0x271   : > { %v14604_v62 = vpack.c.bf16 %v5234_v20, %v5233_v52  ;;  %v3497_v63 = vmax.f32 %v2999_v54, 0.0  ;;  %12841 = vmatmul.mubr.msk.bf16.gmra.mrb[24].mxu0 %vm3729_vm2, %v14550_v47 }
 0x272   : > { %v14608_v33 = vpack.c.bf16 %v5232_v57, %v5231_v59  ;;  %v3495_v1 = vmax.f32 %v2991_v61, 0.0  ;;  %v12598_v5 = vpop.f32.mrb[88].mxu1  ;;  %12844 = vmatprep.mubr.msk.bf16.mxu0 %vm3729_vm2, %v14572_v22 }
 0x273   : > { %v3665_v0 = vpack.c.bf16 %v3497_v63, %v3496_v30  ;;  %v4413_v13 = vadd.f32 %v14613_v2, %v12598_v5  ;;  %v4404_v3 = vpop.f32.mrb[89].mxu1 }
 0x274   : > { %v3664_v14 = vpack.c.bf16 %v3495_v1, %v3494_v29  ;;  %v4405_v7 = vadd.f32 %v14613_v2, %v4404_v3  ;;  %v12450_v15 = vpop.f32.mrb[176].mxu0  ;;  %v12599_v16 = vpop.f32.mrb[90].mxu1 }
 0x275   : > { %v3012_v47 = vadd.f32 %v14540_v56, %v12450_v15  ;;  %v4416_v48 = vadd.f32 %v14613_v2, %v12599_v16  ;;  %v3003_v17 = vpop.f32.mrb[177].mxu0  ;;  %v4407_v21 = vpop.f32.mrb[91].mxu1  ;;  %v5237_v24 = vmax.f32 %v4413_v13, 0.0 }
 0x276   : > { %v3004_v19 = vadd.f32 %v14540_v56, %v3003_v17  ;;  %v4408_v22 = vadd.f32 %v14613_v2, %v4407_v21  ;;  %v12451_v23 = vpop.f32.mrb[178].mxu0  ;;  %12704 = vmatprep.mubr.msk.bf16.mxu1 %vm3729_vm2, %v3664_v14  ;;  %v5235_v26 = vmax.f32 %v4405_v7, 0.0 }
 0x277   : > { %v5238_v25 = vmax.f32 %v4416_v48, 0.0  ;;  %v3015_v60 = vadd.f32 %v14540_v56, %v12451_v23  ;;  %v3006_v31 = vpop.f32.mrb[179].mxu0  ;;  %12705 = vmatmul.mubr.msk.bf16.gmra.mrb[196].mxu1 %vm3729_vm2, %v3665_v0  ;;  %v3500_v37 = vmax.f32 %v3012_v47, 0.0 }
 0x278   : > { %v5236_v28 = vmax.f32 %v4408_v22, 0.0  ;;  %v3007_v36 = vadd.f32 %v14540_v56, %v3006_v31  ;;  %v3498_v8 = vmax.f32 %v3004_v19, 0.0 }
 0x279   : > { %v14625_v38 = vpack.c.bf16 %v5238_v25, %v5237_v24  ;;  %v3501_v4 = vmax.f32 %v3015_v60, 0.0  ;;  %12845 = vmatmul.mubr.msk.bf16.gmra.mrb[28].mxu0 %vm3729_vm2, %v14568_v53 }
 0x27a   : > { %v14629_v9 = vpack.c.bf16 %v5236_v28, %v5235_v26  ;;  %v3499_v46 = vmax.f32 %v3007_v36, 0.0  ;;  %v12602_v40 = vpop.f32.mrb[92].mxu1  ;;  %12848 = vmatprep.mubr.msk.bf16.mxu0 %vm3729_vm2, %v14590_v27 }
 0x27b   : > { %v3667_v41 = vpack.c.bf16 %v3501_v4, %v3500_v37  ;;  %v4429_v49 = vadd.f32 %v14613_v2, %v12602_v40  ;;  %v4420_v45 = vpop.f32.mrb[93].mxu1 }
 0x27c   : > { %v3666_v32 = vpack.c.bf16 %v3499_v46, %v3498_v8  ;;  %v4421_v18 = vadd.f32 %v14613_v2, %v4420_v45  ;;  %v12454_v52 = vpop.f32.mrb[180].mxu0  ;;  %v12603_v20 = vpop.f32.mrb[94].mxu1 }
 0x27d   : > { %v3028_v54 = vadd.f32 %v14540_v56, %v12454_v52  ;;  %v4432_v53 = vadd.f32 %v14613_v2, %v12603_v20  ;;  %v3019_v55 = vpop.f32.mrb[181].mxu0  ;;  %v4423_v59 = vpop.f32.mrb[95].mxu1  ;;  %v5241_v30 = vmax.f32 %v4429_v49, 0.0 }
 0x27e   : > { %v3020_v57 = vadd.f32 %v14540_v56, %v3019_v55  ;;  %v4424_v61 = vadd.f32 %v14613_v2, %v4423_v59  ;;  %v12455_v27 = vpop.f32.mrb[182].mxu0  ;;  %12708 = vmatprep.mubr.msk.bf16.mxu1 %vm3729_vm2, %v3666_v32  ;;  %v5239_v5 = vmax.f32 %v4421_v18, 0.0 }
 0x27f   : > { %v5242_v63 = vmax.f32 %v4432_v53, 0.0  ;;  %v3031_v29 = vadd.f32 %v14540_v56, %v12455_v27  ;;  %v3022_v1 = vpop.f32.mrb[183].mxu0  ;;  %12709 = vmatmul.mubr.msk.bf16.gmra.mrb[200].mxu1 %vm3729_vm2, %v3667_v41  ;;  %v3504_v3 = vmax.f32 %v3028_v54, 0.0 }
 0x280   : > { %v5240_v0 = vmax.f32 %v4424_v61, 0.0  ;;  %v3023_v13 = vadd.f32 %v14540_v56, %v3022_v1  ;;  %v3502_v15 = vmax.f32 %v3020_v57, 0.0 }
 0x281   : > { %v14643_v14 = vpack.c.bf16 %v5242_v63, %v5241_v30  ;;  %v3505_v7 = vmax.f32 %v3031_v29, 0.0  ;;  %12849 = vmatmul.mubr.msk.bf16.gmra.mrb[32].mxu0 %vm3729_vm2, %v14586_v58 }
 0x282   : > { %v14647_v16 = vpack.c.bf16 %v5240_v0, %v5239_v5  ;;  %v3503_v47 = vmax.f32 %v3023_v13, 0.0  ;;  %v12606_v48 = vpop.f32.mrb[96].mxu1  ;;  %12852 = vmatprep.mubr.msk.bf16.mxu0 %vm3729_vm2, %v14608_v33 }
 0x283   : > { %v3669_v17 = vpack.c.bf16 %v3505_v7, %v3504_v3  ;;  %v4445_v21 = vadd.f32 %v14613_v2, %v12606_v48  ;;  %v4436_v19 = vpop.f32.mrb[97].mxu1 }
 0x284   : > { %v3668_v22 = vpack.c.bf16 %v3503_v47, %v3502_v15  ;;  %v4437_v23 = vadd.f32 %v14613_v2, %v4436_v19  ;;  %v12458_v24 = vpop.f32.mrb[184].mxu0  ;;  %v12607_v25 = vpop.f32.mrb[98].mxu1 }
 0x285   : > { %v3044_v60 = vadd.f32 %v14540_v56, %v12458_v24  ;;  %v4448_v58 = vadd.f32 %v14613_v2, %v12607_v25  ;;  %v3035_v31 = vpop.f32.mrb[185].mxu0  ;;  %v4439_v26 = vpop.f32.mrb[99].mxu1  ;;  %v5245_v37 = vmax.f32 %v4445_v21, 0.0 }
 0x286   : > { %v3036_v28 = vadd.f32 %v14540_v56, %v3035_v31  ;;  %v4440_v36 = vadd.f32 %v14613_v2, %v4439_v26  ;;  %v12459_v33 = vpop.f32.mrb[186].mxu0  ;;  %12712 = vmatprep.mubr.msk.bf16.mxu1 %vm3729_vm2, %v3668_v22  ;;  %v5243_v40 = vmax.f32 %v4437_v23, 0.0 }
 0x287   : > { %v5246_v4 = vmax.f32 %v4448_v58, 0.0  ;;  %v3047_v8 = vadd.f32 %v14540_v56, %v12459_v33  ;;  %v3038_v46 = vpop.f32.mrb[187].mxu0  ;;  %12713 = vmatmul.mubr.msk.bf16.gmra.mrb[204].mxu1 %vm3729_vm2, %v3669_v17  ;;  %v3508_v45 = vmax.f32 %v3044_v60, 0.0 }
 0x288   : > { %v5244_v41 = vmax.f32 %v4440_v36, 0.0  ;;  %v3039_v49 = vadd.f32 %v14540_v56, %v3038_v46  ;;  %v3506_v52 = vmax.f32 %v3036_v28, 0.0 }
 0x289   : > { %v14661_v32 = vpack.c.bf16 %v5246_v4, %v5245_v37  ;;  %v3509_v18 = vmax.f32 %v3047_v8, 0.0  ;;  %12853 = vmatmul.mubr.msk.bf16.gmra.mrb[36].mxu0 %vm3729_vm2, %v14604_v62 }
 0x28a   : > { %v14665_v20 = vpack.c.bf16 %v5244_v41, %v5243_v40  ;;  %v3507_v54 = vmax.f32 %v3039_v49, 0.0  ;;  %v12610_v53 = vpop.f32.mrb[100].mxu1  ;;  %12856 = vmatprep.mubr.msk.bf16.mxu0 %vm3729_vm2, %v14629_v9 }
 0x28b   : > { %v3671_v55 = vpack.c.bf16 %v3509_v18, %v3508_v45  ;;  %v4461_v59 = vadd.f32 %v14613_v2, %v12610_v53  ;;  %v4452_v57 = vpop.f32.mrb[101].mxu1 }
 0x28c   : > { %v3670_v61 = vpack.c.bf16 %v3507_v54, %v3506_v52  ;;  %v4453_v27 = vadd.f32 %v14613_v2, %v4452_v57  ;;  %v12462_v30 = vpop.f32.mrb[188].mxu0  ;;  %v12611_v63 = vpop.f32.mrb[102].mxu1 }
 0x28d   : > { %v3060_v29 = vadd.f32 %v14540_v56, %v12462_v30  ;;  %v4464_v62 = vadd.f32 %v14613_v2, %v12611_v63  ;;  %v3051_v1 = vpop.f32.mrb[189].mxu0  ;;  %v4455_v5 = vpop.f32.mrb[103].mxu1  ;;  %v5249_v3 = vmax.f32 %v4461_v59, 0.0 }
 0x28e   : > { %v3052_v0 = vadd.f32 %v14540_v56, %v3051_v1  ;;  %v4456_v13 = vadd.f32 %v14613_v2, %v4455_v5  ;;  %v12463_v9 = vpop.f32.mrb[190].mxu0  ;;  %12716 = vmatprep.mubr.msk.bf16.mxu1 %vm3729_vm2, %v3670_v61  ;;  %v5247_v48 = vmax.f32 %v4453_v27, 0.0 }
 0x28f   : > { %v5250_v7 = vmax.f32 %v4464_v62, 0.0  ;;  %v3063_v15 = vadd.f32 %v14540_v56, %v12463_v9  ;;  %v3054_v47 = vpop.f32.mrb[191].mxu0  ;;  %12717 = vmatmul.mubr.msk.bf16.gmra.mrb[208].mxu1 %vm3729_vm2, %v3671_v55  ;;  %v3512_v19 = vmax.f32 %v3060_v29, 0.0 }
 0x290   : > { %v5248_v17 = vmax.f32 %v4456_v13, 0.0  ;;  %v3055_v21 = vadd.f32 %v14540_v56, %v3054_v47  ;;  %v3510_v24 = vmax.f32 %v3052_v0, 0.0 }
 0x291   : > { %v14679_v22 = vpack.c.bf16 %v5250_v7, %v5249_v3  ;;  %v3513_v23 = vmax.f32 %v3063_v15, 0.0  ;;  %12857 = vmatmul.mubr.msk.bf16.gmra.mrb[40].mxu0 %vm3729_vm2, %v14625_v38 }
 0x292   : > { %v14683_v25 = vpack.c.bf16 %v5248_v17, %v5247_v48  ;;  %v3511_v60 = vmax.f32 %v3055_v21, 0.0  ;;  %v12614_v58 = vpop.f32.mrb[104].mxu1  ;;  %12860 = vmatprep.mubr.msk.bf16.mxu0 %vm3729_vm2, %v14647_v16 }
 0x293   : > { %v3673_v31 = vpack.c.bf16 %v3513_v23, %v3512_v19  ;;  %v4477_v26 = vadd.f32 %v14613_v2, %v12614_v58  ;;  %v4468_v28 = vpop.f32.mrb[105].mxu1 }
 0x294   : > { %v3672_v36 = vpack.c.bf16 %v3511_v60, %v3510_v24  ;;  %v4469_v33 = vadd.f32 %v14613_v2, %v4468_v28  ;;  %v12466_v37 = vpop.f32.mrb[192].mxu0  ;;  %v12615_v4 = vpop.f32.mrb[106].mxu1 }
 0x295   : > { %v3076_v8 = vadd.f32 %v14540_v56, %v12466_v37  ;;  %v4480_v38 = vadd.f32 %v14613_v2, %v12615_v4  ;;  %v3067_v46 = vpop.f32.mrb[193].mxu0  ;;  %v4471_v40 = vpop.f32.mrb[107].mxu1  ;;  %v5253_v45 = vmax.f32 %v4477_v26, 0.0 }
 0x296   : > { %v3068_v41 = vadd.f32 %v14540_v56, %v3067_v46  ;;  %v4472_v49 = vadd.f32 %v14613_v2, %v4471_v40  ;;  %v12467_v16 = vpop.f32.mrb[194].mxu0  ;;  %12720 = vmatprep.mubr.msk.bf16.mxu1 %vm3729_vm2, %v3672_v36  ;;  %v5251_v53 = vmax.f32 %v4469_v33, 0.0 }
 0x297   : > { %v5254_v18 = vmax.f32 %v4480_v38, 0.0  ;;  %v3079_v52 = vadd.f32 %v14540_v56, %v12467_v16  ;;  %v3070_v54 = vpop.f32.mrb[195].mxu0  ;;  %12721 = vmatmul.mubr.msk.bf16.gmra.mrb[212].mxu1 %vm3729_vm2, %v3673_v31  ;;  %v3516_v57 = vmax.f32 %v3076_v8, 0.0 }
 0x298   : > { %v5252_v55 = vmax.f32 %v4472_v49, 0.0  ;;  %v3071_v59 = vadd.f32 %v14540_v56, %v3070_v54  ;;  %v3514_v30 = vmax.f32 %v3068_v41, 0.0 }
 0x299   : > { %v14697_v61 = vpack.c.bf16 %v5254_v18, %v5253_v45  ;;  %v3517_v27 = vmax.f32 %v3079_v52, 0.0  ;;  %12861 = vmatmul.mubr.msk.bf16.gmra.mrb[44].mxu0 %vm3729_vm2, %v14643_v14 }
 0x29a   : > { %v14701_v63 = vpack.c.bf16 %v5252_v55, %v5251_v53  ;;  %v3515_v29 = vmax.f32 %v3071_v59, 0.0  ;;  %v12618_v62 = vpop.f32.mrb[108].mxu1  ;;  %12864 = vmatprep.mubr.msk.bf16.mxu0 %vm3729_vm2, %v14665_v20 }
 0x29b   : > { %v3675_v1 = vpack.c.bf16 %v3517_v27, %v3516_v57  ;;  %v4493_v5 = vadd.f32 %v14613_v2, %v12618_v62  ;;  %v4484_v0 = vpop.f32.mrb[109].mxu1 }
 0x29c   : > { %v3674_v13 = vpack.c.bf16 %v3515_v29, %v3514_v30  ;;  %v4485_v9 = vadd.f32 %v14613_v2, %v4484_v0  ;;  %v12470_v3 = vpop.f32.mrb[196].mxu0  ;;  %v12619_v7 = vpop.f32.mrb[110].mxu1 }
 0x29d   : > { %v3092_v15 = vadd.f32 %v14540_v56, %v12470_v3  ;;  %v4496_v14 = vadd.f32 %v14613_v2, %v12619_v7  ;;  %v3083_v47 = vpop.f32.mrb[197].mxu0  ;;  %v4487_v48 = vpop.f32.mrb[111].mxu1  ;;  %v5257_v19 = vmax.f32 %v4493_v5, 0.0 }
 0x29e   : > { %v3084_v17 = vadd.f32 %v14540_v56, %v3083_v47  ;;  %v4488_v21 = vadd.f32 %v14613_v2, %v4487_v48  ;;  %v12471_v20 = vpop.f32.mrb[198].mxu0  ;;  %12724 = vmatprep.mubr.msk.bf16.mxu1 %vm3729_vm2, %v3674_v13  ;;  %v5255_v58 = vmax.f32 %v4485_v9, 0.0 }
 0x29f   : > { %v5258_v23 = vmax.f32 %v4496_v14, 0.0  ;;  %v3095_v24 = vadd.f32 %v14540_v56, %v12471_v20  ;;  %v3086_v60 = vpop.f32.mrb[199].mxu0  ;;  %12725 = vmatmul.mubr.msk.bf16.gmra.mrb[216].mxu1 %vm3729_vm2, %v3675_v1  ;;  %v3520_v28 = vmax.f32 %v3092_v15, 0.0 }
 0x2a0   : > { %v5256_v31 = vmax.f32 %v4488_v21, 0.0  ;;  %v3087_v26 = vadd.f32 %v14540_v56, %v3086_v60  ;;  %v3518_v37 = vmax.f32 %v3084_v17, 0.0 }
 0x2a1   : > { %v14715_v36 = vpack.c.bf16 %v5258_v23, %v5257_v19  ;;  %v3521_v33 = vmax.f32 %v3095_v24, 0.0  ;;  %12865 = vmatmul.mubr.msk.bf16.gmra.mrb[48].mxu0 %vm3729_vm2, %v14661_v32 }
 0x2a2   : > { %v14719_v4 = vpack.c.bf16 %v5256_v31, %v5255_v58  ;;  %v3519_v8 = vmax.f32 %v3087_v26, 0.0  ;;  %v12622_v38 = vpop.f32.mrb[112].mxu1  ;;  %12868 = vmatprep.mubr.msk.bf16.mxu0 %vm3729_vm2, %v14683_v25 }
 0x2a3   : > { %v3677_v46 = vpack.c.bf16 %v3521_v33, %v3520_v28  ;;  %v4509_v40 = vadd.f32 %v14613_v2, %v12622_v38  ;;  %v4500_v41 = vpop.f32.mrb[113].mxu1 }
 0x2a4   : > { %v3676_v49 = vpack.c.bf16 %v3519_v8, %v3518_v37  ;;  %v4501_v16 = vadd.f32 %v14613_v2, %v4500_v41  ;;  %v12474_v45 = vpop.f32.mrb[200].mxu0  ;;  %v12623_v18 = vpop.f32.mrb[114].mxu1 }
 0x2a5   : > { %v3108_v52 = vadd.f32 %v14540_v56, %v12474_v45  ;;  %v4512_v32 = vadd.f32 %v14613_v2, %v12623_v18  ;;  %v3099_v54 = vpop.f32.mrb[201].mxu0  ;;  %v4503_v53 = vpop.f32.mrb[115].mxu1  ;;  %v5261_v57 = vmax.f32 %v4509_v40, 0.0 }
 0x2a6   : > { %v3100_v55 = vadd.f32 %v14540_v56, %v3099_v54  ;;  %v4504_v59 = vadd.f32 %v14613_v2, %v4503_v53  ;;  %v12475_v25 = vpop.f32.mrb[202].mxu0  ;;  %12728 = vmatprep.mubr.msk.bf16.mxu1 %vm3729_vm2, %v3676_v49  ;;  %v5259_v62 = vmax.f32 %v4501_v16, 0.0 }
 0x2a7   : > { %v5262_v27 = vmax.f32 %v4512_v32, 0.0  ;;  %v3111_v30 = vadd.f32 %v14540_v56, %v12475_v25  ;;  %v3102_v29 = vpop.f32.mrb[203].mxu0  ;;  %12729 = vmatmul.mubr.msk.bf16.gmra.mrb[220].mxu1 %vm3729_vm2, %v3677_v46  ;;  %v3524_v0 = vmax.f32 %v3108_v52, 0.0 }
 0x2a8   : > { %v5260_v1 = vmax.f32 %v4504_v59, 0.0  ;;  %v3103_v5 = vadd.f32 %v14540_v56, %v3102_v29  ;;  %v3522_v3 = vmax.f32 %v3100_v55, 0.0 }
 0x2a9   : > { %v14733_v13 = vpack.c.bf16 %v5262_v27, %v5261_v57  ;;  %v3525_v9 = vmax.f32 %v3111_v30, 0.0  ;;  %12869 = vmatmul.mubr.msk.bf16.gmra.mrb[52].mxu0 %vm3729_vm2, %v14679_v22 }
 0x2aa   : > { %v14737_v7 = vpack.c.bf16 %v5260_v1, %v5259_v62  ;;  %v3523_v15 = vmax.f32 %v3103_v5, 0.0  ;;  %v12626_v14 = vpop.f32.mrb[116].mxu1  ;;  %12872 = vmatprep.mubr.msk.bf16.mxu0 %vm3729_vm2, %v14701_v63 }
 0x2ab   : > { %v3679_v47 = vpack.c.bf16 %v3525_v9, %v3524_v0  ;;  %v4525_v48 = vadd.f32 %v14613_v2, %v12626_v14  ;;  %v4516_v17 = vpop.f32.mrb[117].mxu1 }
 0x2ac   : > { %v3678_v21 = vpack.c.bf16 %v3523_v15, %v3522_v3  ;;  %v4517_v20 = vadd.f32 %v14613_v2, %v4516_v17  ;;  %v12478_v19 = vpop.f32.mrb[204].mxu0  ;;  %v12627_v23 = vpop.f32.mrb[118].mxu1 }
 0x2ad   : > { %v3124_v24 = vadd.f32 %v14540_v56, %v12478_v19  ;;  %v4528_v22 = vadd.f32 %v14613_v2, %v12627_v23  ;;  %v3115_v60 = vpop.f32.mrb[205].mxu0  ;;  %v4519_v58 = vpop.f32.mrb[119].mxu1  ;;  %v5265_v28 = vmax.f32 %v4525_v48, 0.0 }
 0x2ae   : > { %v3116_v31 = vadd.f32 %v14540_v56, %v3115_v60  ;;  %v4520_v26 = vadd.f32 %v14613_v2, %v4519_v58  ;;  %v12479_v63 = vpop.f32.mrb[206].mxu0  ;;  %12732 = vmatprep.mubr.msk.bf16.mxu1 %vm3729_vm2, %v3678_v21  ;;  %v5263_v38 = vmax.f32 %v4517_v20, 0.0 }
 0x2af   : > { %v5266_v33 = vmax.f32 %v4528_v22, 0.0  ;;  %v3127_v37 = vadd.f32 %v14540_v56, %v12479_v63  ;;  %v3118_v8 = vpop.f32.mrb[207].mxu0  ;;  %12733 = vmatmul.mubr.msk.bf16.gmra.mrb[224].mxu1 %vm3729_vm2, %v3679_v47  ;;  %v3528_v41 = vmax.f32 %v3124_v24, 0.0 }
 0x2b0   : > { %v5264_v46 = vmax.f32 %v4520_v26, 0.0  ;;  %v3119_v40 = vadd.f32 %v14540_v56, %v3118_v8  ;;  %v3526_v45 = vmax.f32 %v3116_v31, 0.0 }
 0x2b1   : > { %v14751_v49 = vpack.c.bf16 %v5266_v33, %v5265_v28  ;;  %v3529_v16 = vmax.f32 %v3127_v37, 0.0  ;;  %12873 = vmatmul.mubr.msk.bf16.gmra.mrb[56].mxu0 %vm3729_vm2, %v14697_v61 }
 0x2b2   : > { %v14755_v18 = vpack.c.bf16 %v5264_v46, %v5263_v38  ;;  %v3527_v52 = vmax.f32 %v3119_v40, 0.0  ;;  %v12630_v32 = vpop.f32.mrb[120].mxu1  ;;  %12876 = vmatprep.mubr.msk.bf16.mxu0 %vm3729_vm2, %v14719_v4 }
 0x2b3   : > { %v3681_v54 = vpack.c.bf16 %v3529_v16, %v3528_v41  ;;  %v4541_v53 = vadd.f32 %v14613_v2, %v12630_v32  ;;  %v4532_v55 = vpop.f32.mrb[121].mxu1 }
 0x2b4   : > { %v3680_v59 = vpack.c.bf16 %v3527_v52, %v3526_v45  ;;  %v4533_v25 = vadd.f32 %v14613_v2, %v4532_v55  ;;  %v12482_v57 = vpop.f32.mrb[208].mxu0  ;;  %v12631_v27 = vpop.f32.mrb[122].mxu1 }
 0x2b5   : > { %v3140_v30 = vadd.f32 %v14540_v56, %v12482_v57  ;;  %v4544_v61 = vadd.f32 %v14613_v2, %v12631_v27  ;;  %v3131_v29 = vpop.f32.mrb[209].mxu0  ;;  %v4535_v62 = vpop.f32.mrb[123].mxu1  ;;  %v5269_v0 = vmax.f32 %v4541_v53, 0.0 }
 0x2b6   : > { %v3132_v1 = vadd.f32 %v14540_v56, %v3131_v29  ;;  %v4536_v5 = vadd.f32 %v14613_v2, %v4535_v62  ;;  %v12483_v4 = vpop.f32.mrb[210].mxu0  ;;  %12736 = vmatprep.mubr.msk.bf16.mxu1 %vm3729_vm2, %v3680_v59  ;;  %v5267_v14 = vmax.f32 %v4533_v25, 0.0 }
 0x2b7   : > { %v5270_v9 = vmax.f32 %v4544_v61, 0.0  ;;  %v3143_v3 = vadd.f32 %v14540_v56, %v12483_v4  ;;  %v3134_v15 = vpop.f32.mrb[211].mxu0  ;;  %12737 = vmatmul.mubr.msk.bf16.gmra.mrb[228].mxu1 %vm3729_vm2, %v3681_v54  ;;  %v3532_v17 = vmax.f32 %v3140_v30, 0.0 }
 0x2b8   : > { %v5268_v47 = vmax.f32 %v4536_v5, 0.0  ;;  %v3135_v48 = vadd.f32 %v14540_v56, %v3134_v15  ;;  %v3530_v19 = vmax.f32 %v3132_v1, 0.0 }
 0x2b9   : > { %v14769_v21 = vpack.c.bf16 %v5270_v9, %v5269_v0  ;;  %v3533_v20 = vmax.f32 %v3143_v3, 0.0  ;;  %12877 = vmatmul.mubr.msk.bf16.gmra.mrb[60].mxu0 %vm3729_vm2, %v14715_v36 }
 0x2ba   : > { %v14773_v23 = vpack.c.bf16 %v5268_v47, %v5267_v14  ;;  %v3531_v24 = vmax.f32 %v3135_v48, 0.0  ;;  %v12634_v22 = vpop.f32.mrb[124].mxu1  ;;  %12880 = vmatprep.mubr.msk.bf16.mxu0 %vm3729_vm2, %v14737_v7 }
 0x2bb   : > { %v3683_v60 = vpack.c.bf16 %v3533_v20, %v3532_v17  ;;  %v4557_v58 = vadd.f32 %v14613_v2, %v12634_v22  ;;  %v4548_v31 = vpop.f32.mrb[125].mxu1 }
 0x2bc   : > { %v3682_v26 = vpack.c.bf16 %v3531_v24, %v3530_v19  ;;  %v4549_v63 = vadd.f32 %v14613_v2, %v4548_v31  ;;  %v12486_v28 = vpop.f32.mrb[212].mxu0  ;;  %v12635_v33 = vpop.f32.mrb[126].mxu1 }
 0x2bd   : > { %v3156_v37 = vadd.f32 %v14540_v56, %v12486_v28  ;;  %v4560_v36 = vadd.f32 %v14613_v2, %v12635_v33  ;;  %v3147_v8 = vpop.f32.mrb[213].mxu0  ;;  %v4551_v38 = vpop.f32.mrb[127].mxu1  ;;  %v5273_v41 = vmax.f32 %v4557_v58, 0.0 }
 0x2be   : > { %v3148_v46 = vadd.f32 %v14540_v56, %v3147_v8  ;;  %v4552_v40 = vadd.f32 %v14613_v2, %v4551_v38  ;;  %v12487_v7 = vpop.f32.mrb[214].mxu0  ;;  %12740 = vmatprep.mubr.msk.bf16.mxu1 %vm3729_vm2, %v3682_v26  ;;  %v5271_v32 = vmax.f32 %v4549_v63, 0.0 }
 0x2bf   : > { %v5274_v16 = vmax.f32 %v4560_v36, 0.0  ;;  %v3159_v45 = vadd.f32 %v14540_v56, %v12487_v7  ;;  %v3150_v52 = vpop.f32.mrb[215].mxu0  ;;  %12741 = vmatmul.mubr.msk.bf16.gmra.mrb[232].mxu1 %vm3729_vm2, %v3683_v60  ;;  %v3536_v55 = vmax.f32 %v3156_v37, 0.0 }
 0x2c0   : > { %v5272_v54 = vmax.f32 %v4552_v40, 0.0  ;;  %v3151_v53 = vadd.f32 %v14540_v56, %v3150_v52  ;;  %v3534_v57 = vmax.f32 %v3148_v46, 0.0 }
 0x2c1   : > { %v14787_v59 = vpack.c.bf16 %v5274_v16, %v5273_v41  ;;  %v3537_v25 = vmax.f32 %v3159_v45, 0.0  ;;  %12881 = vmatmul.mubr.msk.bf16.gmra.mrb[64].mxu0 %vm3729_vm2, %v14733_v13 }
 0x2c2   : > { %v14791_v27 = vpack.c.bf16 %v5272_v54, %v5271_v32  ;;  %v3535_v30 = vmax.f32 %v3151_v53, 0.0  ;;  %v12638_v61 = vpop.f32.mrb[128].mxu1  ;;  %12884 = vmatprep.mubr.msk.bf16.mxu0 %vm3729_vm2, %v14755_v18 }
 0x2c3   : > { %v3685_v29 = vpack.c.bf16 %v3537_v25, %v3536_v55  ;;  %v4573_v62 = vadd.f32 %v14613_v2, %v12638_v61  ;;  %v4564_v1 = vpop.f32.mrb[129].mxu1 }
 0x2c4   : > { %v3684_v5 = vpack.c.bf16 %v3535_v30, %v3534_v57  ;;  %v4565_v4 = vadd.f32 %v14613_v2, %v4564_v1  ;;  %v12490_v0 = vpop.f32.mrb[216].mxu0  ;;  %v12639_v9 = vpop.f32.mrb[130].mxu1 }
 0x2c5   : > { %v3172_v3 = vadd.f32 %v14540_v56, %v12490_v0  ;;  %v4576_v13 = vadd.f32 %v14613_v2, %v12639_v9  ;;  %v3163_v15 = vpop.f32.mrb[217].mxu0  ;;  %v4567_v14 = vpop.f32.mrb[131].mxu1  ;;  %v5277_v17 = vmax.f32 %v4573_v62, 0.0 }
 0x2c6   : > { %v3164_v47 = vadd.f32 %v14540_v56, %v3163_v15  ;;  %v4568_v48 = vadd.f32 %v14613_v2, %v4567_v14  ;;  %v12491_v18 = vpop.f32.mrb[218].mxu0  ;;  %12744 = vmatprep.mubr.msk.bf16.mxu1 %vm3729_vm2, %v3684_v5  ;;  %v5275_v22 = vmax.f32 %v4565_v4, 0.0 }
 0x2c7   : > { %v5278_v20 = vmax.f32 %v4576_v13, 0.0  ;;  %v3175_v19 = vadd.f32 %v14540_v56, %v12491_v18  ;;  %v3166_v24 = vpop.f32.mrb[219].mxu0  ;;  %12745 = vmatmul.mubr.msk.bf16.gmra.mrb[236].mxu1 %vm3729_vm2, %v3685_v29  ;;  %v3540_v31 = vmax.f32 %v3172_v3, 0.0 }
 0x2c8   : > { %v5276_v60 = vmax.f32 %v4568_v48, 0.0  ;;  %v3167_v58 = vadd.f32 %v14540_v56, %v3166_v24  ;;  %v3538_v28 = vmax.f32 %v3164_v47, 0.0 }
 0x2c9   : > { %v14805_v26 = vpack.c.bf16 %v5278_v20, %v5277_v17  ;;  %v3541_v63 = vmax.f32 %v3175_v19, 0.0  ;;  %12885 = vmatmul.mubr.msk.bf16.gmra.mrb[68].mxu0 %vm3729_vm2, %v14751_v49  ;;  %v13601_v20 = vld [vmem:[%s13690_s17] ss:$0 sm:$0xff] }
 0x2ca   : > { %v14809_v33 = vpack.c.bf16 %v5276_v60, %v5275_v22  ;;  %v3539_v37 = vmax.f32 %v3167_v58, 0.0  ;;  %v12642_v36 = vpop.f32.mrb[132].mxu1  ;;  %12888 = vmatprep.mubr.msk.bf16.mxu0 %vm3729_vm2, %v14773_v23 }
 0x2cb   : > { %v3687_v8 = vpack.c.bf16 %v3541_v63, %v3540_v31  ;;  %v4589_v38 = vadd.f32 %v14613_v2, %v12642_v36  ;;  %v4580_v46 = vpop.f32.mrb[133].mxu1 }
 0x2cc   : > { %v3686_v40 = vpack.c.bf16 %v3539_v37, %v3538_v28  ;;  %v4581_v7 = vadd.f32 %v14613_v2, %v4580_v46  ;;  %v12494_v41 = vpop.f32.mrb[220].mxu0  ;;  %v12643_v16 = vpop.f32.mrb[134].mxu1 }
 0x2cd   : > { %v3188_v45 = vadd.f32 %v14540_v56, %v12494_v41  ;;  %v4592_v49 = vadd.f32 %v14613_v2, %v12643_v16  ;;  %v3179_v52 = vpop.f32.mrb[221].mxu0  ;;  %v4583_v32 = vpop.f32.mrb[135].mxu1  ;;  %v5281_v55 = vmax.f32 %v4589_v38, 0.0 }
 0x2ce   : > { %v3180_v54 = vadd.f32 %v14540_v56, %v3179_v52  ;;  %v4584_v53 = vadd.f32 %v14613_v2, %v4583_v32  ;;  %v12495_v23 = vpop.f32.mrb[222].mxu0  ;;  %12748 = vmatprep.mubr.msk.bf16.mxu1 %vm3729_vm2, %v3686_v40  ;;  %v5279_v61 = vmax.f32 %v4581_v7, 0.0 }
 0x2cf   : > { %v5282_v25 = vmax.f32 %v4592_v49, 0.0  ;;  %v3191_v57 = vadd.f32 %v14540_v56, %v12495_v23  ;;  %v3182_v30 = vpop.f32.mrb[223].mxu0  ;;  %12749 = vmatmul.mubr.msk.bf16.gmra.mrb[240].mxu1 %vm3729_vm2, %v3687_v8  ;;  %v3544_v1 = vmax.f32 %v3188_v45, 0.0 }
 0x2d0   : > { %v5280_v29 = vmax.f32 %v4584_v53, 0.0  ;;  %v3183_v62 = vadd.f32 %v14540_v56, %v3182_v30  ;;  %v3542_v0 = vmax.f32 %v3180_v54, 0.0 }
 0x2d1   : > { %v14823_v5 = vpack.c.bf16 %v5282_v25, %v5281_v55  ;;  %v3545_v4 = vmax.f32 %v3191_v57, 0.0  ;;  %12889 = vmatmul.mubr.msk.bf16.gmra.mrb[72].mxu0 %vm3729_vm2, %v14769_v21 }
 0x2d2   : > { %v14827_v9 = vpack.c.bf16 %v5280_v29, %v5279_v61  ;;  %v3543_v3 = vmax.f32 %v3183_v62, 0.0  ;;  %v12646_v13 = vpop.f32.mrb[136].mxu1  ;;  %12892 = vmatprep.mubr.msk.bf16.mxu0 %vm3729_vm2, %v14791_v27 }
 0x2d3   : > { %v3689_v15 = vpack.c.bf16 %v3545_v4, %v3544_v1  ;;  %v4605_v14 = vadd.f32 %v14613_v2, %v12646_v13  ;;  %v4596_v56 = vpop.f32.mrb[137].mxu1 }
 0x2d4   : > { %v3688_v47 = vpack.c.bf16 %v3543_v3, %v3542_v0  ;;  %v4597_v48 = vadd.f32 %v14613_v2, %v4596_v56  ;;  %v12498_v18 = vpop.f32.mrb[224].mxu0  ;;  %v12647_v17 = vpop.f32.mrb[138].mxu1 }
 0x2d5   : > { %v3204_v19 = vadd.f32 %v13601_v20, %v12498_v18  ;;  %v4608_v21 = vadd.f32 %v14613_v2, %v12647_v17  ;;  %v3195_v24 = vpop.f32.mrb[225].mxu0  ;;  %v4599_v22 = vpop.f32.mrb[139].mxu1  ;;  %v5285_v27 = vmax.f32 %v4605_v14, 0.0 }
 0x2d6   : > { %v3196_v60 = vadd.f32 %v13601_v20, %v3195_v24  ;;  %v4600_v58 = vadd.f32 %v14613_v2, %v4599_v22  ;;  %v12499_v31 = vpop.f32.mrb[226].mxu0  ;;  %12752 = vmatprep.mubr.msk.bf16.mxu1 %vm3729_vm2, %v3688_v47  ;;  %v5283_v36 = vmax.f32 %v4597_v48, 0.0  ;;  %v14861_v24 = vld [vmem:[%s13710_s3] ss:$0 sm:$0xff] }
 0x2d7   : > { %v5286_v63 = vmax.f32 %v4608_v21, 0.0  ;;  %v3207_v28 = vadd.f32 %v13601_v20, %v12499_v31  ;;  %v3198_v37 = vpop.f32.mrb[227].mxu0  ;;  %12753 = vmatmul.mubr.msk.bf16.gmra.mrb[244].mxu1 %vm3729_vm2, %v3689_v15  ;;  %v3548_v46 = vmax.f32 %v3204_v19, 0.0 }
 0x2d8   : > { %v5284_v8 = vmax.f32 %v4600_v58, 0.0  ;;  %v3199_v38 = vadd.f32 %v13601_v20, %v3198_v37  ;;  %v3546_v41 = vmax.f32 %v3196_v60, 0.0 }
 0x2d9   : > { %v14838_v40 = vpack.c.bf16 %v5286_v63, %v5285_v27  ;;  %v3549_v7 = vmax.f32 %v3207_v28, 0.0  ;;  %12893 = vmatmul.mubr.msk.bf16.gmra.mrb[76].mxu0 %vm3729_vm2, %v14787_v59 }
 0x2da   : > { %v14842_v16 = vpack.c.bf16 %v5284_v8, %v5283_v36  ;;  %v3547_v45 = vmax.f32 %v3199_v38, 0.0  ;;  %v12650_v49 = vpop.f32.mrb[140].mxu1  ;;  %12896 = vmatprep.mubr.msk.bf16.mxu0 %vm3729_vm2, %v14809_v33  ;;  %v13355_v8 = vld [vmem:[%s13720_s14 + $0x8] sm:$0xff]  }
 0x2db   : > { %v3691_v52 = vpack.c.bf16 %v3549_v7, %v3548_v46  ;;  %v4621_v32 = vadd.f32 %v14613_v2, %v12650_v49  ;;  %v4612_v54 = vpop.f32.mrb[141].mxu1  ;;  %13050 = vmatprep.subr.bf16.mxu1 %v13355_v8 }
 0x2dc   : > { %v3690_v53 = vpack.c.bf16 %v3547_v45, %v3546_v41  ;;  %v4613_v23 = vadd.f32 %v14613_v2, %v4612_v54  ;;  %v12502_v55 = vpop.f32.mrb[228].mxu0  ;;  %v12651_v25 = vpop.f32.mrb[142].mxu1  ;;  %13051 = vmatpush3.bf16.msra.mxu1 %v13355_v8 }
 0x2dd   : > { %v3220_v57 = vadd.f32 %v13601_v20, %v12502_v55  ;;  %v4624_v59 = vadd.f32 %v14613_v2, %v12651_v25  ;;  %v3211_v30 = vpop.f32.mrb[229].mxu0  ;;  %v4615_v61 = vpop.f32.mrb[143].mxu1  ;;  %v5289_v33 = vmax.f32 %v4621_v32, 0.0 }
 0x2de   : > { %v3212_v29 = vadd.f32 %v13601_v20, %v3211_v30  ;;  %v4616_v62 = vadd.f32 %v14613_v2, %v4615_v61  ;;  %v12503_v1 = vpop.f32.mrb[230].mxu0  ;;  %12756 = vmatprep.mubr.msk.bf16.mxu1 %vm3729_vm2, %v3690_v53  ;;  %v5287_v13 = vmax.f32 %v4613_v23, 0.0 }
 0x2df   : > { %v5290_v4 = vmax.f32 %v4624_v59, 0.0  ;;  %v3223_v0 = vadd.f32 %v13601_v20, %v12503_v1  ;;  %v3214_v3 = vpop.f32.mrb[231].mxu0  ;;  %12757 = vmatmul.mubr.msk.bf16.gmra.mrb[248].mxu1 %vm3729_vm2, %v3691_v52  ;;  %v3552_v56 = vmax.f32 %v3220_v57, 0.0 }
 0x2e0   : > { %v5288_v15 = vmax.f32 %v4616_v62, 0.0  ;;  %v3215_v14 = vadd.f32 %v13601_v20, %v3214_v3  ;;  %v3550_v18 = vmax.f32 %v3212_v29, 0.0 }
 0x2e1   : > { %v14852_v47 = vpack.c.bf16 %v5290_v4, %v5289_v33  ;;  %v3553_v48 = vmax.f32 %v3223_v0, 0.0  ;;  %12897 = vmatmul.mubr.msk.bf16.gmra.mrb[80].mxu0 %vm3729_vm2, %v14805_v26 }
 0x2e2   : > { %v14856_v17 = vpack.c.bf16 %v5288_v15, %v5287_v13  ;;  %v3551_v19 = vmax.f32 %v3215_v14, 0.0  ;;  %v12654_v21 = vpop.f32.mrb[144].mxu1  ;;  %12900 = vmatprep.mubr.msk.bf16.mxu0 %vm3729_vm2, %v14827_v9 }
 0x2e3   : > { %v3693_v22 = vpack.c.bf16 %v3553_v48, %v3552_v56  ;;  %v4637_v20 = vadd.f32 %v14613_v2, %v12654_v21  ;;  %v4628_v60 = vpop.f32.mrb[145].mxu1 }
 0x2e4   : > { %v3692_v58 = vpack.c.bf16 %v3551_v19, %v3550_v18  ;;  %v4629_v31 = vadd.f32 %v14613_v2, %v4628_v60  ;;  %v12655_v27 = vpop.f32.mrb[146].mxu1  ;;  %v12794_v26 = vpop.f32.mrb[232].mxu0 }
 0x2e5   : > { %v4640_v63 = vadd.f32 %v14613_v2, %v12655_v27  ;;  %v6005_v28 = vadd.f32 %v12794_v26, %v14861_v24  ;;  %v4631_v37 = vpop.f32.mrb[147].mxu1  ;;  %v5996_v36 = vpop.f32.mrb[233].mxu0  ;;  %v5293_v7 = vmax.f32 %v4637_v20, 0.0 }
 0x2e6   : > { %v4632_v9 = vadd.f32 %v14613_v2, %v4631_v37  ;;  %v5997_v38 = vadd.f32 %v14861_v24, %v5996_v36  ;;  %12760 = vmatprep.mubr.msk.bf16.mxu1 %vm3729_vm2, %v3692_v58  ;;  %v12795_v46 = vpop.f32.mrb[234].mxu0  ;;  %v5291_v52 = vmax.f32 %v4629_v31, 0.0 }
 0x2e7   : > { %v5294_v41 = vmax.f32 %v4640_v63, 0.0  ;;  %v6008_v45 = vadd.f32 %v12795_v46, %v14861_v24  ;;  %12761 = vmatmul.mubr.msk.bf16.gmra.mrb[252].mxu1 %vm3729_vm2, %v3693_v22  ;;  %v5999_v49 = vpop.f32.mrb[235].mxu0  ;;  %v7021_v55 = vmax.f32 %v6005_v28, 0.0  ;;  %v14910_v46 = vld [vmem:[%s13700_s25] ss:$0 sm:$0xff] }
 0x2e8   : > { %v5292_v32 = vmax.f32 %v4632_v9, 0.0  ;;  %v7019_v54 = vmax.f32 %v5997_v38, 0.0  ;;  %v6000_v53 = vadd.f32 %v14861_v24, %v5999_v49  ;;  %12764 = vmatprep.mubr.msk.bf16.mxu1 %vm3729_vm2, %v14082_v43 }
 0x2e9   : > { %v14876_v23 = vpack.c.bf16 %v5294_v41, %v5293_v7  ;;  %12901 = vmatmul.mubr.msk.bf16.gmra.mrb[84].mxu0 %vm3729_vm2, %v14823_v5  ;;  %v7022_v57 = vmax.f32 %v6008_v45, 0.0  ;;  %v7279_v5 = vsel %vm7275_vm3, %v7021_v55, -inf }
 0x2ea   : > { %v14880_v25 = vpack.c.bf16 %v5292_v32, %v5291_v52  ;;  %v7020_v59 = vmax.f32 %v6000_v53, 0.0  ;;  %v12658_v30 = vpop.f32.mrb[148].mxu1  ;;  %12904 = vmatprep.mubr.msk.bf16.mxu0 %vm3729_vm2, %v14842_v16  ;;  %v7276_v43 = vsel %vm7275_vm3, %v7019_v54, -inf }
 0x2eb   : > { %v4653_v61 = vadd.f32 %v14613_v2, %v12658_v30  ;;  %v4644_v29 = vpop.f32.mrb[149].mxu1  ;;  %v7281_v14 = vsel %vm7275_vm3, %v7022_v57, -inf }
 0x2ec   : > { %v7277_v62 = vsel %vm7275_vm3, %v7020_v59, -inf  ;;  %v4645_v1 = vadd.f32 %v14613_v2, %v4644_v29  ;;  %v12659_v33 = vpop.f32.mrb[150].mxu1  ;;  %v12798_v4 = vpop.f32.mrb[236].mxu0 }
 0x2ed   : > { %v7278_v0 = vmax.f32 %v7276_v43, %v7277_v62  ;;  %v4656_v3 = vadd.f32 %v14613_v2, %v12659_v33  ;;  %v6021_v13 = vadd.f32 %v12798_v4, %v14861_v24  ;;  %v4647_v15 = vpop.f32.mrb[151].mxu1  ;;  %v6012_v16 = vpop.f32.mrb[237].mxu0  ;;  %v5297_v56 = vmax.f32 %v4653_v61, 0.0 }
 0x2ee   : > { %v4648_v48 = vadd.f32 %v14613_v2, %v4647_v15  ;;  %v6013_v18 = vadd.f32 %v14861_v24, %v6012_v16  ;;  %v12799_v19 = vpop.f32.mrb[238].mxu0  ;;  %v5295_v31 = vmax.f32 %v4645_v1, 0.0 }
 0x2ef   : > { %v7280_v21 = vmax.f32 %v7278_v0, %v7279_v5  ;;  %v5298_v22 = vmax.f32 %v4656_v3, 0.0  ;;  %v7025_v20 = vmax.f32 %v6021_v13, 0.0  ;;  %v6024_v60 = vadd.f32 %v12799_v19, %v14861_v24  ;;  %12765 = vmatmul.mubr.msk.bf16.gmra.mrb[0].mxu1 %vm3729_vm2, %v14080_v39  ;;  %v6015_v58 = vpop.f32.mrb[239].mxu0 }
 0x2f0   : > { %v5296_v27 = vmax.f32 %v4648_v48, 0.0  ;;  %v7023_v26 = vmax.f32 %v6013_v18, 0.0  ;;  %v6016_v63 = vadd.f32 %v14861_v24, %v6015_v58  ;;  %12768 = vmatprep.mubr.msk.bf16.mxu1 %vm3729_vm2, %v14100_v11 }
 0x2f1   : > { %v7282_v2 = vmax.f32 %v7280_v21, %v7281_v14  ;;  %v14900_v28 = vpack.c.bf16 %v5298_v22, %v5297_v56  ;;  %v7026_v37 = vmax.f32 %v6024_v60, 0.0  ;;  %12905 = vmatmul.mubr.msk.bf16.gmra.mrb[88].mxu0 %vm3729_vm2, %v14838_v40  ;;  %v7292_v38 = vsel %vm7275_vm3, %v7025_v20, -inf }
 0x2f2   : > { %v14904_v36 = vpack.c.bf16 %v5296_v27, %v5295_v31  ;;  %v7024_v39 = vmax.f32 %v6016_v63, 0.0  ;;  %v12662_v8 = vpop.f32.mrb[152].mxu1  ;;  %12908 = vmatprep.mubr.msk.bf16.mxu0 %vm3729_vm2, %v14856_v17  ;;  %v7289_v41 = vsel %vm7275_vm3, %v7023_v26, -inf }
 0x2f3   : > { %v7283_v9 = vrot.slane %v7282_v2, 4  ;;  %v4669_v11 = vadd.f32 %v14910_v46, %v12662_v8  ;;  %v4660_v7 = vpop.f32.mrb[153].mxu1  ;;  %v7294_v45 = vsel %vm7275_vm3, %v7026_v37, -inf }
 0x2f4   : > { %v7290_v40 = vsel %vm7275_vm3, %v7024_v39, -inf  ;;  %v4661_v49 = vadd.f32 %v14910_v46, %v4660_v7  ;;  %v12663_v52 = vpop.f32.mrb[154].mxu1  ;;  %v12802_v32 = vpop.f32.mrb[240].mxu0 }
 0x2f5   : > { %v7284_v54 = vmax.f32 %v7282_v2, %v7283_v9  ;;  %v7291_v17 = vmax.f32 %v7289_v41, %v7290_v40  ;;  %v5301_v53 = vmax.f32 %v4669_v11, 0.0  ;;  %v4672_v55 = vadd.f32 %v14910_v46, %v12663_v52  ;;  %v4663_v57 = vpop.f32.mrb[155].mxu1  ;;  %v6028_v59 = vpop.f32.mrb[241].mxu0 }
 0x2f6   : > { %v5299_v30 = vmax.f32 %v4661_v49, 0.0  ;;  %v6037_v61 = vadd.f32 %v12802_v32, %v14861_v24  ;;  %v4664_v29 = vadd.f32 %v14910_v46, %v4663_v57  ;;  %v6029_v43 = vadd.f32 %v14861_v24, %v6028_v59  ;;  %v12803_v62 = vpop.f32.mrb[242].mxu0 }
 0x2f7   : > { %v7285_v1 = vrot.slane %v7284_v54, 2  ;;  %v7293_v33 = vmax.f32 %v7291_v17, %v7292_v38  ;;  %v5302_v4 = vmax.f32 %v4672_v55, 0.0  ;;  %v6040_v5 = vadd.f32 %v12803_v62, %v14861_v24  ;;  %12769 = vmatmul.mubr.msk.bf16.gmra.mrb[4].mxu1 %vm3729_vm2, %v14098_v6  ;;  %v6031_v0 = vpop.f32.mrb[243].mxu0 }
 0x2f8   : > { %v7029_v3 = vmax.f32 %v6037_v61, 0.0  ;;  %v5300_v13 = vmax.f32 %v4664_v29, 0.0  ;;  %v7027_v15 = vmax.f32 %v6029_v43, 0.0  ;;  %v6032_v16 = vadd.f32 %v14861_v24, %v6031_v0  ;;  %12772 = vmatprep.mubr.msk.bf16.mxu1 %vm3729_vm2, %v14118_v44 }
 0x2f9   : > { %v7286_v14 = vmax.f32 %v7284_v54, %v7285_v1  ;;  %v7295_v56 = vmax.f32 %v7293_v33, %v7294_v45  ;;  %v14927_v48 = vpack.c.bf16 %v5302_v4, %v5301_v53  ;;  %v7030_v18 = vmax.f32 %v6040_v5, 0.0  ;;  %12909 = vmatmul.mubr.msk.bf16.gmra.mrb[92].mxu0 %vm3729_vm2, %v14852_v47 }
 0x2fa   : > { %v14931_v19 = vpack.c.bf16 %v5300_v13, %v5299_v30  ;;  %v7028_v6 = vmax.f32 %v6032_v16, 0.0  ;;  %v12666_v21 = vpop.f32.mrb[156].mxu1  ;;  %12912 = vmatprep.mubr.msk.bf16.mxu0 %vm3729_vm2, %v14880_v25  ;;  %v7305_v60 = vsel %vm7275_vm3, %v7029_v3, -inf  ;;  %v7302_v31 = vsel %vm7275_vm3, %v7027_v15, -inf }
 0x2fb   : > { %v7287_v22 = vrot.slane %v7286_v14, 1  ;;  %v7296_v20 = vrot.slane %v7295_v56, 4  ;;  %v4685_v44 = vadd.f32 %v14910_v46, %v12666_v21  ;;  %v4676_v58 = vpop.f32.mrb[157].mxu1  ;;  %v7307_v27 = vsel %vm7275_vm3, %v7030_v18, -inf }
 0x2fc   : > { %v7303_v47 = vsel %vm7275_vm3, %v7028_v6, -inf  ;;  %v4677_v26 = vadd.f32 %v14910_v46, %v4676_v58  ;;  %v12667_v63 = vpop.f32.mrb[158].mxu1  ;;  %v12806_v2 = vpop.f32.mrb[244].mxu0 }
 0x2fd   : > { %v7288_v37 = vmax.f32 %v7286_v14, %v7287_v22  ;;  %v7297_v39 = vmax.f32 %v7295_v56, %v7296_v20  ;;  %v7304_v25 = vmax.f32 %v7302_v31, %v7303_v47  ;;  %v5305_v8 = vmax.f32 %v4685_v44, 0.0  ;;  %v4679_v9 = vpop.f32.mrb[159].mxu1  ;;  %v6044_v38 = vpop.f32.mrb[245].mxu0 }
 0x2fe   : > { %v5303_v11 = vmax.f32 %v4677_v26, 0.0  ;;  %v4688_v7 = vadd.f32 %v14910_v46, %v12667_v63  ;;  %v6053_v41 = vadd.f32 %v12806_v2, %v14861_v24  ;;  %v4680_v45 = vadd.f32 %v14910_v46, %v4679_v9  ;;  %v12807_v40 = vpop.f32.mrb[246].mxu0 }
 0x2ff   : > { %v8116_v49 = vpack.c.bf16 %v7288_v37, %v7288_v37  ;;  %v7298_v52 = vrot.slane %v7297_v39, 2  ;;  %v7306_v32 = vmax.f32 %v7304_v25, %v7305_v60  ;;  %v6045_v54 = vadd.f32 %v14861_v24, %v6044_v38  ;;  %12773 = vmatmul.mubr.msk.bf16.gmra.mrb[8].mxu1 %vm3729_vm2, %v14116_v42  ;;  %v6047_v17 = vpop.f32.mrb[247].mxu0 }
 0x300   : > { %v5306_v53 = vmax.f32 %v4688_v7, 0.0  ;;  %v7033_v55 = vmax.f32 %v6053_v41, 0.0  ;;  %v5304_v57 = vmax.f32 %v4680_v45, 0.0  ;;  %v6056_v59 = vadd.f32 %v12807_v40, %v14861_v24  ;;  %12776 = vmatprep.mubr.msk.bf16.mxu1 %vm3729_vm2, %v14136_v12 }
 0x301   : > { %v7299_v30 = vmax.f32 %v7297_v39, %v7298_v52  ;;  %v7308_v61 = vmax.f32 %v7306_v32, %v7307_v27  ;;  %v7031_v29 = vmax.f32 %v6045_v54, 0.0  ;;  %12913 = vmatmul.mubr.msk.bf16.gmra.mrb[96].mxu0 %vm3729_vm2, %v14876_v23  ;;  %v8424_v43 = vunpack.c.l.b16 %v8116_v49 }
 0x302   : > { %v14952_v62 = vpack.c.bf16 %v5306_v53, %v5305_v8  ;;  %v14954_v42 = vpack.c.bf16 %v5304_v57, %v5303_v11  ;;  %v12670_v1 = vpop.f32.mrb[160].mxu1  ;;  %12916 = vmatprep.mubr.msk.bf16.mxu0 %vm3729_vm2, %v14904_v36  ;;  %v7318_v12 = vsel %vm7275_vm3, %v7033_v55, -inf  ;;  %v6048_v5 = vadd.f32 %v14861_v24, %v6047_v17 }
 0x303   : > { %v7300_v33 = vrot.slane %v7299_v30, 1  ;;  %v7309_v4 = vrot.slane %v7308_v61, 4  ;;  %v4692_v0 = vpop.f32.mrb[161].mxu1  ;;  %v7315_v3 = vsel %vm7275_vm3, %v7031_v29, -inf  ;;  %v7034_v23 = vmax.f32 %v6056_v59, 0.0 }
 0x304   : > { %v4701_v13 = vadd.f32 %v14910_v46, %v12670_v1  ;;  %v4693_v15 = vadd.f32 %v14910_v46, %v4692_v0  ;;  %v12671_v16 = vpop.f32.mrb[162].mxu1  ;;  %v12810_v14 = vpop.f32.mrb[248].mxu0  ;;  %v7032_v6 = vmax.f32 %v6048_v5, 0.0 }
 0x305   : > { %v7301_v56 = vmax.f32 %v7299_v30, %v7300_v33  ;;  %v7310_v18 = vmax.f32 %v7308_v61, %v7309_v4  ;;  %v4704_v36 = vadd.f32 %v14910_v46, %v12671_v16  ;;  %v4695_v21 = vpop.f32.mrb[163].mxu1  ;;  %v6060_v22 = vpop.f32.mrb[249].mxu0  ;;  %v6069_v44 = vadd.f32 %v12810_v14, %v14861_v24 }
 0x306   : > { %v5309_v20 = vmax.f32 %v4701_v13, 0.0  ;;  %v5307_v60 = vmax.f32 %v4693_v15, 0.0  ;;  %v4696_v58 = vadd.f32 %v14910_v46, %v4695_v21  ;;  %v12811_v31 = vpop.f32.mrb[250].mxu0  ;;  %v7316_v26 = vsel %vm7275_vm3, %v7032_v6, -inf }
 0x307   : > { %v8117_v27 = vpack.c.bf16 %v7301_v56, %v7301_v56  ;;  %v7311_v47 = vrot.slane %v7310_v18, 2  ;;  %v5310_v63 = vmax.f32 %v4704_v36, 0.0  ;;  %12777 = vmatmul.mubr.msk.bf16.gmra.mrb[12].mxu1 %vm3729_vm2, %v14134_v10  ;;  %v6063_v2 = vpop.f32.mrb[251].mxu0  ;;  %v7317_v37 = vmax.f32 %v7315_v3, %v7316_v26 }
 0x308   : > { %v7037_v39 = vmax.f32 %v6069_v44, 0.0  ;;  %v5308_v25 = vmax.f32 %v4696_v58, 0.0  ;;  %v6061_v8 = vadd.f32 %v14861_v24, %v6060_v22  ;;  %12780 = vmatprep.mubr.msk.bf16.mxu1 %vm3729_vm2, %v14150_v35  ;;  %v6072_v7 = vadd.f32 %v12811_v31, %v14861_v24 }
 0x309   : > { %v8425_v9 = vunpack.c.l.b16 %v8117_v27  ;;  %v7312_v38 = vmax.f32 %v7310_v18, %v7311_v47  ;;  %v14972_v11 = vpack.c.bf16 %v5310_v63, %v5309_v20  ;;  %12917 = vmatmul.mubr.msk.bf16.gmra.mrb[100].mxu0 %vm3729_vm2, %v14900_v28  ;;  %v7320_v10 = vsel %vm7275_vm3, %v7034_v23, -inf }
 0x30a   : > { %v7319_v41 = vmax.f32 %v7317_v37, %v7318_v12  ;;  %v14978_v45 = vpack.c.bf16 %v5308_v25, %v5307_v60  ;;  %v7035_v40 = vmax.f32 %v6061_v8, 0.0  ;;  %v12674_v49 = vpop.f32.mrb[164].mxu1  ;;  %12920 = vmatprep.mubr.msk.bf16.mxu0 %vm3729_vm2, %v14931_v19  ;;  %v7331_v32 = vsel %vm7275_vm3, %v7037_v39, -inf }
 0x30b   : > { %v8489_v35 = vsel %vm8488_vm4, %v8425_v9, %v8424_v43  ;;  %v7313_v52 = vrot.slane %v7312_v38, 1  ;;  %v6064_v54 = vadd.f32 %v14861_v24, %v6063_v2  ;;  %v4708_v17 = vpop.f32.mrb[165].mxu1  ;;  %v7038_v28 = vmax.f32 %v6072_v7, 0.0 }
 0x30c   : > { %v7321_v53 = vmax.f32 %v7319_v41, %v7320_v10  ;;  %v4717_v55 = vadd.f32 %v14910_v46, %v12674_v49  ;;  %v4709_v57 = vadd.f32 %v14910_v46, %v4708_v17  ;;  %v12675_v59 = vpop.f32.mrb[166].mxu1  ;;  %v12814_v30 = vpop.f32.mrb[252].mxu0  ;;  %v7328_v29 = vsel %vm7275_vm3, %v7035_v40, -inf }
 0x30d   : > { %v7314_v61 = vmax.f32 %v7312_v38, %v7313_v52  ;;  %v7036_v19 = vmax.f32 %v6064_v54, 0.0  ;;  %v4720_v43 = vadd.f32 %v14910_v46, %v12675_v59  ;;  %v4711_v1 = vpop.f32.mrb[167].mxu1  ;;  %v6076_v33 = vpop.f32.mrb[253].mxu0  ;;  %v6085_v0 = vadd.f32 %v12814_v30, %v14861_v24 }
 0x30e   : > { %v7322_v4 = vrot.slane %v7321_v53, 4  ;;  %v5313_v12 = vmax.f32 %v4717_v55, 0.0  ;;  %v5311_v5 = vmax.f32 %v4709_v57, 0.0  ;;  %v12815_v3 = vpop.f32.mrb[254].mxu0  ;;  %v4712_v16 = vadd.f32 %v14910_v46, %v4711_v1 }
 0x30f   : > { %v8118_v23 = vpack.c.bf16 %v7314_v61, %v7314_v61  ;;  %v7329_v13 = vsel %vm7275_vm3, %v7036_v19, -inf  ;;  %v5314_v15 = vmax.f32 %v4720_v43, 0.0  ;;  %12781 = vmatmul.mubr.msk.bf16.gmra.mrb[16].mxu1 %vm3729_vm2, %v14148_v34  ;;  %v6079_v14 = vpop.f32.mrb[255].mxu0  ;;  %v7041_v6 = vmax.f32 %v6085_v0, 0.0 }
 0x310   : > { %v7323_v56 = vmax.f32 %v7321_v53, %v7322_v4  ;;  %v7330_v18 = vmax.f32 %v7328_v29, %v7329_v13  ;;  %v6077_v36 = vadd.f32 %v14861_v24, %v6076_v33  ;;  %12784 = vmatprep.mubr.msk.bf16.mxu1 %vm3729_vm2, %v14160_v51  ;;  %v5312_v20 = vmax.f32 %v4712_v16, 0.0 }
 0x311   : > { %v8426_v21 = vunpack.c.l.b16 %v8118_v23  ;;  %v14997_v22 = vpack.c.bf16 %v5314_v15, %v5313_v12  ;;  %v6088_v60 = vadd.f32 %v12815_v3, %v14861_v24  ;;  %12921 = vmatmul.mubr.msk.bf16.gmra.mrb[104].mxu0 %vm3729_vm2, %v14927_v48  ;;  %v7333_v34 = vsel %vm7275_vm3, %v7038_v28, -inf }
 0x312   : > { %v7324_v44 = vrot.slane %v7323_v56, 2  ;;  %v7332_v58 = vmax.f32 %v7330_v18, %v7331_v32  ;;  %v7039_v31 = vmax.f32 %v6077_v36, 0.0  ;;  %v12678_v27 = vpop.f32.mrb[168].mxu1  ;;  %12924 = vmatprep.mubr.msk.bf16.mxu0 %vm3729_vm2, %v14954_v42  ;;  %v7344_v47 = vsel %vm7275_vm3, %v7041_v6, -inf }
 0x313   : > { %v15006_v51 = vsel %vm8490_vm5, %v8426_v21, %v8489_v35  ;;  %v15009_v26 = vpack.c.bf16 %v5312_v20, %v5311_v5  ;;  %v6080_v63 = vadd.f32 %v14861_v24, %v6079_v14  ;;  %v4724_v2 = vpop.f32.mrb[169].mxu1  ;;  %v7042_v39 = vmax.f32 %v6088_v60, 0.0 }
 0x314   : > { %v7325_v48 = vmax.f32 %v7323_v56, %v7324_v44  ;;  %v7334_v37 = vmax.f32 %v7332_v58, %v7333_v34  ;;  %v4733_v25 = vadd.f32 %v14910_v46, %v12678_v27  ;;  %v12679_v8 = vpop.f32.mrb[170].mxu1  ;;  %v12818_v9 = vpop.f32.mrb[0].mxu0  ;;  %v7341_v38 = vsel %vm7275_vm3, %v7039_v31, -inf }
 0x315   : > { %v7040_v42 = vmax.f32 %v6080_v63, 0.0  ;;  %v4725_v7 = vadd.f32 %v14910_v46, %v4724_v2  ;;  %v4736_v10 = vadd.f32 %v14910_v46, %v12679_v8  ;;  %v4727_v41 = vpop.f32.mrb[171].mxu1  ;;  %v6092_v40 = vpop.f32.mrb[1].mxu0  ;;  %v6101_v32 = vadd.f32 %v12818_v9, %v14861_v24 }
 0x316   : > { %v7326_v49 = vrot.slane %v7325_v48, 1  ;;  %v7335_v35 = vrot.slane %v7334_v37, 4  ;;  %v5317_v52 = vmax.f32 %v4733_v25, 0.0  ;;  %v12819_v54 = vpop.f32.mrb[2].mxu0  ;;  %v4728_v55 = vadd.f32 %v14910_v46, %v4727_v41 }
 0x317   : > { %v7342_v17 = vsel %vm7275_vm3, %v7040_v42, -inf  ;;  %v5315_v53 = vmax.f32 %v4725_v7, 0.0  ;;  %v5318_v28 = vmax.f32 %v4736_v10, 0.0  ;;  %12785 = vmatmul.mubr.msk.bf16.gmra.mrb[20].mxu1 %vm3729_vm2, %v14158_v50  ;;  %v6095_v57 = vpop.f32.mrb[3].mxu0  ;;  %v7045_v29 = vmax.f32 %v6101_v32, 0.0 }
 0x318   : > { %v7327_v59 = vmax.f32 %v7325_v48, %v7326_v49  ;;  %v7336_v30 = vmax.f32 %v7334_v37, %v7335_v35  ;;  %v7343_v61 = vmax.f32 %v7341_v38, %v7342_v17  ;;  %v5316_v43 = vmax.f32 %v4728_v55, 0.0 }
 0x319   : > { %v15021_v19 = vpack.c.bf16 %v5318_v28, %v5317_v52  ;;  %v6093_v1 = vadd.f32 %v14861_v24, %v6092_v40  ;;  %v6104_v33 = vadd.f32 %v12819_v54, %v14861_v24  ;;  %12925 = vmatmul.mubr.msk.bf16.gmra.mrb[108].mxu0 %vm3729_vm2, %v14952_v62  ;;  %v7346_v5 = vsel %vm7275_vm3, %v7042_v39, -inf }
 0x31a   : > { %v8119_v4 = vpack.c.bf16 %v7327_v59, %v7327_v59  ;;  %v7337_v12 = vrot.slane %v7336_v30, 2  ;;  %v7345_v50 = vmax.f32 %v7343_v61, %v7344_v47  ;;  %v12682_v0 = vpop.f32.mrb[172].mxu1  ;;  %12928 = vmatprep.mubr.msk.bf16.mxu0 %vm3729_vm2, %v14978_v45  ;;  %v7357_v3 = vsel %vm7275_vm3, %v7045_v29, -inf }
 0x31b   : > { %v15031_v23 = vpack.c.bf16 %v5316_v43, %v5315_v53  ;;  %v7043_v13 = vmax.f32 %v6093_v1, 0.0  ;;  %v6096_v15 = vadd.f32 %v14861_v24, %v6095_v57  ;;  %v4740_v16 = vpop.f32.mrb[173].mxu1  ;;  %v7046_v62 = vmax.f32 %v6104_v33, 0.0 }
 0x31c   : > { %v7338_v14 = vmax.f32 %v7336_v30, %v7337_v12  ;;  %v7347_v56 = vmax.f32 %v7345_v50, %v7346_v5  ;;  %v4749_v18 = vadd.f32 %v14910_v46, %v12682_v0  ;;  %v12683_v6 = vpop.f32.mrb[174].mxu1  ;;  %v12822_v36 = vpop.f32.mrb[4].mxu0  ;;  %v15035_v21 = vunpack.c.l.b16 %v8119_v4 }
 0x31d   : > { %v7354_v20 = vsel %vm7275_vm3, %v7043_v13, -inf  ;;  %v7044_v45 = vmax.f32 %v6096_v15, 0.0  ;;  %v4741_v60 = vadd.f32 %v14910_v46, %v4740_v16  ;;  %v4743_v44 = vpop.f32.mrb[175].mxu1  ;;  %v6108_v34 = vpop.f32.mrb[5].mxu0  ;;  %v4752_v47 = vadd.f32 %v14910_v46, %v12683_v6 }
 0x31e   : > { %v7339_v58 = vrot.slane %v7338_v14, 1  ;;  %v7348_v31 = vrot.slane %v7347_v56, 4  ;;  %v5321_v27 = vmax.f32 %v4749_v18, 0.0  ;;  %v12823_v63 = vpop.f32.mrb[6].mxu0  ;;  %v6117_v37 = vadd.f32 %v12822_v36, %v14861_v24 }
 0x31f   : > { %v7355_v2 = vsel %vm7275_vm3, %v7044_v45, -inf  ;;  %v5319_v48 = vmax.f32 %v4741_v60, 0.0  ;;  %v4744_v39 = vadd.f32 %v14910_v46, %v4743_v44  ;;  %v6111_v25 = vpop.f32.mrb[7].mxu0  ;;  %v5322_v42 = vmax.f32 %v4752_v47, 0.0 }
 0x320   : > { %v7340_v8 = vmax.f32 %v7338_v14, %v7339_v58  ;;  %v7349_v9 = vmax.f32 %v7347_v56, %v7348_v31  ;;  %v7356_v38 = vmax.f32 %v7354_v20, %v7355_v2  ;;  %v7049_v7 = vmax.f32 %v6117_v37, 0.0 }
 0x321   : > { %v5320_v10 = vmax.f32 %v4744_v39, 0.0  ;;  %v6109_v41 = vadd.f32 %v14861_v24, %v6108_v34  ;;  %v6120_v40 = vadd.f32 %v12823_v63, %v14861_v24  ;;  %12929 = vmatmul.mubr.msk.bf16.gmra.mrb[112].mxu0 %vm3729_vm2, %v14972_v11  ;;  %v15047_v32 = vpack.c.bf16 %v5322_v42, %v5321_v27 }
 0x322   : > { %v8120_v49 = vpack.c.bf16 %v7340_v8, %v7340_v8  ;;  %v7350_v35 = vrot.slane %v7349_v9, 2  ;;  %v7358_v52 = vmax.f32 %v7356_v38, %v7357_v3  ;;  %v12686_v54 = vpop.f32.mrb[176].mxu1  ;;  %12932 = vmatprep.mubr.msk.bf16.mxu0 %vm3729_vm2, %v15009_v26  ;;  %v7359_v17 = vsel %vm7275_vm3, %v7046_v62, -inf }
 0x323   : > { %v7370_v53 = vsel %vm7275_vm3, %v7049_v7, -inf  ;;  %v15053_v28 = vpack.c.bf16 %v5320_v10, %v5319_v48  ;;  %v7047_v55 = vmax.f32 %v6109_v41, 0.0  ;;  %v4756_v57 = vpop.f32.mrb[177].mxu1  ;;  %v7050_v11 = vmax.f32 %v6120_v40, 0.0 }
 0x324   : > { %v7351_v59 = vmax.f32 %v7349_v9, %v7350_v35  ;;  %v7360_v30 = vmax.f32 %v7358_v52, %v7359_v17  ;;  %v6112_v61 = vadd.f32 %v14861_v24, %v6111_v25  ;;  %v12687_v29 = vpop.f32.mrb[178].mxu1  ;;  %v12826_v43 = vpop.f32.mrb[8].mxu0  ;;  %v15056_v1 = vunpack.c.l.b16 %v8120_v49 }
 0x325   : > { %v7367_v33 = vsel %vm7275_vm3, %v7047_v55, -inf  ;;  %v4765_v26 = vadd.f32 %v14910_v46, %v12686_v54  ;;  %v4757_v4 = vadd.f32 %v14910_v46, %v4756_v57  ;;  %v4759_v12 = vpop.f32.mrb[179].mxu1  ;;  %v6124_v5 = vpop.f32.mrb[9].mxu0  ;;  %v4768_v13 = vadd.f32 %v14910_v46, %v12687_v29 }
 0x326   : > { %v7352_v50 = vrot.slane %v7351_v59, 1  ;;  %v7361_v0 = vrot.slane %v7360_v30, 4  ;;  %v7048_v3 = vmax.f32 %v6112_v61, 0.0  ;;  %v12827_v15 = vpop.f32.mrb[10].mxu0  ;;  %v6133_v56 = vadd.f32 %v12826_v43, %v14861_v24 }
 0x327   : > { %v5325_v16 = vmax.f32 %v4765_v26, 0.0  ;;  %v5323_v14 = vmax.f32 %v4757_v4, 0.0  ;;  %v4760_v62 = vadd.f32 %v14910_v46, %v4759_v12  ;;  %v6127_v18 = vpop.f32.mrb[11].mxu0  ;;  %v5326_v45 = vmax.f32 %v4768_v13, 0.0 }
 0x328   : > { %v7353_v6 = vmax.f32 %v7351_v59, %v7352_v50  ;;  %v7362_v36 = vmax.f32 %v7360_v30, %v7361_v0  ;;  %v7368_v20 = vsel %vm7275_vm3, %v7048_v3, -inf  ;;  %v7053_v44 = vmax.f32 %v6133_v56, 0.0 }
 0x329   : > { %v7369_v60 = vmax.f32 %v7367_v33, %v7368_v20  ;;  %v5324_v34 = vmax.f32 %v4760_v62, 0.0  ;;  %v6125_v58 = vadd.f32 %v14861_v24, %v6124_v5  ;;  %12933 = vmatmul.mubr.msk.bf16.gmra.mrb[116].mxu0 %vm3729_vm2, %v14997_v22  ;;  %v15068_v47 = vpack.c.bf16 %v5326_v45, %v5325_v16 }
 0x32a   : > { %v8121_v31 = vpack.c.bf16 %v7353_v6, %v7353_v6  ;;  %v7363_v27 = vrot.slane %v7362_v36, 2  ;;  %v6136_v63 = vadd.f32 %v12827_v15, %v14861_v24  ;;  %v12690_v2 = vpop.f32.mrb[180].mxu1  ;;  %12936 = vmatprep.mubr.msk.bf16.mxu0 %vm3729_vm2, %v15031_v23  ;;  %v7372_v48 = vsel %vm7275_vm3, %v7050_v11, -inf }
 0x32b   : > { %v7371_v37 = vmax.f32 %v7369_v60, %v7370_v53  ;;  %v15074_v39 = vpack.c.bf16 %v5324_v34, %v5323_v14  ;;  %v7051_v25 = vmax.f32 %v6125_v58, 0.0  ;;  %v4772_v8 = vpop.f32.mrb[181].mxu1  ;;  %v7383_v38 = vsel %vm7275_vm3, %v7053_v44, -inf }
 0x32c   : > { %v15076_v9 = vunpack.c.l.b16 %v8121_v31  ;;  %v7364_v22 = vmax.f32 %v7362_v36, %v7363_v27  ;;  %v6128_v42 = vadd.f32 %v14861_v24, %v6127_v18  ;;  %v12691_v7 = vpop.f32.mrb[182].mxu1  ;;  %v12830_v10 = vpop.f32.mrb[12].mxu0  ;;  %v7054_v40 = vmax.f32 %v6136_v63, 0.0 }
 0x32d   : > { %v7373_v41 = vmax.f32 %v7371_v37, %v7372_v48  ;;  %v4781_v23 = vadd.f32 %v14910_v46, %v12690_v2  ;;  %v4773_v49 = vadd.f32 %v14910_v46, %v4772_v8  ;;  %v4775_v35 = vpop.f32.mrb[183].mxu1  ;;  %v6140_v52 = vpop.f32.mrb[13].mxu0  ;;  %v7380_v17 = vsel %vm7275_vm3, %v7051_v25, -inf }
 0x32e   : > { %v7365_v54 = vrot.slane %v7364_v22, 1  ;;  %v7052_v53 = vmax.f32 %v6128_v42, 0.0  ;;  %v4784_v55 = vadd.f32 %v14910_v46, %v12691_v7  ;;  %v12831_v57 = vpop.f32.mrb[14].mxu0  ;;  %v6149_v61 = vadd.f32 %v12830_v10, %v14861_v24 }
 0x32f   : > { %v7374_v59 = vrot.slane %v7373_v41, 4  ;;  %v5329_v30 = vmax.f32 %v4781_v23, 0.0  ;;  %v5327_v11 = vmax.f32 %v4773_v49, 0.0  ;;  %v6143_v29 = vpop.f32.mrb[15].mxu0  ;;  %v4776_v4 = vadd.f32 %v14910_v46, %v4775_v35 }
 0x330   : > { %v7366_v43 = vmax.f32 %v7364_v22, %v7365_v54  ;;  %v7381_v33 = vsel %vm7275_vm3, %v7052_v53, -inf  ;;  %v5330_v26 = vmax.f32 %v4784_v55, 0.0  ;;  %v7057_v50 = vmax.f32 %v6149_v61, 0.0 }
 0x331   : > { %v7375_v12 = vmax.f32 %v7373_v41, %v7374_v59  ;;  %v7382_v5 = vmax.f32 %v7380_v17, %v7381_v33  ;;  %v6141_v0 = vadd.f32 %v14861_v24, %v6140_v52  ;;  %12937 = vmatmul.mubr.msk.bf16.gmra.mrb[120].mxu0 %vm3729_vm2, %v15021_v19  ;;  %v5328_v15 = vmax.f32 %v4776_v4, 0.0 }
 0x332   : > { %v8122_v3 = vpack.c.bf16 %v7366_v43, %v7366_v43  ;;  %v15090_v13 = vpack.c.bf16 %v5330_v26, %v5329_v30  ;;  %v6152_v16 = vadd.f32 %v12831_v57, %v14861_v24  ;;  %v12694_v14 = vpop.f32.mrb[184].mxu1  ;;  %12940 = vmatprep.mubr.msk.bf16.mxu0 %vm3729_vm2, %v15053_v28  ;;  %v7385_v62 = vsel %vm7275_vm3, %v7054_v40, -inf }
 0x333   : > { %v7376_v56 = vrot.slane %v7375_v12, 2  ;;  %v7384_v18 = vmax.f32 %v7382_v5, %v7383_v38  ;;  %v7055_v6 = vmax.f32 %v6141_v0, 0.0  ;;  %v4788_v36 = vpop.f32.mrb[185].mxu1  ;;  %v7396_v20 = vsel %vm7275_vm3, %v7057_v50, -inf }
 0x334   : > { %v15097_v45 = vpack.c.bf16 %v5328_v15, %v5327_v11  ;;  %v7058_v19 = vmax.f32 %v6152_v16, 0.0  ;;  %v6144_v60 = vadd.f32 %v14861_v24, %v6143_v29  ;;  %v12695_v44 = vpop.f32.mrb[186].mxu1  ;;  %v12834_v34 = vpop.f32.mrb[16].mxu0  ;;  %v15100_v58 = vunpack.c.l.b16 %v8122_v3 }
 0x335   : > { %v15102_v31 = vmax.f32 %v7375_v12, %v7376_v56  ;;  %v7386_v28 = vmax.f32 %v7384_v18, %v7385_v62  ;;  %v4797_v27 = vadd.f32 %v14910_v46, %v12694_v14  ;;  %v4791_v63 = vpop.f32.mrb[187].mxu1  ;;  %v6156_v2 = vpop.f32.mrb[17].mxu0  ;;  %v7393_v48 = vsel %vm7275_vm3, %v7055_v6, -inf }
 0x336   : > { %v7056_v37 = vmax.f32 %v6144_v60, 0.0  ;;  %v4789_v25 = vadd.f32 %v14910_v46, %v4788_v36  ;;  %v4800_v8 = vadd.f32 %v14910_v46, %v12695_v44  ;;  %v12835_v22 = vpop.f32.mrb[18].mxu0  ;;  %v7398_v42 = vsel %vm7275_vm3, %v7058_v19, -inf }
 0x337   : > { %v7387_v38 = vrot.slane %v7386_v28, 4  ;;  %v5333_v7 = vmax.f32 %v4797_v27, 0.0  ;;  %v6165_v10 = vadd.f32 %v12834_v34, %v14861_v24  ;;  %v6159_v41 = vpop.f32.mrb[19].mxu0  ;;  %v4792_v35 = vadd.f32 %v14910_v46, %v4791_v63 }
 0x338   : > { %v7394_v40 = vsel %vm7275_vm3, %v7056_v37, -inf  ;;  %v5331_v23 = vmax.f32 %v4789_v25, 0.0  ;;  %v5334_v49 = vmax.f32 %v4800_v8, 0.0  ;;  %v6157_v53 = vadd.f32 %v14861_v24, %v6156_v2 }
 0x339   : > { %v7388_v52 = vmax.f32 %v7386_v28, %v7387_v38  ;;  %v7395_v54 = vmax.f32 %v7393_v48, %v7394_v40  ;;  %v7061_v17 = vmax.f32 %v6165_v10, 0.0  ;;  %12941 = vmatmul.mubr.msk.bf16.gmra.mrb[124].mxu0 %vm3729_vm2, %v15047_v32  ;;  %v5332_v57 = vmax.f32 %v4792_v35, 0.0 }
 0x33a   : > { %v15115_v55 = vpack.c.bf16 %v5334_v49, %v5333_v7  ;;  %v6168_v59 = vadd.f32 %v12835_v22, %v14861_v24  ;;  %v6160_v30 = vadd.f32 %v14861_v24, %v6159_v41  ;;  %v12698_v11 = vpop.f32.mrb[188].mxu1  ;;  %12944 = vmatprep.mubr.msk.bf16.mxu0 %vm3729_vm2, %v15074_v39  ;;  %v7059_v33 = vmax.f32 %v6157_v53, 0.0 }
 0x33b   : > { %v7389_v61 = vrot.slane %v7388_v52, 2  ;;  %v7397_v29 = vmax.f32 %v7395_v54, %v7396_v20  ;;  %v7409_v43 = vsel %vm7275_vm3, %v7061_v17, -inf  ;;  %v4804_v26 = vpop.f32.mrb[189].mxu1  ;;  %v15122_v4 = vpack.c.bf16 %v5332_v57, %v5331_v23 }
 0x33c   : > { %v7062_v32 = vmax.f32 %v6168_v59, 0.0  ;;  %v7060_v12 = vmax.f32 %v6160_v30, 0.0  ;;  %v4813_v5 = vadd.f32 %v14910_v46, %v12698_v11  ;;  %v12699_v50 = vpop.f32.mrb[190].mxu1  ;;  %v12838_v0 = vpop.f32.mrb[20].mxu0  ;;  %v7406_v16 = vsel %vm7275_vm3, %v7059_v33, -inf }
 0x33d   : > { %v7390_v3 = vmax.f32 %v7388_v52, %v7389_v61  ;;  %v7399_v15 = vmax.f32 %v7397_v29, %v7398_v42  ;;  %v4805_v39 = vadd.f32 %v14910_v46, %v4804_v26  ;;  %v4807_v14 = vpop.f32.mrb[191].mxu1  ;;  %v6172_v56 = vpop.f32.mrb[21].mxu0  ;;  %v4816_v36 = vadd.f32 %v14910_v46, %v12699_v50 }
 0x33e   : > { %v7411_v62 = vsel %vm7275_vm3, %v7062_v32, -inf  ;;  %v7407_v18 = vsel %vm7275_vm3, %v7060_v12, -inf  ;;  %v5337_v6 = vmax.f32 %v4813_v5, 0.0  ;;  %v12839_v20 = vpop.f32.mrb[22].mxu0  ;;  %v6181_v63 = vadd.f32 %v12838_v0, %v14861_v24  ;;  %v15150_v0 = vld [vmem:[%s13710_s3] ss:$0 sm:$0xff] }
 0x33f   : > { %v7391_v19 = vrot.slane %v7390_v3, 1  ;;  %v7400_v60 = vrot.slane %v7399_v15, 4  ;;  %v7408_v44 = vmax.f32 %v7406_v16, %v7407_v18  ;;  %v5335_v34 = vmax.f32 %v4805_v39, 0.0  ;;  %v6175_v28 = vpop.f32.mrb[23].mxu0 }
 0x340   : > { %v5338_v27 = vmax.f32 %v4816_v36, 0.0  ;;  %v4808_v2 = vadd.f32 %v14910_v46, %v4807_v14  ;;  %v6173_v48 = vadd.f32 %v14861_v24, %v6172_v56  ;;  %v6184_v22 = vadd.f32 %v12839_v20, %v14861_v24 }
 0x341   : > { %v7392_v37 = vmax.f32 %v7390_v3, %v7391_v19  ;;  %v7401_v25 = vmax.f32 %v7399_v15, %v7400_v60  ;;  %v7410_v8 = vmax.f32 %v7408_v44, %v7409_v43  ;;  %12945 = vmatmul.mubr.msk.bf16.gmra.mrb[128].mxu0 %vm3729_vm2, %v15068_v47  ;;  %v7065_v42 = vmax.f32 %v6181_v63, 0.0 }
 0x342   : > { %v15136_v38 = vpack.c.bf16 %v5338_v27, %v5337_v6  ;;  %v5336_v7 = vmax.f32 %v4808_v2, 0.0  ;;  %v7063_v10 = vmax.f32 %v6173_v48, 0.0  ;;  %v12702_v41 = vpop.f32.mrb[192].mxu1  ;;  %12948 = vmatprep.mubr.msk.bf16.mxu0 %vm3729_vm2, %v15097_v45  ;;  %v7378_v40 = vrot.slane %v15102_v31, 1 }
 0x343   : > { %v8124_v23 = vpack.c.bf16 %v7392_v37, %v7392_v37  ;;  %v7402_v49 = vrot.slane %v7401_v25, 2  ;;  %v7412_v35 = vmax.f32 %v7410_v8, %v7411_v62  ;;  %v4820_v52 = vpop.f32.mrb[193].mxu1  ;;  %v7422_v54 = vsel %vm7275_vm3, %v7065_v42, -inf }
 0x344   : > { %v15142_v17 = vpack.c.bf16 %v5336_v7, %v5335_v34  ;;  %v7066_v47 = vmax.f32 %v6184_v22, 0.0  ;;  %v6176_v53 = vadd.f32 %v14861_v24, %v6175_v28  ;;  %v12703_v57 = vpop.f32.mrb[194].mxu1  ;;  %v12842_v59 = vpop.f32.mrb[24].mxu0  ;;  %v7419_v45 = vsel %vm7275_vm3, %v7063_v10, -inf }
 0x345   : > { %v8432_v30 = vunpack.c.l.b16 %v8124_v23  ;;  %v7403_v11 = vmax.f32 %v7401_v25, %v7402_v49  ;;  %v7413_v61 = vrot.slane %v7412_v35, 4  ;;  %v4823_v29 = vpop.f32.mrb[195].mxu1  ;;  %v6188_v43 = vpop.f32.mrb[25].mxu0  ;;  %v4829_v26 = vadd.f32 %v14910_v46, %v12702_v41 }
 0x346   : > { %v7064_v33 = vmax.f32 %v6176_v53, 0.0  ;;  %v4821_v32 = vadd.f32 %v14910_v46, %v4820_v52  ;;  %v4832_v12 = vadd.f32 %v14910_v46, %v12703_v57  ;;  %v12843_v5 = vpop.f32.mrb[26].mxu0  ;;  %v6197_v3 = vadd.f32 %v15150_v0, %v12842_v59 }
 0x347   : > { %v7404_v50 = vrot.slane %v7403_v11, 1  ;;  %v7414_v24 = vmax.f32 %v7412_v35, %v7413_v61  ;;  %v4824_v15 = vadd.f32 %v14910_v46, %v4823_v29  ;;  %v6191_v16 = vpop.f32.mrb[27].mxu0  ;;  %v5341_v14 = vmax.f32 %v4829_v26, 0.0 }
 0x348   : > { %v7420_v39 = vsel %vm7275_vm3, %v7064_v33, -inf  ;;  %v5339_v56 = vmax.f32 %v4821_v32, 0.0  ;;  %v5342_v62 = vmax.f32 %v4832_v12, 0.0  ;;  %v7069_v20 = vmax.f32 %v6197_v3, 0.0 }
 0x349   : > { %v7405_v18 = vmax.f32 %v7403_v11, %v7404_v50  ;;  %v7415_v6 = vrot.slane %v7414_v24, 2  ;;  %v7421_v36 = vmax.f32 %v7419_v45, %v7420_v39  ;;  %12949 = vmatmul.mubr.msk.bf16.gmra.mrb[132].mxu0 %vm3729_vm2, %v15090_v13  ;;  %v5340_v60 = vmax.f32 %v4824_v15, 0.0 }
 0x34a   : > { %v15157_v19 = vpack.c.bf16 %v5342_v62, %v5341_v14  ;;  %v6189_v44 = vadd.f32 %v15150_v0, %v6188_v43  ;;  %v6200_v34 = vadd.f32 %v15150_v0, %v12843_v5  ;;  %v12706_v28 = vpop.f32.mrb[196].mxu1  ;;  %12952 = vmatprep.mubr.msk.bf16.mxu0 %vm3729_vm2, %v15122_v4  ;;  %v7424_v2 = vsel %vm7275_vm3, %v7066_v47, -inf }
 0x34b   : > { %v8125_v27 = vpack.c.bf16 %v7405_v18, %v7405_v18  ;;  %v7416_v63 = vmax.f32 %v7414_v24, %v7415_v6  ;;  %v7423_v48 = vmax.f32 %v7421_v36, %v7422_v54  ;;  %v4836_v37 = vpop.f32.mrb[197].mxu1  ;;  %v7435_v25 = vsel %vm7275_vm3, %v7069_v20, -inf }
 0x34c   : > { %v15165_v13 = vpack.c.bf16 %v5340_v60, %v5339_v56  ;;  %v7067_v8 = vmax.f32 %v6189_v44, 0.0  ;;  %v6192_v22 = vadd.f32 %v15150_v0, %v6191_v16  ;;  %v12707_v42 = vpop.f32.mrb[198].mxu1  ;;  %v12846_v7 = vpop.f32.mrb[28].mxu0  ;;  %v4845_v4 = vadd.f32 %v14910_v46, %v12706_v28 }
 0x34d   : > { %v8433_v10 = vunpack.c.l.b16 %v8125_v27  ;;  %v7417_v41 = vrot.slane %v7416_v63, 1  ;;  %v7425_v23 = vmax.f32 %v7423_v48, %v7424_v2  ;;  %v4839_v49 = vpop.f32.mrb[199].mxu1  ;;  %v6204_v35 = vpop.f32.mrb[29].mxu0  ;;  %v7070_v54 = vmax.f32 %v6200_v34, 0.0 }
 0x34e   : > { %v7432_v52 = vsel %vm7275_vm3, %v7067_v8, -inf  ;;  %v7068_v47 = vmax.f32 %v6192_v22, 0.0  ;;  %v4837_v53 = vadd.f32 %v14910_v46, %v4836_v37  ;;  %v12847_v57 = vpop.f32.mrb[30].mxu0  ;;  %v5345_v45 = vmax.f32 %v4845_v4, 0.0  ;;  %v15194_v8 = vld [vmem:[%s13700_s25] ss:$0 sm:$0xff] }
 0x34f   : > { %v8502_v59 = vsel %vm8488_vm4, %v8433_v10, %v8432_v30  ;;  %v7418_v11 = vmax.f32 %v7416_v63, %v7417_v41  ;;  %v7426_v61 = vrot.slane %v7425_v23, 4  ;;  %v6207_v29 = vpop.f32.mrb[31].mxu0  ;;  %v4848_v26 = vadd.f32 %v14910_v46, %v12707_v42 }
 0x350   : > { %v7433_v43 = vsel %vm7275_vm3, %v7068_v47, -inf  ;;  %v5343_v33 = vmax.f32 %v4837_v53, 0.0  ;;  %v6213_v32 = vadd.f32 %v15150_v0, %v12846_v7  ;;  %v4840_v24 = vadd.f32 %v14910_v46, %v4839_v49 }
 0x351   : > { %v8126_v12 = vpack.c.bf16 %v7418_v11, %v7418_v11  ;;  %v7427_v5 = vmax.f32 %v7425_v23, %v7426_v61  ;;  %v7434_v50 = vmax.f32 %v7432_v52, %v7433_v43  ;;  %12953 = vmatmul.mubr.msk.bf16.gmra.mrb[136].mxu0 %vm3729_vm2, %v15115_v55  ;;  %v5346_v30 = vmax.f32 %v4848_v26, 0.0 }
 0x352   : > { %v7073_v3 = vmax.f32 %v6213_v32, 0.0  ;;  %v6205_v15 = vadd.f32 %v15150_v0, %v6204_v35  ;;  %v6216_v16 = vadd.f32 %v15150_v0, %v12847_v57  ;;  %v12710_v39 = vpop.f32.mrb[200].mxu1  ;;  %12956 = vmatprep.mubr.msk.bf16.mxu0 %vm3729_vm2, %v15142_v17  ;;  %v5344_v18 = vmax.f32 %v4840_v24, 0.0 }
 0x353   : > { %v8434_v14 = vunpack.c.l.b16 %v8126_v12  ;;  %v7428_v56 = vrot.slane %v7427_v5, 2  ;;  %v7436_v62 = vmax.f32 %v7434_v50, %v7435_v25  ;;  %v4852_v6 = vpop.f32.mrb[201].mxu1  ;;  %v7437_v46 = vsel %vm7275_vm3, %v7070_v54, -inf }
 0x354   : > { %v15183_v36 = vpack.c.bf16 %v5346_v30, %v5345_v45  ;;  %v7448_v55 = vsel %vm7275_vm3, %v7073_v3, -inf  ;;  %v7071_v20 = vmax.f32 %v6205_v15, 0.0  ;;  %v12711_v60 = vpop.f32.mrb[202].mxu1  ;;  %v12850_v44 = vpop.f32.mrb[32].mxu0  ;;  %v15189_v27 = vpack.c.bf16 %v5344_v18, %v5343_v33 }
 0x355   : > { %v15187_v34 = vsel %vm8490_vm5, %v8434_v14, %v8502_v59  ;;  %v7429_v28 = vmax.f32 %v7427_v5, %v7428_v56  ;;  %v7438_v17 = vmax.f32 %v7436_v62, %v7437_v46  ;;  %v4855_v63 = vpop.f32.mrb[203].mxu1  ;;  %v6220_v2 = vpop.f32.mrb[33].mxu0  ;;  %v7074_v37 = vmax.f32 %v6216_v16, 0.0 }
 0x356   : > { %v7445_v48 = vsel %vm7275_vm3, %v7071_v20, -inf  ;;  %v6208_v25 = vadd.f32 %v15150_v0, %v6207_v29  ;;  %v4861_v22 = vadd.f32 %v15194_v8, %v12710_v39  ;;  %v12851_v42 = vpop.f32.mrb[34].mxu0  ;;  %v4853_v41 = vadd.f32 %v15194_v8, %v4852_v6 }
 0x357   : > { %v7430_v7 = vrot.slane %v7429_v28, 1  ;;  %v7439_v10 = vrot.slane %v7438_v17, 4  ;;  %v4864_v23 = vadd.f32 %v15194_v8, %v12711_v60  ;;  %v6223_v4 = vpop.f32.mrb[35].mxu0  ;;  %v6229_v52 = vadd.f32 %v15150_v0, %v12850_v44 }
 0x358   : > { %v7072_v49 = vmax.f32 %v6208_v25, 0.0  ;;  %v5349_v35 = vmax.f32 %v4861_v22, 0.0  ;;  %v4856_v54 = vadd.f32 %v15194_v8, %v4855_v63  ;;  %v5347_v57 = vmax.f32 %v4853_v41, 0.0 }
 0x359   : > { %v7431_v47 = vmax.f32 %v7429_v28, %v7430_v7  ;;  %v7440_v53 = vmax.f32 %v7438_v17, %v7439_v10  ;;  %v5350_v59 = vmax.f32 %v4864_v23, 0.0  ;;  %12957 = vmatmul.mubr.msk.bf16.gmra.mrb[140].mxu0 %vm3729_vm2, %v15136_v38  ;;  %v7077_v61 = vmax.f32 %v6229_v52, 0.0 }
 0x35a   : > { %v7446_v11 = vsel %vm7275_vm3, %v7072_v49, -inf  ;;  %v5348_v45 = vmax.f32 %v4856_v54, 0.0  ;;  %v6221_v29 = vadd.f32 %v15150_v0, %v6220_v2  ;;  %v12714_v43 = vpop.f32.mrb[204].mxu1  ;;  %12960 = vmatprep.mubr.msk.bf16.mxu0 %vm3729_vm2, %v15165_v13  ;;  %v7450_v50 = vsel %vm7275_vm3, %v7074_v37, -inf }
 0x35b   : > { %v8127_v33 = vpack.c.bf16 %v7431_v47, %v7431_v47  ;;  %v7441_v26 = vrot.slane %v7440_v53, 2  ;;  %v7447_v32 = vmax.f32 %v7445_v48, %v7446_v11  ;;  %v15207_v12 = vpack.c.bf16 %v5350_v59, %v5349_v35  ;;  %v4868_v5 = vpop.f32.mrb[205].mxu1 }
 0x35c   : > { %v15210_v24 = vpack.c.bf16 %v5348_v45, %v5347_v57  ;;  %v7075_v38 = vmax.f32 %v6221_v29, 0.0  ;;  %v6232_v30 = vadd.f32 %v15150_v0, %v12851_v42  ;;  %v12715_v3 = vpop.f32.mrb[206].mxu1  ;;  %v12854_v15 = vpop.f32.mrb[36].mxu0  ;;  %v7461_v14 = vsel %vm7275_vm3, %v7077_v61, -inf }
 0x35d   : > { %v7442_v16 = vmax.f32 %v7440_v53, %v7441_v26  ;;  %v7449_v39 = vmax.f32 %v7447_v32, %v7448_v55  ;;  %v6224_v13 = vadd.f32 %v15150_v0, %v6223_v4  ;;  %v4871_v56 = vpop.f32.mrb[207].mxu1  ;;  %v6236_v62 = vpop.f32.mrb[37].mxu0  ;;  %v15215_v18 = vunpack.c.l.b16 %v8127_v33 }
 0x35e   : > { %v7458_v6 = vsel %vm7275_vm3, %v7075_v38, -inf  ;;  %v7078_v46 = vmax.f32 %v6232_v30, 0.0  ;;  %v4877_v20 = vadd.f32 %v15194_v8, %v12714_v43  ;;  %v12855_v60 = vpop.f32.mrb[38].mxu0  ;;  %v4880_v63 = vadd.f32 %v15194_v8, %v12715_v3 }
 0x35f   : > { %v7443_v44 = vrot.slane %v7442_v16, 1  ;;  %v7451_v28 = vmax.f32 %v7449_v39, %v7450_v50  ;;  %v7076_v17 = vmax.f32 %v6224_v13, 0.0  ;;  %v6239_v55 = vpop.f32.mrb[39].mxu0  ;;  %v4869_v37 = vadd.f32 %v15194_v8, %v4868_v5 }
 0x360   : > { %v7463_v2 = vsel %vm7275_vm3, %v7078_v46, -inf  ;;  %v5353_v48 = vmax.f32 %v4877_v20, 0.0  ;;  %v6245_v25 = vadd.f32 %v15150_v0, %v12854_v15  ;;  %v5354_v10 = vmax.f32 %v4880_v63, 0.0 }
 0x361   : > { %v7444_v22 = vmax.f32 %v7442_v16, %v7443_v44  ;;  %v7452_v42 = vrot.slane %v7451_v28, 4  ;;  %v7459_v7 = vsel %vm7275_vm3, %v7076_v17, -inf  ;;  %12961 = vmatmul.mubr.msk.bf16.gmra.mrb[144].mxu0 %vm3729_vm2, %v15157_v19  ;;  %v4872_v4 = vadd.f32 %v15194_v8, %v4871_v56 }
 0x362   : > { %v7460_v41 = vmax.f32 %v7458_v6, %v7459_v7  ;;  %v7081_v23 = vmax.f32 %v6245_v25, 0.0  ;;  %v6237_v49 = vadd.f32 %v15150_v0, %v6236_v62  ;;  %v12718_v35 = vpop.f32.mrb[208].mxu1  ;;  %12964 = vmatprep.mubr.msk.bf16.mxu0 %vm3729_vm2, %v15189_v27  ;;  %v15230_v47 = vpack.c.bf16 %v5354_v10, %v5353_v48 }
 0x363   : > { %v8128_v52 = vpack.c.bf16 %v7444_v22, %v7444_v22  ;;  %v7453_v54 = vmax.f32 %v7451_v28, %v7452_v42  ;;  %v6248_v53 = vadd.f32 %v15150_v0, %v12855_v60  ;;  %v4884_v57 = vpop.f32.mrb[209].mxu1  ;;  %v5351_v11 = vmax.f32 %v4869_v37, 0.0 }
 0x364   : > { %v7462_v59 = vmax.f32 %v7460_v41, %v7461_v14  ;;  %v5352_v19 = vmax.f32 %v4872_v4, 0.0  ;;  %v7079_v61 = vmax.f32 %v6237_v49, 0.0  ;;  %v12719_v45 = vpop.f32.mrb[210].mxu1  ;;  %v12858_v29 = vpop.f32.mrb[40].mxu0  ;;  %v7474_v26 = vsel %vm7275_vm3, %v7081_v23, -inf }
 0x365   : > { %v15233_v43 = vunpack.c.l.b16 %v8128_v52  ;;  %v7454_v33 = vrot.slane %v7453_v54, 2  ;;  %v6240_v27 = vadd.f32 %v15150_v0, %v6239_v55  ;;  %v4887_v32 = vpop.f32.mrb[211].mxu1  ;;  %v6252_v5 = vpop.f32.mrb[41].mxu0  ;;  %v7082_v30 = vmax.f32 %v6248_v53, 0.0 }
 0x366   : > { %v7464_v50 = vmax.f32 %v7462_v59, %v7463_v2  ;;  %v15237_v38 = vpack.c.bf16 %v5352_v19, %v5351_v11  ;;  %v4893_v3 = vadd.f32 %v15194_v8, %v12718_v35  ;;  %v12859_v15 = vpop.f32.mrb[42].mxu0  ;;  %v7471_v39 = vsel %vm7275_vm3, %v7079_v61, -inf }
 0x367   : > { %v7455_v16 = vmax.f32 %v7453_v54, %v7454_v33  ;;  %v7080_v14 = vmax.f32 %v6240_v27, 0.0  ;;  %v4885_v13 = vadd.f32 %v15194_v8, %v4884_v57  ;;  %v6255_v56 = vpop.f32.mrb[43].mxu0  ;;  %v4896_v46 = vadd.f32 %v15194_v8, %v12719_v45 }
 0x368   : > { %v7465_v62 = vrot.slane %v7464_v50, 4  ;;  %v5357_v6 = vmax.f32 %v4893_v3, 0.0  ;;  %v6261_v20 = vadd.f32 %v15150_v0, %v12858_v29  ;;  %v4888_v17 = vadd.f32 %v15194_v8, %v4887_v32 }
 0x369   : > { %v7456_v60 = vrot.slane %v7455_v16, 1  ;;  %v7472_v44 = vsel %vm7275_vm3, %v7080_v14, -inf  ;;  %v5355_v28 = vmax.f32 %v4885_v13, 0.0  ;;  %12965 = vmatmul.mubr.msk.bf16.gmra.mrb[148].mxu0 %vm3729_vm2, %v15183_v36  ;;  %v5358_v2 = vmax.f32 %v4896_v46, 0.0 }
 0x36a   : > { %v7466_v63 = vmax.f32 %v7464_v50, %v7465_v62  ;;  %v7473_v55 = vmax.f32 %v7471_v39, %v7472_v44  ;;  %v7085_v48 = vmax.f32 %v6261_v20, 0.0  ;;  %v12722_v37 = vpop.f32.mrb[212].mxu1  ;;  %12968 = vmatprep.mubr.msk.bf16.mxu0 %vm3729_vm2, %v15210_v24  ;;  %v5356_v22 = vmax.f32 %v4888_v17, 0.0 }
 0x36b   : > { %v7457_v25 = vmax.f32 %v7455_v16, %v7456_v60  ;;  %v6253_v42 = vadd.f32 %v15150_v0, %v6252_v5  ;;  %v6264_v7 = vadd.f32 %v15150_v0, %v12859_v15  ;;  %v4900_v10 = vpop.f32.mrb[213].mxu1  ;;  %v7476_v23 = vsel %vm7275_vm3, %v7082_v30, -inf  ;;  %v13356_v60 = vld [vmem:[%s13720_s14 + $0x10] sm:$0xff]  }
 0x36c   : > { %v7467_v41 = vrot.slane %v7466_v63, 2  ;;  %v7475_v4 = vmax.f32 %v7473_v55, %v7474_v26  ;;  %v15253_v36 = vpack.c.bf16 %v5358_v2, %v5357_v6  ;;  %v12723_v49 = vpop.f32.mrb[214].mxu1  ;;  %v12862_v35 = vpop.f32.mrb[44].mxu0  ;;  %v7487_v54 = vsel %vm7275_vm3, %v7085_v48, -inf  ;;  %13052 = vmatprep.subr.bf16.mxu1 %v13356_v60 }
 0x36d   : > { %v8129_v52 = vpack.c.bf16 %v7457_v25, %v7457_v25  ;;  %v15256_v53 = vpack.c.bf16 %v5356_v22, %v5355_v28  ;;  %v7083_v24 = vmax.f32 %v6253_v42, 0.0  ;;  %v4903_v57 = vpop.f32.mrb[215].mxu1  ;;  %v6268_v59 = vpop.f32.mrb[45].mxu0  ;;  %v6256_v61 = vadd.f32 %v15150_v0, %v6255_v56  ;;  %13053 = vmatpush3.bf16.msra.mxu1 %v13356_v60 }
 0x36e   : > { %v7468_v11 = vmax.f32 %v7466_v63, %v7467_v41  ;;  %v7477_v19 = vmax.f32 %v7475_v4, %v7476_v23  ;;  %v4909_v45 = vadd.f32 %v15194_v8, %v12722_v37  ;;  %v12863_v29 = vpop.f32.mrb[46].mxu0  ;;  %v7086_v27 = vmax.f32 %v6264_v7, 0.0 }
 0x36f   : > { %v15260_v33 = vunpack.c.l.b16 %v8129_v52  ;;  %v7484_v26 = vsel %vm7275_vm3, %v7083_v24, -inf  ;;  %v4901_v32 = vadd.f32 %v15194_v8, %v4900_v10  ;;  %v6271_v5 = vpop.f32.mrb[47].mxu0  ;;  %v7084_v3 = vmax.f32 %v6256_v61, 0.0 }
 0x370   : > { %v7469_v50 = vrot.slane %v7468_v11, 1  ;;  %v7478_v30 = vrot.slane %v7477_v19, 4  ;;  %v5361_v15 = vmax.f32 %v4909_v45, 0.0  ;;  %v4912_v39 = vadd.f32 %v15194_v8, %v12723_v49 }
 0x371   : > { %v5359_v16 = vmax.f32 %v4901_v32, 0.0  ;;  %v6277_v14 = vadd.f32 %v15150_v0, %v12862_v35  ;;  %v4904_v13 = vadd.f32 %v15194_v8, %v4903_v57  ;;  %12969 = vmatmul.mubr.msk.bf16.gmra.mrb[152].mxu0 %vm3729_vm2, %v15207_v12  ;;  %v7485_v6 = vsel %vm7275_vm3, %v7084_v3, -inf }
 0x372   : > { %v15269_v56 = vmax.f32 %v7468_v11, %v7469_v50  ;;  %v7479_v62 = vmax.f32 %v7477_v19, %v7478_v30  ;;  %v6269_v46 = vadd.f32 %v15150_v0, %v6268_v59  ;;  %v12726_v20 = vpop.f32.mrb[216].mxu1  ;;  %12972 = vmatprep.mubr.msk.bf16.mxu0 %vm3729_vm2, %v15237_v38  ;;  %v7486_v44 = vmax.f32 %v7484_v26, %v7485_v6 }
 0x373   : > { %v5362_v28 = vmax.f32 %v4912_v39, 0.0  ;;  %v7089_v17 = vmax.f32 %v6277_v14, 0.0  ;;  %v5360_v63 = vmax.f32 %v4904_v13, 0.0  ;;  %v4916_v55 = vpop.f32.mrb[217].mxu1  ;;  %v7489_v12 = vsel %vm7275_vm3, %v7086_v27, -inf }
 0x374   : > { %v7480_v2 = vrot.slane %v7479_v62, 2  ;;  %v7087_v48 = vmax.f32 %v6269_v46, 0.0  ;;  %v6280_v37 = vadd.f32 %v15150_v0, %v12863_v29  ;;  %v12727_v25 = vpop.f32.mrb[218].mxu1  ;;  %v12866_v22 = vpop.f32.mrb[48].mxu0  ;;  %v8130_v42 = vpack.c.bf16 %v15269_v56, %v15269_v56 }
 0x375   : > { %v7488_v7 = vmax.f32 %v7486_v44, %v7487_v54  ;;  %v15280_v38 = vpack.c.bf16 %v5362_v28, %v5361_v15  ;;  %v15282_v10 = vpack.c.bf16 %v5360_v63, %v5359_v16  ;;  %v4919_v41 = vpop.f32.mrb[219].mxu1  ;;  %v6284_v23 = vpop.f32.mrb[49].mxu0  ;;  %v7500_v49 = vsel %vm7275_vm3, %v7089_v17, -inf }
 0x376   : > { %v15284_v4 = vmax.f32 %v7479_v62, %v7480_v2  ;;  %v7497_v35 = vsel %vm7275_vm3, %v7087_v48, -inf  ;;  %v7090_v52 = vmax.f32 %v6280_v37, 0.0  ;;  %v12867_v24 = vpop.f32.mrb[50].mxu0  ;;  %v6272_v59 = vadd.f32 %v15150_v0, %v6271_v5 }
 0x377   : > { %v7490_v57 = vmax.f32 %v7488_v7, %v7489_v12  ;;  %v4925_v54 = vadd.f32 %v15194_v8, %v12726_v20  ;;  %v4917_v11 = vadd.f32 %v15194_v8, %v4916_v55  ;;  %v6287_v19 = vpop.f32.mrb[51].mxu0  ;;  %v4928_v29 = vadd.f32 %v15194_v8, %v12727_v25 }
 0x378   : > { %v7482_v61 = vrot.slane %v15284_v4, 1  ;;  %v7502_v45 = vsel %vm7275_vm3, %v7090_v52, -inf  ;;  %v6293_v26 = vadd.f32 %v15150_v0, %v12866_v22  ;;  %v7088_v32 = vmax.f32 %v6272_v59, 0.0 }
 0x379   : > { %v7491_v27 = vrot.slane %v7490_v57, 4  ;;  %v5365_v50 = vmax.f32 %v4925_v54, 0.0  ;;  %v5363_v30 = vmax.f32 %v4917_v11, 0.0  ;;  %12973 = vmatmul.mubr.msk.bf16.gmra.mrb[156].mxu0 %vm3729_vm2, %v15230_v47  ;;  %v5366_v5 = vmax.f32 %v4928_v29, 0.0 }
 0x37a   : > { %v7093_v3 = vmax.f32 %v6293_v26, 0.0  ;;  %v4920_v15 = vadd.f32 %v15194_v8, %v4919_v41  ;;  %v6285_v16 = vadd.f32 %v15150_v0, %v6284_v23  ;;  %v12730_v39 = vpop.f32.mrb[220].mxu1  ;;  %12976 = vmatprep.mubr.msk.bf16.mxu0 %vm3729_vm2, %v15256_v53  ;;  %v7498_v13 = vsel %vm7275_vm3, %v7088_v32, -inf }
 0x37b   : > { %v7492_v14 = vmax.f32 %v7490_v57, %v7491_v27  ;;  %v6296_v62 = vadd.f32 %v15150_v0, %v12867_v24  ;;  %v6288_v6 = vadd.f32 %v15150_v0, %v6287_v19  ;;  %v4932_v46 = vpop.f32.mrb[221].mxu1  ;;  %v7499_v20 = vmax.f32 %v7497_v35, %v7498_v13 }
 0x37c   : > { %v15304_v47 = vpack.c.bf16 %v5366_v5, %v5365_v50  ;;  %v7513_v60 = vsel %vm7275_vm3, %v7093_v3, -inf  ;;  %v5364_v44 = vmax.f32 %v4920_v15, 0.0  ;;  %v12731_v28 = vpop.f32.mrb[222].mxu1  ;;  %v12870_v17 = vpop.f32.mrb[52].mxu0  ;;  %v7091_v55 = vmax.f32 %v6285_v16, 0.0 }
 0x37d   : > { %v7493_v63 = vrot.slane %v7492_v14, 2  ;;  %v7094_v53 = vmax.f32 %v6296_v62, 0.0  ;;  %v7092_v2 = vmax.f32 %v6288_v6, 0.0  ;;  %v4935_v12 = vpop.f32.mrb[223].mxu1  ;;  %v6300_v48 = vpop.f32.mrb[53].mxu0  ;;  %v7501_v37 = vmax.f32 %v7499_v20, %v7500_v49 }
 0x37e   : > { %v15307_v25 = vpack.c.bf16 %v5364_v44, %v5363_v30  ;;  %v4941_v22 = vadd.f32 %v15194_v8, %v12730_v39  ;;  %v4933_v7 = vadd.f32 %v15194_v8, %v4932_v46  ;;  %v12871_v41 = vpop.f32.mrb[54].mxu0  ;;  %v7510_v35 = vsel %vm7275_vm3, %v7091_v55, -inf }
 0x37f   : > { %v7494_v23 = vmax.f32 %v7492_v14, %v7493_v63  ;;  %v7515_v52 = vsel %vm7275_vm3, %v7094_v53, -inf  ;;  %v7511_v24 = vsel %vm7275_vm3, %v7092_v2, -inf  ;;  %v15314_v57 = vpop.f32.mrb[55].mxu0  ;;  %v7503_v59 = vmax.f32 %v7501_v37, %v7502_v45 }
 0x380   : > { %v7512_v54 = vmax.f32 %v7510_v35, %v7511_v24  ;;  %v5369_v11 = vmax.f32 %v4941_v22, 0.0  ;;  %v5367_v49 = vmax.f32 %v4933_v7, 0.0  ;;  %v4944_v29 = vadd.f32 %v15194_v8, %v12731_v28 }
 0x381   : > { %v7495_v19 = vrot.slane %v7494_v23, 1  ;;  %v6309_v26 = vadd.f32 %v15150_v0, %v12870_v17  ;;  %v4936_v27 = vadd.f32 %v15194_v8, %v4935_v12  ;;  %12977 = vmatmul.mubr.msk.bf16.gmra.mrb[160].mxu0 %vm3729_vm2, %v15253_v36  ;;  %v7504_v32 = vrot.slane %v7503_v59, 4 }
 0x382   : > { %v7514_v50 = vmax.f32 %v7512_v54, %v7513_v60  ;;  %v6301_v30 = vadd.f32 %v15150_v0, %v6300_v48  ;;  %v15323_v5 = vadd.f32 %v15150_v0, %v12871_v41  ;;  %v12734_v45 = vpop.f32.mrb[224].mxu1  ;;  %12980 = vmatprep.mubr.msk.bf16.mxu0 %vm3729_vm2, %v15282_v10  ;;  %v5370_v15 = vmax.f32 %v4944_v29, 0.0 }
 0x383   : > { %v7496_v3 = vmax.f32 %v7494_v23, %v7495_v19  ;;  %v7097_v16 = vmax.f32 %v6309_v26, 0.0  ;;  %v5368_v39 = vmax.f32 %v4936_v27, 0.0  ;;  %v4948_v14 = vpop.f32.mrb[225].mxu1  ;;  %v8438_v36 = vunpack.c.l.b16 %v8130_v42 }
 0x384   : > { %v7505_v13 = vmax.f32 %v7503_v59, %v7504_v32  ;;  %v7516_v62 = vmax.f32 %v7514_v50, %v7515_v52  ;;  %v7095_v6 = vmax.f32 %v6301_v30, 0.0  ;;  %v12735_v46 = vpop.f32.mrb[226].mxu1  ;;  %v15330_v20 = vpop.f32.mrb[56].mxu0  ;;  %v15332_v44 = vpack.c.bf16 %v5370_v15, %v5369_v11 }
 0x385   : > { %v8132_v60 = vpack.c.bf16 %v7496_v3, %v7496_v3  ;;  %v15334_v28 = vpack.c.bf16 %v5368_v39, %v5367_v49  ;;  %v7098_v10 = vmax.f32 %v15323_v5, 0.0  ;;  %v4951_v17 = vpop.f32.mrb[227].mxu1  ;;  %v15337_v63 = vpop.f32.mrb[57].mxu0  ;;  %v15340_v56 = vsel %vm7275_vm3, %v7097_v16, -inf }
 0x386   : > { %v7506_v55 = vrot.slane %v7505_v13, 2  ;;  %v7517_v53 = vrot.slane %v7516_v62, 4  ;;  %v15343_v42 = vsel %vm7275_vm3, %v7095_v6, -inf  ;;  %v12875_v2 = vpop.f32.mrb[58].mxu0  ;;  %v7379_v48 = vmax.f32 %v15102_v31, %v7378_v40 }
 0x387   : > { %v8440_v12 = vunpack.c.l.b16 %v8132_v60  ;;  %v7483_v37 = vmax.f32 %v15284_v4, %v7482_v61  ;;  %v8493_v22 = vsel %vm8492_vm6, %v15035_v21, %v15006_v51  ;;  %v15354_v7 = vpop.f32.mrb[59].mxu0  ;;  %v6304_v49 = vadd.f32 %v15150_v0, %v15314_v57 }
 0x388   : > { %v7507_v41 = vmax.f32 %v7505_v13, %v7506_v55  ;;  %v7518_v23 = vmax.f32 %v7516_v62, %v7517_v53  ;;  %v8123_v35 = vpack.c.bf16 %v7379_v48, %v7379_v48  ;;  %v8495_v24 = vsel %vm8494_vm7, %v15056_v1, %v8493_v22 }
 0x389   : > { %v8131_v52 = vpack.c.bf16 %v7483_v37, %v7483_v37  ;;  %12981 = vmatmul.mubr.msk.bf16.gmra.mrb[164].mxu0 %vm3729_vm2, %v15280_v38  ;;  %v8497_v51 = vsel %vm8496_vm8, %v15076_v9, %v8495_v24  ;;  %v8504_v1 = vsel %vm8492_vm6, %v15215_v18, %v15187_v34  ;;  %v4957_v26 = vadd.f32 %v15194_v8, %v12734_v45 }
 0x38a   : > { %v7508_v31 = vrot.slane %v7507_v41, 1  ;;  %v7519_v40 = vrot.slane %v7518_v23, 2  ;;  %v12738_v21 = vpop.f32.mrb[228].mxu1  ;;  %12984 = vmatprep.mubr.msk.bf16.mxu0 %vm3729_vm2, %v15307_v25  ;;  %v8431_v4 = vunpack.c.l.b16 %v8123_v35  ;;  %v8499_v59 = vsel %vm8498_vm9, %v15100_v58, %v8497_v51 }
 0x38b   : > { %v8439_v61 = vunpack.c.l.b16 %v8131_v52  ;;  %v15369_v38 = vpop.f32.mrb[229].mxu1  ;;  %v8505_v9 = vsel %vm8494_vm7, %v15233_v43, %v8504_v1  ;;  %v4949_v34 = vadd.f32 %v15194_v8, %v4948_v14  ;;  %v7096_v30 = vmax.f32 %v6304_v49, 0.0 }
 0x38c   : > { %v7509_v54 = vmax.f32 %v7507_v41, %v7508_v31  ;;  %v7520_v11 = vmax.f32 %v7518_v23, %v7519_v40  ;;  %v12739_v25 = vpop.f32.mrb[230].mxu1  ;;  %v12878_v19 = vpop.f32.mrb[60].mxu0  ;;  %v8501_v29 = vsel %vm8500_vm10, %v8431_v4, %v8499_v59  ;;  %v8506_v58 = vsel %vm8496_vm8, %v15260_v33, %v8505_v9 }
 0x38d   : > { %v4967_v18 = vpop.f32.mrb[231].mxu1  ;;  %v6332_v27 = vpop.f32.mrb[61].mxu0  ;;  %v8507_v43 = vsel %vm8498_vm9, %v8438_v36, %v8506_v58  ;;  %v5373_v15 = vmax.f32 %v4957_v26, 0.0  ;;  %v5371_v16 = vmax.f32 %v4949_v34, 0.0  ;;  %v4960_v39 = vadd.f32 %v15194_v8, %v12735_v46 }
 0x38e   : > { %v8133_v32 = vpack.c.bf16 %v7509_v54, %v7509_v54  ;;  %v7521_v50 = vrot.slane %v7520_v11, 1  ;;  %v12879_v3 = vpop.f32.mrb[62].mxu0  ;;  %v8508_v57 = vsel %vm8500_vm10, %v8439_v61, %v8507_v43  ;;  %v7524_v14 = vsel %vm7275_vm3, %v7096_v30, -inf }
 0x38f   : > { %v6335_v13 = vpop.f32.mrb[63].mxu0  ;;  %v8551_v45 = vpack.c.b16 %v8508_v57, %v8501_v29  ;;  %v7525_v6 = vmax.f32 %v15343_v42, %v7524_v14  ;;  %v5374_v60 = vmax.f32 %v4960_v39, 0.0  ;;  %v6325_v36 = vadd.f32 %v15150_v0, %v15330_v20 }
 0x390   : > { %v8441_v33 = vunpack.c.l.b16 %v8133_v32  ;;  %v7522_v62 = vmax.f32 %v7520_v11, %v7521_v50  ;;  %v4952_v55 = vadd.f32 %v15194_v8, %v4951_v17  ;;  %v6317_v48 = vadd.f32 %v15150_v0, %v15337_v63 }
 0x391   : > { %12985 = vmatmul.mubr.msk.bf16.gmra.mrb[168].mxu0 %vm3729_vm2, %v15304_v47  ;;  %13056 = vmatprep.mubr.msk.bf16.mxu1 %vm7275_vm3, %v8551_v45  ;;  %v6328_v37 = vadd.f32 %v15150_v0, %v12875_v2  ;;  %v7527_v22 = vmax.f32 %v7525_v6, %v15340_v56  ;;  %v15396_v41 = vpack.c.bf16 %v5374_v60, %v5373_v15  ;;  %v7101_v20 = vmax.f32 %v6325_v36, 0.0 }
 0x392   : > { %v8509_v53 = vsel %vm8488_vm4, %v8441_v33, %v8440_v12  ;;  %v8134_v46 = vpack.c.bf16 %v7522_v62, %v7522_v62  ;;  %v12742_v42 = vpop.f32.mrb[232].mxu1  ;;  %v5372_v17 = vmax.f32 %v4952_v55, 0.0  ;;  %12988 = vmatprep.mubr.msk.bf16.mxu0 %vm3729_vm2, %v15334_v28  ;;  %v7528_v23 = vsel %vm7275_vm3, %v7098_v10, -inf }
 0x393   : > { %v4980_v47 = vpop.f32.mrb[233].mxu1  ;;  %v7099_v35 = vmax.f32 %v6317_v48, 0.0  ;;  %v6320_v63 = vadd.f32 %v15150_v0, %v15354_v7  ;;  %v7529_v56 = vmax.f32 %v7527_v22, %v7528_v23  ;;  %v7102_v31 = vmax.f32 %v6328_v37, 0.0 }
 0x394   : > { %v8442_v12 = vunpack.c.l.b16 %v8134_v46  ;;  %v12743_v2 = vpop.f32.mrb[234].mxu1  ;;  %v12882_v52 = vpop.f32.mrb[64].mxu0  ;;  %v5527_v24 = vpack.c.bf16 %v5372_v17, %v5371_v16  ;;  %v4973_v40 = vadd.f32 %v15194_v8, %v12738_v21  ;;  %v7539_v5 = vsel %vm7275_vm3, %v7101_v20, -inf }
 0x395   : > { %v4983_v51 = vpop.f32.mrb[235].mxu1  ;;  %v6348_v4 = vpop.f32.mrb[65].mxu0  ;;  %v7536_v10 = vsel %vm7275_vm3, %v7099_v35, -inf  ;;  %v7100_v61 = vmax.f32 %v6320_v63, 0.0  ;;  %v7530_v1 = vrot.slane %v7529_v56, 4  ;;  %v4965_v54 = vadd.f32 %v15194_v8, %v15369_v38  ;;  %v13357_v35 = vld [vmem:[%s13720_s14 + $0x18] sm:$0xff]  }
 0x396   : > { %v15407_v28 = vsel %vm8490_vm5, %v8442_v12, %v8509_v53  ;;  %v12883_v59 = vpop.f32.mrb[66].mxu0  ;;  %v5377_v7 = vmax.f32 %v4973_v40, 0.0  ;;  %v4976_v11 = vadd.f32 %v15194_v8, %v12739_v25  ;;  %v6341_v49 = vadd.f32 %v15150_v0, %v12878_v19  ;;  %13054 = vmatprep.subr.bf16.mxu1 %v13357_v35 }
 0x397   : > { %v15414_v9 = vpop.f32.mrb[67].mxu0  ;;  %v7537_v21 = vsel %vm7275_vm3, %v7100_v61, -inf  ;;  %v4968_v29 = vadd.f32 %v15194_v8, %v4967_v18  ;;  %v6333_v58 = vadd.f32 %v15150_v0, %v6332_v27  ;;  %v7531_v26 = vmax.f32 %v7529_v56, %v7530_v1  ;;  %13055 = vmatpush3.bf16.msra.mxu1 %v13357_v35 }
 0x398   : > { %v7538_v34 = vmax.f32 %v7536_v10, %v7537_v21  ;;  %v5375_v32 = vmax.f32 %v4965_v54, 0.0  ;;  %v5378_v50 = vmax.f32 %v4976_v11, 0.0  ;;  %v7105_v38 = vmax.f32 %v6341_v49, 0.0 }
 0x399   : > { %12989 = vmatmul.mubr.msk.bf16.gmra.mrb[172].mxu0 %vm3729_vm2, %v15332_v44  ;;  %v5376_v43 = vmax.f32 %v4968_v29, 0.0  ;;  %v7103_v25 = vmax.f32 %v6333_v58, 0.0  ;;  %v6344_v30 = vadd.f32 %v15150_v0, %v12879_v3  ;;  %v7532_v19 = vrot.slane %v7531_v26, 2 }
 0x39a   : > { %v12746_v57 = vpop.f32.mrb[236].mxu1  ;;  %12992 = vmatprep.mubr.msk.bf16.mxu0 %vm3729_vm2, %v5527_v24  ;;  %v7540_v15 = vmax.f32 %v7538_v34, %v7539_v5  ;;  %v15424_v18 = vpack.c.bf16 %v5378_v50, %v5377_v7  ;;  %v6336_v27 = vadd.f32 %v15150_v0, %v6335_v13  ;;  %v7541_v39 = vsel %vm7275_vm3, %v7102_v31, -inf }
 0x39b   : > { %v15427_v16 = vpop.f32.mrb[237].mxu1  ;;  %v7552_v44 = vsel %vm7275_vm3, %v7105_v38, -inf  ;;  %v5529_v33 = vpack.c.bf16 %v5376_v43, %v5375_v32  ;;  %v7106_v62 = vmax.f32 %v6344_v30, 0.0  ;;  %v7533_v3 = vmax.f32 %v7531_v26, %v7532_v19 }
 0x39c   : > { %v12747_v45 = vpop.f32.mrb[238].mxu1  ;;  %v15431_v14 = vpop.f32.mrb[68].mxu0  ;;  %v7542_v6 = vmax.f32 %v7540_v15, %v7541_v39  ;;  %v7104_v60 = vmax.f32 %v6336_v27, 0.0  ;;  %v4989_v36 = vadd.f32 %v15194_v8, %v12742_v42  ;;  %v7549_v13 = vsel %vm7275_vm3, %v7103_v25, -inf }
 0x39d   : > { %v4999_v55 = vpop.f32.mrb[239].mxu1  ;;  %v15434_v53 = vpop.f32.mrb[69].mxu0  ;;  %v4981_v46 = vadd.f32 %v15194_v8, %v4980_v47  ;;  %v4992_v48 = vadd.f32 %v15194_v8, %v12743_v2  ;;  %v6357_v37 = vadd.f32 %v15150_v0, %v12882_v52  ;;  %v7534_v20 = vrot.slane %v7533_v3, 1 }
 0x39e   : > { %v15440_v22 = vpop.f32.mrb[70].mxu0  ;;  %v7543_v17 = vrot.slane %v7542_v6, 4  ;;  %v7554_v12 = vsel %vm7275_vm3, %v7106_v62, -inf  ;;  %v7550_v23 = vsel %vm7275_vm3, %v7104_v60, -inf  ;;  %v5381_v56 = vmax.f32 %v4989_v36, 0.0 }
 0x39f   : > { %v15444_v42 = vpop.f32.mrb[71].mxu0  ;;  %v7551_v63 = vmax.f32 %v7549_v13, %v7550_v23  ;;  %v5382_v24 = vmax.f32 %v4992_v48, 0.0  ;;  %v7109_v31 = vmax.f32 %v6357_v37, 0.0  ;;  %v7535_v47 = vmax.f32 %v7533_v3, %v7534_v20 }
 0x3a0   : > { %v7544_v40 = vmax.f32 %v7542_v6, %v7543_v17  ;;  %v4984_v2 = vadd.f32 %v15194_v8, %v4983_v51  ;;  %v6349_v52 = vadd.f32 %v15150_v0, %v6348_v4  ;;  %v5379_v10 = vmax.f32 %v4981_v46, 0.0  ;;  %v15479_v6 = vld [vmem:[%s13710_s3] ss:$0 sm:$0xff] }
 0x3a1   : > { %12993 = vmatmul.mubr.msk.bf16.gmra.mrb[176].mxu0 %vm3729_vm2, %v15396_v41  ;;  %v7553_v5 = vmax.f32 %v7551_v63, %v7552_v44  ;;  %v15451_v61 = vpack.c.bf16 %v5382_v24, %v5381_v56  ;;  %v6360_v1 = vadd.f32 %v15150_v0, %v12883_v59  ;;  %v8135_v54 = vpack.c.bf16 %v7535_v47, %v7535_v47 }
 0x3a2   : > { %v15454_v7 = vpop.f32.mrb[240].mxu1  ;;  %12996 = vmatprep.mubr.msk.bf16.mxu0 %vm3729_vm2, %v5529_v33  ;;  %v7545_v11 = vrot.slane %v7544_v40, 2  ;;  %v5380_v21 = vmax.f32 %v4984_v2, 0.0  ;;  %v7107_v51 = vmax.f32 %v6349_v52, 0.0  ;;  %v7565_v41 = vsel %vm7275_vm3, %v7109_v31, -inf }
 0x3a3   : > { %v5012_v49 = vpop.f32.mrb[241].mxu1  ;;  %v7555_v4 = vmax.f32 %v7553_v5, %v7554_v12  ;;  %v6352_v29 = vadd.f32 %v15150_v0, %v15414_v9  ;;  %v5005_v58 = vadd.f32 %v15194_v8, %v12746_v57  ;;  %v8443_v34 = vunpack.c.l.b16 %v8135_v54 }
 0x3a4   : > { %v15461_v59 = vpop.f32.mrb[242].mxu1  ;;  %v15463_v26 = vpop.f32.mrb[72].mxu0  ;;  %v7546_v32 = vmax.f32 %v7544_v40, %v7545_v11  ;;  %v5531_v50 = vpack.c.bf16 %v5380_v21, %v5379_v10  ;;  %v7110_v38 = vmax.f32 %v6360_v1, 0.0  ;;  %v7562_v19 = vsel %vm7275_vm3, %v7107_v51, -inf }
 0x3a5   : > { %v5015_v43 = vpop.f32.mrb[243].mxu1  ;;  %v15465_v25 = vpop.f32.mrb[73].mxu0  ;;  %v7556_v30 = vrot.slane %v7555_v4, 4  ;;  %v7108_v15 = vmax.f32 %v6352_v29, 0.0  ;;  %v5385_v27 = vmax.f32 %v5005_v58, 0.0  ;;  %v8511_v9 = vsel %vm8492_vm6, %v8443_v34, %v15407_v28 }
 0x3a6   : > { %v15468_v0 = vpop.f32.mrb[74].mxu0  ;;  %v7547_v57 = vrot.slane %v7546_v32, 1  ;;  %v4997_v39 = vadd.f32 %v15194_v8, %v15427_v16  ;;  %v5008_v44 = vadd.f32 %v15194_v8, %v12747_v45  ;;  %v6373_v60 = vadd.f32 %v15479_v6, %v15431_v14 }
 0x3a7   : > { %v15475_v33 = vpop.f32.mrb[75].mxu0  ;;  %v7557_v62 = vmax.f32 %v7555_v4, %v7556_v30  ;;  %v7563_v3 = vsel %vm7275_vm3, %v7108_v15, -inf  ;;  %v5000_v36 = vadd.f32 %v15194_v8, %v4999_v55  ;;  %v6365_v20 = vadd.f32 %v15479_v6, %v15434_v53 }
 0x3a8   : > { %v7548_v13 = vmax.f32 %v7546_v32, %v7547_v57  ;;  %v7564_v28 = vmax.f32 %v7562_v19, %v7563_v3  ;;  %v5383_v46 = vmax.f32 %v4997_v39, 0.0  ;;  %v5386_v48 = vmax.f32 %v5008_v44, 0.0 }
 0x3a9   : > { %12997 = vmatmul.mubr.msk.bf16.gmra.mrb[180].mxu0 %vm3729_vm2, %v15424_v18  ;;  %v7558_v16 = vrot.slane %v7557_v62, 2  ;;  %v7113_v45 = vmax.f32 %v6373_v60, 0.0  ;;  %v5384_v37 = vmax.f32 %v5000_v36, 0.0  ;;  %v6376_v23 = vadd.f32 %v15479_v6, %v15440_v22 }
 0x3aa   : > { %v15488_v17 = vpop.f32.mrb[244].mxu1  ;;  %13000 = vmatprep.mubr.msk.bf16.mxu0 %vm3729_vm2, %v5531_v50  ;;  %v8136_v14 = vpack.c.bf16 %v7548_v13, %v7548_v13  ;;  %v7566_v12 = vmax.f32 %v7564_v28, %v7565_v41  ;;  %v15491_v55 = vpack.c.bf16 %v5386_v48, %v5385_v27  ;;  %v7567_v63 = vsel %vm7275_vm3, %v7110_v38, -inf }
 0x3ab   : > { %v15495_v35 = vpop.f32.mrb[245].mxu1  ;;  %v7559_v18 = vmax.f32 %v7557_v62, %v7558_v16  ;;  %v5533_v56 = vpack.c.bf16 %v5384_v37, %v5383_v46  ;;  %v7111_v24 = vmax.f32 %v6365_v20, 0.0  ;;  %v7578_v2 = vsel %vm7275_vm3, %v7113_v45, -inf }
 0x3ac   : > { %v15498_v31 = vpop.f32.mrb[246].mxu1  ;;  %v15500_v53 = vpop.f32.mrb[76].mxu0  ;;  %v8444_v47 = vunpack.c.l.b16 %v8136_v14  ;;  %v7568_v40 = vmax.f32 %v7566_v12, %v7567_v63  ;;  %v6368_v52 = vadd.f32 %v15479_v6, %v15444_v42  ;;  %v7114_v1 = vmax.f32 %v6376_v23, 0.0 }
 0x3ad   : > { %v5031_v5 = vpop.f32.mrb[247].mxu1  ;;  %v15505_v22 = vpop.f32.mrb[77].mxu0  ;;  %v7560_v10 = vrot.slane %v7559_v18, 1  ;;  %v5021_v54 = vadd.f32 %v15194_v8, %v15454_v7  ;;  %v5013_v11 = vadd.f32 %v15194_v8, %v5012_v49  ;;  %v7575_v41 = vsel %vm7275_vm3, %v7111_v24, -inf }
 0x3ae   : > { %v15510_v21 = vpop.f32.mrb[78].mxu0  ;;  %v8512_v51 = vsel %vm8494_vm7, %v8444_v47, %v8511_v9  ;;  %v7569_v4 = vrot.slane %v7568_v40, 4  ;;  %v7112_v29 = vmax.f32 %v6368_v52, 0.0  ;;  %v5024_v50 = vadd.f32 %v15194_v8, %v15461_v59 }
 0x3af   : > { %v15514_v58 = vpop.f32.mrb[79].mxu0  ;;  %v7561_v42 = vmax.f32 %v7559_v18, %v7560_v10  ;;  %v5389_v34 = vmax.f32 %v5021_v54, 0.0  ;;  %v5387_v32 = vmax.f32 %v5013_v11, 0.0  ;;  %v6389_v49 = vadd.f32 %v15479_v6, %v15463_v26  ;;  %v15552_v18 = vld [vmem:[%s13700_s25] ss:$0 sm:$0xff] }
 0x3b0   : > { %v7570_v38 = vmax.f32 %v7568_v40, %v7569_v4  ;;  %v7576_v7 = vsel %vm7275_vm3, %v7112_v29, -inf  ;;  %v5016_v30 = vadd.f32 %v15194_v8, %v5015_v43  ;;  %v5390_v27 = vmax.f32 %v5024_v50, 0.0 }
 0x3b1   : > { %13001 = vmatmul.mubr.msk.bf16.gmra.mrb[184].mxu0 %vm3729_vm2, %v15451_v61  ;;  %v8137_v19 = vpack.c.bf16 %v7561_v42, %v7561_v42  ;;  %v7577_v15 = vmax.f32 %v7575_v41, %v7576_v7  ;;  %v6381_v9 = vadd.f32 %v15479_v6, %v15465_v25  ;;  %v7117_v39 = vmax.f32 %v6389_v49, 0.0 }
 0x3b2   : > { %v15526_v57 = vpop.f32.mrb[248].mxu1  ;;  %13004 = vmatprep.mubr.msk.bf16.mxu0 %vm3729_vm2, %v5533_v56  ;;  %v7571_v59 = vrot.slane %v7570_v38, 2  ;;  %v5388_v44 = vmax.f32 %v5016_v30, 0.0  ;;  %v6392_v26 = vadd.f32 %v15479_v6, %v15468_v0  ;;  %v15533_v62 = vpack.c.bf16 %v5390_v27, %v5389_v34 }
 0x3b3   : > { %v15531_v8 = vpop.f32.mrb[249].mxu1  ;;  %v8445_v43 = vunpack.c.l.b16 %v8137_v19  ;;  %v7579_v61 = vmax.f32 %v7577_v15, %v7578_v2  ;;  %v7115_v3 = vmax.f32 %v6381_v9, 0.0  ;;  %v7580_v13 = vsel %vm7275_vm3, %v7114_v1, -inf }
 0x3b4   : > { %v15535_v60 = vpop.f32.mrb[250].mxu1  ;;  %v15537_v25 = vpop.f32.mrb[80].mxu0  ;;  %v7572_v36 = vmax.f32 %v7570_v38, %v7571_v59  ;;  %v7591_v28 = vsel %vm7275_vm3, %v7117_v39, -inf  ;;  %v5535_v46 = vpack.c.bf16 %v5388_v44, %v5387_v32  ;;  %v7118_v37 = vmax.f32 %v6392_v26, 0.0 }
 0x3b5   : > { %v15541_v48 = vpop.f32.mrb[251].mxu1  ;;  %v15543_v0 = vpop.f32.mrb[81].mxu0  ;;  %v8513_v16 = vsel %vm8496_vm8, %v8445_v43, %v8512_v51  ;;  %v7581_v45 = vmax.f32 %v7579_v61, %v7580_v13  ;;  %v6384_v20 = vadd.f32 %v15479_v6, %v15475_v33  ;;  %v7588_v23 = vsel %vm7275_vm3, %v7115_v3, -inf }
 0x3b6   : > { %v15548_v14 = vpop.f32.mrb[82].mxu0  ;;  %v7573_v12 = vrot.slane %v7572_v36, 1  ;;  %v5037_v63 = vadd.f32 %v15552_v18, %v15488_v17  ;;  %v5029_v56 = vadd.f32 %v15552_v18, %v15495_v35  ;;  %v5040_v33 = vadd.f32 %v15552_v18, %v15498_v31 }
 0x3b7   : > { %v15558_v24 = vpop.f32.mrb[83].mxu0  ;;  %v7582_v47 = vrot.slane %v7581_v45, 4  ;;  %v7116_v40 = vmax.f32 %v6384_v20, 0.0  ;;  %v6405_v2 = vadd.f32 %v15479_v6, %v15500_v53  ;;  %v5032_v54 = vadd.f32 %v15552_v18, %v5031_v5 }
 0x3b8   : > { %v7574_v52 = vmax.f32 %v7572_v36, %v7573_v12  ;;  %v5393_v10 = vmax.f32 %v5037_v63, 0.0  ;;  %v5391_v1 = vmax.f32 %v5029_v56, 0.0  ;;  %v5394_v11 = vmax.f32 %v5040_v33, 0.0 }
 0x3b9   : > { %13005 = vmatmul.mubr.msk.bf16.gmra.mrb[188].mxu0 %vm3729_vm2, %v15491_v55  ;;  %v7583_v17 = vmax.f32 %v7581_v45, %v7582_v47  ;;  %v7589_v35 = vsel %vm7275_vm3, %v7116_v40, -inf  ;;  %v7121_v51 = vmax.f32 %v6405_v2, 0.0  ;;  %v5392_v53 = vmax.f32 %v5032_v54, 0.0 }
 0x3ba   : > { %v15568_v4 = vpop.f32.mrb[252].mxu1  ;;  %13008 = vmatprep.mubr.msk.bf16.mxu0 %vm3729_vm2, %v5535_v46  ;;  %v8138_v31 = vpack.c.bf16 %v7574_v52, %v7574_v52  ;;  %v7590_v41 = vmax.f32 %v7588_v23, %v7589_v35  ;;  %v6397_v29 = vadd.f32 %v15479_v6, %v15505_v22  ;;  %v7593_v55 = vsel %vm7275_vm3, %v7118_v37, -inf }
 0x3bb   : > { %v15573_v42 = vpop.f32.mrb[253].mxu1  ;;  %v7584_v5 = vrot.slane %v7583_v17, 2  ;;  %v15576_v34 = vpack.c.bf16 %v5394_v11, %v5393_v10  ;;  %v6408_v32 = vadd.f32 %v15479_v6, %v15510_v21  ;;  %v5537_v30 = vpack.c.bf16 %v5392_v53, %v5391_v1 }
 0x3bc   : > { %v15580_v50 = vpop.f32.mrb[254].mxu1  ;;  %v15582_v38 = vpop.f32.mrb[84].mxu0  ;;  %v8446_v7 = vunpack.c.l.b16 %v8138_v31  ;;  %v7592_v49 = vmax.f32 %v7590_v41, %v7591_v28  ;;  %v7119_v19 = vmax.f32 %v6397_v29, 0.0  ;;  %v7604_v9 = vsel %vm7275_vm3, %v7121_v51, -inf }
 0x3bd   : > { %v15584_v15 = vpop.f32.mrb[255].mxu1  ;;  %v15586_v22 = vpop.f32.mrb[85].mxu0  ;;  %v7585_v27 = vmax.f32 %v7583_v17, %v7584_v5  ;;  %v6400_v59 = vadd.f32 %v15479_v6, %v15514_v58  ;;  %v5053_v21 = vadd.f32 %v15552_v18, %v15526_v57  ;;  %v7122_v43 = vmax.f32 %v6408_v32, 0.0 }
 0x3be   : > { %v15593_v39 = vpop.f32.mrb[86].mxu0  ;;  %v8514_v44 = vsel %vm8498_vm9, %v8446_v7, %v8513_v16  ;;  %v7594_v26 = vmax.f32 %v7592_v49, %v7593_v55  ;;  %v5045_v61 = vadd.f32 %v15552_v18, %v15531_v8  ;;  %v7601_v13 = vsel %vm7275_vm3, %v7119_v19, -inf }
 0x3bf   : > { %v15598_v3 = vpop.f32.mrb[87].mxu0  ;;  %v7586_v36 = vrot.slane %v7585_v27, 1  ;;  %v7120_v28 = vmax.f32 %v6400_v59, 0.0  ;;  %v5397_v46 = vmax.f32 %v5053_v21, 0.0  ;;  %v5056_v57 = vadd.f32 %v15552_v18, %v15535_v60 }
 0x3c0   : > { %v7595_v58 = vrot.slane %v7594_v26, 4  ;;  %v5395_v45 = vmax.f32 %v5045_v61, 0.0  ;;  %v6421_v16 = vadd.f32 %v15479_v6, %v15537_v25  ;;  %v5048_v20 = vadd.f32 %v15552_v18, %v15541_v48 }
 0x3c1   : > { %13009 = vmatmul.mubr.msk.bf16.gmra.mrb[192].mxu0 %vm3729_vm2, %v15533_v62  ;;  %v7587_v37 = vmax.f32 %v7585_v27, %v7586_v36  ;;  %v7602_v8 = vsel %vm7275_vm3, %v7120_v28, -inf  ;;  %v6413_v12 = vadd.f32 %v15479_v6, %v15543_v0  ;;  %v5398_v56 = vmax.f32 %v5056_v57, 0.0 }
 0x3c2   : > { %v15612_v23 = vpop.f32.mrb[0].mxu1  ;;  %13012 = vmatprep.mubr.msk.bf16.mxu0 %vm3729_vm2, %v5537_v30  ;;  %v7596_v60 = vmax.f32 %v7594_v26, %v7595_v58  ;;  %v7603_v63 = vmax.f32 %v7601_v13, %v7602_v8  ;;  %v7125_v25 = vmax.f32 %v6421_v16, 0.0  ;;  %v5396_v40 = vmax.f32 %v5048_v20, 0.0 }
 0x3c3   : > { %v15615_v47 = vpop.f32.mrb[1].mxu1  ;;  %v8139_v62 = vpack.c.bf16 %v7587_v37, %v7587_v37  ;;  %v7123_v33 = vmax.f32 %v6413_v12, 0.0  ;;  %v6424_v2 = vadd.f32 %v15479_v6, %v15548_v14  ;;  %v7606_v10 = vsel %vm7275_vm3, %v7122_v43, -inf }
 0x3c4   : > { %v15619_v48 = vpop.f32.mrb[2].mxu1  ;;  %v15621_v52 = vpop.f32.mrb[88].mxu0  ;;  %v7597_v0 = vrot.slane %v7596_v60, 2  ;;  %v7605_v1 = vmax.f32 %v7603_v63, %v7604_v9  ;;  %v15624_v54 = vpack.c.bf16 %v5398_v56, %v5397_v46  ;;  %v7617_v51 = vsel %vm7275_vm3, %v7125_v25, -inf }
 0x3c5   : > { %v15626_v17 = vpop.f32.mrb[3].mxu1  ;;  %v15628_v35 = vpop.f32.mrb[89].mxu0  ;;  %v8447_v11 = vunpack.c.l.b16 %v8139_v62  ;;  %v5539_v31 = vpack.c.bf16 %v5396_v40, %v5395_v45  ;;  %v7614_v14 = vsel %vm7275_vm3, %v7123_v33, -inf  ;;  %v6416_v5 = vadd.f32 %v15479_v6, %v15558_v24 }
 0x3c6   : > { %v15632_v41 = vpop.f32.mrb[90].mxu0  ;;  %v7598_v53 = vmax.f32 %v7596_v60, %v7597_v0  ;;  %v7607_v29 = vmax.f32 %v7605_v1, %v7606_v10  ;;  %v5069_v55 = vadd.f32 %v15552_v18, %v15568_v4  ;;  %v7126_v49 = vmax.f32 %v6424_v2, 0.0 }
 0x3c7   : > { %v15638_v32 = vpop.f32.mrb[91].mxu0  ;;  %v15641_v7 = vsel %vm8500_vm10, %v8447_v11, %v8514_v44  ;;  %v5061_v30 = vadd.f32 %v15552_v18, %v15573_v42  ;;  %v5072_v19 = vadd.f32 %v15552_v18, %v15580_v50  ;;  %v7124_v59 = vmax.f32 %v6416_v5, 0.0 }
 0x3c8   : > { %v7599_v27 = vrot.slane %v7598_v53, 1  ;;  %v7608_v9 = vrot.slane %v7607_v29, 4  ;;  %v5401_v21 = vmax.f32 %v5069_v55, 0.0  ;;  %v6437_v44 = vadd.f32 %v15479_v6, %v15582_v38 }
 0x3c9   : > { %13013 = vmatmul.mubr.msk.bf16.gmra.mrb[196].mxu0 %vm3729_vm2, %v15576_v34  ;;  %v5399_v24 = vmax.f32 %v5061_v30, 0.0  ;;  %v5402_v4 = vmax.f32 %v5072_v19, 0.0  ;;  %v5064_v26 = vadd.f32 %v15552_v18, %v15584_v15  ;;  %v7615_v61 = vsel %vm7275_vm3, %v7124_v59, -inf }
 0x3ca   : > { %v15653_v43 = vpop.f32.mrb[4].mxu1  ;;  %13016 = vmatprep.mubr.msk.bf16.mxu0 %vm3729_vm2, %v5539_v31  ;;  %v7600_v42 = vmax.f32 %v7598_v53, %v7599_v27  ;;  %v7609_v50 = vmax.f32 %v7607_v29, %v7608_v9  ;;  %v6429_v36 = vadd.f32 %v15479_v6, %v15586_v22  ;;  %v7616_v13 = vmax.f32 %v7614_v14, %v7615_v61 }
 0x3cb   : > { %v15659_v34 = vpop.f32.mrb[5].mxu1  ;;  %v15661_v28 = vpack.c.bf16 %v5402_v4, %v5401_v21  ;;  %v7129_v38 = vmax.f32 %v6437_v44, 0.0  ;;  %v5400_v46 = vmax.f32 %v5064_v26, 0.0  ;;  %v6440_v37 = vadd.f32 %v15479_v6, %v15593_v39 }
 0x3cc   : > { %v15663_v58 = vpop.f32.mrb[6].mxu1  ;;  %v15665_v15 = vpop.f32.mrb[92].mxu0  ;;  %v8140_v45 = vpack.c.bf16 %v7600_v42, %v7600_v42  ;;  %v7610_v57 = vrot.slane %v7609_v50, 2  ;;  %v7127_v16 = vmax.f32 %v6429_v36, 0.0  ;;  %v7619_v20 = vsel %vm7275_vm3, %v7126_v49, -inf }
 0x3cd   : > { %v15669_v8 = vpop.f32.mrb[7].mxu1  ;;  %v15671_v22 = vpop.f32.mrb[93].mxu0  ;;  %v7618_v12 = vmax.f32 %v7616_v13, %v7617_v51  ;;  %v5541_v60 = vpack.c.bf16 %v5400_v46, %v5399_v24  ;;  %v6432_v63 = vadd.f32 %v15479_v6, %v15598_v3  ;;  %v7630_v40 = vsel %vm7275_vm3, %v7129_v38, -inf }
 0x3ce   : > { %v15676_v56 = vpop.f32.mrb[94].mxu0  ;;  %v8448_v25 = vunpack.c.l.b16 %v8140_v45  ;;  %v7611_v62 = vmax.f32 %v7609_v50, %v7610_v57  ;;  %v7130_v33 = vmax.f32 %v6440_v37, 0.0  ;;  %v7627_v0 = vsel %vm7275_vm3, %v7127_v16, -inf }
 0x3cf   : > { %v15679_v2 = vpop.f32.mrb[95].mxu0  ;;  %v7620_v39 = vmax.f32 %v7618_v12, %v7619_v20  ;;  %v7128_v10 = vmax.f32 %v6432_v63, 0.0  ;;  %v5085_v1 = vadd.f32 %v15552_v18, %v15612_v23  ;;  %v5077_v3 = vadd.f32 %v15552_v18, %v15615_v47 }
 0x3d0   : > { %v7612_v11 = vrot.slane %v7611_v62, 1  ;;  %v5088_v51 = vadd.f32 %v15552_v18, %v15619_v48  ;;  %v6453_v31 = vadd.f32 %v15479_v6, %v15621_v52  ;;  %v7632_v53 = vsel %vm7275_vm3, %v7130_v33, -inf }
 0x3d1   : > { %13017 = vmatmul.mubr.msk.bf16.gmra.mrb[200].mxu0 %vm3729_vm2, %v15624_v54  ;;  %v7621_v14 = vrot.slane %v7620_v39, 4  ;;  %v7628_v29 = vsel %vm7275_vm3, %v7128_v10, -inf  ;;  %v5405_v5 = vmax.f32 %v5085_v1, 0.0  ;;  %v5080_v54 = vadd.f32 %v15552_v18, %v15626_v17 }
 0x3d2   : > { %v15694_v23 = vpop.f32.mrb[8].mxu1  ;;  %13020 = vmatprep.mubr.msk.bf16.mxu0 %vm3729_vm2, %v5541_v60  ;;  %v7613_v47 = vmax.f32 %v7611_v62, %v7612_v11  ;;  %v7629_v55 = vmax.f32 %v7627_v0, %v7628_v29  ;;  %v5406_v49 = vmax.f32 %v5088_v51, 0.0  ;;  %v7133_v48 = vmax.f32 %v6453_v31, 0.0 }
 0x3d3   : > { %v15697_v30 = vpop.f32.mrb[9].mxu1  ;;  %v7622_v52 = vmax.f32 %v7620_v39, %v7621_v14  ;;  %v6445_v19 = vadd.f32 %v15479_v6, %v15628_v35  ;;  %v6456_v27 = vadd.f32 %v15479_v6, %v15632_v41  ;;  %v5403_v4 = vmax.f32 %v5077_v3, 0.0 }
 0x3d4   : > { %v15705_v9 = vpop.f32.mrb[10].mxu1  ;;  %v15707_v59 = vpop.f32.mrb[96].mxu0  ;;  %v8141_v21 = vpack.c.bf16 %v7613_v47, %v7613_v47  ;;  %v7631_v24 = vmax.f32 %v7629_v55, %v7630_v40  ;;  %v15709_v44 = vpack.c.bf16 %v5406_v49, %v5405_v5  ;;  %v7643_v50 = vsel %vm7275_vm3, %v7133_v48, -inf }
 0x3d5   : > { %v15711_v26 = vpop.f32.mrb[11].mxu1  ;;  %v15713_v42 = vpop.f32.mrb[97].mxu0  ;;  %v7623_v17 = vrot.slane %v7622_v52, 2  ;;  %v5404_v35 = vmax.f32 %v5080_v54, 0.0  ;;  %v7131_v61 = vmax.f32 %v6445_v19, 0.0  ;;  %v6448_v38 = vadd.f32 %v15479_v6, %v15638_v32 }
 0x3d6   : > { %v15716_v36 = vpop.f32.mrb[98].mxu0  ;;  %v8449_v41 = vunpack.c.l.b16 %v8141_v21  ;;  %v7633_v13 = vmax.f32 %v7631_v24, %v7632_v53  ;;  %v5101_v46 = vadd.f32 %v15552_v18, %v15653_v43  ;;  %v7134_v20 = vmax.f32 %v6456_v27, 0.0 }
 0x3d7   : > { %v15722_v45 = vpop.f32.mrb[99].mxu0  ;;  %v7624_v57 = vmax.f32 %v7622_v52, %v7623_v17  ;;  %v5543_v16 = vpack.c.bf16 %v5404_v35, %v5403_v4  ;;  %v7640_v37 = vsel %vm7275_vm3, %v7131_v61, -inf  ;;  %v7132_v63 = vmax.f32 %v6448_v38, 0.0 }
 0x3d8   : > { %v8516_v12 = vsel %vm8488_vm4, %v8449_v41, %v8448_v25  ;;  %v7634_v60 = vrot.slane %v7633_v13, 4  ;;  %v5409_v62 = vmax.f32 %v5101_v46, 0.0  ;;  %v5093_v32 = vadd.f32 %v15552_v18, %v15659_v34 }
 0x3d9   : > { %13021 = vmatmul.mubr.msk.bf16.gmra.mrb[204].mxu0 %vm3729_vm2, %v15661_v28  ;;  %v7625_v40 = vrot.slane %v7624_v57, 1  ;;  %v5104_v43 = vadd.f32 %v15552_v18, %v15663_v58  ;;  %v6469_v33 = vadd.f32 %v15479_v6, %v15665_v15  ;;  %v7641_v0 = vsel %vm7275_vm3, %v7132_v63, -inf }
 0x3da   : > { %v15734_v39 = vpop.f32.mrb[12].mxu1  ;;  %13024 = vmatprep.mubr.msk.bf16.mxu0 %vm3729_vm2, %v5543_v16  ;;  %v7635_v25 = vmax.f32 %v7633_v13, %v7634_v60  ;;  %v5096_v28 = vadd.f32 %v15552_v18, %v15669_v8  ;;  %v6461_v10 = vadd.f32 %v15479_v6, %v15671_v22  ;;  %v7642_v58 = vmax.f32 %v7640_v37, %v7641_v0 }
 0x3db   : > { %v15742_v34 = vpop.f32.mrb[13].mxu1  ;;  %v7626_v1 = vmax.f32 %v7624_v57, %v7625_v40  ;;  %v5407_v11 = vmax.f32 %v5093_v32, 0.0  ;;  %v5410_v3 = vmax.f32 %v5104_v43, 0.0  ;;  %v7137_v14 = vmax.f32 %v6469_v33, 0.0 }
 0x3dc   : > { %v15744_v15 = vpop.f32.mrb[14].mxu1  ;;  %v15746_v51 = vpop.f32.mrb[100].mxu0  ;;  %v7636_v31 = vrot.slane %v7635_v25, 2  ;;  %v5408_v53 = vmax.f32 %v5096_v28, 0.0  ;;  %v7135_v29 = vmax.f32 %v6461_v10, 0.0  ;;  %v7644_v22 = vmax.f32 %v7642_v58, %v7643_v50 }
 0x3dd   : > { %v15748_v5 = vpop.f32.mrb[15].mxu1  ;;  %v15750_v8 = vpop.f32.mrb[101].mxu0  ;;  %v8142_v47 = vpack.c.bf16 %v7626_v1, %v7626_v1  ;;  %v5546_v55 = vpack.c.bf16 %v5410_v3, %v5409_v62  ;;  %v6472_v49 = vadd.f32 %v15479_v6, %v15676_v56  ;;  %v7645_v54 = vsel %vm7275_vm3, %v7134_v20, -inf }
 0x3de   : > { %v15754_v48 = vpop.f32.mrb[102].mxu0  ;;  %v7637_v52 = vmax.f32 %v7635_v25, %v7636_v31  ;;  %v7656_v19 = vsel %vm7275_vm3, %v7137_v14, -inf  ;;  %v5545_v27 = vpack.c.bf16 %v5408_v53, %v5407_v11  ;;  %v7646_v4 = vmax.f32 %v7644_v22, %v7645_v54 }
 0x3df   : > { %v15758_v21 = vpop.f32.mrb[103].mxu0  ;;  %v8450_v24 = vunpack.c.l.b16 %v8142_v47  ;;  %v7653_v17 = vsel %vm7275_vm3, %v7135_v29, -inf  ;;  %v6464_v50 = vadd.f32 %v15479_v6, %v15679_v2  ;;  %v5117_v56 = vadd.f32 %v15552_v18, %v15694_v23 }
 0x3e0   : > { %v7638_v35 = vrot.slane %v7637_v52, 1  ;;  %v5109_v61 = vadd.f32 %v15552_v18, %v15697_v30  ;;  %v5120_v41 = vadd.f32 %v15552_v18, %v15705_v9  ;;  %v7647_v38 = vrot.slane %v7646_v4, 4 }
 0x3e1   : > { %13025 = vmatmul.mubr.msk.bf16.gmra.mrb[208].mxu0 %vm3729_vm2, %v15709_v44  ;;  %v8517_v13 = vsel %vm8490_vm5, %v8450_v24, %v8516_v12  ;;  %v7138_v46 = vmax.f32 %v6472_v49, 0.0  ;;  %v7136_v57 = vmax.f32 %v6464_v50, 0.0  ;;  %v5413_v23 = vmax.f32 %v5117_v56, 0.0 }
 0x3e2   : > { %v15772_v16 = vpop.f32.mrb[16].mxu1  ;;  %13028 = vmatprep.mubr.msk.bf16.mxu0 %vm3729_vm2, %v5545_v27  ;;  %v7639_v2 = vmax.f32 %v7637_v52, %v7638_v35  ;;  %v5411_v37 = vmax.f32 %v5109_v61, 0.0  ;;  %v5414_v20 = vmax.f32 %v5120_v41, 0.0  ;;  %v7648_v60 = vmax.f32 %v7646_v4, %v7647_v38 }
 0x3e3   : > { %v15775_v30 = vpop.f32.mrb[17].mxu1  ;;  %v7654_v9 = vsel %vm7275_vm3, %v7136_v57, -inf  ;;  %v6485_v44 = vadd.f32 %v15479_v6, %v15707_v59  ;;  %v5112_v12 = vadd.f32 %v15552_v18, %v15711_v26  ;;  %v6477_v33 = vadd.f32 %v15479_v6, %v15713_v42 }
 0x3e4   : > { %v15782_v63 = vpop.f32.mrb[18].mxu1  ;;  %v15784_v62 = vpop.f32.mrb[104].mxu0  ;;  %v8143_v40 = vpack.c.bf16 %v7639_v2, %v7639_v2  ;;  %v7655_v32 = vmax.f32 %v7653_v17, %v7654_v9  ;;  %v15786_v43 = vpack.c.bf16 %v5414_v20, %v5413_v23  ;;  %v7649_v28 = vrot.slane %v7648_v60, 2 }
 0x3e5   : > { %v15790_v25 = vpop.f32.mrb[19].mxu1  ;;  %v15792_v0 = vpop.f32.mrb[105].mxu0  ;;  %v7141_v59 = vmax.f32 %v6485_v44, 0.0  ;;  %v5412_v10 = vmax.f32 %v5112_v12, 0.0  ;;  %v6488_v26 = vadd.f32 %v15479_v6, %v15716_v36  ;;  %v7139_v3 = vmax.f32 %v6477_v33, 0.0 }
 0x3e6   : > { %v15796_v1 = vpop.f32.mrb[106].mxu0  ;;  %v8451_v58 = vunpack.c.l.b16 %v8143_v40  ;;  %v7657_v11 = vmax.f32 %v7655_v32, %v7656_v19  ;;  %v6480_v31 = vadd.f32 %v15479_v6, %v15722_v45  ;;  %v7650_v42 = vmax.f32 %v7648_v60, %v7649_v28 }
 0x3e7   : > { %v15800_v14 = vpop.f32.mrb[107].mxu0  ;;  %v7658_v53 = vsel %vm7275_vm3, %v7138_v46, -inf  ;;  %v5547_v29 = vpack.c.bf16 %v5412_v10, %v5411_v37  ;;  %v7142_v47 = vmax.f32 %v6488_v26, 0.0  ;;  %v7669_v36 = vsel %vm7275_vm3, %v7141_v59, -inf }
 0x3e8   : > { %v8518_v22 = vsel %vm8492_vm6, %v8451_v58, %v8517_v13  ;;  %v7659_v49 = vmax.f32 %v7657_v11, %v7658_v53  ;;  %v7140_v52 = vmax.f32 %v6480_v31, 0.0  ;;  %v7651_v54 = vrot.slane %v7650_v42, 1 }
 0x3e9   : > { %13029 = vmatmul.mubr.msk.bf16.gmra.mrb[212].mxu0 %vm3729_vm2, %v5546_v55  ;;  %v7666_v19 = vsel %vm7275_vm3, %v7139_v3, -inf  ;;  %v5133_v45 = vadd.f32 %v15552_v18, %v15734_v39  ;;  %v5125_v27 = vadd.f32 %v15552_v18, %v15742_v34  ;;  %v5136_v50 = vadd.f32 %v15552_v18, %v15744_v15 }
 0x3ea   : > { %v15811_v24 = vpop.f32.mrb[20].mxu1  ;;  %13032 = vmatprep.mubr.msk.bf16.mxu0 %vm3729_vm2, %v5547_v29  ;;  %v7660_v4 = vrot.slane %v7659_v49, 4  ;;  %v7667_v17 = vsel %vm7275_vm3, %v7140_v52, -inf  ;;  %v6501_v55 = vadd.f32 %v15479_v6, %v15746_v51  ;;  %v7652_v56 = vmax.f32 %v7650_v42, %v7651_v54 }
 0x3eb   : > { %v15819_v35 = vpop.f32.mrb[21].mxu1  ;;  %v7671_v39 = vsel %vm7275_vm3, %v7142_v47, -inf  ;;  %v7668_v61 = vmax.f32 %v7666_v19, %v7667_v17  ;;  %v5417_v34 = vmax.f32 %v5133_v45, 0.0  ;;  %v5418_v46 = vmax.f32 %v5136_v50, 0.0 }
 0x3ec   : > { %v15822_v41 = vpop.f32.mrb[22].mxu1  ;;  %v15824_v13 = vpop.f32.mrb[108].mxu0  ;;  %v7661_v38 = vmax.f32 %v7659_v49, %v7660_v4  ;;  %v7145_v57 = vmax.f32 %v6501_v55, 0.0  ;;  %v5128_v15 = vadd.f32 %v15552_v18, %v15748_v5  ;;  %v8144_v23 = vpack.c.bf16 %v7652_v56, %v7652_v56 }
 0x3ed   : > { %v15828_v2 = vpop.f32.mrb[23].mxu1  ;;  %v15830_v51 = vpop.f32.mrb[109].mxu0  ;;  %v7670_v37 = vmax.f32 %v7668_v61, %v7669_v36  ;;  %v6493_v20 = vadd.f32 %v15479_v6, %v15750_v8  ;;  %v6504_v60 = vadd.f32 %v15479_v6, %v15754_v48  ;;  %v5415_v12 = vmax.f32 %v5125_v27, 0.0 }
 0x3ee   : > { %v15836_v9 = vpop.f32.mrb[110].mxu0  ;;  %v7662_v44 = vrot.slane %v7661_v38, 2  ;;  %v5550_v40 = vpack.c.bf16 %v5418_v46, %v5417_v34  ;;  %v5416_v32 = vmax.f32 %v5128_v15, 0.0  ;;  %v8452_v5 = vunpack.c.l.b16 %v8144_v23 }
 0x3ef   : > { %v15838_v33 = vpop.f32.mrb[111].mxu0  ;;  %v7672_v28 = vmax.f32 %v7670_v37, %v7671_v39  ;;  %v7682_v59 = vsel %vm7275_vm3, %v7145_v57, -inf  ;;  %v7143_v10 = vmax.f32 %v6493_v20, 0.0  ;;  %v6496_v8 = vadd.f32 %v15479_v6, %v15758_v21 }
 0x3f0   : > { %v7663_v26 = vmax.f32 %v7661_v38, %v7662_v44  ;;  %v5549_v58 = vpack.c.bf16 %v5416_v32, %v5415_v12  ;;  %v5149_v48 = vadd.f32 %v15552_v18, %v15772_v16  ;;  %v8519_v11 = vsel %vm8494_vm7, %v8452_v5, %v8518_v22 }
 0x3f1   : > { %13033 = vmatmul.mubr.msk.bf16.gmra.mrb[216].mxu0 %vm3729_vm2, %v15786_v43  ;;  %v7673_v3 = vrot.slane %v7672_v28, 4  ;;  %v7679_v31 = vsel %vm7275_vm3, %v7143_v10, -inf  ;;  %v7146_v42 = vmax.f32 %v6504_v60, 0.0  ;;  %v7144_v29 = vmax.f32 %v6496_v8, 0.0 }
 0x3f2   : > { %v7664_v53 = vrot.slane %v7663_v26, 1  ;;  %v5421_v47 = vmax.f32 %v5149_v48, 0.0  ;;  %v5141_v49 = vadd.f32 %v15552_v18, %v15775_v30  ;;  %13036 = vmatprep.mubr.msk.bf16.mxu0 %vm3729_vm2, %v5549_v58  ;;  %v5152_v16 = vadd.f32 %v15552_v18, %v15782_v63 }
 0x3f3   : > { %v7674_v21 = vmax.f32 %v7672_v28, %v7673_v3  ;;  %v6517_v43 = vadd.f32 %v15479_v6, %v15784_v62  ;;  %v5144_v22 = vadd.f32 %v15552_v18, %v15790_v25  ;;  %v7680_v54 = vsel %vm7275_vm3, %v7144_v29, -inf }
 0x3f4   : > { %v15858_v36 = vpop.f32.mrb[112].mxu0  ;;  %v7665_v52 = vmax.f32 %v7663_v26, %v7664_v53  ;;  %v5419_v19 = vmax.f32 %v5141_v49, 0.0  ;;  %v6509_v30 = vadd.f32 %v15479_v6, %v15792_v0  ;;  %v7681_v4 = vmax.f32 %v7679_v31, %v7680_v54 }
 0x3f5   : > { %v15863_v45 = vpop.f32.mrb[113].mxu0  ;;  %v7675_v27 = vrot.slane %v7674_v21, 2  ;;  %v5422_v63 = vmax.f32 %v5152_v16, 0.0  ;;  %v7149_v17 = vmax.f32 %v6517_v43, 0.0  ;;  %v5420_v55 = vmax.f32 %v5144_v22, 0.0 }
 0x3f6   : > { %v15865_v50 = vpop.f32.mrb[114].mxu0  ;;  %v8145_v62 = vpack.c.bf16 %v7665_v52, %v7665_v52  ;;  %v7147_v25 = vmax.f32 %v6509_v30, 0.0  ;;  %v6520_v56 = vadd.f32 %v15479_v6, %v15796_v1  ;;  %v7684_v34 = vsel %vm7275_vm3, %v7146_v42, -inf }
 0x3f7   : > { %v6543_v39 = vpop.f32.mrb[115].mxu0  ;;  %v7676_v61 = vmax.f32 %v7674_v21, %v7675_v27  ;;  %v7683_v38 = vmax.f32 %v7681_v4, %v7682_v59  ;;  %v5552_v0 = vpack.c.bf16 %v5422_v63, %v5421_v47  ;;  %v7695_v57 = vsel %vm7275_vm3, %v7149_v17, -inf }
 0x3f8   : > { %v8453_v46 = vunpack.c.l.b16 %v8145_v62  ;;  %v5551_v15 = vpack.c.bf16 %v5420_v55, %v5419_v19  ;;  %v7692_v23 = vsel %vm7275_vm3, %v7147_v25, -inf  ;;  %v6512_v60 = vadd.f32 %v15479_v6, %v15800_v14 }
 0x3f9   : > { %13037 = vmatmul.mubr.msk.bf16.gmra.mrb[220].mxu0 %vm3729_vm2, %v5550_v40  ;;  %v7677_v37 = vrot.slane %v7676_v61, 1  ;;  %v7685_v20 = vmax.f32 %v7683_v38, %v7684_v34  ;;  %v5165_v1 = vadd.f32 %v15552_v18, %v15811_v24  ;;  %v7150_v12 = vmax.f32 %v6520_v56, 0.0 }
 0x3fa   : > { %v8520_v44 = vsel %vm8496_vm8, %v8453_v46, %v8519_v11  ;;  %v5157_v32 = vadd.f32 %v15552_v18, %v15819_v35  ;;  %v5168_v5 = vadd.f32 %v15552_v18, %v15822_v41  ;;  %13040 = vmatprep.mubr.msk.bf16.mxu0 %vm3729_vm2, %v5551_v15  ;;  %v7148_v59 = vmax.f32 %v6512_v60, 0.0 }
 0x3fb   : > { %v7678_v40 = vmax.f32 %v7676_v61, %v7677_v37  ;;  %v7686_v28 = vrot.slane %v7685_v20, 4  ;;  %v5425_v10 = vmax.f32 %v5165_v1, 0.0  ;;  %v6533_v24 = vadd.f32 %v15479_v6, %v15824_v13 }
 0x3fc   : > { %v12934_v26 = vpop.f32.mrb[116].mxu0  ;;  %v5423_v14 = vmax.f32 %v5157_v32, 0.0  ;;  %v5426_v58 = vmax.f32 %v5168_v5, 0.0  ;;  %v5160_v8 = vadd.f32 %v15552_v18, %v15828_v2  ;;  %v7693_v41 = vsel %vm7275_vm3, %v7148_v59, -inf }
 0x3fd   : > { %v6556_v48 = vpop.f32.mrb[117].mxu0  ;;  %v8146_v35 = vpack.c.bf16 %v7678_v40, %v7678_v40  ;;  %v7687_v11 = vmax.f32 %v7685_v20, %v7686_v28  ;;  %v6525_v3 = vadd.f32 %v15479_v6, %v15830_v51  ;;  %v7694_v42 = vmax.f32 %v7692_v23, %v7693_v41 }
 0x3fe   : > { %v12935_v31 = vpop.f32.mrb[118].mxu0  ;;  %v5554_v53 = vpack.c.bf16 %v5426_v58, %v5425_v10  ;;  %v7153_v29 = vmax.f32 %v6533_v24, 0.0  ;;  %v5424_v47 = vmax.f32 %v5160_v8, 0.0  ;;  %v6536_v18 = vadd.f32 %v15479_v6, %v15836_v9 }
 0x3ff   : > { %v6559_v49 = vpop.f32.mrb[119].mxu0  ;;  %v8454_v21 = vunpack.c.l.b16 %v8146_v35  ;;  %v7688_v16 = vrot.slane %v7687_v11, 2  ;;  %v7151_v13 = vmax.f32 %v6525_v3, 0.0  ;;  %v7697_v2 = vsel %vm7275_vm3, %v7150_v12, -inf }
 0x400   : > { %v7696_v43 = vmax.f32 %v7694_v42, %v7695_v57  ;;  %v5553_v22 = vpack.c.bf16 %v5424_v47, %v5423_v14  ;;  %v6528_v52 = vadd.f32 %v15479_v6, %v15838_v33  ;;  %v7708_v19 = vsel %vm7275_vm3, %v7153_v29, -inf }
 0x401   : > { %13041 = vmatmul.mubr.msk.bf16.gmra.mrb[224].mxu0 %vm3729_vm2, %v5552_v0  ;;  %v8521_v51 = vsel %vm8498_vm9, %v8454_v21, %v8520_v44  ;;  %v7689_v54 = vmax.f32 %v7687_v11, %v7688_v16  ;;  %v7154_v30 = vmax.f32 %v6536_v18, 0.0  ;;  %v6549_v9 = vadd.f32 %v15479_v6, %v15858_v36 }
 0x402   : > { %v7698_v27 = vmax.f32 %v7696_v43, %v7697_v2  ;;  %v7152_v4 = vmax.f32 %v6528_v52, 0.0  ;;  %v6541_v63 = vadd.f32 %v15479_v6, %v15863_v45  ;;  %13044 = vmatprep.mubr.msk.bf16.mxu0 %vm3729_vm2, %v5553_v22  ;;  %v7705_v33 = vsel %vm7275_vm3, %v7151_v13, -inf  ;;  %v15924_v13 = vld [vmem:[%s13710_s3] ss:$0 sm:$0xff] }
 0x403   : > { %v7690_v17 = vrot.slane %v7689_v54, 1  ;;  %v6552_v62 = vadd.f32 %v15479_v6, %v15865_v50  ;;  %v6544_v55 = vadd.f32 %v15479_v6, %v6543_v39  ;;  %v7157_v34 = vmax.f32 %v6549_v9, 0.0 }
 0x404   : > { %v12938_v25 = vpop.f32.mrb[120].mxu0  ;;  %v7699_v56 = vrot.slane %v7698_v27, 4  ;;  %v7706_v61 = vsel %vm7275_vm3, %v7152_v4, -inf  ;;  %v7155_v38 = vmax.f32 %v6541_v63, 0.0  ;;  %v7710_v45 = vsel %vm7275_vm3, %v7154_v30, -inf }
 0x405   : > { %v6572_v36 = vpop.f32.mrb[121].mxu0  ;;  %v7691_v0 = vmax.f32 %v7689_v54, %v7690_v17  ;;  %v7707_v46 = vmax.f32 %v7705_v33, %v7706_v61  ;;  %v7156_v57 = vmax.f32 %v6544_v55, 0.0  ;;  %v7721_v37 = vsel %vm7275_vm3, %v7157_v34, -inf }
 0x406   : > { %v12939_v15 = vpop.f32.mrb[122].mxu0  ;;  %v7700_v23 = vmax.f32 %v7698_v27, %v7699_v56  ;;  %v7158_v20 = vmax.f32 %v6552_v62, 0.0  ;;  %v6565_v50 = vadd.f32 %v15479_v6, %v12934_v26  ;;  %v7718_v44 = vsel %vm7275_vm3, %v7155_v38, -inf }
 0x407   : > { %v6575_v39 = vpop.f32.mrb[123].mxu0  ;;  %v8147_v60 = vpack.c.bf16 %v7691_v0, %v7691_v0  ;;  %v7709_v1 = vmax.f32 %v7707_v46, %v7708_v19  ;;  %v7719_v12 = vsel %vm7275_vm3, %v7156_v57, -inf  ;;  %v6557_v28 = vadd.f32 %v15479_v6, %v6556_v48 }
 0x408   : > { %v7701_v32 = vrot.slane %v7700_v23, 2  ;;  %v7720_v5 = vmax.f32 %v7718_v44, %v7719_v12  ;;  %v7161_v40 = vmax.f32 %v6565_v50, 0.0  ;;  %v6568_v14 = vadd.f32 %v15479_v6, %v12935_v31 }
 0x409   : > { %13045 = vmatmul.mubr.msk.bf16.gmra.mrb[228].mxu0 %vm3729_vm2, %v5554_v53  ;;  %v8455_v59 = vunpack.c.l.b16 %v8147_v60  ;;  %v7711_v10 = vmax.f32 %v7709_v1, %v7710_v45  ;;  %v6560_v26 = vadd.f32 %v15479_v6, %v6559_v49  ;;  %v7723_v24 = vsel %vm7275_vm3, %v7158_v20, -inf }
 0x40a   : > { %v7702_v58 = vmax.f32 %v7700_v23, %v7701_v32  ;;  %v7722_v8 = vmax.f32 %v7720_v5, %v7721_v37  ;;  %v7159_v35 = vmax.f32 %v6557_v28, 0.0  ;;  %v7734_v3 = vsel %vm7275_vm3, %v7161_v40, -inf }
 0x40b   : > { %v8522_v11 = vsel %vm8500_vm10, %v8455_v59, %v8521_v51  ;;  %v7712_v41 = vrot.slane %v7711_v10, 4  ;;  %v7160_v48 = vmax.f32 %v6560_v26, 0.0  ;;  %v7162_v31 = vmax.f32 %v6568_v14, 0.0 }
 0x40c   : > { %v12942_v42 = vpop.f32.mrb[124].mxu0  ;;  %v8552_v53 = vpack.c.b16 %v8522_v11, %v15641_v7  ;;  %v7703_v29 = vrot.slane %v7702_v58, 1  ;;  %v7724_v47 = vmax.f32 %v7722_v8, %v7723_v24  ;;  %v7731_v49 = vsel %vm7275_vm3, %v7159_v35, -inf }
 0x40d   : > { %v6588_v21 = vpop.f32.mrb[125].mxu0  ;;  %v7713_v6 = vmax.f32 %v7711_v10, %v7712_v41  ;;  %v7732_v16 = vsel %vm7275_vm3, %v7160_v48, -inf  ;;  %v6581_v18 = vadd.f32 %v15924_v13, %v12938_v25  ;;  %v6573_v7 = vadd.f32 %v15924_v13, %v6572_v36 }
 0x40e   : > { %v12943_v2 = vpop.f32.mrb[126].mxu0  ;;  %v7704_v43 = vmax.f32 %v7702_v58, %v7703_v29  ;;  %v7725_v22 = vrot.slane %v7724_v47, 4  ;;  %13057 = vmatmul.mubr.msk.bf16.vlgmr.msra.gmra.mrb[24].mxu1 %vm7275_vm3, %v8552_v53  ;;  %v7733_v52 = vmax.f32 %v7731_v49, %v7732_v16  ;;  %v6584_v30 = vadd.f32 %v15924_v13, %v12939_v15 }
 0x40f   : > { %v6591_v51 = vpop.f32.mrb[127].mxu0  ;;  %v7714_v54 = vrot.slane %v7713_v6, 2  ;;  %v7165_v19 = vmax.f32 %v6581_v18, 0.0  ;;  %v6576_v27 = vadd.f32 %v15924_v13, %v6575_v39  ;;  %v7163_v17 = vmax.f32 %v6573_v7, 0.0 }
 0x410   : > { %v8148_v4 = vpack.c.bf16 %v7704_v43, %v7704_v43  ;;  %v7726_v9 = vmax.f32 %v7724_v47, %v7725_v22  ;;  %v7735_v63 = vmax.f32 %v7733_v52, %v7734_v3  ;;  %v7736_v62 = vsel %vm7275_vm3, %v7162_v31, -inf }
 0x411   : > { %v7715_v33 = vmax.f32 %v7713_v6, %v7714_v54  ;;  %v7747_v55 = vsel %vm7275_vm3, %v7165_v19, -inf  ;;  %v7164_v25 = vmax.f32 %v6576_v27, 0.0  ;;  %v7166_v38 = vmax.f32 %v6584_v30, 0.0 }
 0x412   : > { %v8456_v56 = vunpack.c.l.b16 %v8148_v4  ;;  %v7727_v61 = vrot.slane %v7726_v9, 2  ;;  %v7737_v34 = vmax.f32 %v7735_v63, %v7736_v62  ;;  %v7744_v0 = vsel %vm7275_vm3, %v7163_v17, -inf }
 0x413   : > { %v7716_v36 = vrot.slane %v7715_v33, 1  ;;  %v7745_v45 = vsel %vm7275_vm3, %v7164_v25, -inf  ;;  %v6597_v46 = vadd.f32 %v15924_v13, %v12942_v42  ;;  %v6589_v20 = vadd.f32 %v15924_v13, %v6588_v21 }
 0x414   : > { %v12946_v57 = vpop.f32.mrb[128].mxu0  ;;  %v7728_v15 = vmax.f32 %v7726_v9, %v7727_v61  ;;  %v7738_v23 = vrot.slane %v7737_v34, 4  ;;  %v7746_v37 = vmax.f32 %v7744_v0, %v7745_v45  ;;  %v6600_v1 = vadd.f32 %v15924_v13, %v12943_v2 }
 0x415   : > { %v6604_v50 = vpop.f32.mrb[129].mxu0  ;;  %v7717_v39 = vmax.f32 %v7715_v33, %v7716_v36  ;;  %v7169_v60 = vmax.f32 %v6597_v46, 0.0  ;;  %v6592_v44 = vadd.f32 %v15924_v13, %v6591_v51  ;;  %v7167_v28 = vmax.f32 %v6589_v20, 0.0 }
 0x416   : > { %v12947_v12 = vpop.f32.mrb[130].mxu0  ;;  %v7729_v32 = vrot.slane %v7728_v15, 1  ;;  %v7739_v5 = vmax.f32 %v7737_v34, %v7738_v23  ;;  %v7748_v40 = vmax.f32 %v7746_v37, %v7747_v55  ;;  %v7749_v14 = vsel %vm7275_vm3, %v7166_v38, -inf }
 0x417   : > { %v6607_v59 = vpop.f32.mrb[131].mxu0  ;;  %v8149_v10 = vpack.c.bf16 %v7717_v39, %v7717_v39  ;;  %v7760_v26 = vsel %vm7275_vm3, %v7169_v60, -inf  ;;  %v7168_v58 = vmax.f32 %v6592_v44, 0.0  ;;  %v7170_v11 = vmax.f32 %v6600_v1, 0.0 }
 0x418   : > { %v7730_v24 = vmax.f32 %v7728_v15, %v7729_v32  ;;  %v7740_v8 = vrot.slane %v7739_v5, 2  ;;  %v7750_v35 = vmax.f32 %v7748_v40, %v7749_v14  ;;  %v7757_v3 = vsel %vm7275_vm3, %v7167_v28, -inf }
 0x419   : > { %v8457_v41 = vunpack.c.l.b16 %v8149_v10  ;;  %v7758_v48 = vsel %vm7275_vm3, %v7168_v58, -inf  ;;  %v6613_v42 = vadd.f32 %v15924_v13, %v12946_v57  ;;  %v6605_v49 = vadd.f32 %v15924_v13, %v6604_v50 }
 0x41a   : > { %v8150_v53 = vpack.c.bf16 %v7730_v24, %v7730_v24  ;;  %v7741_v29 = vmax.f32 %v7739_v5, %v7740_v8  ;;  %v7751_v47 = vrot.slane %v7750_v35, 4  ;;  %v7759_v31 = vmax.f32 %v7757_v3, %v7758_v48 }
 0x41b   : > { %v8523_v21 = vsel %vm8488_vm4, %v8457_v41, %v8456_v56  ;;  %v7173_v6 = vmax.f32 %v6613_v42, 0.0  ;;  %v6616_v16 = vadd.f32 %v15924_v13, %v12947_v12  ;;  %v7762_v51 = vsel %vm7275_vm3, %v7170_v11, -inf }
 0x41c   : > { %v12950_v18 = vpop.f32.mrb[132].mxu0  ;;  %v8458_v2 = vunpack.c.l.b16 %v8150_v53  ;;  %v7742_v43 = vrot.slane %v7741_v29, 1  ;;  %v7752_v22 = vmax.f32 %v7750_v35, %v7751_v47  ;;  %v7761_v52 = vmax.f32 %v7759_v31, %v7760_v26 }
 0x41d   : > { %v6620_v7 = vpop.f32.mrb[133].mxu0  ;;  %v7171_v54 = vmax.f32 %v6605_v49, 0.0  ;;  %v6608_v19 = vadd.f32 %v15924_v13, %v6607_v59  ;;  %v7174_v63 = vmax.f32 %v6616_v16, 0.0  ;;  %v6629_v55 = vadd.f32 %v15924_v13, %v12950_v18  ;;  %v15973_v16 = vld [vmem:[%s15966_s22] sm:$0xff] }
 0x41e   : > { %v12951_v30 = vpop.f32.mrb[134].mxu0  ;;  %v15950_v27 = vsel %vm8490_vm5, %v8458_v2, %v8523_v21  ;;  %v7753_v4 = vrot.slane %v7752_v22, 2  ;;  %v7763_v9 = vmax.f32 %v7761_v52, %v7762_v51  ;;  %v7743_v33 = vmax.f32 %v7741_v29, %v7742_v43 }
 0x41f   : > { %v6623_v17 = vpop.f32.mrb[135].mxu0  ;;  %v7172_v62 = vmax.f32 %v6608_v19, 0.0  ;;  %v7773_v61 = vsel %vm7275_vm3, %v7173_v6, -inf  ;;  %v6621_v34 = vadd.f32 %v15924_v13, %v6620_v7  ;;  %v7770_v38 = vsel %vm7275_vm3, %v7171_v54, -inf }
 0x420   : > { %v7754_v25 = vmax.f32 %v7752_v22, %v7753_v4  ;;  %v7764_v56 = vrot.slane %v7763_v9, 4  ;;  %v6632_v0 = vadd.f32 %v15924_v13, %v12951_v30  ;;  %v6624_v45 = vadd.f32 %v15924_v13, %v6623_v17 }
 0x421   : > { %v7771_v36 = vsel %vm7275_vm3, %v7172_v62, -inf  ;;  %v7775_v15 = vsel %vm7275_vm3, %v7174_v63, -inf  ;;  %v8151_v37 = vpack.c.bf16 %v7743_v33, %v7743_v33  ;;  %v7177_v20 = vmax.f32 %v6629_v55, 0.0 }
 0x422   : > { %v7755_v46 = vrot.slane %v7754_v25, 1  ;;  %v7765_v57 = vmax.f32 %v7763_v9, %v7764_v56  ;;  %v7772_v23 = vmax.f32 %v7770_v38, %v7771_v36  ;;  %v7175_v50 = vmax.f32 %v6621_v34, 0.0  ;;  %v15984_v56 = vld [vmem:[%s15966_s22 + $0x8] sm:$0xff] }
 0x423   : > { %v7176_v39 = vmax.f32 %v6624_v45, 0.0  ;;  %v7178_v32 = vmax.f32 %v6632_v0, 0.0  ;;  %v7786_v11 = vsel %vm7275_vm3, %v7177_v20, -inf  ;;  %v8459_v42 = vunpack.c.l.b16 %v8151_v37 }
 0x424   : > { %v12954_v60 = vpop.f32.mrb[136].mxu0  ;;  %v7756_v1 = vmax.f32 %v7754_v25, %v7755_v46  ;;  %v7766_v44 = vrot.slane %v7765_v57, 2  ;;  %v7774_v12 = vmax.f32 %v7772_v23, %v7773_v61  ;;  %v7783_v40 = vsel %vm7275_vm3, %v7175_v50, -inf }
 0x425   : > { %v6636_v5 = vpop.f32.mrb[137].mxu0  ;;  %v7784_v28 = vsel %vm7275_vm3, %v7176_v39, -inf  ;;  %v6645_v59 = vadd.f32 %v15924_v13, %v12954_v60  ;;  %v7788_v21 = vsel %vm7275_vm3, %v7178_v32, -inf  ;;  %v13662_v54 = vmov 1  }
 0x426   : > { %v6637_v10 = vadd.f32 %v15924_v13, %v6636_v5  ;;  %v12955_v14 = vpop.f32.mrb[138].mxu0  ;;  %v8152_v26 = vpack.c.bf16 %v7756_v1, %v7756_v1  ;;  %v7767_v58 = vmax.f32 %v7765_v57, %v7766_v44  ;;  %v7776_v24 = vmax.f32 %v7774_v12, %v7775_v15  ;;  %13207 = vset.pattern.permute.xlu1 %v13662_v54  ;;  %v15996_v5 = vld [vmem:[%s15966_s22 + $0x18] sm:$0xff] }
 0x427   : > { %v7785_v8 = vmax.f32 %v7783_v40, %v7784_v28  ;;  %v6639_v35 = vpop.f32.mrb[139].mxu0  ;;  %v6648_v3 = vadd.f32 %v15924_v13, %v12955_v14  ;;  %v7181_v6 = vmax.f32 %v6645_v59, 0.0  ;;  %8242 = vperm.xlu1 %13207, %v15973_v16   ;;  %v17004_v17 = vmov 0   ;;  %v15999_v40 = vld [vmem:[%s15966_s22 + $0x10] sm:$0xff] }
 0x428   : > { %v7179_v41 = vmax.f32 %v6637_v10, 0.0  ;;  %v6640_v48 = vadd.f32 %v15924_v13, %v6639_v35  ;;  %v7768_v53 = vrot.slane %v7767_v58, 1  ;;  %v7777_v29 = vrot.slane %v7776_v24, 4  ;;  %13206 = vset.pattern.permute.xlu0 %v17004_v17 }
 0x429   : > { %v7787_v47 = vmax.f32 %v7785_v8, %v7786_v11  ;;  %v8460_v31 = vunpack.c.l.b16 %v8152_v26  ;;  %v7182_v52 = vmax.f32 %v6648_v3, 0.0  ;;  %v7799_v33 = vsel %vm7275_vm3, %v7181_v6, -inf  ;;  %8191 = vperm.xlu0 %13206, %v15973_v16  }
 0x42a   : > { %v7180_v49 = vmax.f32 %v6640_v48, 0.0  ;;  %v7769_v18 = vmax.f32 %v7767_v58, %v7768_v53  ;;  %v7778_v2 = vmax.f32 %v7776_v24, %v7777_v29  ;;  %v7796_v22 = vsel %vm7275_vm3, %v7179_v41, -inf }
 0x42b   : > { %v7789_v43 = vmax.f32 %v7787_v47, %v7788_v21  ;;  %v8525_v61 = vsel %vm8492_vm6, %v8459_v42, %v15950_v27  ;;  %v7801_v46 = vsel %vm7275_vm3, %v7182_v52, -inf  ;;  %8246 = vperm.xlu1 %13207, %v15984_v56  }
 0x42c   : > { %v7797_v7 = vsel %vm7275_vm3, %v7180_v49, -inf  ;;  %v12958_v51 = vpop.f32.mrb[140].mxu0  ;;  %v8153_v19 = vpack.c.bf16 %v7769_v18, %v7769_v18  ;;  %v7779_v30 = vrot.slane %v7778_v2, 2  ;;  %v8526_v27 = vsel %vm8494_vm7, %v8460_v31, %v8525_v61 }
 0x42d   : > { %v7790_v4 = vrot.slane %v7789_v43, 4  ;;  %v7798_v9 = vmax.f32 %v7796_v22, %v7797_v7  ;;  %v6652_v63 = vpop.f32.mrb[141].mxu0  ;;  %v6661_v62 = vadd.f32 %v15924_v13, %v12958_v51  ;;  %8196 = vperm.xlu0 %13206, %v15984_v56  }
 0x42e   : > { %v6653_v55 = vadd.f32 %v15924_v13, %v6652_v63  ;;  %v12959_v25 = vpop.f32.mrb[142].mxu0  ;;  %v8461_v34 = vunpack.c.l.b16 %v8153_v19  ;;  %v7780_v38 = vmax.f32 %v7778_v2, %v7779_v30 }
 0x42f   : > { %v7791_v36 = vmax.f32 %v7789_v43, %v7790_v4  ;;  %v7800_v0 = vmax.f32 %v7798_v9, %v7799_v33  ;;  %v6655_v45 = vpop.f32.mrb[143].mxu0  ;;  %v6664_v15 = vadd.f32 %v15924_v13, %v12959_v25  ;;  %v7185_v39 = vmax.f32 %v6661_v62, 0.0  ;;  %13208 = vset.pattern.permute.xlu1 %v17004_v17 }
 0x430   : > { %v7183_v57 = vmax.f32 %v6653_v55, 0.0  ;;  %v6656_v23 = vadd.f32 %v15924_v13, %v6655_v45  ;;  %v7781_v37 = vrot.slane %v7780_v38, 1  ;;  %v8527_v28 = vsel %vm8496_vm8, %v8461_v34, %v8526_v27  ;;  %8206 = vperm.xlu1 %13208, %v15996_v5  }
 0x431   : > { %v7792_v20 = vrot.slane %v7791_v36, 2  ;;  %v7802_v50 = vmax.f32 %v7800_v0, %v7801_v46  ;;  %v7186_v60 = vmax.f32 %v6664_v15, 0.0  ;;  %v7812_v11 = vsel %vm7275_vm3, %v7185_v39, -inf  ;;  %8201 = vperm.xlu0 %13206, %v15999_v40  }
 0x432   : > { %v7184_v1 = vmax.f32 %v6656_v23, 0.0  ;;  %v7782_v44 = vmax.f32 %v7780_v38, %v7781_v37  ;;  %v7809_v59 = vsel %vm7275_vm3, %v7183_v57, -inf  ;;  %v13664_v23 = vmov 2  }
 0x433   : > { %v7793_v12 = vmax.f32 %v7791_v36, %v7792_v20  ;;  %v7803_v32 = vrot.slane %v7802_v50, 4  ;;  %v7814_v29 = vsel %vm7275_vm3, %v7186_v60, -inf }
 0x434   : > { %v7810_v10 = vsel %vm7275_vm3, %v7184_v1, -inf  ;;  %v12962_v14 = vpop.f32.mrb[144].mxu0  ;;  %v8154_v26 = vpack.c.bf16 %v7782_v44, %v7782_v44  ;;  %13210 = vset.pattern.permute.xlu1 %v13662_v54 }
 0x435   : > { %v7794_v58 = vrot.slane %v7793_v12, 1  ;;  %v7804_v24 = vmax.f32 %v7802_v50, %v7803_v32  ;;  %v7811_v8 = vmax.f32 %v7809_v59, %v7810_v10  ;;  %v6668_v35 = vpop.f32.mrb[145].mxu0  ;;  %v6677_v41 = vadd.f32 %v15924_v13, %v12962_v14  ;;  %13209 = vset.pattern.permute.xlu0 %v13662_v54  ;;  %8254 = vperm.xlu1 %13210, %v15996_v5  }
 0x436   : > { %v6669_v3 = vadd.f32 %v15924_v13, %v6668_v35  ;;  %v12963_v48 = vpop.f32.mrb[146].mxu0  ;;  %v8462_v42 = vunpack.c.l.b16 %v8154_v26  ;;  %8250 = vperm.xlu0 %13209, %v15999_v40  }
 0x437   : > { %v7805_v53 = vrot.slane %v7804_v24, 2  ;;  %v7813_v47 = vmax.f32 %v7811_v8, %v7812_v11  ;;  %v6671_v31 = vpop.f32.mrb[147].mxu0  ;;  %v6680_v6 = vadd.f32 %v15924_v13, %v12963_v48  ;;  %v7795_v18 = vmax.f32 %v7793_v12, %v7794_v58 }
 0x438   : > { %v7187_v21 = vmax.f32 %v6669_v3, 0.0  ;;  %v6672_v49 = vadd.f32 %v15924_v13, %v6671_v31  ;;  %v8528_v22 = vsel %vm8498_vm9, %v8462_v42, %v8527_v28  ;;  %v7189_v52 = vmax.f32 %v6677_v41, 0.0 }
 0x439   : > { %v7806_v2 = vmax.f32 %v7804_v24, %v7805_v53  ;;  %v7815_v43 = vmax.f32 %v7813_v47, %v7814_v29  ;;  %v8155_v51 = vpack.c.bf16 %v7795_v18, %v7795_v18  ;;  %v7190_v4 = vmax.f32 %v6680_v6, 0.0  ;;  %13211 = vset.pattern.permute.xlu1 %v13664_v23 }
 0x43a   : > { %v7188_v7 = vmax.f32 %v6672_v49, 0.0  ;;  %v7822_v30 = vsel %vm7275_vm3, %v7187_v21, -inf  ;;  %v7825_v34 = vsel %vm7275_vm3, %v7189_v52, -inf  ;;  %13212 = vset.pattern.permute.xlu0 %v13664_v23  ;;  %8294 = vperm.xlu1 %13211, %v15973_v16  }
 0x43b   : > { %v7816_v19 = vrot.slane %v7815_v43, 4  ;;  %v8463_v33 = vunpack.c.l.b16 %v8155_v51  ;;  %v7807_v62 = vrot.slane %v7806_v2, 1  ;;  %v7827_v37 = vsel %vm7275_vm3, %v7190_v4, -inf  ;;  %8298 = vperm.xlu0 %13212, %v15984_v56  }
 0x43c   : > { %v7823_v9 = vsel %vm7275_vm3, %v7188_v7, -inf  ;;  %v12966_v63 = vpop.f32.mrb[148].mxu0 }
 0x43d   : > { %v7817_v55 = vmax.f32 %v7815_v43, %v7816_v19  ;;  %v7824_v25 = vmax.f32 %v7822_v30, %v7823_v9  ;;  %v6684_v61 = vpop.f32.mrb[149].mxu0  ;;  %v6693_v38 = vadd.f32 %v15924_v13, %v12966_v63  ;;  %v16024_v45 = vsel %vm8500_vm10, %v8463_v33, %v8528_v22 }
 0x43e   : > { %v6685_v36 = vadd.f32 %v15924_v13, %v6684_v61  ;;  %v12967_v0 = vpop.f32.mrb[150].mxu0  ;;  %v7808_v39 = vmax.f32 %v7806_v2, %v7807_v62  ;;  %8302 = vperm.xlu1 %13211, %v15999_v40  }
 0x43f   : > { %v7818_v46 = vrot.slane %v7817_v55, 2  ;;  %v7826_v57 = vmax.f32 %v7824_v25, %v7825_v34  ;;  %v6687_v15 = vpop.f32.mrb[151].mxu0  ;;  %v6696_v50 = vadd.f32 %v15924_v13, %v12967_v0  ;;  %v7193_v44 = vmax.f32 %v6693_v38, 0.0  ;;  %13213 = vset.pattern.permute.xlu0 %v17004_v17 }
 0x440   : > { %v7191_v20 = vmax.f32 %v6685_v36, 0.0  ;;  %v6688_v27 = vadd.f32 %v15924_v13, %v6687_v15  ;;  %v8156_v16 = vpack.c.bf16 %v7808_v39, %v7808_v39 }
 0x441   : > { %v7819_v60 = vmax.f32 %v7817_v55, %v7818_v46  ;;  %v7828_v1 = vmax.f32 %v7826_v57, %v7827_v37  ;;  %v7194_v10 = vmax.f32 %v6696_v50, 0.0  ;;  %v7838_v35 = vsel %vm7275_vm3, %v7193_v44, -inf }
 0x442   : > { %v7192_v12 = vmax.f32 %v6688_v27, 0.0  ;;  %v7835_v59 = vsel %vm7275_vm3, %v7191_v20, -inf  ;;  %8306 = vperm.xlu1 %13211, %v15996_v5   ;;  %v8464_v6 = vunpack.c.l.b16 %v8156_v16 }
 0x443   : > { %v7820_v32 = vrot.slane %v7819_v60, 1  ;;  %v7829_v28 = vrot.slane %v7828_v1, 4  ;;  %v7840_v40 = vsel %vm7275_vm3, %v7194_v10, -inf }
 0x444   : > { %v7836_v14 = vsel %vm7275_vm3, %v7192_v12, -inf  ;;  %v12970_v26 = vpop.f32.mrb[152].mxu0 }
 0x445   : > { %v7821_v58 = vmax.f32 %v7819_v60, %v7820_v32  ;;  %v7830_v56 = vmax.f32 %v7828_v1, %v7829_v28  ;;  %v7837_v24 = vmax.f32 %v7835_v59, %v7836_v14  ;;  %v6700_v8 = vpop.f32.mrb[153].mxu0  ;;  %v6709_v11 = vadd.f32 %v15924_v13, %v12970_v26 }
 0x446   : > { %v6701_v41 = vadd.f32 %v15924_v13, %v6700_v8  ;;  %v12971_v3 = vpop.f32.mrb[154].mxu0  ;;  %13214 = vset.pattern.permute.xlu1 %v17004_v17 }
 0x447   : > { %v8157_v48 = vpack.c.bf16 %v7821_v58, %v7821_v58  ;;  %v7831_v42 = vrot.slane %v7830_v56, 2  ;;  %v7839_v53 = vmax.f32 %v7837_v24, %v7838_v35  ;;  %v6703_v29 = vpop.f32.mrb[155].mxu0  ;;  %v6712_v31 = vadd.f32 %v15924_v13, %v12971_v3 }
 0x448   : > { %v7195_v47 = vmax.f32 %v6701_v41, 0.0  ;;  %v6704_v21 = vadd.f32 %v15924_v13, %v6703_v29  ;;  %v7197_v43 = vmax.f32 %v6709_v11, 0.0 }
 0x449   : > { %v8465_v49 = vunpack.c.l.b16 %v8157_v48  ;;  %v7832_v18 = vmax.f32 %v7830_v56, %v7831_v42  ;;  %v7841_v2 = vmax.f32 %v7839_v53, %v7840_v40  ;;  %v7198_v30 = vmax.f32 %v6712_v31, 0.0 }
 0x44a   : > { %v7196_v22 = vmax.f32 %v6704_v21, 0.0  ;;  %v7848_v19 = vsel %vm7275_vm3, %v7195_v47, -inf  ;;  %v7851_v55 = vsel %vm7275_vm3, %v7197_v43, -inf }
 0x44b   : > { %v8530_v52 = vsel %vm8488_vm4, %v8465_v49, %v8464_v6  ;;  %v7833_v7 = vrot.slane %v7832_v18, 1  ;;  %v7842_v51 = vrot.slane %v7841_v2, 4  ;;  %v7853_v57 = vsel %vm7275_vm3, %v7198_v30, -inf }
 0x44c   : > { %v7849_v4 = vsel %vm7275_vm3, %v7196_v22, -inf  ;;  %v12974_v9 = vpop.f32.mrb[156].mxu0 }
 0x44d   : > { %v7834_v63 = vmax.f32 %v7832_v18, %v7833_v7  ;;  %v7843_v5 = vmax.f32 %v7841_v2, %v7842_v51  ;;  %v7850_v33 = vmax.f32 %v7848_v19, %v7849_v4  ;;  %v6716_v62 = vpop.f32.mrb[157].mxu0  ;;  %v6725_v25 = vadd.f32 %v15924_v13, %v12974_v9 }
 0x44e   : > { %v6717_v61 = vadd.f32 %v15924_v13, %v6716_v62  ;;  %v12975_v34 = vpop.f32.mrb[158].mxu0 }
 0x44f   : > { %v8158_v38 = vpack.c.bf16 %v7834_v63, %v7834_v63  ;;  %v7844_v36 = vrot.slane %v7843_v5, 2  ;;  %v7852_v0 = vmax.f32 %v7850_v33, %v7851_v55  ;;  %v6719_v46 = vpop.f32.mrb[159].mxu0  ;;  %v6728_v37 = vadd.f32 %v15924_v13, %v12975_v34 }
 0x450   : > { %v7199_v15 = vmax.f32 %v6717_v61, 0.0  ;;  %v6720_v20 = vadd.f32 %v15924_v13, %v6719_v46  ;;  %v7201_v60 = vmax.f32 %v6725_v25, 0.0 }
 0x451   : > { %v8466_v50 = vunpack.c.l.b16 %v8158_v38  ;;  %v7845_v27 = vmax.f32 %v7843_v5, %v7844_v36  ;;  %v7854_v39 = vmax.f32 %v7852_v0, %v7853_v57  ;;  %v7202_v59 = vmax.f32 %v6728_v37, 0.0 }
 0x452   : > { %v7200_v1 = vmax.f32 %v6720_v20, 0.0  ;;  %v7861_v28 = vsel %vm7275_vm3, %v7199_v15, -inf  ;;  %v7864_v24 = vsel %vm7275_vm3, %v7201_v60, -inf }
 0x453   : > { %v8531_v44 = vsel %vm8490_vm5, %v8466_v50, %v8530_v52  ;;  %v7846_v12 = vrot.slane %v7845_v27, 1  ;;  %v7855_v32 = vrot.slane %v7854_v39, 4  ;;  %v7866_v53 = vsel %vm7275_vm3, %v7202_v59, -inf }
 0x454   : > { %v7862_v10 = vsel %vm7275_vm3, %v7200_v1, -inf  ;;  %v12978_v14 = vpop.f32.mrb[160].mxu0 }
 0x455   : > { %v7847_v26 = vmax.f32 %v7845_v27, %v7846_v12  ;;  %v7856_v16 = vmax.f32 %v7854_v39, %v7855_v32  ;;  %v7863_v58 = vmax.f32 %v7861_v28, %v7862_v10  ;;  %v6732_v56 = vpop.f32.mrb[161].mxu0  ;;  %v6741_v8 = vadd.f32 %v15924_v13, %v12978_v14 }
 0x456   : > { %v6733_v35 = vadd.f32 %v15924_v13, %v6732_v56  ;;  %v12979_v11 = vpop.f32.mrb[162].mxu0 }
 0x457   : > { %v8159_v41 = vpack.c.bf16 %v7847_v26, %v7847_v26  ;;  %v7857_v3 = vrot.slane %v7856_v16, 2  ;;  %v7865_v48 = vmax.f32 %v7863_v58, %v7864_v24  ;;  %v6735_v42 = vpop.f32.mrb[163].mxu0  ;;  %v6744_v40 = vadd.f32 %v15924_v13, %v12979_v11 }
 0x458   : > { %v7203_v29 = vmax.f32 %v6733_v35, 0.0  ;;  %v6736_v47 = vadd.f32 %v15924_v13, %v6735_v42  ;;  %v7205_v49 = vmax.f32 %v6741_v8, 0.0 }
 0x459   : > { %v8467_v31 = vunpack.c.l.b16 %v8159_v41  ;;  %v7858_v21 = vmax.f32 %v7856_v16, %v7857_v3  ;;  %v7867_v6 = vmax.f32 %v7865_v48, %v7866_v53  ;;  %v7206_v7 = vmax.f32 %v6744_v40, 0.0 }
 0x45a   : > { %v7204_v18 = vmax.f32 %v6736_v47, 0.0  ;;  %v7874_v52 = vsel %vm7275_vm3, %v7203_v29, -inf  ;;  %v7877_v5 = vsel %vm7275_vm3, %v7205_v49, -inf }
 0x45b   : > { %v7859_v2 = vrot.slane %v7858_v21, 1  ;;  %v7868_v43 = vrot.slane %v7867_v6, 4  ;;  %v8532_v22 = vsel %vm8492_vm6, %v8467_v31, %v8531_v44  ;;  %v7879_v36 = vsel %vm7275_vm3, %v7206_v7, -inf }
 0x45c   : > { %v7875_v51 = vsel %vm7275_vm3, %v7204_v18, -inf  ;;  %v12982_v19 = vpop.f32.mrb[164].mxu0 }
 0x45d   : > { %v7860_v30 = vmax.f32 %v7858_v21, %v7859_v2  ;;  %v7869_v4 = vmax.f32 %v7867_v6, %v7868_v43  ;;  %v7876_v9 = vmax.f32 %v7874_v52, %v7875_v51  ;;  %v6748_v63 = vpop.f32.mrb[165].mxu0  ;;  %v6757_v33 = vadd.f32 %v15924_v13, %v12982_v19 }
 0x45e   : > { %v6749_v62 = vadd.f32 %v15924_v13, %v6748_v63  ;;  %v12983_v55 = vpop.f32.mrb[166].mxu0 }
 0x45f   : > { %v8160_v25 = vpack.c.bf16 %v7860_v30, %v7860_v30  ;;  %v7870_v61 = vrot.slane %v7869_v4, 2  ;;  %v7878_v34 = vmax.f32 %v7876_v9, %v7877_v5  ;;  %v6751_v38 = vpop.f32.mrb[167].mxu0  ;;  %v6760_v46 = vadd.f32 %v15924_v13, %v12983_v55 }
 0x460   : > { %v7207_v0 = vmax.f32 %v6749_v62, 0.0  ;;  %v6752_v57 = vadd.f32 %v15924_v13, %v6751_v38  ;;  %v7209_v50 = vmax.f32 %v6757_v33, 0.0 }
 0x461   : > { %v8468_v15 = vunpack.c.l.b16 %v8160_v25  ;;  %v7871_v37 = vmax.f32 %v7869_v4, %v7870_v61  ;;  %v7880_v20 = vmax.f32 %v7878_v34, %v7879_v36  ;;  %v7210_v12 = vmax.f32 %v6760_v46, 0.0 }
 0x462   : > { %v7208_v27 = vmax.f32 %v6752_v57, 0.0  ;;  %v7887_v44 = vsel %vm7275_vm3, %v7207_v0, -inf  ;;  %v7890_v16 = vsel %vm7275_vm3, %v7209_v50, -inf }
 0x463   : > { %v7872_v39 = vrot.slane %v7871_v37, 1  ;;  %v7881_v60 = vrot.slane %v7880_v20, 4  ;;  %v8533_v1 = vsel %vm8494_vm7, %v8468_v15, %v8532_v22  ;;  %v7892_v3 = vsel %vm7275_vm3, %v7210_v12, -inf }
 0x464   : > { %v7888_v32 = vsel %vm7275_vm3, %v7208_v27, -inf  ;;  %v12986_v28 = vpop.f32.mrb[168].mxu0 }
 0x465   : > { %v7873_v59 = vmax.f32 %v7871_v37, %v7872_v39  ;;  %v7882_v10 = vmax.f32 %v7880_v20, %v7881_v60  ;;  %v7889_v14 = vmax.f32 %v7887_v44, %v7888_v32  ;;  %v6764_v26 = vpop.f32.mrb[169].mxu0  ;;  %v6773_v58 = vadd.f32 %v15924_v13, %v12986_v28 }
 0x466   : > { %v6765_v56 = vadd.f32 %v15924_v13, %v6764_v26  ;;  %v12987_v24 = vpop.f32.mrb[170].mxu0 }
 0x467   : > { %v8161_v8 = vpack.c.bf16 %v7873_v59, %v7873_v59  ;;  %v7883_v35 = vrot.slane %v7882_v10, 2  ;;  %v7891_v11 = vmax.f32 %v7889_v14, %v7890_v16  ;;  %v6767_v41 = vpop.f32.mrb[171].mxu0  ;;  %v6776_v42 = vadd.f32 %v15924_v13, %v12987_v24 }
 0x468   : > { %v7211_v48 = vmax.f32 %v6765_v56, 0.0  ;;  %v6768_v53 = vadd.f32 %v15924_v13, %v6767_v41  ;;  %v7213_v31 = vmax.f32 %v6773_v58, 0.0 }
 0x469   : > { %v8469_v29 = vunpack.c.l.b16 %v8161_v8  ;;  %v7884_v40 = vmax.f32 %v7882_v10, %v7883_v35  ;;  %v7893_v47 = vmax.f32 %v7891_v11, %v7892_v3  ;;  %v7214_v43 = vmax.f32 %v6776_v42, 0.0 }
 0x46a   : > { %v7212_v21 = vmax.f32 %v6768_v53, 0.0  ;;  %v7900_v2 = vsel %vm7275_vm3, %v7211_v48, -inf  ;;  %v7903_v4 = vsel %vm7275_vm3, %v7213_v31, -inf }
 0x46b   : > { %v7885_v6 = vrot.slane %v7884_v40, 1  ;;  %v7894_v49 = vrot.slane %v7893_v47, 4  ;;  %v8534_v18 = vsel %vm8496_vm8, %v8469_v29, %v8533_v1  ;;  %v7905_v61 = vsel %vm7275_vm3, %v7214_v43, -inf }
 0x46c   : > { %v7901_v22 = vsel %vm7275_vm3, %v7212_v21, -inf  ;;  %v12990_v52 = vpop.f32.mrb[172].mxu0 }
 0x46d   : > { %v7886_v7 = vmax.f32 %v7884_v40, %v7885_v6  ;;  %v7895_v51 = vmax.f32 %v7893_v47, %v7894_v49  ;;  %v7902_v19 = vmax.f32 %v7900_v2, %v7901_v22  ;;  %v6780_v30 = vpop.f32.mrb[173].mxu0  ;;  %v6789_v9 = vadd.f32 %v15924_v13, %v12990_v52 }
 0x46e   : > { %v6781_v63 = vadd.f32 %v15924_v13, %v6780_v30  ;;  %v12991_v5 = vpop.f32.mrb[174].mxu0 }
 0x46f   : > { %v8162_v33 = vpack.c.bf16 %v7886_v7, %v7886_v7  ;;  %v7896_v62 = vrot.slane %v7895_v51, 2  ;;  %v7904_v55 = vmax.f32 %v7902_v19, %v7903_v4  ;;  %v6783_v25 = vpop.f32.mrb[175].mxu0  ;;  %v6792_v38 = vadd.f32 %v15924_v13, %v12991_v5 }
 0x470   : > { %v7215_v34 = vmax.f32 %v6781_v63, 0.0  ;;  %v6784_v36 = vadd.f32 %v15924_v13, %v6783_v25  ;;  %v7217_v15 = vmax.f32 %v6789_v9, 0.0 }
 0x471   : > { %v8470_v0 = vunpack.c.l.b16 %v8162_v33  ;;  %v7897_v46 = vmax.f32 %v7895_v51, %v7896_v62  ;;  %v7906_v57 = vmax.f32 %v7904_v55, %v7905_v61  ;;  %v7218_v27 = vmax.f32 %v6792_v38, 0.0  ;;  %v13358_v33 = vld [vmem:[%s13730_s24] sm:$0xff]   ;;  %v13359_v62 = vld [vmem:[%s13730_s24 + $0x8] sm:$0xff]  }
 0x472   : > { %v7216_v37 = vmax.f32 %v6784_v36, 0.0  ;;  %v7913_v60 = vsel %vm7275_vm3, %v7215_v34, -inf  ;;  %v7916_v10 = vsel %vm7275_vm3, %v7217_v15, -inf  ;;  %13064 = vmatprep.subr.bf16.mxu1 %v13358_v33 }
 0x473   : > { %v7898_v20 = vrot.slane %v7897_v46, 1  ;;  %v7907_v50 = vrot.slane %v7906_v57, 4  ;;  %v8535_v39 = vsel %vm8498_vm9, %v8470_v0, %v8534_v18  ;;  %v7918_v56 = vsel %vm7275_vm3, %v7218_v27, -inf  ;;  %13065 = vmatpush3.bf16.msra.mxu1 %v13358_v33 }
 0x474   : > { %v7914_v1 = vsel %vm7275_vm3, %v7216_v37, -inf  ;;  %v12994_v44 = vpop.f32.mrb[176].mxu0  ;;  %13066 = vmatprep.subr.bf16.mxu1 %v13359_v62  ;;  %v13360_v37 = vld [vmem:[%s13730_s24 + $0x10] sm:$0xff]  }
 0x475   : > { %v7908_v12 = vmax.f32 %v7906_v57, %v7907_v50  ;;  %v7915_v32 = vmax.f32 %v7913_v60, %v7914_v1  ;;  %v6796_v28 = vpop.f32.mrb[177].mxu0  ;;  %v7899_v59 = vmax.f32 %v7897_v46, %v7898_v20  ;;  %v6805_v14 = vadd.f32 %v15924_v13, %v12994_v44 }
 0x476   : > { %v6797_v26 = vadd.f32 %v15924_v13, %v6796_v28  ;;  %v12995_v16 = vpop.f32.mrb[178].mxu0 }
 0x477   : > { %v7909_v58 = vrot.slane %v7908_v12, 2  ;;  %v7917_v24 = vmax.f32 %v7915_v32, %v7916_v10  ;;  %v6799_v8 = vpop.f32.mrb[179].mxu0  ;;  %v6808_v11 = vadd.f32 %v15924_v13, %v12995_v16  ;;  %v8163_v3 = vpack.c.bf16 %v7899_v59, %v7899_v59  ;;  %13067 = vmatpush3.bf16.msra.mxu1 %v13359_v62 }
 0x478   : > { %v7219_v35 = vmax.f32 %v6797_v26, 0.0  ;;  %v6800_v41 = vadd.f32 %v15924_v13, %v6799_v8  ;;  %v7221_v53 = vmax.f32 %v6805_v14, 0.0  ;;  %13068 = vmatprep.subr.bf16.mxu1 %v13360_v37 }
 0x479   : > { %v7910_v48 = vmax.f32 %v7908_v12, %v7909_v58  ;;  %v7919_v42 = vmax.f32 %v7917_v24, %v7918_v56  ;;  %v8471_v40 = vunpack.c.l.b16 %v8163_v3  ;;  %v7222_v21 = vmax.f32 %v6808_v11, 0.0  ;;  %v13361_v24 = vld [vmem:[%s13730_s24 + $0x18] sm:$0xff]  }
 0x47a   : > { %v7220_v29 = vmax.f32 %v6800_v41, 0.0  ;;  %v7926_v31 = vsel %vm7275_vm3, %v7219_v35, -inf  ;;  %v7929_v7 = vsel %vm7275_vm3, %v7221_v53, -inf }
 0x47b   : > { %v7920_v47 = vrot.slane %v7919_v42, 4  ;;  %v8536_v18 = vsel %vm8500_vm10, %v8471_v40, %v8535_v39  ;;  %v7911_v2 = vrot.slane %v7910_v48, 1  ;;  %v7931_v55 = vsel %vm7275_vm3, %v7222_v21, -inf  ;;  %13069 = vmatpush3.bf16.msra.mxu1 %v13360_v37 }
 0x47c   : > { %v7927_v6 = vsel %vm7275_vm3, %v7220_v29, -inf  ;;  %v12998_v49 = vpop.f32.mrb[180].mxu0  ;;  %v8553_v4 = vpack.c.b16 %v8536_v18, %v16024_v45  ;;  %v16123_v29 = vld [vmem:[%s15966_s22 + $0x28] sm:$0xff]  ;;  %13070 = vmatprep.subr.bf16.mxu1 %v13361_v24 }
 0x47d   : > { %v7921_v43 = vmax.f32 %v7919_v42, %v7920_v47  ;;  %v7928_v22 = vmax.f32 %v7926_v31, %v7927_v6  ;;  %v6812_v52 = vpop.f32.mrb[181].mxu0  ;;  %v6821_v51 = vadd.f32 %v15924_v13, %v12998_v49  ;;  %v7912_v38 = vmax.f32 %v7910_v48, %v7911_v2  ;;  %8216 = vperm.xlu1 %13214, %v16123_v29   ;;  %v16127_v31 = vld [vmem:[%s15966_s22 + $0x20] sm:$0xff] }
 0x47e   : > { %v6813_v19 = vadd.f32 %v15924_v13, %v6812_v52  ;;  %v12999_v30 = vpop.f32.mrb[182].mxu0  ;;  %13060 = vmatprep.mubr.msk.bf16.mxu1 %vm7275_vm3, %v8553_v4  ;;  %8211 = vperm.xlu0 %13213, %v16127_v31  }
 0x47f   : > { %v7922_v9 = vrot.slane %v7921_v43, 2  ;;  %v7930_v63 = vmax.f32 %v7928_v22, %v7929_v7  ;;  %v6815_v5 = vpop.f32.mrb[183].mxu0  ;;  %v6824_v61 = vadd.f32 %v15924_v13, %v12999_v30  ;;  %v7225_v45 = vmax.f32 %v6821_v51, 0.0  ;;  %v16135_v30 = vld [vmem:[%s13710_s3] ss:$0 sm:$0xff]  ;;  %13071 = vmatpush3.bf16.msra.mxu1 %v13361_v24 }
 0x480   : > { %v7223_v25 = vmax.f32 %v6813_v19, 0.0  ;;  %v6816_v34 = vadd.f32 %v15924_v13, %v6815_v5  ;;  %v8164_v60 = vpack.c.bf16 %v7912_v38, %v7912_v38 }
 0x481   : > { %v7923_v36 = vmax.f32 %v7921_v43, %v7922_v9  ;;  %v7932_v0 = vmax.f32 %v7930_v63, %v7931_v55  ;;  %v7226_v50 = vmax.f32 %v6824_v61, 0.0  ;;  %v7942_v28 = vsel %vm7275_vm3, %v7225_v45, -inf  ;;  %13215 = vset.pattern.permute.xlu1 %v13662_v54 }
 0x482   : > { %v7224_v46 = vmax.f32 %v6816_v34, 0.0  ;;  %v7939_v20 = vsel %vm7275_vm3, %v7223_v25, -inf  ;;  %v8472_v3 = vunpack.c.l.b16 %v8164_v60  ;;  %8258 = vperm.xlu1 %13215, %v16127_v31   ;;  %13216 = vset.pattern.permute.xlu0 %v13662_v54 }
 0x483   : > { %v7924_v57 = vrot.slane %v7923_v36, 1  ;;  %v7933_v15 = vrot.slane %v7932_v0, 4  ;;  %v7944_v8 = vsel %vm7275_vm3, %v7226_v50, -inf  ;;  %8262 = vperm.xlu0 %13216, %v16123_v29  }
 0x484   : > { %v7940_v27 = vsel %vm7275_vm3, %v7224_v46, -inf  ;;  %v13002_v39 = vpop.f32.mrb[184].mxu0  ;;  %v16147_v46 = vld [vmem:[%s15966_s22 + $0x30] sm:$0xff] }
 0x485   : > { %v7925_v1 = vmax.f32 %v7923_v36, %v7924_v57  ;;  %v7934_v44 = vmax.f32 %v7932_v0, %v7933_v15  ;;  %v7941_v12 = vmax.f32 %v7939_v20, %v7940_v27  ;;  %v6828_v32 = vpop.f32.mrb[185].mxu0  ;;  %v6837_v59 = vadd.f32 %v15924_v13, %v13002_v39 }
 0x486   : > { %v6829_v10 = vadd.f32 %v15924_v13, %v6828_v32  ;;  %v13003_v14 = vpop.f32.mrb[186].mxu0  ;;  %13217 = vset.pattern.permute.xlu1 %v17004_v17 }
 0x487   : > { %v8165_v26 = vpack.c.bf16 %v7925_v1, %v7925_v1  ;;  %v7935_v16 = vrot.slane %v7934_v44, 2  ;;  %v7943_v58 = vmax.f32 %v7941_v12, %v7942_v28  ;;  %v6831_v56 = vpop.f32.mrb[187].mxu0  ;;  %v6840_v11 = vadd.f32 %v15924_v13, %v13003_v14  ;;  %8221 = vperm.xlu1 %13217, %v16147_v46   ;;  %8266 = vperm.xlu0 %13216, %v16147_v46  }
 0x488   : > { %v7227_v35 = vmax.f32 %v6829_v10, 0.0  ;;  %v6832_v41 = vadd.f32 %v15924_v13, %v6831_v56  ;;  %v7229_v40 = vmax.f32 %v6837_v59, 0.0  ;;  %v8115_v59 = vld [vmem:[%s15966_s22 + $0x38] sm:$0xff]  ;;  %s17040_s22 = sld [smem:[#allocation11_spill]] }
 0x489   : > { %v8473_v48 = vunpack.c.l.b16 %v8165_v26  ;;  %v7936_v42 = vmax.f32 %v7934_v44, %v7935_v16  ;;  %v7945_v53 = vmax.f32 %v7943_v58, %v7944_v8  ;;  %v7230_v18 = vmax.f32 %v6840_v11, 0.0 }
 0x48a   : > { %v7228_v47 = vmax.f32 %v6832_v41, 0.0  ;;  %v7952_v13 = vsel %vm7275_vm3, %v7227_v35, -inf  ;;  %v7955_v19 = vsel %vm7275_vm3, %v7229_v40, -inf }
 0x48b   : > { %v8537_v21 = vsel %vm8488_vm4, %v8473_v48, %v8472_v3  ;;  %v7937_v6 = vrot.slane %v7936_v42, 1  ;;  %v7946_v49 = vrot.slane %v7945_v53, 4  ;;  %v7957_v25 = vsel %vm7275_vm3, %v7230_v18, -inf  ;;  %8226 = vperm.xlu1 %13217, %v8115_v59   ;;  %13219 = vset.pattern.permute.xlu0 %v13664_v23 }
 0x48c   : > { %v7953_v2 = vsel %vm7275_vm3, %v7228_v47, -inf  ;;  %v13006_v43 = vpop.f32.mrb[188].mxu0  ;;  %8310 = vperm.xlu0 %13219, %v16127_v31  }
 0x48d   : > { %v7938_v22 = vmax.f32 %v7936_v42, %v7937_v6  ;;  %v7947_v52 = vmax.f32 %v7945_v53, %v7946_v49  ;;  %v7954_v7 = vmax.f32 %v7952_v13, %v7953_v2  ;;  %v6844_v51 = vpop.f32.mrb[189].mxu0  ;;  %v6853_v4 = vadd.f32 %v16135_v30, %v13006_v43 }
 0x48e   : > { %v6845_v9 = vadd.f32 %v16135_v30, %v6844_v51  ;;  %v13007_v63 = vpop.f32.mrb[190].mxu0 }
 0x48f   : > { %v8166_v5 = vpack.c.bf16 %v7938_v22, %v7938_v22  ;;  %v7948_v33 = vrot.slane %v7947_v52, 2  ;;  %v7956_v62 = vmax.f32 %v7954_v7, %v7955_v19  ;;  %v6847_v55 = vpop.f32.mrb[191].mxu0  ;;  %v6856_v34 = vadd.f32 %v16135_v30, %v13007_v63  ;;  %13218 = vset.pattern.permute.xlu1 %v13662_v54 }
 0x490   : > { %v7231_v61 = vmax.f32 %v6845_v9, 0.0  ;;  %v6848_v38 = vadd.f32 %v16135_v30, %v6847_v55  ;;  %v7233_v57 = vmax.f32 %v6853_v4, 0.0  ;;  %8270 = vperm.xlu1 %13218, %v8115_v59   ;;  %8322 = vperm.xlu0 %13219, %v8115_v59  }
 0x491   : > { %v8474_v36 = vunpack.c.l.b16 %v8166_v5  ;;  %v7949_v0 = vmax.f32 %v7947_v52, %v7948_v33  ;;  %v7958_v45 = vmax.f32 %v7956_v62, %v7957_v25  ;;  %v7234_v39 = vmax.f32 %v6856_v34, 0.0 }
 0x492   : > { %v7232_v15 = vmax.f32 %v6848_v38, 0.0  ;;  %v7965_v27 = vsel %vm7275_vm3, %v7231_v61, -inf  ;;  %v7968_v10 = vsel %vm7275_vm3, %v7233_v57, -inf }
 0x493   : > { %v8538_v37 = vsel %vm8490_vm5, %v8474_v36, %v8537_v21  ;;  %v7950_v20 = vrot.slane %v7949_v0, 1  ;;  %v7959_v50 = vrot.slane %v7958_v45, 4  ;;  %v7970_v35 = vsel %vm7275_vm3, %v7234_v39, -inf }
 0x494   : > { %v7966_v60 = vsel %vm7275_vm3, %v7232_v15, -inf  ;;  %v13010_v1 = vpop.f32.mrb[192].mxu0  ;;  %13220 = vset.pattern.permute.xlu1 %v13664_v23 }
 0x495   : > { %v7951_v44 = vmax.f32 %v7949_v0, %v7950_v20  ;;  %v7960_v12 = vmax.f32 %v7958_v45, %v7959_v50  ;;  %v7967_v32 = vmax.f32 %v7965_v27, %v7966_v60  ;;  %v6860_v28 = vpop.f32.mrb[193].mxu0  ;;  %v6869_v14 = vadd.f32 %v16135_v30, %v13010_v1  ;;  %8314 = vperm.xlu1 %13220, %v16123_v29  }
 0x496   : > { %v6861_v26 = vadd.f32 %v16135_v30, %v6860_v28  ;;  %v13011_v16 = vpop.f32.mrb[194].mxu0 }
 0x497   : > { %v8167_v58 = vpack.c.bf16 %v7951_v44, %v7951_v44  ;;  %v7961_v56 = vrot.slane %v7960_v12, 2  ;;  %v7969_v24 = vmax.f32 %v7967_v32, %v7968_v10  ;;  %v6863_v8 = vpop.f32.mrb[195].mxu0  ;;  %v6872_v41 = vadd.f32 %v16135_v30, %v13011_v16 }
 0x498   : > { %v7235_v11 = vmax.f32 %v6861_v26, 0.0  ;;  %v6864_v3 = vadd.f32 %v16135_v30, %v6863_v8  ;;  %v7237_v40 = vmax.f32 %v6869_v14, 0.0 }
 0x499   : > { %v8475_v48 = vunpack.c.l.b16 %v8167_v58  ;;  %v7962_v42 = vmax.f32 %v7960_v12, %v7961_v56  ;;  %v7971_v53 = vmax.f32 %v7969_v24, %v7970_v35  ;;  %v7238_v18 = vmax.f32 %v6872_v41, 0.0  ;;  %8318 = vperm.xlu1 %13220, %v16147_v46  }
 0x49a   : > { %v7236_v47 = vmax.f32 %v6864_v3, 0.0  ;;  %v7978_v13 = vsel %vm7275_vm3, %v7235_v11, -inf  ;;  %v7981_v31 = vsel %vm7275_vm3, %v7237_v40, -inf }
 0x49b   : > { %v8539_v21 = vsel %vm8492_vm6, %v8475_v48, %v8538_v37  ;;  %v7963_v6 = vrot.slane %v7962_v42, 1  ;;  %v7972_v49 = vrot.slane %v7971_v53, 4  ;;  %v7983_v55 = vsel %vm7275_vm3, %v7238_v18, -inf }
 0x49c   : > { %v7979_v2 = vsel %vm7275_vm3, %v7236_v47, -inf  ;;  %v13014_v43 = vpop.f32.mrb[196].mxu0 }
 0x49d   : > { %v7964_v22 = vmax.f32 %v7962_v42, %v7963_v6  ;;  %v7973_v52 = vmax.f32 %v7971_v53, %v7972_v49  ;;  %v7980_v7 = vmax.f32 %v7978_v13, %v7979_v2  ;;  %v6876_v51 = vpop.f32.mrb[197].mxu0  ;;  %v6885_v19 = vadd.f32 %v16135_v30, %v13014_v43 }
 0x49e   : > { %v6877_v4 = vadd.f32 %v16135_v30, %v6876_v51  ;;  %v13015_v9 = vpop.f32.mrb[198].mxu0 }
 0x49f   : > { %v8168_v63 = vpack.c.bf16 %v7964_v22, %v7964_v22  ;;  %v7974_v5 = vrot.slane %v7973_v52, 2  ;;  %v7982_v33 = vmax.f32 %v7980_v7, %v7981_v31  ;;  %v6879_v62 = vpop.f32.mrb[199].mxu0  ;;  %v6888_v25 = vadd.f32 %v16135_v30, %v13015_v9 }
 0x4a0   : > { %v7239_v54 = vmax.f32 %v6877_v4, 0.0  ;;  %v6880_v61 = vadd.f32 %v16135_v30, %v6879_v62  ;;  %v7241_v0 = vmax.f32 %v6885_v19, 0.0 }
 0x4a1   : > { %v8476_v34 = vunpack.c.l.b16 %v8168_v63  ;;  %v7975_v38 = vmax.f32 %v7973_v52, %v7974_v5  ;;  %v7984_v36 = vmax.f32 %v7982_v33, %v7983_v55  ;;  %v7242_v50 = vmax.f32 %v6888_v25, 0.0 }
 0x4a2   : > { %v7240_v45 = vmax.f32 %v6880_v61, 0.0  ;;  %v7991_v20 = vsel %vm7275_vm3, %v7239_v54, -inf  ;;  %v7994_v23 = vsel %vm7275_vm3, %v7241_v0, -inf }
 0x4a3   : > { %v8540_v57 = vsel %vm8494_vm7, %v8476_v34, %v8539_v21  ;;  %v7976_v15 = vrot.slane %v7975_v38, 1  ;;  %v7985_v37 = vrot.slane %v7984_v36, 4  ;;  %v7996_v16 = vsel %vm7275_vm3, %v7242_v50, -inf }
 0x4a4   : > { %v7992_v27 = vsel %vm7275_vm3, %v7240_v45, -inf  ;;  %v13018_v39 = vpop.f32.mrb[200].mxu0 }
 0x4a5   : > { %v7977_v60 = vmax.f32 %v7975_v38, %v7976_v15  ;;  %v7986_v1 = vmax.f32 %v7984_v36, %v7985_v37  ;;  %v7993_v44 = vmax.f32 %v7991_v20, %v7992_v27  ;;  %v6892_v12 = vpop.f32.mrb[201].mxu0  ;;  %v6901_v32 = vadd.f32 %v16135_v30, %v13018_v39 }
 0x4a6   : > { %v6893_v29 = vadd.f32 %v16135_v30, %v6892_v12  ;;  %v13019_v28 = vpop.f32.mrb[202].mxu0  ;;  %v16192_v4 = vpop.permute.xlu1 %8242 }
 0x4a7   : > { %v8169_v59 = vpack.c.bf16 %v7977_v60, %v7977_v60  ;;  %v7987_v10 = vrot.slane %v7986_v1, 2  ;;  %v7995_v14 = vmax.f32 %v7993_v44, %v7994_v23  ;;  %v6895_v26 = vpop.f32.mrb[203].mxu0  ;;  %v6904_v56 = vadd.f32 %v16135_v30, %v13019_v28 }
 0x4a8   : > { %v7243_v58 = vmax.f32 %v6893_v29, 0.0  ;;  %v6896_v24 = vadd.f32 %v16135_v30, %v6895_v26  ;;  %v7245_v41 = vmax.f32 %v6901_v32, 0.0 }
 0x4a9   : > { %v8477_v8 = vunpack.c.l.b16 %v8169_v59  ;;  %v7988_v35 = vmax.f32 %v7986_v1, %v7987_v10  ;;  %v7997_v11 = vmax.f32 %v7995_v14, %v7996_v16  ;;  %v7246_v40 = vmax.f32 %v6904_v56, 0.0 }
 0x4aa   : > { %v7244_v3 = vmax.f32 %v6896_v24, 0.0  ;;  %v8004_v53 = vsel %vm7275_vm3, %v7243_v58, -inf  ;;  %v8007_v2 = vsel %vm7275_vm3, %v7245_v41, -inf  ;;  %v16200_v39 = vpop.permute.xlu1 %8246 }
 0x4ab   : > { %v8541_v48 = vsel %vm8496_vm8, %v8477_v8, %v8540_v57  ;;  %v7989_v42 = vrot.slane %v7988_v35, 1  ;;  %v7998_v46 = vrot.slane %v7997_v11, 4  ;;  %v8009_v9 = vsel %vm7275_vm3, %v7246_v40, -inf }
 0x4ac   : > { %v8005_v47 = vsel %vm7275_vm3, %v7244_v3, -inf  ;;  %v13022_v21 = vpop.f32.mrb[204].mxu0 }
 0x4ad   : > { %v7990_v6 = vmax.f32 %v7988_v35, %v7989_v42  ;;  %v7999_v49 = vmax.f32 %v7997_v11, %v7998_v46  ;;  %v8006_v13 = vmax.f32 %v8004_v53, %v8005_v47  ;;  %v6908_v18 = vpop.f32.mrb[205].mxu0  ;;  %v6917_v43 = vadd.f32 %v16135_v30, %v13022_v21  ;;  %v16215_v53 = vpop.permute.xlu0 %8191 }
 0x4ae   : > { %v6909_v22 = vadd.f32 %v16135_v30, %v6908_v18  ;;  %v13023_v52 = vpop.f32.mrb[206].mxu0 }
 0x4af   : > { %v8170_v7 = vpack.c.bf16 %v7990_v6, %v7990_v6  ;;  %v8000_v51 = vrot.slane %v7999_v49, 2  ;;  %v8008_v31 = vmax.f32 %v8006_v13, %v8007_v2  ;;  %v6911_v19 = vpop.f32.mrb[207].mxu0  ;;  %v6920_v5 = vadd.f32 %v16135_v30, %v13023_v52  ;;  %v16211_v41 = vpop.permute.xlu1 %8206 }
 0x4b0   : > { %v7247_v63 = vmax.f32 %v6909_v22, 0.0  ;;  %v6912_v33 = vadd.f32 %v16135_v30, %v6911_v19  ;;  %v7249_v25 = vmax.f32 %v6917_v43, 0.0  ;;  %v17003_v13 = vlaneseq }
 0x4b1   : > { %v8478_v62 = vunpack.c.l.b16 %v8170_v7  ;;  %v8001_v55 = vmax.f32 %v7999_v49, %v8000_v51  ;;  %v8010_v54 = vmax.f32 %v8008_v31, %v8009_v9  ;;  %v7250_v45 = vmax.f32 %v6920_v5, 0.0 }
 0x4b2   : > { %v7248_v61 = vmax.f32 %v6912_v33, 0.0  ;;  %v8017_v0 = vsel %vm7275_vm3, %v7247_v63, -inf  ;;  %v8020_v60 = vsel %vm7275_vm3, %v7249_v25, -inf }
 0x4b3   : > { %v8542_v34 = vsel %vm8498_vm9, %v8478_v62, %v8541_v48  ;;  %v8002_v38 = vrot.slane %v8001_v55, 1  ;;  %v8011_v36 = vrot.slane %v8010_v54, 4  ;;  %v8022_v59 = vsel %vm7275_vm3, %v7250_v45, -inf }
 0x4b4   : > { %v8018_v57 = vsel %vm7275_vm3, %v7248_v61, -inf  ;;  %v13026_v15 = vpop.f32.mrb[208].mxu0  ;;  %v16223_v62 = vpop.permute.xlu1 %8254 }
 0x4b5   : > { %v8003_v37 = vmax.f32 %v8001_v55, %v8002_v38  ;;  %v8012_v20 = vmax.f32 %v8010_v54, %v8011_v36  ;;  %v8019_v50 = vmax.f32 %v8017_v0, %v8018_v57  ;;  %v6924_v27 = vpop.f32.mrb[209].mxu0  ;;  %v6933_v1 = vadd.f32 %v16135_v30, %v13026_v15  ;;  %v16228_v61 = vpop.permute.xlu0 %8196 }
 0x4b6   : > { %v6925_v44 = vadd.f32 %v16135_v30, %v6924_v27  ;;  %v13027_v12 = vpop.f32.mrb[210].mxu0  ;;  %v16226_v55 = vshrl.u32 %v17003_v13, 7 }
 0x4b7   : > { %v8171_v23 = vpack.c.bf16 %v8003_v37, %v8003_v37  ;;  %v8013_v32 = vrot.slane %v8012_v20, 2  ;;  %v8021_v29 = vmax.f32 %v8019_v50, %v8020_v60  ;;  %v6927_v28 = vpop.f32.mrb[211].mxu0  ;;  %v6936_v14 = vadd.f32 %v16135_v30, %v13027_v12 }
 0x4b8   : > { %v7251_v10 = vmax.f32 %v6925_v44, 0.0  ;;  %v6928_v26 = vadd.f32 %v16135_v30, %v6927_v28  ;;  %v7253_v24 = vmax.f32 %v6933_v1, 0.0  ;;  %17021 = vst [vmem:[#allocation14_spill] sm:$0xff] %v16226_v55  ;;  %v16233_v60 = vsub.s32 1, %v16226_v55 }
 0x4b9   : > { %v8479_v16 = vunpack.c.l.b16 %v8171_v23  ;;  %v8014_v58 = vmax.f32 %v8012_v20, %v8013_v32  ;;  %v8023_v56 = vmax.f32 %v8021_v29, %v8022_v59  ;;  %v7254_v48 = vmax.f32 %v6936_v14, 0.0  ;;  %v8188_v23 = vld [vmem:[%s13715_s8] sm:$0x7]  ;;  %v16240_v59 = vpop.permute.xlu1 %8294 }
 0x4ba   : > { %v7252_v8 = vmax.f32 %v6928_v26, 0.0  ;;  %v8030_v3 = vsel %vm7275_vm3, %v7251_v10, -inf  ;;  %v8033_v49 = vsel %vm7275_vm3, %v7253_v24, -inf  ;;  %v16238_v29 = vsub.s32 0, %v16226_v55 }
 0x4bb   : > { %v16209_v35 = vsel %vm8500_vm10, %v8479_v16, %v8542_v34  ;;  %v8024_v11 = vrot.slane %v8023_v56, 4  ;;  %v8015_v40 = vrot.slane %v8014_v58, 1  ;;  %v8035_v51 = vsel %vm7275_vm3, %v7254_v48, -inf }
 0x4bc   : > { %v8031_v42 = vsel %vm7275_vm3, %v7252_v8, -inf  ;;  %v13030_v46 = vpop.f32.mrb[212].mxu0  ;;  %v16245_v16 = vsub.s32 2, %v16226_v55  ;;  %v16251_v48 = vrot.slane %v8188_v23, %v16233_v60 }
 0x4bd   : > { %v8025_v47 = vmax.f32 %v8023_v56, %v8024_v11  ;;  %v8032_v21 = vmax.f32 %v8030_v3, %v8031_v42  ;;  %v6940_v6 = vpop.f32.mrb[213].mxu0  ;;  %v6949_v18 = vadd.f32 %v16135_v30, %v13030_v46  ;;  %v8016_v63 = vmax.f32 %v8014_v58, %v8015_v40  ;;  %v16247_v58 = vpop.permute.xlu0 %8201 }
 0x4be   : > { %v6941_v2 = vadd.f32 %v16135_v30, %v6940_v6  ;;  %v13031_v43 = vpop.f32.mrb[214].mxu0  ;;  %17022 = vst [vmem:[#allocation15_spill] sm:$0xff] %v16245_v16 }
 0x4bf   : > { %v8026_v22 = vrot.slane %v8025_v47, 2  ;;  %v8034_v52 = vmax.f32 %v8032_v21, %v8033_v49  ;;  %v6943_v7 = vpop.f32.mrb[215].mxu0  ;;  %v6952_v19 = vadd.f32 %v16135_v30, %v13031_v43  ;;  %v7257_v54 = vmax.f32 %v6949_v18, 0.0 }
 0x4c0   : > { %v7255_v31 = vmax.f32 %v6941_v2, 0.0  ;;  %v6944_v9 = vadd.f32 %v16135_v30, %v6943_v7  ;;  %v8172_v15 = vpack.c.bf16 %v8016_v63, %v8016_v63  ;;  %v16257_v49 = vrot.slane %v8188_v23, %v16238_v29 }
 0x4c1   : > { %v8027_v5 = vmax.f32 %v8025_v47, %v8026_v22  ;;  %v8036_v33 = vmax.f32 %v8034_v52, %v8035_v51  ;;  %v7258_v0 = vmax.f32 %v6952_v19, 0.0  ;;  %v8046_v1 = vsel %vm7275_vm3, %v7257_v54, -inf  ;;  %v16262_v51 = vpop.permute.xlu1 %8302 }
 0x4c2   : > { %v7256_v25 = vmax.f32 %v6944_v9, 0.0  ;;  %v8043_v36 = vsel %vm7275_vm3, %v7255_v31, -inf  ;;  %v8480_v24 = vunpack.c.l.b16 %v8172_v15  ;;  %v16260_v7 = vrot.slane %v8188_v23, %v16245_v16 }
 0x4c3   : > { %v8028_v34 = vrot.slane %v8027_v5, 1  ;;  %v8037_v38 = vrot.slane %v8036_v33, 4  ;;  %v8048_v14 = vsel %vm7275_vm3, %v7258_v0, -inf  ;;  %v8277_v19 = vmul.f32 %v16251_v48, %v16192_v4 }
 0x4c4   : > { %v8044_v45 = vsel %vm7275_vm3, %v7256_v25, -inf  ;;  %v13034_v57 = vpop.f32.mrb[216].mxu0  ;;  %v8235_v15 = vmul.f32 %v16257_v49, %v16247_v58 }
 0x4c5   : > { %v8029_v37 = vmax.f32 %v8027_v5, %v8028_v34  ;;  %v8038_v20 = vmax.f32 %v8036_v33, %v8037_v38  ;;  %v8045_v50 = vmax.f32 %v8043_v36, %v8044_v45  ;;  %v6956_v27 = vpop.f32.mrb[217].mxu0  ;;  %v6965_v26 = vadd.f32 %v16135_v30, %v13034_v57  ;;  %v16268_v33 = vpop.permute.xlu0 %8250 }
 0x4c6   : > { %v13035_v44 = vpop.f32.mrb[218].mxu0  ;;  %v6957_v56 = vadd.f32 %v16135_v30, %v6956_v27  ;;  %v8278_v34 = vmul.f32 %v16251_v48, %v16200_v39  ;;  %v8236_v45 = vmul.f32 %v16257_v49, %v16211_v41 }
 0x4c7   : > { %v8173_v12 = vpack.c.bf16 %v8029_v37, %v8029_v37  ;;  %v8039_v32 = vrot.slane %v8038_v20, 2  ;;  %v8047_v28 = vmax.f32 %v8045_v50, %v8046_v1  ;;  %v6959_v10 = vpop.f32.mrb[219].mxu0  ;;  %v6968_v46 = vadd.f32 %v16135_v30, %v13035_v44 }
 0x4c8   : > { %v7259_v42 = vmax.f32 %v6957_v56, 0.0  ;;  %v6960_v40 = vadd.f32 %v16135_v30, %v6959_v10  ;;  %v7261_v18 = vmax.f32 %v6965_v26, 0.0  ;;  %v8279_v1 = vmul.f32 %v16251_v48, %v16268_v33  ;;  %v16289_v56 = vpop.permute.xlu1 %8306 }
 0x4c9   : > { %v8481_v8 = vunpack.c.l.b16 %v8173_v12  ;;  %v8040_v11 = vmax.f32 %v8038_v20, %v8039_v32  ;;  %v8049_v3 = vmax.f32 %v8047_v28, %v8048_v14  ;;  %v7262_v63 = vmax.f32 %v6968_v46, 0.0 }
 0x4ca   : > { %v7260_v2 = vmax.f32 %v6960_v40, 0.0  ;;  %v8056_v9 = vsel %vm7275_vm3, %v7259_v42, -inf  ;;  %v8059_v57 = vsel %vm7275_vm3, %v7261_v18, -inf  ;;  %v8233_v44 = vmul.f32 %v16257_v49, %v16215_v53 }
 0x4cb   : > { %v8544_v47 = vsel %vm8488_vm4, %v8481_v8, %v8480_v24  ;;  %v8041_v21 = vrot.slane %v8040_v11, 1  ;;  %v8050_v6 = vrot.slane %v8049_v3, 4  ;;  %v8280_v12 = vmul.f32 %v16251_v48, %v16223_v62 }
 0x4cc   : > { %v13038_v43 = vpop.f32.mrb[220].mxu0  ;;  %v8057_v5 = vsel %vm7275_vm3, %v7260_v2, -inf  ;;  %v8061_v23 = vsel %vm7275_vm3, %v7262_v63, -inf  ;;  %v8234_v14 = vmul.f32 %v16257_v49, %v16228_v61  ;;  %v8331_v24 = vmul.f32 %v16260_v7, %v16262_v51 }
 0x4cd   : > { %v8042_v22 = vmax.f32 %v8040_v11, %v8041_v21  ;;  %v8051_v52 = vmax.f32 %v8049_v3, %v8050_v6  ;;  %v6972_v31 = vpop.f32.mrb[221].mxu0  ;;  %v8058_v36 = vmax.f32 %v8056_v9, %v8057_v5  ;;  %v6981_v37 = vadd.f32 %v16135_v30, %v13038_v43  ;;  %v16293_v3 = vpop.permute.xlu0 %8298 }
 0x4ce   : > { %v13039_v54 = vpop.f32.mrb[222].mxu0  ;;  %v6973_v32 = vadd.f32 %v16135_v30, %v6972_v31  ;;  %v8287_v6 = vadd.f32 %v8279_v1, %v8235_v15  ;;  %v8329_v2 = vmul.f32 %v16260_v7, %v16240_v59  ;;  %v8332_v43 = vmul.f32 %v16260_v7, %v16289_v56 }
 0x4cf   : > { %v8174_v25 = vpack.c.bf16 %v8042_v22, %v8042_v22  ;;  %v8052_v38 = vrot.slane %v8051_v52, 2  ;;  %v6975_v0 = vpop.f32.mrb[223].mxu0  ;;  %v8060_v27 = vmax.f32 %v8058_v36, %v8059_v57  ;;  %v7265_v8 = vmax.f32 %v6981_v37, 0.0 }
 0x4d0   : > { %v7263_v11 = vmax.f32 %v6973_v32, 0.0  ;;  %v6984_v42 = vadd.f32 %v16135_v30, %v13039_v54  ;;  %v8285_v22 = vadd.f32 %v8277_v19, %v8233_v44  ;;  %v8330_v5 = vmul.f32 %v16260_v7, %v16293_v3 }
 0x4d1   : > { %v8482_v20 = vunpack.c.l.b16 %v8174_v25  ;;  %v8053_v50 = vmax.f32 %v8051_v52, %v8052_v38  ;;  %v8062_v26 = vmax.f32 %v8060_v27, %v8061_v23  ;;  %v8288_v52 = vadd.f32 %v8280_v12, %v8236_v45  ;;  %v16309_v23 = vld [vmem:[%s13725_s19] ss:$0 sm:$0xff] }
 0x4d2   : > { %v8072_v38 = vsel %vm7275_vm3, %v7265_v8, -inf  ;;  %v8069_v36 = vsel %vm7275_vm3, %v7263_v11, -inf  ;;  %v8339_v45 = vadd.f32 %v8331_v24, %v8287_v6  ;;  %v8286_v32 = vadd.f32 %v8278_v34, %v8234_v14 }
 0x4d3   : > { %v8545_v28 = vsel %vm8490_vm5, %v8482_v20, %v8544_v47  ;;  %v8054_v10 = vrot.slane %v8053_v50, 1  ;;  %v8063_v21 = vrot.slane %v8062_v26, 4  ;;  %v6976_v47 = vadd.f32 %v16135_v30, %v6975_v0 }
 0x4d4   : > { %v13042_v46 = vpop.f32.mrb[224].mxu0  ;;  %v7266_v0 = vmax.f32 %v6984_v42, 0.0  ;;  %v8340_v27 = vadd.f32 %v8332_v43, %v8288_v52 }
 0x4d5   : > { %v8055_v40 = vmax.f32 %v8053_v50, %v8054_v10  ;;  %v6988_v18 = vpop.f32.mrb[225].mxu0  ;;  %v8064_v63 = vmax.f32 %v8062_v26, %v8063_v21  ;;  %v7264_v54 = vmax.f32 %v6976_v47, 0.0  ;;  %v6997_v57 = vadd.f32 %v16135_v30, %v13042_v46 }
 0x4d6   : > { %v13043_v31 = vpop.f32.mrb[226].mxu0  ;;  %v8337_v50 = vadd.f32 %v8329_v2, %v8285_v22  ;;  %v6989_v10 = vadd.f32 %v16135_v30, %v6988_v18  ;;  %v8074_v24 = vsel %vm7275_vm3, %v7266_v0, -inf  ;;  %v8355_v22 = vadd.f32 %v16309_v23, %v8340_v27 }
 0x4d7   : > { %v8175_v9 = vpack.c.bf16 %v8055_v40, %v8055_v40  ;;  %v6991_v25 = vpop.f32.mrb[227].mxu0  ;;  %v8065_v37 = vrot.slane %v8064_v63, 2  ;;  %v8070_v19 = vsel %vm7275_vm3, %v7264_v54, -inf  ;;  %v7269_v1 = vmax.f32 %v6997_v57, 0.0 }
 0x4d8   : > { %v8071_v20 = vmax.f32 %v8069_v36, %v8070_v19  ;;  %v7000_v8 = vadd.f32 %v16135_v30, %v13043_v31  ;;  %v6992_v11 = vadd.f32 %v16135_v30, %v6991_v25  ;;  %v8338_v40 = vadd.f32 %v8330_v5, %v8286_v32 }
 0x4d9   : > { %v8483_v15 = vunpack.c.l.b16 %v8175_v9  ;;  %v8066_v12 = vmax.f32 %v8064_v63, %v8065_v37  ;;  %v7267_v21 = vmax.f32 %v6989_v10, 0.0  ;;  %v8352_v43 = vadd.f32 %v16309_v23, %v8337_v50 }
 0x4da   : > { %v8073_v26 = vmax.f32 %v8071_v20, %v8072_v38  ;;  %v7268_v2 = vmax.f32 %v6992_v11, 0.0  ;;  %v8085_v52 = vsel %vm7275_vm3, %v7269_v1, -inf  ;;  %v7270_v5 = vmax.f32 %v7000_v8, 0.0 }
 0x4db   : > { %v8546_v44 = vsel %vm8492_vm6, %v8483_v15, %v8545_v28  ;;  %v8067_v46 = vrot.slane %v8066_v12, 1  ;;  %v8354_v28 = vadd.f32 %v16309_v23, %v8339_v45  ;;  %v8082_v63 = vsel %vm7275_vm3, %v7267_v21, -inf }
 0x4dc   : > { %v13046_v42 = vpop.f32.mrb[228].mxu0  ;;  %v8075_v6 = vmax.f32 %v8073_v26, %v8074_v24  ;;  %v8083_v54 = vsel %vm7275_vm3, %v7268_v2, -inf  ;;  %v8353_v38 = vadd.f32 %v16309_v23, %v8338_v40  ;;  %v8087_v26 = vsel %vm7275_vm3, %v7270_v5, -inf }
 0x4dd   : > { %v7004_v47 = vpop.f32.mrb[229].mxu0  ;;  %v8068_v18 = vmax.f32 %v8066_v12, %v8067_v46  ;;  %v8084_v36 = vmax.f32 %v8082_v63, %v8083_v54  ;;  %v7013_v0 = vadd.f32 %v16135_v30, %v13046_v42 }
 0x4de   : > { %v7005_v34 = vadd.f32 %v16135_v30, %v7004_v47  ;;  %v13047_v14 = vpop.f32.mrb[230].mxu0  ;;  %v8076_v9 = vrot.slane %v8075_v6, 4 }
 0x4df   : > { %v7007_v31 = vpop.f32.mrb[231].mxu0  ;;  %v8176_v25 = vpack.c.bf16 %v8068_v18, %v8068_v18  ;;  %v7016_v19 = vadd.f32 %v16135_v30, %v13047_v14  ;;  %v8086_v1 = vmax.f32 %v8084_v36, %v8085_v52  ;;  %v7273_v40 = vmax.f32 %v7013_v0, 0.0 }
 0x4e0   : > { %v8077_v57 = vmax.f32 %v8075_v6, %v8076_v9  ;;  %v7271_v37 = vmax.f32 %v7005_v34, 0.0  ;;  %v7008_v45 = vadd.f32 %v16135_v30, %v7007_v31 }
 0x4e1   : > { %v13058_v15 = vpop.f32.mrb[24].mxu1  ;;  %v8484_v20 = vunpack.c.l.b16 %v8176_v25  ;;  %v8088_v24 = vmax.f32 %v8086_v1, %v8087_v26  ;;  %v7274_v6 = vmax.f32 %v7016_v19, 0.0 }
 0x4e2   : > { %v8634_v50 = vadd.f32 %v13058_v15, %v8354_v28  ;;  %v8625_v27 = vpop.f32.mrb[25].mxu1  ;;  %v8078_v12 = vrot.slane %v8077_v57, 2  ;;  %v7272_v8 = vmax.f32 %v7008_v45, 0.0  ;;  %v8095_v30 = vsel %vm7275_vm3, %v7271_v37, -inf }
 0x4e3   : > { %v8626_v32 = vadd.f32 %v8625_v27, %v8352_v43  ;;  %v13059_v10 = vpop.f32.mrb[26].mxu1  ;;  %v8547_v11 = vsel %vm8494_vm7, %v8484_v20, %v8546_v44  ;;  %v8089_v34 = vrot.slane %v8088_v24, 4 }
 0x4e4   : > { %v8637_v42 = vadd.f32 %v13059_v10, %v8355_v22  ;;  %v8628_v46 = vpop.f32.mrb[27].mxu1  ;;  %v8079_v21 = vmax.f32 %v8077_v57, %v8078_v12  ;;  %v8658_v28 = vmax.f32 %v8634_v50, 0.0  ;;  %v8096_v14 = vsel %vm7275_vm3, %v7272_v8, -inf }
 0x4e5   : > { %v8629_v47 = vadd.f32 %v8628_v46, %v8353_v38  ;;  %v8656_v43 = vmax.f32 %v8626_v32, 0.0  ;;  %v8097_v31 = vmax.f32 %v8095_v30, %v8096_v14  ;;  %v8090_v44 = vmax.f32 %v8088_v24, %v8089_v34  ;;  %v9518_v30 = vld [vmem:[%s13785_s12] sm:$0x77] }
 0x4e6   : > { %v8659_v2 = vmax.f32 %v8637_v42, 0.0  ;;  %v8080_v18 = vrot.slane %v8079_v21, 1  ;;  %v8098_v22 = vsel %vm7275_vm3, %v7273_v40, -inf  ;;  %v8100_v38 = vsel %vm7275_vm3, %v7274_v6, -inf  ;;  %v13362_v40 = vld [vmem:[%s13740_s6] sm:$0xff]  }
 0x4e7   : > { %v8657_v52 = vmax.f32 %v8629_v47, 0.0  ;;  %v8099_v54 = vmax.f32 %v8097_v31, %v8098_v22  ;;  %v8091_v25 = vrot.slane %v8090_v44, 2  ;;  %13080 = vmatprep.subr.bf16.mxu1 %v13362_v40  ;;  %v9560_v47 = vsub.s32 5, %v16226_v55  ;;  %v16351_v31 = vld [vmem:[%s17024_s26] sm:$0xff]  }
 0x4e8   : > { %v8665_v9 = vpack.c.bf16 %v8659_v2, %v8658_v28  ;;  %v8081_v63 = vmax.f32 %v8079_v21, %v8080_v18  ;;  %v13363_v21 = vld [vmem:[%s13740_s6 + $0x8] sm:$0xff]   ;;  %v9526_v6 = vsub.s32 4, %v16226_v55  ;;  %v13365_v28 = vld [vmem:[%s13740_s6 + $0x18] sm:$0xff]   ;;  %v9610_v2 = vsub.s32 6, %v16226_v55  ;;  %v8940_v18 = vld [vmem:[%s17023_s23] sm:$0x7] }
 0x4e9   : > { %v8664_v5 = vpack.c.bf16 %v8657_v52, %v8656_v43  ;;  %v8101_v0 = vmax.f32 %v8099_v54, %v8100_v38  ;;  %v8092_v57 = vmax.f32 %v8090_v44, %v8091_v25  ;;  %v9557_v34 = vrot.slane %v9518_v30, %v16233_v60  ;;  %s17041_s23 = sld [smem:[#allocation8_spill]] }
 0x4ea   : > { %v8177_v36 = vpack.c.bf16 %v8081_v63, %v8081_v63  ;;  %v9561_v14 = vrot.slane %v9518_v30, %v9560_v47  ;;  %v9523_v43 = vrot.slane %v9518_v30, %v16238_v29  ;;  %v9527_v52 = vrot.slane %v9518_v30, %v9526_v6 }
 0x4eb   : > { %v8102_v37 = vrot.slane %v8101_v0, 4  ;;  %v8093_v19 = vrot.slane %v8092_v57, 1  ;;  %v9611_v44 = vrot.slane %v9518_v30, %v9610_v2  ;;  %v16355_v22 = vrot.slane %v8940_v18, %v16233_v60 }
 0x4ec   : > { %v8485_v15 = vunpack.c.l.b16 %v8177_v36  ;;  %v16358_v63 = vrot.slane %v9557_v34, %v16233_v60  ;;  %v16364_v54 = vrot.slane %v8940_v18, %v16238_v29  ;;  %v16367_v25 = vrot.slane %v9523_v43, %v16238_v29 }
 0x4ed   : > { %v8103_v20 = vmax.f32 %v8101_v0, %v8102_v37  ;;  %v8094_v50 = vmax.f32 %v8092_v57, %v8093_v19  ;;  %v16370_v38 = vrot.slane %v9527_v52, %v16238_v29  ;;  %v16374_v36 = vrot.slane %v8940_v18, %v16245_v16 }
 0x4ee   : > { %v8548_v45 = vsel %vm8496_vm8, %v8485_v15, %v8547_v11  ;;  %v16380_v57 = vrot.slane %v9611_v44, %v16245_v16  ;;  %v8957_v15 = vmul.f32 %v16355_v22, %v16192_v4  ;;  %v9572_v37 = vmul.f32 %v16358_v63, %v16192_v4 }
 0x4ef   : > { %v8104_v27 = vrot.slane %v8103_v20, 2  ;;  %v8178_v1 = vpack.c.bf16 %v8094_v50, %v8094_v50  ;;  %v9538_v50 = vmul.f32 %v16367_v25, %v16215_v53  ;;  %v9544_v47 = vmul.f32 %v16367_v25, %v16211_v41 }
 0x4f0   : > { %v9542_v2 = vmul.f32 %v16367_v25, %v16247_v58  ;;  %v9543_v43 = vmul.f32 %v16370_v38, %v16247_v58  ;;  %v8959_v52 = vmul.f32 %v16355_v22, %v16268_v33 }
 0x4f1   : > { %v8105_v12 = vmax.f32 %v8103_v20, %v8104_v27  ;;  %v8486_v32 = vunpack.c.l.b16 %v8178_v1  ;;  %v8945_v20 = vmul.f32 %v16364_v54, %v16215_v53  ;;  %v9539_v27 = vmul.f32 %v16370_v38, %v16215_v53 }
 0x4f2   : > { %v8946_v1 = vmul.f32 %v16364_v54, %v16228_v61 }
 0x4f3   : > { %v8106_v10 = vrot.slane %v8105_v12, 1  ;;  %v8549_v26 = vsel %vm8498_vm9, %v8486_v32, %v8548_v45  ;;  %v8958_v45 = vmul.f32 %v16355_v22, %v16200_v39  ;;  %v9540_v32 = vmul.f32 %v16367_v25, %v16228_v61 }
 0x4f5   : > { %v8107_v8 = vmax.f32 %v8105_v12, %v8106_v10  ;;  %v9574_v12 = vmul.f32 %v16358_v63, %v16200_v39  ;;  %v9541_v10 = vmul.f32 %v16370_v38, %v16228_v61  ;;  %v8966_v61 = vadd.f32 %v8958_v45, %v8946_v1 }
 0x4f6   : > { %v8979_v45 = vmul.f32 %v16374_v36, %v16262_v51 }
 0x4f7   : > { %v8179_v42 = vpack.c.bf16 %v8107_v8, %v8107_v8  ;;  %v8978_v8 = vmul.f32 %v16374_v36, %v16293_v3 }
 0x4f9   : > { %v8487_v46 = vunpack.c.l.b16 %v8179_v42  ;;  %v9623_v42 = vmul.f32 %v16380_v57, %v16240_v59 }
 0x4fb   : > { %v8550_v24 = vsel %vm8500_vm10, %v8487_v46, %v8549_v26  ;;  %v8977_v26 = vmul.f32 %v16374_v36, %v16240_v59  ;;  %v9625_v46 = vmul.f32 %v16380_v57, %v16293_v3 }
 0x4fc   : > { %v8554_v11 = vpack.c.b16 %v8550_v24, %v16209_v35  ;;  %v13364_v35 = vld [vmem:[%s13740_s6 + $0x10] sm:$0xff]   ;;  %v8965_v24 = vadd.f32 %v8957_v15, %v8945_v20  ;;  %v9545_v15 = vmul.f32 %v16370_v38, %v16211_v41 }
 0x4fe   : > { %13061 = vmatmul.mubr.msk.bf16.gmra.mrb[28].mxu1 %vm7275_vm3, %v8554_v11  ;;  %v9588_v11 = vadd.f32 %v9572_v37, %v9538_v50  ;;  %v8960_v37 = vmul.f32 %v16355_v22, %v16223_v62 }
 0x4ff   : > { %13072 = vmatprep.mubr.msk.bf16.mxu1 %vm7275_vm3, %v8664_v5  ;;  %v16361_v5 = vrot.slane %v9561_v14, %v16233_v60 }
 0x501   : > { %v9573_v19 = vmul.f32 %v16361_v5, %v16192_v4  ;;  %v9575_v4 = vmul.f32 %v16361_v5, %v16200_v39  ;;  %v9577_v44 = vmul.f32 %v16361_v5, %v16268_v33 }
 0x503   : > { %v9591_v6 = vadd.f32 %v9575_v4, %v9541_v10 }
 0x505   : > { %v16436_v18 = vadd.f32 %v9625_v46, %v9591_v6 }
 0x506   : > { %13073 = vmatmul.mubr.msk.bf16.vlgmr.msra.gmra.mrb[32].mxu1 %vm7275_vm3, %v8665_v9  ;;  %v9607_v9 = vrot.slane %v9518_v30, %v16245_v16  ;;  %v9590_v30 = vadd.f32 %v9574_v12, %v9540_v32  ;;  %v9593_v12 = vadd.f32 %v9577_v44, %v9543_v43 }
 0x507   : > { %13081 = vmatpush3.bf16.msra.mxu1 %v13362_v40  ;;  %v9589_v40 = vadd.f32 %v9573_v19, %v9539_v27  ;;  %17027 = vst [vmem:[#allocation18_spill] sm:$0xff] %v16436_v18  ;;  %v9578_v19 = vmul.f32 %v16358_v63, %v16223_v62  ;;  %v9629_v27 = vmul.f32 %v16380_v57, %v16289_v56 }
 0x508   : > { %13082 = vmatprep.subr.bf16.mxu1 %v13363_v21  ;;  %v16377_v0 = vrot.slane %v9607_v9, %v16245_v16  ;;  %v9576_v9 = vmul.f32 %v16358_v63, %v16268_v33  ;;  %v9627_v33 = vmul.f32 %v16380_v57, %v16262_v51 }
 0x509   : > { %v16432_v34 = vadd.f32 %v9623_v42, %v9589_v40  ;;  %v9594_v32 = vadd.f32 %v9578_v19, %v9544_v47 }
 0x50a   : > { %v9622_v53 = vmul.f32 %v16377_v0, %v16240_v59  ;;  %v9624_v39 = vmul.f32 %v16377_v0, %v16293_v3  ;;  %v8947_v59 = vmul.f32 %v16364_v54, %v16247_v58  ;;  %v9579_v58 = vmul.f32 %v16361_v5, %v16223_v62 }
 0x50b   : > { %13083 = vmatpush3.bf16.msra.mxu1 %v13363_v21  ;;  %v8948_v21 = vmul.f32 %v16364_v54, %v16211_v41  ;;  %17025 = vst [vmem:[#allocation16_spill] sm:$0xff] %v16432_v34  ;;  %v9626_v20 = vmul.f32 %v16377_v0, %v16262_v51  ;;  %v8980_v41 = vmul.f32 %v16374_v36, %v16289_v56 }
 0x50c   : > { %13084 = vmatprep.subr.bf16.mxu1 %v13364_v35  ;;  %v16428_v3 = vadd.f32 %v9622_v53, %v9588_v11  ;;  %v16434_v14 = vadd.f32 %v9624_v39, %v9590_v30  ;;  %v9628_v50 = vmul.f32 %v16377_v0, %v16289_v56  ;;  %v8967_v1 = vadd.f32 %v8959_v52, %v8947_v59 }
 0x50d   : > { %v9592_v62 = vadd.f32 %v9576_v9, %v9542_v2  ;;  %v8968_v4 = vadd.f32 %v8960_v37, %v8948_v21  ;;  %v9595_v10 = vadd.f32 %v9579_v58, %v9545_v15  ;;  %v16470_v51 = vadd.f32 %v9627_v33, %v9593_v12  ;;  %v9654_v33 = vld [vmem:[%s17032_s28] sm:$0x3]  ;;  %s17043_s28 = sld [smem:[#allocation13_spill]] }
 0x50e   : > { %17026 = vst [vmem:[#allocation17_spill] sm:$0xff] %v16434_v14  ;;  %v16476_v39 = vadd.f32 %v9628_v50, %v9594_v32  ;;  %v16540_v16 = vrot.slane %v9654_v33, %v16238_v29 }
 0x50f   : > { %13085 = vmatpush3.bf16.msra.mxu1 %v13364_v35  ;;  %v16424_v35 = vadd.f32 %v8977_v26, %v8965_v24  ;;  %v16466_v26 = vadd.f32 %v8979_v45, %v8967_v1  ;;  %v16468_v53 = vadd.f32 %v9626_v20, %v9592_v62  ;;  %17029 = vst [vmem:[#allocation20_spill] sm:$0xff] %v16470_v51 }
 0x510   : > { %13086 = vmatprep.subr.bf16.mxu1 %v13365_v28  ;;  %v16474_v42 = vadd.f32 %v8980_v41, %v8968_v4  ;;  %17030 = vst [vmem:[#allocation21_spill] sm:$0xff] %v16476_v39  ;;  %v16478_v46 = vadd.f32 %v9629_v27, %v9595_v10 }
 0x511   : > { %17028 = vst [vmem:[#allocation19_spill] sm:$0xff] %v16468_v53 }
 0x512   : > { %17031 = vst [vmem:[#allocation22_spill] sm:$0xff] %v16478_v46  ;;  %v16543_v46 = vrot.slane %v9654_v33, %v16233_v60 }
 0x513   : > { %13087 = vmatpush3.bf16.msra.mxu1 %v13365_v28  ;;  %v16426_v28 = vadd.f32 %v8978_v8, %v8966_v61  ;;  %v16472_v8 = vpop.permute.xlu1 %8216  ;;  %v16484_v61 = vpop.permute.xlu0 %8211 }
 0x514   : > { %13096 = vmatprep.subr.bf16.mxu1 %v16351_v31  ;;  %v8950_v30 = vmul.f32 %v16364_v54, %v16472_v8  ;;  %v9548_v6 = vmul.f32 %v16367_v25, %v16472_v8  ;;  %v9549_v2 = vmul.f32 %v16370_v38, %v16472_v8  ;;  %v8949_v44 = vmul.f32 %v16364_v54, %v16484_v61 }
 0x515   : > { %v9546_v15 = vmul.f32 %v16367_v25, %v16484_v61  ;;  %v9547_v37 = vmul.f32 %v16370_v38, %v16484_v61 }
 0x517   : > { %v16480_v56 = vpop.permute.xlu1 %8258  ;;  %v16488_v40 = vpop.permute.xlu0 %8262 }
 0x518   : > { %v8962_v43 = vmul.f32 %v16355_v22, %v16488_v40  ;;  %v9582_v52 = vmul.f32 %v16358_v63, %v16488_v40  ;;  %v9583_v9 = vmul.f32 %v16361_v5, %v16488_v40  ;;  %v8961_v41 = vmul.f32 %v16355_v22, %v16480_v56 }
 0x519   : > { %v9580_v50 = vmul.f32 %v16358_v63, %v16480_v56  ;;  %v9581_v27 = vmul.f32 %v16361_v5, %v16480_v56 }
 0x51a   : > { %v8970_v12 = vadd.f32 %v8962_v43, %v8950_v30  ;;  %v9598_v4 = vadd.f32 %v9582_v52, %v9548_v6  ;;  %v9599_v32 = vadd.f32 %v9583_v9, %v9549_v2  ;;  %v16554_v9 = vld [vmem:[%s17033_s1] ss:$0 sm:$0xff]  ;;  %v8969_v51 = vadd.f32 %v8961_v41, %v8949_v44  ;;  %s17044_s1 = sld [smem:[#allocation10_spill]] }
 0x51b   : > { %v16482_v24 = vpop.permute.xlu1 %8221  ;;  %v16492_v47 = vpop.permute.xlu0 %8266  ;;  %v9596_v53 = vadd.f32 %v9580_v50, %v9546_v15  ;;  %v9597_v18 = vadd.f32 %v9581_v27, %v9547_v37 }
 0x51c   : > { %v8951_v1 = vmul.f32 %v16364_v54, %v16482_v24  ;;  %v9550_v62 = vmul.f32 %v16367_v25, %v16482_v24  ;;  %v9551_v10 = vmul.f32 %v16370_v38, %v16482_v24  ;;  %v8963_v13 = vmul.f32 %v16355_v22, %v16492_v47 }
 0x51d   : > { %v9584_v17 = vmul.f32 %v16358_v63, %v16492_v47  ;;  %v9585_v6 = vmul.f32 %v16361_v5, %v16492_v47 }
 0x51f   : > { %v16486_v11 = vpop.permute.xlu1 %8226  ;;  %v16520_v20 = vpop.permute.xlu0 %8310  ;;  %v9601_v41 = vadd.f32 %v9585_v6, %v9551_v10  ;;  %v8283_v10 = vmul.f32 %v16251_v48, %v16492_v47  ;;  %v8281_v6 = vmul.f32 %v16251_v48, %v16480_v56 }
 0x520   : > { %v8981_v2 = vmul.f32 %v16374_v36, %v16520_v20  ;;  %v9630_v43 = vmul.f32 %v16377_v0, %v16520_v20  ;;  %v9631_v52 = vmul.f32 %v16380_v57, %v16520_v20  ;;  %v8333_v56 = vmul.f32 %v16260_v7, %v16520_v20 }
 0x522   : > { %v9647_v14 = vadd.f32 %v9631_v52, %v9597_v18  ;;  %v8971_v18 = vadd.f32 %v8963_v13, %v8951_v1 }
 0x523   : > { %v16490_v21 = vpop.permute.xlu1 %8270  ;;  %v8323_v33 = vpop.permute.xlu0 %8322 }
 0x524   : > { %v9636_v37 = vmul.f32 %v16377_v0, %v8323_v33 }
 0x527   : > { %v16498_v59 = vpop.permute.xlu1 %8314 }
 0x528   : > { %v8982_v19 = vmul.f32 %v16374_v36, %v16498_v59  ;;  %v9632_v58 = vmul.f32 %v16377_v0, %v16498_v59  ;;  %v9633_v45 = vmul.f32 %v16380_v57, %v16498_v59 }
 0x52a   : > { %v8990_v55 = vadd.f32 %v8982_v19, %v8970_v12  ;;  %v9648_v39 = vadd.f32 %v9632_v58, %v9598_v4  ;;  %v9649_v30 = vadd.f32 %v9633_v45, %v9599_v32  ;;  %v8952_v19 = vmul.f32 %v16364_v54, %v16486_v11 }
 0x52b   : > { %v9552_v4 = vmul.f32 %v16367_v25, %v16486_v11  ;;  %v8319_v32 = vpop.permute.xlu1 %8318  ;;  %v9553_v54 = vmul.f32 %v16370_v38, %v16486_v11  ;;  %v9646_v25 = vadd.f32 %v9630_v43, %v9596_v53 }
 0x52c   : > { %v16559_v58 = vadd.f32 %v16554_v9, %v8990_v55  ;;  %v16562_v45 = vadd.f32 %v16540_v16, %v9648_v39  ;;  %v16565_v12 = vadd.f32 %v16543_v46, %v9649_v30  ;;  %v8964_v55 = vmul.f32 %v16355_v22, %v16490_v21 }
 0x52d   : > { %v9586_v39 = vmul.f32 %v16358_v63, %v16490_v21  ;;  %v9587_v30 = vmul.f32 %v16361_v5, %v16490_v21  ;;  %v8983_v44 = vmul.f32 %v16374_v36, %v8319_v32  ;;  %v9634_v15 = vmul.f32 %v16377_v0, %v8319_v32 }
 0x52e   : > { %17034 = vst [vmem:[#allocation23_spill] sm:$0xff] %v16562_v45  ;;  %17035 = vst [vmem:[#allocation24_spill] sm:$0xff] %v16565_v12  ;;  %v8984_v12 = vmul.f32 %v16374_v36, %v8323_v33  ;;  %v8989_v45 = vadd.f32 %v8981_v2, %v8969_v51  ;;  %v9635_v38 = vmul.f32 %v16380_v57, %v8319_v32 }
 0x52f   : > { %v9637_v22 = vmul.f32 %v16380_v57, %v8323_v33  ;;  %v16587_v5 = vadd.f32 %v16540_v16, %v9646_v25  ;;  %v16590_v51 = vadd.f32 %v16543_v46, %v9647_v14  ;;  %v8972_v53 = vadd.f32 %v8964_v55, %v8952_v19 }
 0x530   : > { %v16584_v63 = vadd.f32 %v16554_v9, %v8989_v45  ;;  %v9600_v36 = vadd.f32 %v9584_v17, %v9550_v62  ;;  %v9602_v50 = vadd.f32 %v9586_v39, %v9552_v4  ;;  %v9603_v27 = vadd.f32 %v9587_v30, %v9553_v54 }
 0x531   : > { %v8991_v2 = vadd.f32 %v8983_v44, %v8971_v18  ;;  %v8992_v43 = vadd.f32 %v8984_v12, %v8972_v53  ;;  %v9651_v52 = vadd.f32 %v9635_v38, %v9601_v41  ;;  %v8239_v62 = vmul.f32 %v16257_v49, %v16482_v24 }
 0x532   : > { %v9650_v0 = vadd.f32 %v9634_v15, %v9600_v36  ;;  %v9652_v57 = vadd.f32 %v9636_v37, %v9602_v50  ;;  %v9653_v34 = vadd.f32 %v9637_v22, %v9603_v27  ;;  %v8237_v19 = vmul.f32 %v16257_v49, %v16484_v61  ;;  %v11649_v27 = vld [vmem:[%s17036_s2] ss:$0 sm:$0xff]  ;;  %s11119_s2 = sshll.u32 %s17064_s7, 2 }
 0x533   : > { %v16593_v45 = vadd.f32 %v16554_v9, %v8991_v2  ;;  %v16596_v25 = vadd.f32 %v16554_v9, %v8992_v43  ;;  %v16602_v17 = vadd.f32 %v16543_v46, %v9651_v52  ;;  %v8240_v12 = vmul.f32 %v16257_v49, %v16486_v11 }
 0x534   : > { %v16599_v14 = vadd.f32 %v16540_v16, %v9650_v0  ;;  %v16605_v13 = vadd.f32 %v16540_v16, %v9652_v57  ;;  %v16608_v1 = vadd.f32 %v16543_v46, %v9653_v34  ;;  %v8284_v4 = vmul.f32 %v16251_v48, %v16490_v21 }
 0x535   : > { %v8238_v34 = vmul.f32 %v16257_v49, %v16472_v8  ;;  %v8282_v24 = vmul.f32 %v16251_v48, %v16488_v40  ;;  %v8335_v47 = vmul.f32 %v16260_v7, %v8319_v32  ;;  %v8291_v54 = vadd.f32 %v8283_v10, %v8239_v62 }
 0x536   : > { %v8289_v55 = vadd.f32 %v8281_v6, %v8237_v19  ;;  %v8336_v61 = vmul.f32 %v16260_v7, %v8323_v33  ;;  %v8292_v39 = vadd.f32 %v8284_v4, %v8240_v12  ;;  %v8334_v11 = vmul.f32 %v16260_v7, %v16498_v59 }
 0x537   : > { %v8290_v21 = vadd.f32 %v8282_v24, %v8238_v34  ;;  %v8343_v30 = vadd.f32 %v8335_v47, %v8291_v54 }
 0x538   : > { %v8341_v44 = vadd.f32 %v8333_v56, %v8289_v55  ;;  %v8344_v49 = vadd.f32 %v8336_v61, %v8292_v39  ;;  %v13367_v56 = vld [vmem:[%s17024_s26 + $0x8] sm:$0xff]   ;;  %v13368_v55 = vld [vmem:[%s17024_s26 + $0x10] sm:$0xff]   ;;  %v13369_v61 = vld [vmem:[%s17024_s26 + $0x18] sm:$0xff]  }
 0x539   : > { %v8342_v8 = vadd.f32 %v8334_v11, %v8290_v21  ;;  %v8358_v48 = vadd.f32 %v16309_v23, %v8343_v30  ;;  %v13370_v39 = vld [vmem:[%s17024_s26 + $0x20] sm:$0xff]   ;;  %v13371_v11 = vld [vmem:[%s17024_s26 + $0x28] sm:$0xff]   ;;  %v13372_v21 = vld [vmem:[%s17024_s26 + $0x30] sm:$0xff]  }
 0x53a   : > { %v8356_v32 = vadd.f32 %v16309_v23, %v8341_v44  ;;  %v8359_v38 = vadd.f32 %v16309_v23, %v8344_v49  ;;  %v13373_v30 = vld [vmem:[%s17024_s26 + $0x38] sm:$0xff]  }
 0x53b   : > { %v8357_v22 = vadd.f32 %v16309_v23, %v8342_v8 }
 0x5d1   : > { %v13062_v40 = vpop.f32.mrb[28].mxu1 }
 0x5d2   : > { %v8650_v15 = vadd.f32 %v13062_v40, %v8358_v48  ;;  %v8641_v20 = vpop.f32.mrb[29].mxu1 }
 0x5d3   : > { %v8642_v33 = vadd.f32 %v8641_v20, %v8356_v32  ;;  %v13063_v37 = vpop.f32.mrb[30].mxu1 }
 0x5d4   : > { %v8653_v7 = vadd.f32 %v13063_v37, %v8359_v38  ;;  %v8644_v59 = vpop.f32.mrb[31].mxu1  ;;  %v8662_v53 = vmax.f32 %v8650_v15, 0.0 }
 0x5d5   : > { %v8645_v18 = vadd.f32 %v8644_v59, %v8357_v22  ;;  %v8660_v41 = vmax.f32 %v8642_v33, 0.0 }
 0x5d6   : > { %v8663_v36 = vmax.f32 %v8653_v7, 0.0  ;;  %v11658_v7 = vld [vmem:[%s17038_s16] ss:$0 sm:$0xff]  ;;  %s16938_s16 = scalar_lea.vmem %s13820_s4, %s11119_s2 }
 0x5d7   : > { %v8661_v50 = vmax.f32 %v8645_v18, 0.0 }
 0x5d8   : > { %v8667_v2 = vpack.c.bf16 %v8663_v36, %v8662_v53 }
 0x5d9   : > { %v8666_v43 = vpack.c.bf16 %v8661_v50, %v8660_v41  ;;  %v13074_v0 = vpop.f32.mrb[32].mxu1 }
 0x5da   : > { %v8762_v52 = vadd.f32 %v13074_v0, %v11649_v27  ;;  %v8753_v57 = vpop.f32.mrb[33].mxu1 }
 0x5db   : > { %v8754_v62 = vadd.f32 %v11649_v27, %v8753_v57  ;;  %v13075_v10 = vpop.f32.mrb[34].mxu1  ;;  %13076 = vmatprep.mubr.msk.bf16.mxu1 %vm7275_vm3, %v8666_v43 }
 0x5dc   : > { %v8765_v23 = vadd.f32 %v13075_v10, %v11649_v27  ;;  %v8756_v6 = vpop.f32.mrb[35].mxu1  ;;  %13077 = vmatmul.mubr.msk.bf16.gmra.mrb[36].mxu1 %vm7275_vm3, %v8667_v2  ;;  %v8786_v12 = vmax.f32 %v8762_v52, 0.0 }
 0x5dd   : > { %v8757_v19 = vadd.f32 %v11649_v27, %v8756_v6  ;;  %v8784_v34 = vmax.f32 %v8754_v62, 0.0 }
 0x5de   : > { %v8787_v4 = vmax.f32 %v8765_v23, 0.0 }
 0x5df   : > { %v8785_v24 = vmax.f32 %v8757_v19, 0.0  ;;  %v13375_v19 = vld [vmem:[%s17037_s15 + $0x8] sm:$0xff]  }
 0x5e0   : > { %v8793_v47 = vpack.c.bf16 %v8787_v4, %v8786_v12  ;;  %v13376_v12 = vld [vmem:[%s17037_s15 + $0x10] sm:$0xff]   ;;  %v13377_v4 = vld [vmem:[%s17037_s15 + $0x18] sm:$0xff]  }
 0x5e1   : > { %v8792_v54 = vpack.c.bf16 %v8785_v24, %v8784_v34  ;;  %v13378_v34 = vld [vmem:[%s17037_s15 + $0x20] sm:$0xff]   ;;  %v13379_v24 = vld [vmem:[%s17037_s15 + $0x28] sm:$0xff]  }
 0x5e3   : > { %13088 = vmatprep.mubr.msk.bf16.mxu1 %vm7275_vm3, %v8792_v54  ;;  %v13381_v54 = vld [vmem:[%s17037_s15 + $0x38] sm:$0xff]  }
 0x5e4   : > { %13089 = vmatmul.mubr.msk.bf16.vlgmr.msra.gmra.mrb[40].mxu1 %vm7275_vm3, %v8793_v47  ;;  %v13380_v47 = vld [vmem:[%s17037_s15 + $0x30] sm:$0xff]  }
 0x5e5   : > { %13097 = vmatpush3.bf16.msra.mxu1 %v16351_v31  ;;  %v13374_v31 = vld [vmem:[%s17037_s15] sm:$0xff]  }
 0x5e6   : > { %13098 = vmatprep.subr.bf16.mxu1 %v13367_v56 }
 0x5e9   : > { %13099 = vmatpush3.bf16.msra.mxu1 %v13367_v56  ;;  %v13384_v56 = vld [vmem:[%s17039_s18 + $0x4] ss:$8 sps:$4 sm:$0xff]  }
 0x5ea   : > { %13100 = vmatprep.subr.bf16.mxu1 %v13368_v55 }
 0x5ed   : > { %13101 = vmatpush3.bf16.msra.mxu1 %v13368_v55 }
 0x5ee   : > { %13102 = vmatprep.subr.bf16.mxu1 %v13369_v61 }
 0x5f1   : > { %13103 = vmatpush3.bf16.msra.mxu1 %v13369_v61 }
 0x5f2   : > { %13104 = vmatprep.subr.bf16.mxu1 %v13370_v39 }
 0x5f5   : > { %13105 = vmatpush3.bf16.msra.mxu1 %v13370_v39 }
 0x5f6   : > { %13106 = vmatprep.subr.bf16.mxu1 %v13371_v11 }
 0x5f9   : > { %13107 = vmatpush3.bf16.msra.mxu1 %v13371_v11 }
 0x5fa   : > { %13108 = vmatprep.subr.bf16.mxu1 %v13372_v21 }
 0x5fd   : > { %13109 = vmatpush3.bf16.msra.mxu1 %v13372_v21 }
 0x5fe   : > { %13110 = vmatprep.subr.bf16.mxu1 %v13373_v30 }
 0x601   : > { %13111 = vmatpush3.bf16.msra.mxu1 %v13373_v30 }
 0x602   : > { %13120 = vmatprep.subr.bf16.mxu1 %v13374_v31 }
 0x6af   : > { %v13078_v44 = vpop.f32.mrb[36].mxu1 }
 0x6b0   : > { %v8778_v49 = vadd.f32 %v13078_v44, %v11649_v27  ;;  %v8769_v8 = vpop.f32.mrb[37].mxu1 }
 0x6b1   : > { %v8770_v48 = vadd.f32 %v11649_v27, %v8769_v8  ;;  %v13079_v40 = vpop.f32.mrb[38].mxu1 }
 0x6b2   : > { %v8781_v32 = vadd.f32 %v13079_v40, %v11649_v27  ;;  %v8772_v15 = vpop.f32.mrb[39].mxu1  ;;  %v8790_v38 = vmax.f32 %v8778_v49, 0.0 }
 0x6b3   : > { %v8773_v20 = vadd.f32 %v11649_v27, %v8772_v15  ;;  %v8788_v37 = vmax.f32 %v8770_v48, 0.0  ;;  %v9002_v15 = vadd.f32 %v16554_v9, %v16466_v26 }
 0x6b4   : > { %v8791_v33 = vmax.f32 %v8781_v32, 0.0 }
 0x6b5   : > { %v8789_v22 = vmax.f32 %v8773_v20, 0.0 }
 0x6b6   : > { %v8795_v59 = vpack.c.bf16 %v8791_v33, %v8790_v38  ;;  %v9000_v33 = vadd.f32 %v16554_v9, %v16424_v35 }
 0x6b7   : > { %v8794_v18 = vpack.c.bf16 %v8789_v22, %v8788_v37  ;;  %v13090_v53 = vpop.f32.mrb[40].mxu1 }
 0x6b8   : > { %v8890_v36 = vadd.f32 %v13090_v53, %v11658_v7  ;;  %v8881_v41 = vpop.f32.mrb[41].mxu1  ;;  %v9001_v53 = vadd.f32 %v16554_v9, %v16426_v28  ;;  %v13385_v28 = vld [vmem:[%s17039_s18 + $0x10] ss:$8 sps:$4 sm:$0xff]  }
 0x6b9   : > { %v8882_v50 = vadd.f32 %v11658_v7, %v8881_v41  ;;  %v13091_v2 = vpop.f32.mrb[42].mxu1  ;;  %13092 = vmatprep.mubr.msk.bf16.mxu1 %vm7275_vm3, %v8794_v18 }
 0x6ba   : > { %v8893_v43 = vadd.f32 %v13091_v2, %v11658_v7  ;;  %v8884_v0 = vpop.f32.mrb[43].mxu1  ;;  %13093 = vmatmul.mubr.msk.bf16.gmra.mrb[44].mxu1 %vm7275_vm3, %v8795_v59  ;;  %v8914_v52 = vmax.f32 %v8890_v36, 0.0  ;;  %v9003_v59 = vadd.f32 %v16554_v9, %v16474_v42  ;;  %v13390_v9 = vld [vmem:[%s17039_s18 + $0x24] ss:$8 sps:$4 sm:$0xff]  }
 0x6bb   : > { %v8885_v27 = vadd.f32 %v11658_v7, %v8884_v0  ;;  %v8912_v62 = vmax.f32 %v8882_v50, 0.0 }
 0x6bc   : > { %v8915_v57 = vmax.f32 %v8893_v43, 0.0 }
 0x6bd   : > { %v8913_v10 = vmax.f32 %v8885_v27, 0.0  ;;  %v13382_v27 = vld [vmem:[%s17039_s18] ss:$8 sps:$4 sm:$0xff]  }
 0x6be   : > { %v8921_v23 = vpack.c.bf16 %v8915_v57, %v8914_v52  ;;  %v13387_v52 = vld [vmem:[%s17039_s18 + $0x14] ss:$8 sps:$4 sm:$0xff]   ;;  %v13388_v57 = vld [vmem:[%s17039_s18 + $0x20] ss:$8 sps:$4 sm:$0xff]  }
 0x6bf   : > { %v8920_v6 = vpack.c.bf16 %v8913_v10, %v8912_v62  ;;  %v13393_v62 = vld [vmem:[%s17039_s18 + $0x34] ss:$8 sps:$4 sm:$0xff]   ;;  %v13391_v10 = vld [vmem:[%s17039_s18 + $0x30] ss:$8 sps:$4 sm:$0xff]  }
 0x6c1   : > { %13112 = vmatprep.mubr.bf16.mxu1 %v8920_v6  ;;  %v13396_v6 = vld [vmem:[%s17039_s18 + $0x44] ss:$8 sps:$4 sm:$0xff]  }
 0x6c2   : > { %13113 = vmatmul.mubr.bf16.vlgmr.msra.gmra.mrb[48].mxu1 %v8921_v23  ;;  %v13394_v23 = vld [vmem:[%s17039_s18 + $0x40] ss:$8 sps:$4 sm:$0xff]  }
 0x6c3   : > { %13121 = vmatpush3.bf16.msra.mxu1 %v13374_v31 }
 0x6c4   : > { %13122 = vmatprep.subr.bf16.mxu1 %v13375_v19 }
 0x6c7   : > { %13123 = vmatpush3.bf16.msra.mxu1 %v13375_v19  ;;  %v13399_v19 = vld [vmem:[%s17039_s18 + $0x54] ss:$8 sps:$4 sm:$0xff]  }
 0x6c8   : > { %13124 = vmatprep.subr.bf16.mxu1 %v13376_v12 }
 0x6cb   : > { %13125 = vmatpush3.bf16.msra.mxu1 %v13376_v12  ;;  %v13397_v12 = vld [vmem:[%s17039_s18 + $0x50] ss:$8 sps:$4 sm:$0xff]  }
 0x6cc   : > { %13126 = vmatprep.subr.bf16.mxu1 %v13377_v4 }
 0x6cf   : > { %13127 = vmatpush3.bf16.msra.mxu1 %v13377_v4  ;;  %v13400_v4 = vld [vmem:[%s17039_s18 + $0x60] ss:$8 sps:$4 sm:$0xff]  }
 0x6d0   : > { %13128 = vmatprep.subr.bf16.mxu1 %v13378_v34 }
 0x6d3   : > { %13129 = vmatpush3.bf16.msra.mxu1 %v13378_v34  ;;  %v13402_v34 = vld [vmem:[%s17039_s18 + $0x64] ss:$8 sps:$4 sm:$0xff]  }
 0x6d4   : > { %13130 = vmatprep.subr.bf16.mxu1 %v13379_v24 }
 0x6d7   : > { %13131 = vmatpush3.bf16.msra.mxu1 %v13379_v24  ;;  %v13405_v24 = vld [vmem:[%s17039_s18 + $0x74] ss:$8 sps:$4 sm:$0xff]  }
 0x6d8   : > { %13132 = vmatprep.subr.bf16.mxu1 %v13380_v47 }
 0x6db   : > { %13133 = vmatpush3.bf16.msra.mxu1 %v13380_v47  ;;  %v13403_v47 = vld [vmem:[%s17039_s18 + $0x70] ss:$8 sps:$4 sm:$0xff]  }
 0x6dc   : > { %13134 = vmatprep.subr.bf16.mxu1 %v13381_v54 }
 0x6df   : > { %13135 = vmatpush3.bf16.msra.mxu1 %v13381_v54  ;;  %v13408_v54 = vld [vmem:[%s17040_s22 + $0x4] ss:$8 sps:$4 sm:$0xff]  }
 0x6e0   : > { %9389 = vmatprep.subr.bf16.mxu1 %v13384_v56 }
 0x78d   : > { %v13094_v55 = vpop.f32.mrb[44].mxu1 }
 0x78e   : > { %v8906_v61 = vadd.f32 %v13094_v55, %v11658_v7  ;;  %v8897_v39 = vpop.f32.mrb[45].mxu1 }
 0x78f   : > { %v8898_v11 = vadd.f32 %v11658_v7, %v8897_v39  ;;  %v13095_v21 = vpop.f32.mrb[46].mxu1 }
 0x790   : > { %v8909_v30 = vadd.f32 %v13095_v21, %v11658_v7  ;;  %v8900_v31 = vpop.f32.mrb[47].mxu1  ;;  %v8918_v49 = vmax.f32 %v8906_v61, 0.0 }
 0x791   : > { %v8901_v44 = vadd.f32 %v11658_v7, %v8900_v31  ;;  %v8916_v48 = vmax.f32 %v8898_v11, 0.0 }
 0x792   : > { %v8919_v8 = vmax.f32 %v8909_v30, 0.0 }
 0x793   : > { %v8917_v40 = vmax.f32 %v8901_v44, 0.0 }
 0x794   : > { %v8923_v32 = vpack.c.bf16 %v8919_v8, %v8918_v49 }
 0x795   : > { %v8922_v20 = vpack.c.bf16 %v8917_v40, %v8916_v48  ;;  %v13114_v38 = vpop.f32.mrb[48].mxu1  ;;  %v16690_v40 = vld [vmem:[%s17041_s23] ss:$0 sm:$0xff] }
 0x796   : > { %v9099_v37 = vadd.f32 %v13114_v38, %v9002_v15  ;;  %v9090_v22 = vpop.f32.mrb[49].mxu1 }
 0x797   : > { %v9091_v7 = vadd.f32 %v9090_v22, %v9000_v33  ;;  %v13115_v18 = vpop.f32.mrb[50].mxu1  ;;  %13116 = vmatprep.mubr.bf16.mxu1 %v8922_v20  ;;  %v17042_v22 = vmov 0  }
 0x798   : > { %v9102_v26 = vadd.f32 %v13115_v18, %v9003_v59  ;;  %v9093_v36 = vpop.f32.mrb[51].mxu1  ;;  %13117 = vmatmul.mubr.bf16.gmra.mrb[52].mxu1 %v8923_v32  ;;  %v9123_v35 = vmax.f32 %v9099_v37, 0.0 }
 0x799   : > { %v9094_v41 = vadd.f32 %v9093_v36, %v9001_v53  ;;  %v9121_v2 = vmax.f32 %v9091_v7, 0.0 }
 0x79a   : > { %v9124_v50 = vmax.f32 %v9102_v26, 0.0 }
 0x79b   : > { %v9122_v43 = vmax.f32 %v9094_v41, 0.0  ;;  %v13406_v41 = vld [vmem:[%s17040_s22] ss:$8 sps:$4 sm:$0xff]  }
 0x79c   : > { %v9130_v42 = vpack.c.bf16 %v9124_v50, %v9123_v35  ;;  %v13411_v35 = vld [vmem:[%s17040_s22 + $0x14] ss:$8 sps:$4 sm:$0xff]   ;;  %v13409_v50 = vld [vmem:[%s17040_s22 + $0x10] ss:$8 sps:$4 sm:$0xff]  }
 0x79d   : > { %v9129_v0 = vpack.c.bf16 %v9122_v43, %v9121_v2  ;;  %v13414_v2 = vld [vmem:[%s17040_s22 + $0x24] ss:$8 sps:$4 sm:$0xff]   ;;  %v13412_v43 = vld [vmem:[%s17040_s22 + $0x20] ss:$8 sps:$4 sm:$0xff]  }
 0x79f   : > { %13136 = vmatprep.mubr.bf16.mxu1 %v9129_v0  ;;  %v13415_v0 = vld [vmem:[%s17040_s22 + $0x30] ss:$8 sps:$4 sm:$0xff]  }
 0x7a0   : > { %13137 = vmatmul.mubr.bf16.vlgmr.msra.gmra.mrb[56].mxu1 %v9130_v42  ;;  %v13417_v42 = vld [vmem:[%s17040_s22 + $0x34] ss:$8 sps:$4 sm:$0xff]  }
 0x7a1   : > { %9390 = vmatpush1.bf16.msra.mxu1 %v13382_v27  ;;  %v13420_v27 = vld [vmem:[%s17040_s22 + $0x44] ss:$8 sps:$4 sm:$0xff]  }
 0x7a2   : > { %9391 = vmatprep.subr.bf16.mxu1 %v13387_v52  ;;  %v13418_v52 = vld [vmem:[%s17040_s22 + $0x40] ss:$8 sps:$4 sm:$0xff]  }
 0x7a5   : > { %9392 = vmatpush1.bf16.msra.mxu1 %v13385_v28  ;;  %v13423_v28 = vld [vmem:[%s17040_s22 + $0x54] ss:$8 sps:$4 sm:$0xff]  }
 0x7a6   : > { %9393 = vmatprep.subr.bf16.mxu1 %v13390_v9  ;;  %v13421_v9 = vld [vmem:[%s17040_s22 + $0x50] ss:$8 sps:$4 sm:$0xff]  }
 0x7a9   : > { %9394 = vmatpush1.bf16.msra.mxu1 %v13388_v57  ;;  %v13426_v57 = vld [vmem:[%s17040_s22 + $0x64] ss:$8 sps:$4 sm:$0xff]  }
 0x7aa   : > { %9395 = vmatprep.subr.bf16.mxu1 %v13393_v62  ;;  %v13424_v62 = vld [vmem:[%s17040_s22 + $0x60] ss:$8 sps:$4 sm:$0xff]  }
 0x7ad   : > { %9396 = vmatpush1.bf16.msra.mxu1 %v13391_v10  ;;  %v13429_v10 = vld [vmem:[%s17040_s22 + $0x74] ss:$8 sps:$4 sm:$0xff]  }
 0x7ae   : > { %9397 = vmatprep.subr.bf16.mxu1 %v13396_v6  ;;  %v13432_v6 = vld [vmem:[%s17040_s22 + $0x84] ss:$8 sps:$4 sm:$0xff]  }
 0x7b1   : > { %9398 = vmatpush1.bf16.msra.mxu1 %v13394_v23  ;;  %v13427_v23 = vld [vmem:[%s17040_s22 + $0x70] ss:$8 sps:$4 sm:$0xff]  }
 0x7b2   : > { %9399 = vmatprep.subr.bf16.mxu1 %v13399_v19  ;;  %v13430_v19 = vld [vmem:[%s17040_s22 + $0x80] ss:$8 sps:$4 sm:$0xff]  }
 0x7b5   : > { %9400 = vmatpush1.bf16.msra.mxu1 %v13397_v12  ;;  %v13435_v12 = vld [vmem:[%s17040_s22 + $0x94] ss:$8 sps:$4 sm:$0xff]  }
 0x7b6   : > { %9401 = vmatprep.subr.bf16.mxu1 %v13402_v34  ;;  %v13436_v34 = vld [vmem:[%s17040_s22 + $0xa0] ss:$8 sps:$4 sm:$0xff]  }
 0x7b9   : > { %9402 = vmatpush1.bf16.msra.mxu1 %v13400_v4  ;;  %v13433_v4 = vld [vmem:[%s17040_s22 + $0x90] ss:$8 sps:$4 sm:$0xff]  }
 0x7ba   : > { %9403 = vmatprep.subr.bf16.mxu1 %v13405_v24  ;;  %v13438_v24 = vld [vmem:[%s17040_s22 + $0xa4] ss:$8 sps:$4 sm:$0xff]  }
 0x7bd   : > { %9404 = vmatpush1.bf16.msra.mxu1 %v13403_v47  ;;  %v13441_v47 = vld [vmem:[%s17040_s22 + $0xb4] ss:$8 sps:$4 sm:$0xff]  }
 0x7be   : > { %9842 = vmatprep.subr.bf16.mxu1 %v13408_v54  ;;  %v13439_v54 = vld [vmem:[%s17040_s22 + $0xb0] ss:$8 sps:$4 sm:$0xff]  }
 0x86b   : > { %v13118_v56 = vpop.f32.mrb[52].mxu1 }
 0x86c   : > { %v9115_v55 = vadd.f32 %v13118_v56, %v16593_v45  ;;  %v9106_v61 = vpop.f32.mrb[53].mxu1  ;;  %v13442_v56 = vld [vmem:[%s17040_s22 + $0xc0] ss:$8 sps:$4 sm:$0xff]  }
 0x86d   : > { %v9107_v39 = vadd.f32 %v9106_v61, %v16584_v63  ;;  %v13119_v11 = vpop.f32.mrb[54].mxu1  ;;  %v13447_v61 = vld [vmem:[%s17040_s22 + $0xd4] ss:$8 sps:$4 sm:$0xff]  }
 0x86e   : > { %v9118_v21 = vadd.f32 %v13119_v11, %v16596_v25  ;;  %v9109_v30 = vpop.f32.mrb[55].mxu1  ;;  %v9127_v44 = vmax.f32 %v9115_v55, 0.0  ;;  %v13444_v55 = vld [vmem:[%s17040_s22 + $0xc4] ss:$8 sps:$4 sm:$0xff]   ;;  %v13448_v11 = vld [vmem:[%s17040_s22 + $0xe0] ss:$8 sps:$4 sm:$0xff]  }
 0x86f   : > { %v9110_v31 = vadd.f32 %v9109_v30, %v16559_v58  ;;  %v9125_v8 = vmax.f32 %v9107_v39, 0.0  ;;  %v13445_v39 = vld [vmem:[%s17040_s22 + $0xd0] ss:$8 sps:$4 sm:$0xff]   ;;  %v13453_v30 = vld [vmem:[%s17040_s22 + $0xf4] ss:$8 sps:$4 sm:$0xff]  }
 0x870   : > { %v9128_v49 = vmax.f32 %v9118_v21, 0.0  ;;  %v13450_v21 = vld [vmem:[%s17040_s22 + $0xe4] ss:$8 sps:$4 sm:$0xff]  }
 0x871   : > { %v9126_v48 = vmax.f32 %v9110_v31, 0.0  ;;  %v13451_v31 = vld [vmem:[%s17040_s22 + $0xf0] ss:$8 sps:$4 sm:$0xff]  }
 0x872   : > { %v9132_v32 = vpack.c.bf16 %v9128_v49, %v9127_v44  ;;  %v13456_v44 = vld [vmem:[%s17043_s28 + $0x4] ss:$8 sps:$4 sm:$0xff]  }
 0x873   : > { %v9131_v15 = vpack.c.bf16 %v9126_v48, %v9125_v8  ;;  %v13138_v20 = vpop.f32.mrb[56].mxu1 }
 0x874   : > { %v9247_v45 = vadd.f32 %v13138_v20, %v16690_v40  ;;  %v9238_v38 = vpop.f32.mrb[57].mxu1  ;;  %v9297_v20 = vld [vmem:[%s17044_s1] sm:$0x3] }
 0x875   : > { %v9239_v63 = vadd.f32 %v16690_v40, %v9238_v38  ;;  %v13139_v25 = vpop.f32.mrb[58].mxu1  ;;  %13140 = vmatprep.mubr.bf16.mxu1 %v9131_v15 }
 0x876   : > { %v9250_v58 = vadd.f32 %v13139_v25, %v16690_v40  ;;  %v9241_v33 = vpop.f32.mrb[59].mxu1  ;;  %13141 = vmatmul.mubr.bf16.gmra.mrb[60].mxu1 %v9132_v32  ;;  %v9271_v59 = vmax.f32 %v9247_v45, 0.0 }
 0x877   : > { %v9242_v37 = vadd.f32 %v16690_v40, %v9241_v33  ;;  %9421 = vmatprep.mubr.bf16.mxu1 %v17042_v22  ;;  %v9269_v18 = vmax.f32 %v9239_v63, 0.0  ;;  %v16737_v33 = vrot.slane %v9297_v20, %v16238_v29 }
 0x878   : > { %v9272_v7 = vmax.f32 %v9250_v58, 0.0 }
 0x879   : > { %v9270_v53 = vmax.f32 %v9242_v37, 0.0 }
 0x87a   : > { %v9278_v26 = vpack.c.bf16 %v9272_v7, %v9271_v59  ;;  %v16740_v7 = vrot.slane %v9297_v20, %v16233_v60  ;;  %v13477_v20 = vld [vmem:[%s17043_s28 + $0x74] ss:$8 sps:$4 sm:$0xff]  }
 0x87b   : > { %v9277_v36 = vpack.c.bf16 %v9270_v53, %v9269_v18 }
 0x87e   : > { %9422 = vmatmul.mubr.bf16.vlgmr.msra.gmra.mrb[64].mxu1 %v9277_v36 }
 0x87f   : > { %9431 = vmatprep.mubr.bf16.mxu1 %v17042_v22  ;;  %9843 = vmatpush1.bf16.msra.mxu1 %v13406_v41 }
 0x880   : > { %9844 = vmatprep.subr.bf16.mxu1 %v13411_v35 }
 0x883   : > { %9845 = vmatpush1.bf16.msra.mxu1 %v13409_v50 }
 0x884   : > { %9846 = vmatprep.subr.bf16.mxu1 %v13414_v2 }
 0x886   : > { %9432 = vmatmul.mubr.bf16.gmra.mrb[68].mxu1 %v9278_v26 }
 0x887   : > { %9847 = vmatpush1.bf16.msra.mxu1 %v13412_v43  ;;  %9441 = vmatprep.mubr.bf16.mxu1 %v17042_v22 }
 0x888   : > { %9848 = vmatprep.subr.bf16.mxu1 %v13417_v42 }
 0x88b   : > { %9849 = vmatpush1.bf16.msra.mxu1 %v13415_v0 }
 0x88c   : > { %9850 = vmatprep.subr.bf16.mxu1 %v13420_v27 }
 0x88f   : > { %9851 = vmatpush1.bf16.msra.mxu1 %v13418_v52 }
 0x890   : > { %9852 = vmatprep.subr.bf16.mxu1 %v13423_v28 }
 0x893   : > { %9853 = vmatpush1.bf16.msra.mxu1 %v13421_v9 }
 0x894   : > { %9854 = vmatprep.subr.bf16.mxu1 %v13426_v57 }
 0x897   : > { %9855 = vmatpush1.bf16.msra.mxu1 %v13424_v62 }
 0x898   : > { %9856 = vmatprep.subr.bf16.mxu1 %v13429_v10 }
 0x89b   : > { %9857 = vmatpush1.bf16.msra.mxu1 %v13427_v23 }
 0x89c   : > { %9858 = vmatprep.subr.bf16.mxu1 %v13432_v6 }
 0x89f   : > { %9859 = vmatpush1.bf16.msra.mxu1 %v13430_v19 }
 0x8a0   : > { %9860 = vmatprep.subr.bf16.mxu1 %v13435_v12 }
 0x8a3   : > { %9861 = vmatpush1.bf16.msra.mxu1 %v13433_v4 }
 0x8a4   : > { %9862 = vmatprep.subr.bf16.mxu1 %v13438_v24 }
 0x8a7   : > { %9863 = vmatpush1.bf16.msra.mxu1 %v13436_v34 }
 0x8a8   : > { %9864 = vmatprep.subr.bf16.mxu1 %v13441_v47 }
 0x8ab   : > { %9865 = vmatpush1.bf16.msra.mxu1 %v13439_v54 }
 0x8ac   : > { %9866 = vmatprep.subr.bf16.mxu1 %v13444_v55 }
 0x8af   : > { %9867 = vmatpush1.bf16.msra.mxu1 %v13442_v56  ;;  %v13454_v56 = vld [vmem:[%s17043_s28] ss:$8 sps:$4 sm:$0xff]  }
 0x8b0   : > { %9868 = vmatprep.subr.bf16.mxu1 %v13447_v61  ;;  %v13459_v61 = vld [vmem:[%s17043_s28 + $0x14] ss:$8 sps:$4 sm:$0xff]  }
 0x8b3   : > { %9869 = vmatpush1.bf16.msra.mxu1 %v13445_v39  ;;  %v13457_v39 = vld [vmem:[%s17043_s28 + $0x10] ss:$8 sps:$4 sm:$0xff]  }
 0x8b4   : > { %9870 = vmatprep.subr.bf16.mxu1 %v13450_v21  ;;  %v13460_v21 = vld [vmem:[%s17043_s28 + $0x20] ss:$8 sps:$4 sm:$0xff]  }
 0x8b7   : > { %9871 = vmatpush1.bf16.msra.mxu1 %v13448_v11  ;;  %v13462_v11 = vld [vmem:[%s17043_s28 + $0x24] ss:$8 sps:$4 sm:$0xff]  }
 0x8b8   : > { %9872 = vmatprep.subr.bf16.mxu1 %v13453_v30  ;;  %v13465_v30 = vld [vmem:[%s17043_s28 + $0x34] ss:$8 sps:$4 sm:$0xff]  }
 0x8bb   : > { %9873 = vmatpush1.bf16.msra.mxu1 %v13451_v31  ;;  %v13463_v31 = vld [vmem:[%s17043_s28 + $0x30] ss:$8 sps:$4 sm:$0xff]  }
 0x8bc   : > { %10143 = vmatprep.subr.bf16.mxu1 %v13456_v44  ;;  %v13468_v44 = vld [vmem:[%s17043_s28 + $0x44] ss:$8 sps:$4 sm:$0xff]  }
 0x949   : > { %v13142_v49 = vpop.f32.mrb[60].mxu1 }
 0x94a   : > { %v9263_v8 = vadd.f32 %v13142_v49, %v16690_v40  ;;  %v9254_v48 = vpop.f32.mrb[61].mxu1  ;;  %v13466_v49 = vld [vmem:[%s17043_s28 + $0x40] ss:$8 sps:$4 sm:$0xff]  }
 0x94b   : > { %v9255_v32 = vadd.f32 %v16690_v40, %v9254_v48  ;;  %v13143_v15 = vpop.f32.mrb[62].mxu1  ;;  %v13469_v48 = vld [vmem:[%s17043_s28 + $0x50] ss:$8 sps:$4 sm:$0xff]  }
 0x94c   : > { %v9266_v45 = vadd.f32 %v13143_v15, %v16690_v40  ;;  %v9257_v38 = vpop.f32.mrb[63].mxu1  ;;  %v9275_v25 = vmax.f32 %v9263_v8, 0.0  ;;  %v13471_v8 = vld [vmem:[%s17043_s28 + $0x54] ss:$8 sps:$4 sm:$0xff]   ;;  %v13472_v15 = vld [vmem:[%s17043_s28 + $0x60] ss:$8 sps:$4 sm:$0xff]  }
 0x94d   : > { %v9258_v63 = vadd.f32 %v16690_v40, %v9257_v38  ;;  %v9273_v37 = vmax.f32 %v9255_v32, 0.0  ;;  %v13474_v32 = vld [vmem:[%s17043_s28 + $0x64] ss:$8 sps:$4 sm:$0xff]  }
 0x94e   : > { %v9276_v58 = vmax.f32 %v9266_v45, 0.0  ;;  %v13475_v45 = vld [vmem:[%s17043_s28 + $0x70] ss:$8 sps:$4 sm:$0xff]   ;;  %v13480_v38 = vld [vmem:[%s17043_s28 + $0x84] ss:$8 sps:$4 sm:$0xff]  }
 0x94f   : > { %v9274_v59 = vmax.f32 %v9258_v63, 0.0  ;;  %v13478_v63 = vld [vmem:[%s17043_s28 + $0x80] ss:$8 sps:$4 sm:$0xff]  }
 0x950   : > { %v9280_v18 = vpack.c.bf16 %v9276_v58, %v9275_v25  ;;  %v13483_v25 = vld [vmem:[%s17043_s28 + $0x94] ss:$8 sps:$4 sm:$0xff]   ;;  %v13481_v58 = vld [vmem:[%s17043_s28 + $0x90] ss:$8 sps:$4 sm:$0xff]  }
 0x951   : > { %v9279_v53 = vpack.c.bf16 %v9274_v59, %v9273_v37  ;;  %v9423_v26 = vpop.f32.mrb[64].mxu1  ;;  %v13484_v37 = vld [vmem:[%s17043_s28 + $0xa0] ss:$8 sps:$4 sm:$0xff]   ;;  %v13486_v59 = vld [vmem:[%s17043_s28 + $0xa4] ss:$8 sps:$4 sm:$0xff]  }
 0x952   : > { %v9424_v36 = vadd.f32 %v9423_v26, %v16737_v33  ;;  %v9425_v41 = vpop.f32.mrb[65].mxu1  ;;  %v13490_v26 = vld [vmem:[%s17043_s28 + $0xc0] ss:$8 sps:$4 sm:$0xff]  }
 0x953   : > { %v9426_v35 = vadd.f32 %v9425_v41, %v16740_v7  ;;  %v9427_v50 = vpop.f32.mrb[66].mxu1  ;;  %9442 = vmatmul.mubr.bf16.gmra.mrb[72].mxu1 %v9279_v53  ;;  %v13487_v53 = vld [vmem:[%s17043_s28 + $0xb0] ss:$8 sps:$4 sm:$0xff]   ;;  %v13495_v41 = vld [vmem:[%s17043_s28 + $0xd4] ss:$8 sps:$4 sm:$0xff]  }
 0x954   : > { %v9428_v40 = vadd.f32 %v9427_v50, %v16737_v33  ;;  %v9429_v2 = vpop.f32.mrb[67].mxu1  ;;  %9451 = vmatprep.mubr.bf16.mxu1 %v17042_v22  ;;  %v9462_v42 = vmax.f32 %v9424_v36, 0.0  ;;  %v13492_v36 = vld [vmem:[%s17043_s28 + $0xc4] ss:$8 sps:$4 sm:$0xff]   ;;  %v13496_v50 = vld [vmem:[%s17043_s28 + $0xe0] ss:$8 sps:$4 sm:$0xff]  }
 0x955   : > { %v9430_v43 = vadd.f32 %v9429_v2, %v16740_v7  ;;  %v9463_v27 = vmax.f32 %v9426_v35, 0.0  ;;  %v13493_v35 = vld [vmem:[%s17043_s28 + $0xd0] ss:$8 sps:$4 sm:$0xff]   ;;  %v13501_v2 = vld [vmem:[%s17043_s28 + $0xf4] ss:$8 sps:$4 sm:$0xff]  }
 0x956   : > { %v9464_v0 = vmax.f32 %v9428_v40, 0.0  ;;  %v13498_v40 = vld [vmem:[%s17043_s28 + $0xe4] ss:$8 sps:$4 sm:$0xff]  }
 0x957   : > { %v9465_v52 = vmax.f32 %v9430_v43, 0.0  ;;  %v13499_v43 = vld [vmem:[%s17043_s28 + $0xf0] ss:$8 sps:$4 sm:$0xff]  }
 0x958   : > { %v9478_v28 = vpack.c.bf16 %v9464_v0, %v9462_v42  ;;  %v13504_v42 = vld [vmem:[%s13810_s30 + $0x4] ss:$16 sps:$4 sm:$0xff]  }
 0x959   : > { %v9479_v9 = vpack.c.bf16 %v9465_v52, %v9463_v27  ;;  %v9433_v57 = vpop.f32.mrb[68].mxu1 }
 0x95a   : > { %v9434_v62 = vadd.f32 %v9433_v57, %v16737_v33  ;;  %v9435_v10 = vpop.f32.mrb[69].mxu1 }
 0x95b   : > { %v9436_v23 = vadd.f32 %v9435_v10, %v16740_v7  ;;  %v9437_v6 = vpop.f32.mrb[70].mxu1  ;;  %9452 = vmatmul.mubr.bf16.gmra.mrb[76].mxu1 %v9280_v18  ;;  %v13489_v18 = vld [vmem:[%s17043_s28 + $0xb4] ss:$8 sps:$4 sm:$0xff]  }
 0x95c   : > { %v9438_v22 = vadd.f32 %v9437_v6, %v16737_v33  ;;  %v9439_v19 = vpop.f32.mrb[71].mxu1  ;;  %9874 = vmatprep.mubr.bf16.mxu1 %v9479_v9  ;;  %v9466_v4 = vmax.f32 %v9434_v62, 0.0 }
 0x95d   : > { %v9440_v12 = vadd.f32 %v9439_v19, %v16740_v7  ;;  %v9467_v24 = vmax.f32 %v9436_v23, 0.0 }
 0x95e   : > { %v9468_v34 = vmax.f32 %v9438_v22, 0.0 }
 0x95f   : > { %v9469_v47 = vmax.f32 %v9440_v12, 0.0 }
 0x960   : > { %v9480_v54 = vpack.c.bf16 %v9468_v34, %v9466_v4 }
 0x961   : > { %v9481_v55 = vpack.c.bf16 %v9469_v47, %v9467_v24 }
 0x963   : > { %9875 = vmatmul.mubr.bf16.vlgmr.msra.gmra.mrb[80].mxu1 %v9478_v28 }
 0x964   : > { %9884 = vmatprep.mubr.bf16.mxu1 %v9481_v55  ;;  %10144 = vmatpush1.bf16.msra.mxu1 %v13454_v56 }
 0x965   : > { %10145 = vmatprep.subr.bf16.mxu1 %v13459_v61 }
 0x968   : > { %10146 = vmatpush1.bf16.msra.mxu1 %v13457_v39 }
 0x969   : > { %10147 = vmatprep.subr.bf16.mxu1 %v13462_v11 }
 0x96b   : > { %9885 = vmatmul.mubr.bf16.gmra.mrb[84].mxu1 %v9480_v54 }
 0x96c   : > { %10148 = vmatpush1.bf16.msra.mxu1 %v13460_v21 }
 0x96d   : > { %10149 = vmatprep.subr.bf16.mxu1 %v13465_v30 }
 0x970   : > { %10150 = vmatpush1.bf16.msra.mxu1 %v13463_v31 }
 0x971   : > { %10151 = vmatprep.subr.bf16.mxu1 %v13468_v44 }
 0x974   : > { %10152 = vmatpush1.bf16.msra.mxu1 %v13466_v49  ;;  %v9666_v49 = vadd.f32 %v16540_v16, %v16428_v3 }
 0x975   : > { %10153 = vmatprep.subr.bf16.mxu1 %v13471_v8 }
 0x978   : > { %10154 = vmatpush1.bf16.msra.mxu1 %v13469_v48 }
 0x979   : > { %10155 = vmatprep.subr.bf16.mxu1 %v13474_v32  ;;  %v17045_v32 = vld [vmem:[#allocation16_spill] sm:$0xff] }
 0x97c   : > { %10156 = vmatpush1.bf16.msra.mxu1 %v13472_v15  ;;  %v9667_v15 = vadd.f32 %v16543_v46, %v17045_v32  ;;  %v13528_v32 = vld [vmem:[%s13810_s30 + $0x104] ss:$16 sps:$4 sm:$0xff]  }
 0x97d   : > { %10157 = vmatprep.subr.bf16.mxu1 %v13477_v20 }
 0x980   : > { %10158 = vmatpush1.bf16.msra.mxu1 %v13475_v45 }
 0x981   : > { %10159 = vmatprep.subr.bf16.mxu1 %v13480_v38 }
 0x984   : > { %10160 = vmatpush1.bf16.msra.mxu1 %v13478_v63 }
 0x985   : > { %10161 = vmatprep.subr.bf16.mxu1 %v13483_v25  ;;  %v17047_v25 = vld [vmem:[#allocation18_spill] sm:$0xff] }
 0x988   : > { %10162 = vmatpush1.bf16.msra.mxu1 %v13481_v58  ;;  %v9669_v58 = vadd.f32 %v16543_v46, %v17047_v25  ;;  %v13538_v25 = vld [vmem:[%s13810_s30 + $0x180] ss:$16 sps:$4 sm:$0xff]  }
 0x989   : > { %10163 = vmatprep.subr.bf16.mxu1 %v13486_v59 }
 0x98c   : > { %10164 = vmatpush1.bf16.msra.mxu1 %v13484_v37 }
 0x98d   : > { %10165 = vmatprep.subr.bf16.mxu1 %v13489_v18 }
 0x990   : > { %10166 = vmatpush1.bf16.msra.mxu1 %v13487_v53 }
 0x991   : > { %10167 = vmatprep.subr.bf16.mxu1 %v13492_v36 }
 0x994   : > { %10168 = vmatpush1.bf16.msra.mxu1 %v13490_v26 }
 0x995   : > { %10169 = vmatprep.subr.bf16.mxu1 %v13495_v41 }
 0x998   : > { %10170 = vmatpush1.bf16.msra.mxu1 %v13493_v35  ;;  %v17048_v35 = vld [vmem:[#allocation19_spill] sm:$0xff] }
 0x999   : > { %10171 = vmatprep.subr.bf16.mxu1 %v13498_v40 }
 0x99c   : > { %10172 = vmatpush1.bf16.msra.mxu1 %v13496_v50  ;;  %v9670_v50 = vadd.f32 %v16540_v16, %v17048_v35 }
 0x99d   : > { %10173 = vmatprep.subr.bf16.mxu1 %v13501_v2 }
 0x9a0   : > { %10174 = vmatpush1.bf16.msra.mxu1 %v13499_v43  ;;  %v17049_v43 = vld [vmem:[#allocation20_spill] sm:$0xff] }
 0x9a1   : > { %10646 = vmatprep.subr.bf16.mxu1 %v13504_v42  ;;  %v9671_v42 = vadd.f32 %v16543_v46, %v17049_v43  ;;  %v17052_v43 = vld [vmem:[#allocation23_spill] sm:$0xff] }
 0xa26   : > { %v9443_v0 = vpop.f32.mrb[72].mxu1 }
 0xa27   : > { %v9444_v27 = vadd.f32 %v9443_v0, %v16737_v33  ;;  %v9445_v52 = vpop.f32.mrb[73].mxu1  ;;  %v13502_v0 = vld [vmem:[%s13810_s30] ss:$16 sps:$4 sm:$0xff]  }
 0xa28   : > { %v9446_v28 = vadd.f32 %v9445_v52, %v16740_v7  ;;  %v9447_v9 = vpop.f32.mrb[74].mxu1 }
 0xa29   : > { %v9448_v57 = vadd.f32 %v9447_v9, %v16737_v33  ;;  %v9449_v62 = vpop.f32.mrb[75].mxu1  ;;  %v9470_v23 = vmax.f32 %v9444_v27, 0.0 }
 0xa2a   : > { %v9450_v10 = vadd.f32 %v9449_v62, %v16740_v7  ;;  %v9471_v22 = vmax.f32 %v9446_v28, 0.0  ;;  %v17050_v28 = vld [vmem:[#allocation21_spill] sm:$0xff] }
 0xa2b   : > { %v9472_v6 = vmax.f32 %v9448_v57, 0.0  ;;  %v9672_v9 = vadd.f32 %v16540_v16, %v17050_v28  ;;  %v13507_v57 = vld [vmem:[%s13810_s30 + $0x24] ss:$16 sps:$4 sm:$0xff]  }
 0xa2c   : > { %v9473_v19 = vmax.f32 %v9450_v10, 0.0 }
 0xa2d   : > { %v9482_v12 = vpack.c.bf16 %v9472_v6, %v9470_v23  ;;  %v17051_v23 = vld [vmem:[#allocation22_spill] sm:$0xff] }
 0xa2e   : > { %v9483_v4 = vpack.c.bf16 %v9473_v19, %v9471_v22  ;;  %v9453_v34 = vpop.f32.mrb[76].mxu1  ;;  %v9673_v6 = vadd.f32 %v16543_v46, %v17051_v23 }
 0xa2f   : > { %v9454_v24 = vadd.f32 %v9453_v34, %v16737_v33  ;;  %v9455_v47 = vpop.f32.mrb[77].mxu1 }
 0xa30   : > { %v9456_v54 = vadd.f32 %v9455_v47, %v16740_v7  ;;  %v9457_v56 = vpop.f32.mrb[78].mxu1  ;;  %9894 = vmatprep.mubr.bf16.mxu1 %v9483_v4  ;;  %v13505_v4 = vld [vmem:[%s13810_s30 + $0x20] ss:$16 sps:$4 sm:$0xff]  }
 0xa31   : > { %v9458_v55 = vadd.f32 %v9457_v56, %v16737_v33  ;;  %v9459_v61 = vpop.f32.mrb[79].mxu1  ;;  %9895 = vmatmul.mubr.bf16.gmra.mrb[88].mxu1 %v9482_v12  ;;  %v9474_v11 = vmax.f32 %v9454_v24, 0.0  ;;  %v17046_v33 = vld [vmem:[#allocation17_spill] sm:$0xff] }
 0xa32   : > { %v9460_v39 = vadd.f32 %v9459_v61, %v16740_v7  ;;  %v9475_v30 = vmax.f32 %v9456_v54, 0.0  ;;  %v9668_v38 = vadd.f32 %v16540_v16, %v17046_v33  ;;  %v13510_v16 = vld [vmem:[%s13810_s30 + $0x44] ss:$16 sps:$4 sm:$0xff]   ;;  %v13532_v33 = vld [vmem:[%s13810_s30 + $0x140] ss:$16 sps:$4 sm:$0xff]  }
 0xa33   : > { %v9476_v21 = vmax.f32 %v9458_v55, 0.0  ;;  %v13508_v55 = vld [vmem:[%s13810_s30 + $0x40] ss:$16 sps:$4 sm:$0xff]   ;;  %v13513_v61 = vld [vmem:[%s13810_s30 + $0x64] ss:$16 sps:$4 sm:$0xff]  }
 0xa34   : > { %v9477_v31 = vmax.f32 %v9460_v39, 0.0  ;;  %v13511_v39 = vld [vmem:[%s13810_s30 + $0x60] ss:$16 sps:$4 sm:$0xff]  }
 0xa35   : > { %v9484_v44 = vpack.c.bf16 %v9476_v21, %v9474_v11  ;;  %v13516_v11 = vld [vmem:[%s13810_s30 + $0x84] ss:$16 sps:$4 sm:$0xff]   ;;  %v13514_v21 = vld [vmem:[%s13810_s30 + $0x80] ss:$16 sps:$4 sm:$0xff]  }
 0xa36   : > { %v9485_v8 = vpack.c.bf16 %v9477_v31, %v9475_v30  ;;  %v9876_v48 = vpop.f32.mrb[80].mxu1  ;;  %v13519_v30 = vld [vmem:[%s13810_s30 + $0xa4] ss:$16 sps:$4 sm:$0xff]   ;;  %v13517_v31 = vld [vmem:[%s13810_s30 + $0xa0] ss:$16 sps:$4 sm:$0xff]  }
 0xa37   : > { %v9877_v20 = vadd.f32 %v9876_v48, %v9666_v49  ;;  %v9878_v45 = vpop.f32.mrb[81].mxu1  ;;  %v13520_v49 = vld [vmem:[%s13810_s30 + $0xc0] ss:$16 sps:$4 sm:$0xff]  }
 0xa38   : > { %v9879_v63 = vadd.f32 %v9878_v45, %v9667_v15  ;;  %v9880_v7 = vpop.f32.mrb[82].mxu1  ;;  %9904 = vmatprep.mubr.bf16.mxu1 %v9485_v8  ;;  %v13525_v8 = vld [vmem:[%s13810_s30 + $0xe4] ss:$16 sps:$4 sm:$0xff]   ;;  %v13523_v48 = vld [vmem:[%s13810_s30 + $0xe0] ss:$16 sps:$4 sm:$0xff]  }
 0xa39   : > { %v9881_v37 = vadd.f32 %v9880_v7, %v9668_v38  ;;  %v9882_v59 = vpop.f32.mrb[83].mxu1  ;;  %9905 = vmatmul.mubr.bf16.gmra.mrb[92].mxu1 %v9484_v44  ;;  %v9915_v18 = vmax.f32 %v9877_v20, 0.0  ;;  %v13522_v44 = vld [vmem:[%s13810_s30 + $0xc4] ss:$16 sps:$4 sm:$0xff]   ;;  %v13526_v15 = vld [vmem:[%s13810_s30 + $0x100] ss:$16 sps:$4 sm:$0xff]  }
 0xa3a   : > { %v9883_v3 = vadd.f32 %v9882_v59, %v9669_v58  ;;  %v9916_v26 = vmax.f32 %v9879_v63, 0.0  ;;  %v13531_v20 = vld [vmem:[%s13810_s30 + $0x124] ss:$16 sps:$4 sm:$0xff]   ;;  %v13529_v45 = vld [vmem:[%s13810_s30 + $0x120] ss:$16 sps:$4 sm:$0xff]  }
 0xa3b   : > { %v9917_v53 = vmax.f32 %v9881_v37, 0.0  ;;  %v13534_v38 = vld [vmem:[%s13810_s30 + $0x144] ss:$16 sps:$4 sm:$0xff]   ;;  %v13535_v7 = vld [vmem:[%s13810_s30 + $0x160] ss:$16 sps:$4 sm:$0xff]  }
 0xa3c   : > { %v9918_v36 = vmax.f32 %v9883_v3, 0.0  ;;  %v13537_v63 = vld [vmem:[%s13810_s30 + $0x164] ss:$16 sps:$4 sm:$0xff]   ;;  %v13541_v59 = vld [vmem:[%s13810_s30 + $0x1a0] ss:$16 sps:$4 sm:$0xff]  }
 0xa3d   : > { %v9931_v41 = vpack.c.bf16 %v9917_v53, %v9915_v18  ;;  %v13540_v58 = vld [vmem:[%s13810_s30 + $0x184] ss:$16 sps:$4 sm:$0xff]   ;;  %v13544_v3 = vld [vmem:[%s13810_s30 + $0x1c0] ss:$16 sps:$4 sm:$0xff]  }
 0xa3e   : > { %v9932_v40 = vpack.c.bf16 %v9918_v36, %v9916_v26  ;;  %v9886_v2 = vpop.f32.mrb[84].mxu1  ;;  %v13543_v37 = vld [vmem:[%s13810_s30 + $0x1a4] ss:$16 sps:$4 sm:$0xff]   ;;  %v13547_v26 = vld [vmem:[%s13810_s30 + $0x1e0] ss:$16 sps:$4 sm:$0xff]  }
 0xa3f   : > { %v9887_v27 = vadd.f32 %v9886_v2, %v9670_v50  ;;  %v9888_v52 = vpop.f32.mrb[85].mxu1  ;;  %v13546_v18 = vld [vmem:[%s13810_s30 + $0x1c4] ss:$16 sps:$4 sm:$0xff]   ;;  %v13552_v36 = vld [vmem:[%s13810_s30 + $0xc] ss:$16 sps:$4 sm:$0xff]  }
 0xa40   : > { %v9889_v62 = vadd.f32 %v9888_v52, %v9671_v42  ;;  %v9890_v10 = vpop.f32.mrb[86].mxu1  ;;  %10175 = vmatprep.mubr.bf16.mxu1 %v9932_v40  ;;  %v13549_v53 = vld [vmem:[%s13810_s30 + $0x1e4] ss:$16 sps:$4 sm:$0xff]  }
 0xa41   : > { %v9891_v22 = vadd.f32 %v9890_v10, %v9672_v9  ;;  %v9892_v19 = vpop.f32.mrb[87].mxu1  ;;  %10176 = vmatmul.mubr.bf16.vlgmr.msra.gmra.mrb[96].mxu1 %v9931_v41  ;;  %v9919_v34 = vmax.f32 %v9887_v27, 0.0  ;;  %v17053_v27 = vld [vmem:[#allocation24_spill] sm:$0xff] }
 0xa42   : > { %v9893_v12 = vadd.f32 %v9892_v19, %v9673_v6  ;;  %10647 = vmatpush1.bf16.msra.mxu1 %v13502_v0  ;;  %v9920_v47 = vmax.f32 %v9889_v62, 0.0 }
 0xa43   : > { %v9921_v24 = vmax.f32 %v9891_v22, 0.0  ;;  %10648 = vmatprep.subr.bf16.mxu1 %v13507_v57 }
 0xa44   : > { %v9922_v54 = vmax.f32 %v9893_v12, 0.0  ;;  %v9971_v12 = vld [vmem:[%s13805_s20] sm:$0x3] }
 0xa45   : > { %v9933_v56 = vpack.c.bf16 %v9921_v24, %v9919_v34 }
 0xa46   : > { %v9934_v46 = vpack.c.bf16 %v9922_v54, %v9920_v47  ;;  %10649 = vmatpush1.bf16.msra.mxu1 %v13505_v4  ;;  %v16849_v54 = vrot.slane %v9971_v12, %v16238_v29 }
 0xa47   : > { %10650 = vmatprep.subr.bf16.mxu1 %v13510_v16 }
 0xa48   : > { %10185 = vmatprep.mubr.bf16.mxu1 %v9934_v46 }
 0xa49   : > { %10186 = vmatmul.mubr.bf16.gmra.mrb[100].mxu1 %v9933_v56 }
 0xa4a   : > { %10651 = vmatpush1.bf16.msra.mxu1 %v13508_v55 }
 0xa4b   : > { %10652 = vmatprep.subr.bf16.mxu1 %v13513_v61 }
 0xa4e   : > { %10653 = vmatpush1.bf16.msra.mxu1 %v13511_v39 }
 0xa4f   : > { %10654 = vmatprep.subr.bf16.mxu1 %v13516_v11 }
 0xa52   : > { %10655 = vmatpush1.bf16.msra.mxu1 %v13514_v21 }
 0xa53   : > { %10656 = vmatprep.subr.bf16.mxu1 %v13519_v30 }
 0xa56   : > { %10657 = vmatpush1.bf16.msra.mxu1 %v13517_v31 }
 0xa57   : > { %10658 = vmatprep.subr.bf16.mxu1 %v13522_v44 }
 0xa5a   : > { %10659 = vmatpush1.bf16.msra.mxu1 %v13520_v49 }
 0xa5b   : > { %10660 = vmatprep.subr.bf16.mxu1 %v13525_v8 }
 0xa5e   : > { %10661 = vmatpush1.bf16.msra.mxu1 %v13523_v48 }
 0xa5f   : > { %10662 = vmatprep.subr.bf16.mxu1 %v13528_v32 }
 0xa62   : > { %10663 = vmatpush1.bf16.msra.mxu1 %v13526_v15 }
 0xa63   : > { %10664 = vmatprep.subr.bf16.mxu1 %v13531_v20 }
 0xa66   : > { %10665 = vmatpush1.bf16.msra.mxu1 %v13529_v45  ;;  %v13550_v45 = vld [vmem:[%s13810_s30 + $0x8] ss:$16 sps:$4 sm:$0xff]  }
 0xa67   : > { %10666 = vmatprep.subr.bf16.mxu1 %v13534_v38 }
 0xa6a   : > { %10667 = vmatpush1.bf16.msra.mxu1 %v13532_v33 }
 0xa6b   : > { %10668 = vmatprep.subr.bf16.mxu1 %v13537_v63  ;;  %v13555_v63 = vld [vmem:[%s13810_s30 + $0x2c] ss:$16 sps:$4 sm:$0xff]  }
 0xa6e   : > { %10669 = vmatpush1.bf16.msra.mxu1 %v13535_v7 }
 0xa6f   : > { %10670 = vmatprep.subr.bf16.mxu1 %v13540_v58 }
 0xa72   : > { %10671 = vmatpush1.bf16.msra.mxu1 %v13538_v25 }
 0xa73   : > { %10672 = vmatprep.subr.bf16.mxu1 %v13543_v37 }
 0xa76   : > { %10673 = vmatpush1.bf16.msra.mxu1 %v13541_v59 }
 0xa77   : > { %10674 = vmatprep.subr.bf16.mxu1 %v13546_v18 }
 0xa7a   : > { %10675 = vmatpush1.bf16.msra.mxu1 %v13544_v3  ;;  %v13553_v3 = vld [vmem:[%s13810_s30 + $0x28] ss:$16 sps:$4 sm:$0xff]  }
 0xa7b   : > { %10676 = vmatprep.subr.bf16.mxu1 %v13549_v53 }
 0xa7e   : > { %10677 = vmatpush1.bf16.msra.mxu1 %v13547_v26  ;;  %v13558_v26 = vld [vmem:[%s13810_s30 + $0x4c] ss:$16 sps:$4 sm:$0xff]  }
 0xa7f   : > { %10719 = vmatprep.subr.bf16.mxu1 %v13552_v36 }
 0xb04   : > { %v9896_v41 = vpop.f32.mrb[88].mxu1 }
 0xb05   : > { %v9897_v35 = vadd.f32 %v9896_v41, %v16587_v5  ;;  %v9898_v50 = vpop.f32.mrb[89].mxu1 }
 0xb06   : > { %v9899_v40 = vadd.f32 %v9898_v50, %v16590_v51  ;;  %v9900_v2 = vpop.f32.mrb[90].mxu1 }
 0xb07   : > { %v9901_v42 = vadd.f32 %v9900_v2, %v17052_v43  ;;  %v9902_v0 = vpop.f32.mrb[91].mxu1  ;;  %v9923_v28 = vmax.f32 %v9897_v35, 0.0  ;;  %v13561_v2 = vld [vmem:[%s13810_s30 + $0x6c] ss:$16 sps:$4 sm:$0xff]   ;;  %v13559_v43 = vld [vmem:[%s13810_s30 + $0x68] ss:$16 sps:$4 sm:$0xff]  }
 0xb08   : > { %v9903_v52 = vadd.f32 %v9902_v0, %v17053_v27  ;;  %v9924_v57 = vmax.f32 %v9899_v40, 0.0  ;;  %v13556_v40 = vld [vmem:[%s13810_s30 + $0x48] ss:$16 sps:$4 sm:$0xff]   ;;  %v13567_v27 = vld [vmem:[%s13810_s30 + $0xac] ss:$16 sps:$4 sm:$0xff]  }
 0xb09   : > { %v9925_v9 = vmax.f32 %v9901_v42, 0.0  ;;  %v13564_v42 = vld [vmem:[%s13810_s30 + $0x8c] ss:$16 sps:$4 sm:$0xff]   ;;  %v13562_v0 = vld [vmem:[%s13810_s30 + $0x88] ss:$16 sps:$4 sm:$0xff]  }
 0xb0a   : > { %v9926_v62 = vmax.f32 %v9903_v52, 0.0  ;;  %v13565_v52 = vld [vmem:[%s13810_s30 + $0xa8] ss:$16 sps:$4 sm:$0xff]  }
 0xb0b   : > { %v9935_v10 = vpack.c.bf16 %v9925_v9, %v9923_v28  ;;  %v13570_v28 = vld [vmem:[%s13810_s30 + $0xcc] ss:$16 sps:$4 sm:$0xff]   ;;  %v13568_v9 = vld [vmem:[%s13810_s30 + $0xc8] ss:$16 sps:$4 sm:$0xff]  }
 0xb0c   : > { %v9936_v23 = vpack.c.bf16 %v9926_v62, %v9924_v57  ;;  %v9906_v6 = vpop.f32.mrb[92].mxu1  ;;  %v13573_v57 = vld [vmem:[%s13810_s30 + $0xec] ss:$16 sps:$4 sm:$0xff]   ;;  %v13571_v62 = vld [vmem:[%s13810_s30 + $0xe8] ss:$16 sps:$4 sm:$0xff]  }
 0xb0d   : > { %v9907_v22 = vadd.f32 %v9906_v6, %v16599_v14  ;;  %v9908_v5 = vpop.f32.mrb[93].mxu1  ;;  %v16852_v14 = vrot.slane %v9971_v12, %v16233_v60  ;;  %v13579_v6 = vld [vmem:[%s13810_s30 + $0x12c] ss:$16 sps:$4 sm:$0xff]   ;;  %v13583_v12 = vld [vmem:[%s13810_s30 + $0x168] ss:$16 sps:$4 sm:$0xff]  }
 0xb0e   : > { %v9909_v19 = vadd.f32 %v9908_v5, %v16602_v17  ;;  %v9910_v51 = vpop.f32.mrb[94].mxu1  ;;  %10195 = vmatprep.mubr.bf16.mxu1 %v9936_v23  ;;  %v13574_v23 = vld [vmem:[%s13810_s30 + $0x108] ss:$16 sps:$4 sm:$0xff]  }
 0xb0f   : > { %v9911_v4 = vadd.f32 %v9910_v51, %v16605_v13  ;;  %v9912_v34 = vpop.f32.mrb[95].mxu1  ;;  %10196 = vmatmul.mubr.bf16.gmra.mrb[104].mxu1 %v9935_v10  ;;  %v9927_v16 = vmax.f32 %v9907_v22, 0.0  ;;  %v13576_v10 = vld [vmem:[%s13810_s30 + $0x10c] ss:$16 sps:$4 sm:$0xff]   ;;  %v13577_v22 = vld [vmem:[%s13810_s30 + $0x128] ss:$16 sps:$4 sm:$0xff]  }
 0xb10   : > { %v9913_v24 = vadd.f32 %v9912_v34, %v16608_v1  ;;  %v9928_v56 = vmax.f32 %v9909_v19, 0.0  ;;  %v13580_v5 = vld [vmem:[%s13810_s30 + $0x148] ss:$16 sps:$4 sm:$0xff]   ;;  %v13582_v19 = vld [vmem:[%s13810_s30 + $0x14c] ss:$16 sps:$4 sm:$0xff]  }
 0xb11   : > { %v9929_v47 = vmax.f32 %v9911_v4, 0.0  ;;  %v13585_v51 = vld [vmem:[%s13810_s30 + $0x16c] ss:$16 sps:$4 sm:$0xff]   ;;  %v13586_v4 = vld [vmem:[%s13810_s30 + $0x188] ss:$16 sps:$4 sm:$0xff]  }
 0xb12   : > { %v9930_v46 = vmax.f32 %v9913_v24, 0.0  ;;  %v13588_v34 = vld [vmem:[%s13810_s30 + $0x18c] ss:$16 sps:$4 sm:$0xff]  }
 0xb13   : > { %v9937_v17 = vpack.c.bf16 %v9929_v47, %v9927_v16  ;;  %v13591_v24 = vld [vmem:[%s13810_s30 + $0x1ac] ss:$16 sps:$4 sm:$0xff]   ;;  %v13589_v16 = vld [vmem:[%s13810_s30 + $0x1a8] ss:$16 sps:$4 sm:$0xff]  }
 0xb14   : > { %v9938_v55 = vpack.c.bf16 %v9930_v46, %v9928_v56  ;;  %v10177_v61 = vpop.f32.mrb[96].mxu1  ;;  %v13592_v47 = vld [vmem:[%s13810_s30 + $0x1c8] ss:$16 sps:$4 sm:$0xff]   ;;  %v13594_v56 = vld [vmem:[%s13810_s30 + $0x1cc] ss:$16 sps:$4 sm:$0xff]  }
 0xb15   : > { %v10178_v39 = vadd.f32 %v10177_v61, %v16849_v54  ;;  %v10179_v13 = vpop.f32.mrb[97].mxu1  ;;  %v13597_v46 = vld [vmem:[%s13810_s30 + $0x1ec] ss:$16 sps:$4 sm:$0xff]  }
 0xb16   : > { %v10180_v11 = vadd.f32 %v10179_v13, %v16852_v14  ;;  %v10181_v1 = vpop.f32.mrb[98].mxu1  ;;  %10205 = vmatprep.mubr.bf16.mxu1 %v9938_v55 }
 0xb17   : > { %v10182_v21 = vadd.f32 %v10181_v1, %v16849_v54  ;;  %v10183_v30 = vpop.f32.mrb[99].mxu1  ;;  %10206 = vmatmul.mubr.bf16.gmra.mrb[108].mxu1 %v9937_v17  ;;  %v10216_v44 = vmax.f32 %v10178_v39, 0.0  ;;  %v13595_v17 = vld [vmem:[%s13810_s30 + $0x1e8] ss:$16 sps:$4 sm:$0xff]  }
 0xb18   : > { %v10184_v31 = vadd.f32 %v10183_v30, %v16852_v14  ;;  %v10217_v8 = vmax.f32 %v10180_v11, 0.0 }
 0xb19   : > { %v10218_v49 = vmax.f32 %v10182_v21, 0.0 }
 0xb1a   : > { %v10219_v48 = vmax.f32 %v10184_v31, 0.0 }
 0xb1b   : > { %v16858_v32 = vpack.c.bf16 %v10218_v49, %v10216_v44 }
 0xb1c   : > { %v16860_v15 = vpack.c.bf16 %v10219_v48, %v10217_v8  ;;  %v10187_v20 = vpop.f32.mrb[100].mxu1 }
 0xb1d   : > { %v10188_v33 = vadd.f32 %v10187_v20, %v16849_v54  ;;  %v10189_v38 = vpop.f32.mrb[101].mxu1 }
 0xb1e   : > { %v10190_v7 = vadd.f32 %v10189_v38, %v16852_v14  ;;  %v10191_v25 = vpop.f32.mrb[102].mxu1  ;;  %10678 = vmatprep.mubr.bf16.mxu1 %v16860_v15 }
 0xb1f   : > { %v10192_v58 = vadd.f32 %v10191_v25, %v16849_v54  ;;  %v10193_v37 = vpop.f32.mrb[103].mxu1  ;;  %10679 = vmatmul.mubr.bf16.vlgmr.msra.gmra.mrb[112].mxu1 %v16858_v32  ;;  %v10220_v18 = vmax.f32 %v10188_v33, 0.0  ;;  %v16912_v25 = vld [vmem:[%s13815_s27] sm:$0xf] }
 0xb20   : > { %v10194_v59 = vadd.f32 %v10193_v37, %v16852_v14  ;;  %10720 = vmatpush1.bf16.msra.mxu1 %v13550_v45  ;;  %v10221_v36 = vmax.f32 %v10190_v7, 0.0 }
 0xb21   : > { %v10222_v53 = vmax.f32 %v10192_v58, 0.0  ;;  %10721 = vmatprep.subr.bf16.mxu1 %v13555_v63 }
 0xb22   : > { %v10223_v41 = vmax.f32 %v10194_v59, 0.0 }
 0xb23   : > { %v16872_v35 = vpack.c.bf16 %v10222_v53, %v10220_v18  ;;  %v16918_v53 = vrot.slane %v16912_v25, %v16238_v29 }
 0xb24   : > { %v16874_v50 = vpack.c.bf16 %v10223_v41, %v10221_v36  ;;  %10722 = vmatpush1.bf16.msra.mxu1 %v13553_v3  ;;  %v16922_v41 = vrot.slane %v16912_v25, %v16233_v60 }
 0xb25   : > { %10723 = vmatprep.subr.bf16.mxu1 %v13558_v26 }
 0xb26   : > { %10688 = vmatprep.mubr.bf16.mxu1 %v16874_v50 }
 0xb27   : > { %10689 = vmatmul.mubr.bf16.gmra.mrb[116].mxu1 %v16872_v35 }
 0xb28   : > { %10724 = vmatpush1.bf16.msra.mxu1 %v13556_v40 }
 0xb29   : > { %10725 = vmatprep.subr.bf16.mxu1 %v13561_v2 }
 0xb2c   : > { %10726 = vmatpush1.bf16.msra.mxu1 %v13559_v43 }
 0xb2d   : > { %10727 = vmatprep.subr.bf16.mxu1 %v13564_v42 }
 0xb30   : > { %10728 = vmatpush1.bf16.msra.mxu1 %v13562_v0 }
 0xb31   : > { %10729 = vmatprep.subr.bf16.mxu1 %v13567_v27 }
 0xb34   : > { %10730 = vmatpush1.bf16.msra.mxu1 %v13565_v52 }
 0xb35   : > { %10731 = vmatprep.subr.bf16.mxu1 %v13570_v28 }
 0xb38   : > { %10732 = vmatpush1.bf16.msra.mxu1 %v13568_v9 }
 0xb39   : > { %10733 = vmatprep.subr.bf16.mxu1 %v13573_v57 }
 0xb3c   : > { %10734 = vmatpush1.bf16.msra.mxu1 %v13571_v62 }
 0xb3d   : > { %10735 = vmatprep.subr.bf16.mxu1 %v13576_v10 }
 0xb40   : > { %10736 = vmatpush1.bf16.msra.mxu1 %v13574_v23 }
 0xb41   : > { %10737 = vmatprep.subr.bf16.mxu1 %v13579_v6 }
 0xb44   : > { %10738 = vmatpush1.bf16.msra.mxu1 %v13577_v22 }
 0xb45   : > { %10739 = vmatprep.subr.bf16.mxu1 %v13582_v19 }
 0xb48   : > { %10740 = vmatpush1.bf16.msra.mxu1 %v13580_v5 }
 0xb49   : > { %10741 = vmatprep.subr.bf16.mxu1 %v13585_v51 }
 0xb4c   : > { %10742 = vmatpush1.bf16.msra.mxu1 %v13583_v12 }
 0xb4d   : > { %10743 = vmatprep.subr.bf16.mxu1 %v13588_v34 }
 0xb50   : > { %10744 = vmatpush1.bf16.msra.mxu1 %v13586_v4 }
 0xb51   : > { %10745 = vmatprep.subr.bf16.mxu1 %v13591_v24 }
 0xb54   : > { %10746 = vmatpush1.bf16.msra.mxu1 %v13589_v16 }
 0xb55   : > { %10747 = vmatprep.subr.bf16.mxu1 %v13594_v56 }
 0xb58   : > { %10748 = vmatpush1.bf16.msra.mxu1 %v13592_v47 }
 0xb59   : > { %10749 = vmatprep.subr.bf16.mxu1 %v13597_v46 }
 0xb5c   : > { %10750 = vmatpush1.bf16.msra.mxu1 %v13595_v17 }
 0xbe2   : > { %v10197_v55 = vpop.f32.mrb[104].mxu1 }
 0xbe3   : > { %v10198_v61 = vadd.f32 %v10197_v55, %v16849_v54  ;;  %v10199_v39 = vpop.f32.mrb[105].mxu1 }
 0xbe4   : > { %v10200_v13 = vadd.f32 %v10199_v39, %v16852_v14  ;;  %v10201_v11 = vpop.f32.mrb[106].mxu1 }
 0xbe5   : > { %v10202_v1 = vadd.f32 %v10201_v11, %v16849_v54  ;;  %v10203_v21 = vpop.f32.mrb[107].mxu1  ;;  %v10224_v31 = vmax.f32 %v10198_v61, 0.0 }
 0xbe6   : > { %v10204_v30 = vadd.f32 %v10203_v21, %v16852_v14  ;;  %v10225_v49 = vmax.f32 %v10200_v13, 0.0 }
 0xbe7   : > { %v10226_v44 = vmax.f32 %v10202_v1, 0.0 }
 0xbe8   : > { %v10227_v8 = vmax.f32 %v10204_v30, 0.0 }
 0xbe9   : > { %v10236_v48 = vpack.c.bf16 %v10226_v44, %v10224_v31 }
 0xbea   : > { %v10237_v20 = vpack.c.bf16 %v10227_v8, %v10225_v49  ;;  %v10207_v45 = vpop.f32.mrb[108].mxu1 }
 0xbeb   : > { %v10208_v33 = vadd.f32 %v10207_v45, %v16849_v54  ;;  %v10209_v38 = vpop.f32.mrb[109].mxu1 }
 0xbec   : > { %v10210_v63 = vadd.f32 %v10209_v38, %v16852_v14  ;;  %v10211_v7 = vpop.f32.mrb[110].mxu1  ;;  %10698 = vmatprep.mubr.bf16.mxu1 %v10237_v20 }
 0xbed   : > { %v10212_v58 = vadd.f32 %v10211_v7, %v16849_v54  ;;  %v10213_v37 = vpop.f32.mrb[111].mxu1  ;;  %10699 = vmatmul.mubr.bf16.gmra.mrb[120].mxu1 %v10236_v48  ;;  %v10228_v3 = vmax.f32 %v10208_v33, 0.0 }
 0xbee   : > { %v10214_v59 = vadd.f32 %v10213_v37, %v16852_v14  ;;  %v10229_v26 = vmax.f32 %v10210_v63, 0.0 }
 0xbef   : > { %v10230_v18 = vmax.f32 %v10212_v58, 0.0 }
 0xbf0   : > { %v10231_v36 = vmax.f32 %v10214_v59, 0.0  ;;  %v17057_v59 = vld [vmem:[#allocation14_spill] sm:$0xff] }
 0xbf1   : > { %v10238_v40 = vpack.c.bf16 %v10230_v18, %v10228_v3  ;;  %v10320_v3 = vsub.s32 3, %v17057_v59 }
 0xbf2   : > { %v10239_v2 = vpack.c.bf16 %v10231_v36, %v10229_v26  ;;  %v10680_v43 = vpop.f32.mrb[112].mxu1 }
 0xbf3   : > { %v10681_v54 = vadd.f32 %v10680_v43, %v16918_v53  ;;  %v10682_v42 = vpop.f32.mrb[113].mxu1 }
 0xbf4   : > { %v10683_v14 = vadd.f32 %v10682_v42, %v16922_v41  ;;  %v10684_v0 = vpop.f32.mrb[114].mxu1  ;;  %10708 = vmatprep.mubr.bf16.mxu1 %v10239_v2  ;;  %v17058_v42 = vld [vmem:[#allocation15_spill] sm:$0xff] }
 0xbf5   : > { %v10685_v27 = vadd.f32 %v10684_v0, %v16918_v53  ;;  %v10686_v29 = vpop.f32.mrb[115].mxu1  ;;  %10709 = vmatmul.mubr.bf16.gmra.mrb[124].mxu1 %v10238_v40  ;;  %v10792_v60 = vmax.f32 %v10681_v54, 0.0 }
 0xbf6   : > { %v10687_v52 = vadd.f32 %v10686_v29, %v16922_v41  ;;  %10751 = vmatprep.mubr.bf16.mxu1 %v16860_v15  ;;  %v10793_v9 = vmax.f32 %v10683_v14, 0.0  ;;  %v16959_v14 = vrot.slane %v16912_v25, %v17058_v42  ;;  %v16962_v29 = vrot.slane %v16912_v25, %v10320_v3 }
 0xbf7   : > { %v10796_v28 = vmax.f32 %v10685_v27, 0.0 }
 0xbf8   : > { %v10797_v57 = vmax.f32 %v10687_v52, 0.0 }
 0xbf9   : > { %v10899_v62 = vmax.f32 %v10792_v60, %v10796_v28 }
 0xbfa   : > { %v10912_v10 = vmax.f32 %v10793_v9, %v10797_v57  ;;  %v10690_v23 = vpop.f32.mrb[116].mxu1 }
 0xbfb   : > { %v10691_v6 = vadd.f32 %v10690_v23, %v16918_v53  ;;  %v10692_v22 = vpop.f32.mrb[117].mxu1 }
 0xbfc   : > { %v10693_v5 = vadd.f32 %v10692_v22, %v16922_v41  ;;  %v10694_v19 = vpop.f32.mrb[118].mxu1 }
 0xbfd   : > { %v10800_v51 = vmax.f32 %v10691_v6, 0.0  ;;  %v10695_v12 = vadd.f32 %v10694_v19, %v16918_v53  ;;  %v10696_v4 = vpop.f32.mrb[119].mxu1  ;;  %10752 = vmatmul.mubr.bf16.vlgmr.msra.gmra.mrb[128].mxu1 %v16858_v32  ;;  %v17054_v32 = vlaneseq }
 0xbfe   : > { %v10801_v15 = vmax.f32 %v10693_v5, 0.0  ;;  %v10697_v34 = vadd.f32 %v10696_v4, %v16922_v41  ;;  %10761 = vmatprep.mubr.bf16.mxu1 %v16874_v50  ;;  %v13665_v50 = vmov -inf  }
 0xbff   : > { %v10900_v24 = vmax.f32 %v10899_v62, %v10800_v51  ;;  %v10804_v16 = vmax.f32 %v10695_v12, 0.0  ;;  %vm16941_vm11 = vcmp.lt.s32.totalorder %v17054_v32, 512 }
 0xc00   : > { %v10913_v47 = vmax.f32 %v10912_v10, %v10801_v15  ;;  %v10805_v56 = vmax.f32 %v10697_v34, 0.0  ;;  %10959 = vst.msk [vmem:[%s16938_s16] sm:$0xf] %vm16941_vm11, %v13665_v50 }
 0xc01   : > { %v10901_v46 = vmax.f32 %v10900_v24, %v10804_v16 }
 0xc02   : > { %v10914_v17 = vmax.f32 %v10913_v47, %v10805_v56 }
 0xc05   : > { %10762 = vmatmul.mubr.bf16.gmra.mrb[132].mxu1 %v16872_v35 }
 0xc06   : > { %10771 = vmatprep.mubr.bf16.mxu1 %v10237_v20 }
 0xc0d   : > { %10772 = vmatmul.mubr.bf16.gmra.mrb[136].mxu1 %v10236_v48 }
 0xc0e   : > { %10781 = vmatprep.mubr.bf16.mxu1 %v10239_v2 }
 0xc15   : > { %10782 = vmatmul.mubr.bf16.gmra.mrb[140].mxu1 %v10238_v40 }
 0xcc0   : > { %v10700_v61 = vpop.f32.mrb[120].mxu1 }
 0xcc1   : > { %v10701_v35 = vadd.f32 %v10700_v61, %v16918_v53  ;;  %v10702_v39 = vpop.f32.mrb[121].mxu1 }
 0xcc2   : > { %v10703_v13 = vadd.f32 %v10702_v39, %v16922_v41  ;;  %v10704_v11 = vpop.f32.mrb[122].mxu1 }
 0xcc3   : > { %v10808_v1 = vmax.f32 %v10701_v35, 0.0  ;;  %v10705_v21 = vadd.f32 %v10704_v11, %v16918_v53  ;;  %v10706_v30 = vpop.f32.mrb[123].mxu1 }
 0xcc4   : > { %v10809_v31 = vmax.f32 %v10703_v13, 0.0  ;;  %v10707_v44 = vadd.f32 %v10706_v30, %v16922_v41 }
 0xcc5   : > { %v10902_v49 = vmax.f32 %v10901_v46, %v10808_v1  ;;  %v10812_v8 = vmax.f32 %v10705_v21, 0.0 }
 0xcc6   : > { %v10915_v48 = vmax.f32 %v10914_v17, %v10809_v31  ;;  %v10813_v20 = vmax.f32 %v10707_v44, 0.0 }
 0xcc7   : > { %v10903_v45 = vmax.f32 %v10902_v49, %v10812_v8 }
 0xcc8   : > { %v10916_v33 = vmax.f32 %v10915_v48, %v10813_v20  ;;  %v10710_v38 = vpop.f32.mrb[124].mxu1 }
 0xcc9   : > { %v10711_v63 = vadd.f32 %v10710_v38, %v16918_v53  ;;  %v10712_v7 = vpop.f32.mrb[125].mxu1 }
 0xcca   : > { %v10713_v58 = vadd.f32 %v10712_v7, %v16922_v41  ;;  %v10714_v37 = vpop.f32.mrb[126].mxu1 }
 0xccb   : > { %v10816_v18 = vmax.f32 %v10711_v63, 0.0  ;;  %v10715_v26 = vadd.f32 %v10714_v37, %v16918_v53  ;;  %v10716_v36 = vpop.f32.mrb[127].mxu1 }
 0xccc   : > { %v10817_v40 = vmax.f32 %v10713_v58, 0.0  ;;  %v10717_v2 = vadd.f32 %v10716_v36, %v16922_v41 }
 0xccd   : > { %v10904_v43 = vmax.f32 %v10903_v45, %v10816_v18  ;;  %v10820_v54 = vmax.f32 %v10715_v26, 0.0 }
 0xcce   : > { %v10917_v0 = vmax.f32 %v10916_v33, %v10817_v40  ;;  %v10821_v27 = vmax.f32 %v10717_v2, 0.0 }
 0xccf   : > { %v10905_v52 = vmax.f32 %v10904_v43, %v10820_v54 }
 0xcd0   : > { %v10918_v60 = vmax.f32 %v10917_v0, %v10821_v27  ;;  %v10753_v28 = vpop.f32.mrb[128].mxu1 }
 0xcd1   : > { %v10906_v9 = vrot.slane %v10905_v52, 4  ;;  %v10754_v53 = vadd.f32 %v10753_v28, %v16959_v14  ;;  %v10755_v57 = vpop.f32.mrb[129].mxu1 }
 0xcd2   : > { %v10919_v62 = vrot.slane %v10918_v60, 4  ;;  %v10756_v41 = vadd.f32 %v10755_v57, %v16962_v29  ;;  %v10757_v10 = vpop.f32.mrb[130].mxu1 }
 0xcd3   : > { %v10907_v23 = vmax.f32 %v10905_v52, %v10906_v9  ;;  %v10758_v6 = vadd.f32 %v10757_v10, %v16959_v14  ;;  %v10759_v22 = vpop.f32.mrb[131].mxu1  ;;  %v10794_v51 = vmax.f32 %v10754_v53, 0.0 }
 0xcd4   : > { %v10920_v5 = vmax.f32 %v10918_v60, %v10919_v62  ;;  %v10760_v19 = vadd.f32 %v10759_v22, %v16962_v29  ;;  %v10795_v15 = vmax.f32 %v10756_v41, 0.0 }
 0xcd5   : > { %v10908_v25 = vrot.slane %v10907_v23, 2  ;;  %v10798_v12 = vmax.f32 %v10758_v6, 0.0 }
 0xcd6   : > { %v10921_v4 = vrot.slane %v10920_v5, 2  ;;  %v10799_v34 = vmax.f32 %v10760_v19, 0.0 }
 0xcd7   : > { %v10909_v24 = vmax.f32 %v10907_v23, %v10908_v25  ;;  %v10925_v16 = vmax.f32 %v10794_v51, %v10798_v12 }
 0xcd8   : > { %v10922_v47 = vmax.f32 %v10920_v5, %v10921_v4  ;;  %v10938_v56 = vmax.f32 %v10795_v15, %v10799_v34  ;;  %v10763_v46 = vpop.f32.mrb[132].mxu1 }
 0xcd9   : > { %v10910_v17 = vrot.slane %v10909_v24, 1  ;;  %v10764_v32 = vadd.f32 %v10763_v46, %v16959_v14  ;;  %v10765_v50 = vpop.f32.mrb[133].mxu1 }
 0xcda   : > { %v10923_v61 = vrot.slane %v10922_v47, 1  ;;  %v10766_v35 = vadd.f32 %v10765_v50, %v16962_v29  ;;  %v10767_v39 = vpop.f32.mrb[134].mxu1 }
 0xcdb   : > { %v16970_v13 = vmax.f32 %v10909_v24, %v10910_v17  ;;  %v10802_v11 = vmax.f32 %v10764_v32, 0.0  ;;  %v10768_v1 = vadd.f32 %v10767_v39, %v16959_v14  ;;  %v10769_v21 = vpop.f32.mrb[135].mxu1  ;;  %v13666_v24 = vmov 1966171168  }
 0xcdc   : > { %v10924_v30 = vmax.f32 %v10922_v47, %v10923_v61  ;;  %v10803_v31 = vmax.f32 %v10766_v35, 0.0  ;;  %v10770_v44 = vadd.f32 %v10769_v21, %v16962_v29 }
 0xcdd   : > { %v10926_v49 = vmax.f32 %v10925_v16, %v10802_v11  ;;  %v10806_v8 = vmax.f32 %v10768_v1, 0.0  ;;  %v10968_v16 = vunpack.c.l.s4 %v13666_v24 }
 0xcde   : > { %v10965_v48 = vcombine.low %v16970_v13, %v10924_v30  ;;  %v10939_v20 = vmax.f32 %v10938_v56, %v10803_v31  ;;  %v10807_v45 = vmax.f32 %v10770_v44, 0.0  ;;  %v10960_v30 = vld [vmem:[%s16938_s16] sm:$0xf] }
 0xcdf   : > { %v10927_v33 = vmax.f32 %v10926_v49, %v10806_v8  ;;  %v10969_v17 = vunpack.c.0.s8 %v10968_v16 }
 0xce0   : > { %v10940_v38 = vmax.f32 %v10939_v20, %v10807_v45  ;;  %v10773_v63 = vpop.f32.mrb[136].mxu1 }
 0xce1   : > { %v10774_v7 = vadd.f32 %v10773_v63, %v16959_v14  ;;  %v10775_v58 = vpop.f32.mrb[137].mxu1  ;;  %v10972_v35 = vsub.s32 %v10969_v17, %v17057_v59 }
 0xce2   : > { %v10776_v37 = vadd.f32 %v10775_v58, %v16962_v29  ;;  %v10777_v3 = vpop.f32.mrb[138].mxu1 }
 0xce3   : > { %v10810_v18 = vmax.f32 %v10774_v7, 0.0  ;;  %v10778_v26 = vadd.f32 %v10777_v3, %v16959_v14  ;;  %v10779_v36 = vpop.f32.mrb[139].mxu1  ;;  %v10973_v11 = vrot.slane %v10965_v48, %v10972_v35 }
 0xce4   : > { %v10811_v40 = vmax.f32 %v10776_v37, 0.0  ;;  %v10780_v2 = vadd.f32 %v10779_v36, %v16962_v29 }
 0xce5   : > { %v10928_v43 = vmax.f32 %v10927_v33, %v10810_v18  ;;  %v10814_v54 = vmax.f32 %v10778_v26, 0.0 }
 0xce6   : > { %v10941_v42 = vmax.f32 %v10940_v38, %v10811_v40  ;;  %v10815_v0 = vmax.f32 %v10780_v2, 0.0 }
 0xce7   : > { %v10929_v27 = vmax.f32 %v10928_v43, %v10814_v54 }
 0xce8   : > { %v10942_v52 = vmax.f32 %v10941_v42, %v10815_v0  ;;  %v10783_v60 = vpop.f32.mrb[140].mxu1 }
 0xce9   : > { %v10784_v28 = vadd.f32 %v10783_v60, %v16959_v14  ;;  %v10785_v9 = vpop.f32.mrb[141].mxu1 }
 0xcea   : > { %v10786_v53 = vadd.f32 %v10785_v9, %v16962_v29  ;;  %v10787_v57 = vpop.f32.mrb[142].mxu1 }
 0xceb   : > { %v10818_v62 = vmax.f32 %v10784_v28, 0.0  ;;  %v10788_v41 = vadd.f32 %v10787_v57, %v16959_v14  ;;  %v10789_v10 = vpop.f32.mrb[143].mxu1 }
 0xcec   : > { %v10819_v23 = vmax.f32 %v10786_v53, 0.0  ;;  %v10790_v6 = vadd.f32 %v10789_v10, %v16962_v29 }
 0xced   : > { %v10930_v22 = vmax.f32 %v10929_v27, %v10818_v62  ;;  %v10822_v5 = vmax.f32 %v10788_v41, 0.0 }
 0xcee   : > { %v10943_v19 = vmax.f32 %v10942_v52, %v10819_v23  ;;  %v10823_v25 = vmax.f32 %v10790_v6, 0.0 }
 0xcef   : > { %v10931_v51 = vmax.f32 %v10930_v22, %v10822_v5 }
 0xcf0   : > { %v10944_v12 = vmax.f32 %v10943_v19, %v10823_v25 }
 0xcf1   : > { %v10932_v4 = vrot.slane %v10931_v51, 4 }
 0xcf2   : > { %v10945_v15 = vrot.slane %v10944_v12, 4 }
 0xcf3   : > { %v10933_v34 = vmax.f32 %v10931_v51, %v10932_v4 }
 0xcf4   : > { %v10946_v47 = vmax.f32 %v10944_v12, %v10945_v15 }
 0xcf5   : > { %v10934_v56 = vrot.slane %v10933_v34, 2 }
 0xcf6   : > { %v10947_v46 = vrot.slane %v10946_v47, 2 }
 0xcf7   : > { %v10935_v14 = vmax.f32 %v10933_v34, %v10934_v56 }
 0xcf8   : > { %v10948_v32 = vmax.f32 %v10946_v47, %v10947_v46 }
 0xcf9   : > { %v10936_v29 = vrot.slane %v10935_v14, 1 }
 0xcfa   : > { %v10949_v50 = vrot.slane %v10948_v32, 1 }
 0xcfb   : > { %v10937_v61 = vmax.f32 %v10935_v14, %v10936_v29 }
 0xcfc   : > { %v10950_v39 = vmax.f32 %v10948_v32, %v10949_v50 }
 0xcfe   : > { %v10966_v13 = vcombine.low %v10937_v61, %v10950_v39 }
 0xd00   : > { %v10980_v1 = vrot.slane %v10966_v13, %v10972_v35 }
 0xd02   : > { %v10981_v21 = vcombine.low %v10973_v11, %v10980_v1 }
 0xd04   : > { %v10988_v31 = vrot.slane %v10981_v21, %v10972_v35 }
 0xd06   : > { %v10990_v44 = vmax.f32 %v10960_v30, %v10988_v31 }
 0xd08   : > { %10995 = vst.msk [vmem:[%s16938_s16] sm:$0xf] %vm16941_vm11, %v10990_v44 }
 0xd09 PF: > { %s69_s11 = sadd.s32 1, %s13631_s11   ;;  %s17059_s7 = smov %s13627_s10 }
 0xd0a   : > { %p66_p5 = scmp.ge.s32.totalorder %s69_s11, 4   ;;  %s17060_s10 = smov %s17062_s0 }
 0xd0c   :  { %68 = sbr.rel (!%p66_p5) target bundleno = 46 (0x2e), region = 202 }

</bundles_post_ra>
